<compile_context>
chip_gen: v7x
topology: tpu7x:2x2x1
jax: 0.10.0
libtpu: 0.0.40
codegen_flags: <defaults>
</compile_context>

<pallas_src>
import functools
import math

import jax
import jax.numpy as jnp
from jax import lax
from jax.experimental import pallas as pl
from jax.experimental.pallas import tpu as pltpu


LANE = 128  # TPU lane width; the feature dim and all weight blocks pad to this.


def _round_up(n, m):
    return ((n + m - 1) // m) * m


def _pad_last(a, n):
    pad = n - a.shape[-1]
    if pad == 0:
        return a
    return jnp.pad(a, [(0, 0)] * (a.ndim - 1) + [(0, pad)])


# ----------------------------------------------------------------------------
# Fused full-stack kernel
# ----------------------------------------------------------------------------

def _make_stack_kernel(*, n_layers, n_heads, d_model, bool_sa, bool_res, eps,
                       offs_x, offs_y, return_att):
    D = d_model
    dh = D // n_heads
    scale = 1.0 / math.sqrt(dh)

    # --- static slab accessors (offsets are Python ints, 8-row aligned) -----
    def _vec(w_ref, off):                       # (1, LANE) bias / LN row
        return w_ref[off:off + 1, :]

    def _mat(w_ref, off):                       # (LANE, LANE) weight block
        return w_ref[off:off + LANE, :]

    def _layer_norm(x, g, b):
        # LayerNorm over the first D lanes of a lane-padded (S, LANE) value.
        # Mean and variance are masked to the real D lanes, so correctness does
        # not depend on the padded lanes being exactly zero; padded gamma/beta
        # are zero so padded output lanes stay zero.
        mask = lax.broadcasted_iota(jnp.int32, x.shape, 1) < D
        inv_d = 1.0 / D
        xm = jnp.where(mask, x, 0.0)
        mu = jnp.sum(xm, axis=-1, keepdims=True) * inv_d
        diff = jnp.where(mask, x - mu, 0.0)
        var = jnp.sum(diff * diff, axis=-1, keepdims=True) * inv_d
        return diff * lax.rsqrt(var + eps) * g + b

    def _mha(w_ref, o, q_in, kv_in, need_weights):
        # Lane-dense projections: each weight is a full (128, 128) block.
        q = jnp.dot(q_in, _mat(w_ref, o['wq']),
                    preferred_element_type=jnp.float32) + _vec(w_ref, o['bq'])
        k = jnp.dot(kv_in, _mat(w_ref, o['wk']),
                    preferred_element_type=jnp.float32) + _vec(w_ref, o['bk'])
        v = jnp.dot(kv_in, _mat(w_ref, o['wv']),
                    preferred_element_type=jnp.float32) + _vec(w_ref, o['bv'])
        wo = _mat(w_ref, o['wo'])
        Lq, Lk = q_in.shape[0], kv_in.shape[0]
        acc = jnp.zeros((Lq, LANE), jnp.float32)
        att = jnp.zeros((Lq, Lk), jnp.float32) if need_weights else None
        # Heads statically unrolled; each head's output folded straight into
        # its slice of the output projection (no lane-wise concatenate).
        for h in range(n_heads):
            sl = slice(h * dh, (h + 1) * dh)
            s = jnp.einsum('qd,kd->qk', q[:, sl], k[:, sl],
                           preferred_element_type=jnp.float32) * scale
            s = s - jnp.max(s, axis=-1, keepdims=True)      # stable softmax
            p = jnp.exp(s)
            p = p * pl.reciprocal(jnp.sum(p, axis=-1, keepdims=True),
                                  approx=True)               # EUP reciprocal
            if need_weights:
                att = att + p
            o_h = jnp.dot(p, v[:, sl], preferred_element_type=jnp.float32)
            acc = acc + jnp.dot(o_h, wo[sl, :],
                                preferred_element_type=jnp.float32)
        out = acc + _vec(w_ref, o['bo'])
        if need_weights:
            att = att * (1.0 / n_heads)     # PyTorch average_attn_weights=True
        return out, att

    def _layer(w_ref, off, cross, ft, need_weights):
        if bool_sa:
            sa_out, _ = _mha(w_ref, off['sa'], ft, ft, need_weights=False)
            ft = _layer_norm(sa_out + ft, _vec(w_ref, off['ln_sa_g']),
                             _vec(w_ref, off['ln_sa_b']))
        res1 = ft
        ca_out, att = _mha(w_ref, off['ca'], ft, cross,
                           need_weights=need_weights)
        ft = _layer_norm(ca_out + res1 if bool_res else ca_out,
                         _vec(w_ref, off['ln1_g']), _vec(w_ref, off['ln1_b']))
        res2 = ft
        h = jnp.dot(ft, _mat(w_ref, off['w1']),
                    preferred_element_type=jnp.float32) + _vec(w_ref, off['b1'])
        h = jnp.maximum(h, 0.0)
        ff = jnp.dot(h, _mat(w_ref, off['w2']),
                     preferred_element_type=jnp.float32) + _vec(w_ref, off['b2'])
        ft = _layer_norm(ff + res2, _vec(w_ref, off['ln2_g']),
                         _vec(w_ref, off['ln2_b']))
        return ft, att

    def _pad_att(att):
        # Pad (Lq, Lk) -> (Lq, 128) so the output store is an unmasked,
        # lane-dense vst (the Lk-wide partial store was the worst pattern).
        pad = LANE - att.shape[1]
        if pad == 0:
            return att
        return jnp.concatenate(
            [att, jnp.zeros((att.shape[0], pad), jnp.float32)], axis=1)

    def kernel(x_ref, y_ref, w_ref, *out_refs):
        if return_att:
            x_out_ref, y_out_ref, att_x_ref, att_y_ref = out_refs
        else:
            x_out_ref, y_out_ref = out_refs
        x = x_ref[0].astype(jnp.float32)        # (Lx, 128), zero-padded lanes
        y = y_ref[0].astype(jnp.float32)        # (Ly, 128), zero-padded lanes
        for i in range(n_layers):               # whole stack stays in VMEM
            x, att_xi = _layer(w_ref, offs_x[i], y, x, return_att)
            y, att_yi = _layer(w_ref, offs_y[i], x, y, return_att)
            if return_att:
                att_x_ref[i, 0] = _pad_att(att_xi)
                att_y_ref[i, 0] = _pad_att(att_yi)
        x_out_ref[0] = x.astype(x_out_ref.dtype)   # lane-dense stores
        y_out_ref[0] = y.astype(y_out_ref.dtype)

    return kernel


def mutual_attention(x_ft, y_ft, slab, *, offs_x, offs_y, n_heads, d_model,
                     return_att_map=False, bool_sa=True, bool_res=False,
                     eps=1e-5):
    """Full MutualAttention forward in one pallas_call.

    x_ft: (B, Lx, D), y_ft: (B, Ly, D); slab/offs from pack_mutual_attention_params.
    """
    B, Lx, _ = x_ft.shape
    Ly = y_ft.shape[1]
    n_layers = len(offs_x)
    assert Lx <= LANE and Ly <= LANE, "toy-shape kernel: sequence <= 128"

    x_p = _pad_last(x_ft.astype(jnp.float32), LANE)   # pad lanes once on host
    y_p = _pad_last(y_ft.astype(jnp.float32), LANE)

    kernel = _make_stack_kernel(
        n_layers=n_layers, n_heads=n_heads, d_model=d_model, bool_sa=bool_sa,
        bool_res=bool_res, eps=eps, offs_x=offs_x, offs_y=offs_y,
        return_att=return_att_map)

    in_specs = [
        pl.BlockSpec((1, Lx, LANE), lambda b: (b, 0, 0)),
        pl.BlockSpec((1, Ly, LANE), lambda b: (b, 0, 0)),
        # single weight slab, constant index map -> DMA'd once, resident
        pl.BlockSpec(slab.shape, lambda b: (0, 0)),
    ]
    out_specs = [
        pl.BlockSpec((1, Lx, LANE), lambda b: (b, 0, 0)),
        pl.BlockSpec((1, Ly, LANE), lambda b: (b, 0, 0)),
    ]
    out_shape = [
        jax.ShapeDtypeStruct((B, Lx, LANE), jnp.float32),
        jax.ShapeDtypeStruct((B, Ly, LANE), jnp.float32),
    ]
    if return_att_map:
        out_specs += [
            pl.BlockSpec((n_layers, 1, Lx, LANE), lambda b: (0, b, 0, 0)),
            pl.BlockSpec((n_layers, 1, Ly, LANE), lambda b: (0, b, 0, 0)),
        ]
        out_shape += [
            jax.ShapeDtypeStruct((n_layers, B, Lx, LANE), jnp.float32),
            jax.ShapeDtypeStruct((n_layers, B, Ly, LANE), jnp.float32),
        ]

    results = pl.pallas_call(
        kernel,
        grid=(B,),                     # batch -> both v7x TensorCores
        in_specs=in_specs,
        out_specs=tuple(out_specs),
        out_shape=tuple(out_shape),
        compiler_params=pltpu.CompilerParams(
            dimension_semantics=("parallel",)),
    )(x_p, y_p, slab)

    x_out = results[0][:, :, :d_model]
    y_out = results[1][:, :, :d_model]
    if return_att_map:
        att_x = {i: results[2][i, :, :, :Ly] for i in range(n_layers)}
        att_y = {i: results[3][i, :, :, :Lx] for i in range(n_layers)}
        return x_out, y_out, att_x, att_y
    return x_out, y_out


# ----------------------------------------------------------------------------
# Host-side weight packing: ONE (rows, 128) f32 slab for the whole stack.
# Logical convention: y = x @ w_t + b, w_t of shape (in_dim, out_dim).
# Every matrix becomes a full (128, 128) block (zero-padded rows/cols); every
# vector becomes an 8-row block (row 0 real).  Padded columns/gammas/betas are
# zero so padded activation lanes stay exactly zero through the whole stack.
# ----------------------------------------------------------------------------

def pack_mutual_attention_params(params, d_model, dim_hidden, bool_sa=True):
    assert d_model <= LANE and dim_hidden <= LANE, \
        "toy-shape kernel: d_model/dim_hidden <= 128"
    blocks = []
    row = [0]

    def add(a2d, rows=None):
        a2d = jnp.asarray(a2d, jnp.float32)
        r, c = a2d.shape
        r_pad = rows if rows is not None else _round_up(max(r, 1), 8)
        blk = jnp.zeros((r_pad, LANE), jnp.float32).at[:r, :c].set(a2d)
        off = row[0]
        blocks.append(blk)
        row[0] += r_pad
        return off

    def add_linear(w_t, b):
        return add(w_t, rows=LANE), add(b[None, :])

    def add_mha(p):
        o = {}
        o['wq'], o['bq'] = add_linear(p['wq_t'], p['bq'])
        o['wk'], o['bk'] = add_linear(p['wk_t'], p['bk'])
        o['wv'], o['bv'] = add_linear(p['wv_t'], p['bv'])
        o['wo'], o['bo'] = add_linear(p['wo_t'], p['bo'])
        return o

    def add_layer(p):
        off = {}
        if bool_sa:
            off['sa'] = add_mha(p['sa'])
            off['ln_sa_g'] = add(p['ln1_sa']['g'][None, :])
            off['ln_sa_b'] = add(p['ln1_sa']['b'][None, :])
        off['ca'] = add_mha(p['ca'])
        off['ln1_g'] = add(p['ln1']['g'][None, :])
        off['ln1_b'] = add(p['ln1']['b'][None, :])
        off['w1'], off['b1'] = add_linear(p['ffn']['w1_t'], p['ffn']['b1'])
        off['w2'], off['b2'] = add_linear(p['ffn']['w2_t'], p['ffn']['b2'])
        off['ln2_g'] = add(p['ln2']['g'][None, :])
        off['ln2_b'] = add(p['ln2']['b'][None, :])
        return off

    offs_x = [add_layer(p) for p in params['x']]
    offs_y = [add_layer(p) for p in params['y']]
    slab = jnp.concatenate(blocks, axis=0)
    return slab, offs_x, offs_y


# ----------------------------------------------------------------------------
# Deterministic synthetic parameters (shapes per the PyTorch __init__)
# ----------------------------------------------------------------------------

def init_mha_params(key, D, scale=0.05):
    ks = jax.random.split(key, 8)
    r = lambda k, shape, s: jax.random.normal(k, shape, jnp.float32) * s
    return dict(
        wq_t=r(ks[0], (D, D), scale), wk_t=r(ks[1], (D, D), scale),
        wv_t=r(ks[2], (D, D), scale), wo_t=r(ks[3], (D, D), scale),
        bq=r(ks[4], (D,), 0.02), bk=r(ks[5], (D,), 0.02),
        bv=r(ks[6], (D,), 0.02), bo=r(ks[7], (D,), 0.02))


def init_ln_params(key, D):
    k1, k2 = jax.random.split(key)
    return dict(g=1.0 + 0.1 * jax.random.normal(k1, (D,), jnp.float32),
                b=0.05 * jax.random.normal(k2, (D,), jnp.float32))


def init_layer_params(key, D, H, bool_sa=True, scale=0.05):
    ks = jax.random.split(key, 10)
    p = dict(
        ca=init_mha_params(ks[0], D, scale),
        ln1=init_ln_params(ks[1], D),
        ffn=dict(
            w1_t=jax.random.normal(ks[2], (D, H), jnp.float32) * scale,
            b1=jax.random.normal(ks[3], (H,), jnp.float32) * 0.02,
            w2_t=jax.random.normal(ks[4], (H, D), jnp.float32) * scale,
            b2=jax.random.normal(ks[5], (D,), jnp.float32) * 0.02),
        ln2=init_ln_params(ks[6], D))
    if bool_sa:
        p["sa"] = init_mha_params(ks[7], D, scale)
        p["ln1_sa"] = init_ln_params(ks[8], D)
    return p


# ----------------------------------------------------------------------------
# Pure-JAX reference of the PyTorch forward (for a correctness cross-check)
# ----------------------------------------------------------------------------

def _ref_mha(q_in, kv_in, p, n_heads):
    B, Lq, D = q_in.shape
    Lk = kv_in.shape[1]
    dh = D // n_heads
    q = q_in @ p["wq_t"] + p["bq"]
    k = kv_in @ p["wk_t"] + p["bk"]
    v = kv_in @ p["wv_t"] + p["bv"]
    qh = q.reshape(B, Lq, n_heads, dh).transpose(0, 2, 1, 3)
    kh = k.reshape(B, Lk, n_heads, dh).transpose(0, 2, 1, 3)
    vh = v.reshape(B, Lk, n_heads, dh).transpose(0, 2, 1, 3)
    s = jnp.einsum('bhqd,bhkd->bhqk', qh, kh) / math.sqrt(dh)
    a = jax.nn.softmax(s, axis=-1)
    o = jnp.einsum('bhqk,bhkd->bhqd', a, vh)
    o = o.transpose(0, 2, 1, 3).reshape(B, Lq, D)
    return o @ p["wo_t"] + p["bo"], a.mean(axis=1)


def _ref_layer_norm(x, p, eps=1e-5):
    mu = x.mean(-1, keepdims=True)
    var = ((x - mu) ** 2).mean(-1, keepdims=True)
    return (x - mu) / jnp.sqrt(var + eps) * p["g"] + p["b"]


def _ref_layer(cross_ft, ft, p, n_heads, bool_sa=True, bool_res=False):
    if bool_sa:
        res = ft
        sa, _ = _ref_mha(ft, ft, p["sa"], n_heads)
        ft = _ref_layer_norm(sa + res, p["ln1_sa"])
    res1 = ft
    ca, att = _ref_mha(ft, cross_ft, p["ca"], n_heads)
    ft = _ref_layer_norm((ca + res1) if bool_res else ca, p["ln1"])
    res2 = ft
    h = jnp.maximum(ft @ p["ffn"]["w1_t"] + p["ffn"]["b1"], 0.0)
    ff = h @ p["ffn"]["w2_t"] + p["ffn"]["b2"]
    return _ref_layer_norm(ff + res2, p["ln2"]), att


def _ref_mutual_attention(x_ft, y_ft, params, n_heads, bool_sa=True):
    ax, ay = {}, {}
    for i, (px, py) in enumerate(zip(params["x"], params["y"])):
        x_ft, ax[i] = _ref_layer(y_ft, x_ft, px, n_heads, bool_sa)
        y_ft, ay[i] = _ref_layer(x_ft, y_ft, py, n_heads, bool_sa)
    return x_ft, y_ft, ax, ay


# ----------------------------------------------------------------------------

if __name__ == "__main__":
    B, Sx, Sy = 2, 8, 16          # batch, x-sequence, y-sequence
    D, H = 32, 64                 # dim_feature, dim_hidden
    n_heads, n_layers = 4, 2

    key = jax.random.PRNGKey(0)
    kx, ky, kp = jax.random.split(key, 3)
    x_ft = jax.random.normal(kx, (B, Sx, D), jnp.float32)
    y_ft = jax.random.normal(ky, (B, Sy, D), jnp.float32)

    lkeys = jax.random.split(kp, 2 * n_layers)
    params = dict(
        x=[init_layer_params(lkeys[i], D, H) for i in range(n_layers)],
        y=[init_layer_params(lkeys[n_layers + i], D, H) for i in range(n_layers)],
    )
    slab, offs_x, offs_y = pack_mutual_attention_params(params, D, H, bool_sa=True)

    run = jax.jit(functools.partial(
        mutual_attention, offs_x=offs_x, offs_y=offs_y, n_heads=n_heads,
        d_model=D, return_att_map=True, bool_sa=True))
    x_out, y_out, att_x, att_y = run(x_ft, y_ft, slab)
    jax.block_until_ready((x_out, y_out, att_x, att_y))

    assert x_out.shape == (B, Sx, D)
    assert y_out.shape == (B, Sy, D)
    assert att_x[0].shape == (B, Sx, Sy)   # query=x, key=y
    assert att_y[0].shape == (B, Sy, Sx)   # query=y, key=x

    # Cross-check against a pure-JAX reference of the PyTorch forward.
    rx, ry, rax, ray = _ref_mutual_attention(x_ft, y_ft, params, n_heads)

    def _close(name, a, b, tol=5e-2):
        err = float(jnp.max(jnp.abs(a - b)))
        assert err < tol, f"{name}: max abs err {err}"

    _close("x_out", x_out, rx)
    _close("y_out", y_out, ry)
    for i in range(n_layers):
        _close(f"att_x[{i}]", att_x[i], rax[i])
        _close(f"att_y[{i}]", att_y[i], ray[i])

    print("KERNEL_OK")
</pallas_src>

<mosaic_0001>
module attributes {stable_mosaic.version = 11 : i64} {
  func.func @kernel(%arg0: i32, %arg1: memref<1x8x128xf32, #tpu.memory_space<vmem>>, %arg2: memref<1x16x128xf32, #tpu.memory_space<vmem>>, %arg3: memref<5632x128xf32, #tpu.memory_space<vmem>>, %arg4: memref<1x8x128xf32, #tpu.memory_space<vmem>>, %arg5: memref<1x16x128xf32, #tpu.memory_space<vmem>>, %arg6: memref<2x1x8x128xf32, #tpu.memory_space<vmem>>, %arg7: memref<2x1x16x128xf32, #tpu.memory_space<vmem>>) attributes {dimension_semantics = [#tpu.dimension_semantics<parallel>], iteration_bounds = array<i64: 2>, scalar_prefetch = 0 : i64, scratch_operands = 0 : i64, tpu.core_type = #tpu.core_type<tc>, window_params = [{transform_indices = @transform_0, window_bounds = array<i64: 1, 8, 128>}, {transform_indices = @transform_1, window_bounds = array<i64: 1, 16, 128>}, {pipeline_mode = #tpu.pipeline_mode<synchronous>, transform_indices = @transform_2, window_bounds = array<i64: 5632, 128>}, {transform_indices = @transform_3, window_bounds = array<i64: 1, 8, 128>}, {transform_indices = @transform_4, window_bounds = array<i64: 1, 16, 128>}, {transform_indices = @transform_5, window_bounds = array<i64: 2, 1, 8, 128>}, {transform_indices = @transform_6, window_bounds = array<i64: 2, 1, 16, 128>}]} {
    %c0 = arith.constant 0 : index
    %c0_0 = arith.constant 0 : index
    %c0_1 = arith.constant 0 : index
    %0 = vector.load %arg1[%c0, %c0_0, %c0_1] : memref<1x8x128xf32, #tpu.memory_space<vmem>>, vector<1x8x128xf32>
    %1 = vector.shape_cast %0 : vector<1x8x128xf32> to vector<8x128xf32>
    %c0_2 = arith.constant 0 : index
    %c0_3 = arith.constant 0 : index
    %c0_4 = arith.constant 0 : index
    %2 = vector.load %arg2[%c0_2, %c0_3, %c0_4] : memref<1x16x128xf32, #tpu.memory_space<vmem>>, vector<1x16x128xf32>
    %3 = vector.shape_cast %2 : vector<1x16x128xf32> to vector<16x128xf32>
    %c0_5 = arith.constant 0 : index
    %c0_6 = arith.constant 0 : index
    %4 = vector.load %arg3[%c0_5, %c0_6] : memref<5632x128xf32, #tpu.memory_space<vmem>>, vector<128x128xf32>
    %cst = arith.constant dense<0.000000e+00> : vector<8x128xf32>
    %5 = tpu.matmul %1, %4, %cst {dimension_numbers = #tpu.dot_dimension_numbers<[1], [0], [0], [1], [0, 0, 1, 1], [], []>} : vector<8x128xf32>, vector<128x128xf32>, vector<8x128xf32> -> vector<8x128xf32>
    %c128 = arith.constant 128 : index
    %c0_7 = arith.constant 0 : index
    %6 = vector.load %arg3[%c128, %c0_7] : memref<5632x128xf32, #tpu.memory_space<vmem>>, vector<1x128xf32>
    %7 = vector.broadcast %6 : vector<1x128xf32> to vector<8x128xf32>
    %8 = arith.addf %5, %7 : vector<8x128xf32>
    %c136 = arith.constant 136 : index
    %c0_8 = arith.constant 0 : index
    %9 = vector.load %arg3[%c136, %c0_8] : memref<5632x128xf32, #tpu.memory_space<vmem>>, vector<128x128xf32>
    %cst_9 = arith.constant dense<0.000000e+00> : vector<8x128xf32>
    %10 = tpu.matmul %1, %9, %cst_9 {dimension_numbers = #tpu.dot_dimension_numbers<[1], [0], [0], [1], [0, 0, 1, 1], [], []>} : vector<8x128xf32>, vector<128x128xf32>, vector<8x128xf32> -> vector<8x128xf32>
    %c264 = arith.constant 264 : index
    %c0_10 = arith.constant 0 : index
    %11 = vector.load %arg3[%c264, %c0_10] : memref<5632x128xf32, #tpu.memory_space<vmem>>, vector<1x128xf32>
    %12 = vector.broadcast %11 : vector<1x128xf32> to vector<8x128xf32>
    %13 = arith.addf %10, %12 : vector<8x128xf32>
    %c272 = arith.constant 272 : index
    %c0_11 = arith.constant 0 : index
    %14 = vector.load %arg3[%c272, %c0_11] : memref<5632x128xf32, #tpu.memory_space<vmem>>, vector<128x128xf32>
    %cst_12 = arith.constant dense<0.000000e+00> : vector<8x128xf32>
    %15 = tpu.matmul %1, %14, %cst_12 {dimension_numbers = #tpu.dot_dimension_numbers<[1], [0], [0], [1], [0, 0, 1, 1], [], []>} : vector<8x128xf32>, vector<128x128xf32>, vector<8x128xf32> -> vector<8x128xf32>
    %c400 = arith.constant 400 : index
    %c0_13 = arith.constant 0 : index
    %16 = vector.load %arg3[%c400, %c0_13] : memref<5632x128xf32, #tpu.memory_space<vmem>>, vector<1x128xf32>
    %17 = vector.broadcast %16 : vector<1x128xf32> to vector<8x128xf32>
    %18 = arith.addf %15, %17 : vector<8x128xf32>
    %c408 = arith.constant 408 : index
    %c0_14 = arith.constant 0 : index
    %19 = vector.load %arg3[%c408, %c0_14] : memref<5632x128xf32, #tpu.memory_space<vmem>>, vector<128x128xf32>
    %cst_15 = arith.constant 0.000000e+00 : f32
    %20 = vector.broadcast %cst_15 : f32 to vector<8x128xf32>
    %21 = vector.extract_strided_slice %8 {offsets = [0, 0], sizes = [8, 8], strides = [1, 1]} : vector<8x128xf32> to vector<8x8xf32>
    %22 = vector.extract_strided_slice %13 {offsets = [0, 0], sizes = [8, 8], strides = [1, 1]} : vector<8x128xf32> to vector<8x8xf32>
    "tpu.trace_start"() <{level = 10 : i32, message = "qd,kd->qk"}> : () -> ()
    %cst_16 = arith.constant dense<0.000000e+00> : vector<8x8xf32>
    %23 = tpu.matmul %21, %22, %cst_16 {dimension_numbers = #tpu.dot_dimension_numbers<[1], [1], [0], [0], [0, 0, 1, 0], [], []>} : vector<8x8xf32>, vector<8x8xf32>, vector<8x8xf32> -> vector<8x8xf32>
    "tpu.trace_stop"() : () -> ()
    %cst_17 = arith.constant 0.353553385 : f32
    %24 = vector.broadcast %cst_17 : f32 to vector<8x8xf32>
    %25 = arith.mulf %23, %24 : vector<8x8xf32>
    %cst_18 = arith.constant dense<0xFF800000> : vector<8xf32>
    %26 = vector.multi_reduction <maximumf>, %25, %cst_18 [1] : vector<8x8xf32> to vector<8xf32>
    %27 = vector.shape_cast %26 : vector<8xf32> to vector<8x1xf32>
    %28 = vector.broadcast %27 : vector<8x1xf32> to vector<8x8xf32>
    %29 = arith.subf %25, %28 : vector<8x8xf32>
    %30 = math.exp %29 : vector<8x8xf32>
    %cst_19 = arith.constant dense<0.000000e+00> : vector<8xf32>
    %31 = vector.multi_reduction <add>, %30, %cst_19 [1] : vector<8x8xf32> to vector<8xf32>
    %32 = vector.shape_cast %31 : vector<8xf32> to vector<8x1xf32>
    %33 = tpu.reciprocal %32 {approx = true} : vector<8x1xf32> -> vector<8x1xf32>
    %34 = vector.broadcast %33 : vector<8x1xf32> to vector<8x8xf32>
    %35 = arith.mulf %30, %34 : vector<8x8xf32>
    %36 = vector.extract_strided_slice %18 {offsets = [0, 0], sizes = [8, 8], strides = [1, 1]} : vector<8x128xf32> to vector<8x8xf32>
    %cst_20 = arith.constant dense<0.000000e+00> : vector<8x8xf32>
    %37 = tpu.matmul %35, %36, %cst_20 {dimension_numbers = #tpu.dot_dimension_numbers<[1], [0], [0], [1], [0, 0, 1, 1], [], []>} : vector<8x8xf32>, vector<8x8xf32>, vector<8x8xf32> -> vector<8x8xf32>
    %38 = vector.extract_strided_slice %19 {offsets = [0, 0], sizes = [8, 128], strides = [1, 1]} : vector<128x128xf32> to vector<8x128xf32>
    %cst_21 = arith.constant dense<0.000000e+00> : vector<8x128xf32>
    %39 = tpu.matmul %37, %38, %cst_21 {dimension_numbers = #tpu.dot_dimension_numbers<[1], [0], [0], [1], [0, 0, 1, 1], [], []>} : vector<8x8xf32>, vector<8x128xf32>, vector<8x128xf32> -> vector<8x128xf32>
    %40 = arith.addf %20, %39 : vector<8x128xf32>
    %41 = vector.extract_strided_slice %8 {offsets = [0, 8], sizes = [8, 8], strides = [1, 1]} : vector<8x128xf32> to vector<8x8xf32>
    %42 = vector.extract_strided_slice %13 {offsets = [0, 8], sizes = [8, 8], strides = [1, 1]} : vector<8x128xf32> to vector<8x8xf32>
    "tpu.trace_start"() <{level = 10 : i32, message = "qd,kd->qk"}> : () -> ()
    %cst_22 = arith.constant dense<0.000000e+00> : vector<8x8xf32>
    %43 = tpu.matmul %41, %42, %cst_22 {dimension_numbers = #tpu.dot_dimension_numbers<[1], [1], [0], [0], [0, 0, 1, 0], [], []>} : vector<8x8xf32>, vector<8x8xf32>, vector<8x8xf32> -> vector<8x8xf32>
    "tpu.trace_stop"() : () -> ()
    %cst_23 = arith.constant 0.353553385 : f32
    %44 = vector.broadcast %cst_23 : f32 to vector<8x8xf32>
    %45 = arith.mulf %43, %44 : vector<8x8xf32>
    %cst_24 = arith.constant dense<0xFF800000> : vector<8xf32>
    %46 = vector.multi_reduction <maximumf>, %45, %cst_24 [1] : vector<8x8xf32> to vector<8xf32>
    %47 = vector.shape_cast %46 : vector<8xf32> to vector<8x1xf32>
    %48 = vector.broadcast %47 : vector<8x1xf32> to vector<8x8xf32>
    %49 = arith.subf %45, %48 : vector<8x8xf32>
    %50 = math.exp %49 : vector<8x8xf32>
    %cst_25 = arith.constant dense<0.000000e+00> : vector<8xf32>
    %51 = vector.multi_reduction <add>, %50, %cst_25 [1] : vector<8x8xf32> to vector<8xf32>
    %52 = vector.shape_cast %51 : vector<8xf32> to vector<8x1xf32>
    %53 = tpu.reciprocal %52 {approx = true} : vector<8x1xf32> -> vector<8x1xf32>
    %54 = vector.broadcast %53 : vector<8x1xf32> to vector<8x8xf32>
    %55 = arith.mulf %50, %54 : vector<8x8xf32>
    %56 = vector.extract_strided_slice %18 {offsets = [0, 8], sizes = [8, 8], strides = [1, 1]} : vector<8x128xf32> to vector<8x8xf32>
    %cst_26 = arith.constant dense<0.000000e+00> : vector<8x8xf32>
    %57 = tpu.matmul %55, %56, %cst_26 {dimension_numbers = #tpu.dot_dimension_numbers<[1], [0], [0], [1], [0, 0, 1, 1], [], []>} : vector<8x8xf32>, vector<8x8xf32>, vector<8x8xf32> -> vector<8x8xf32>
    %58 = vector.extract_strided_slice %19 {offsets = [8, 0], sizes = [8, 128], strides = [1, 1]} : vector<128x128xf32> to vector<8x128xf32>
    %cst_27 = arith.constant dense<0.000000e+00> : vector<8x128xf32>
    %59 = tpu.matmul %57, %58, %cst_27 {dimension_numbers = #tpu.dot_dimension_numbers<[1], [0], [0], [1], [0, 0, 1, 1], [], []>} : vector<8x8xf32>, vector<8x128xf32>, vector<8x128xf32> -> vector<8x128xf32>
    %60 = arith.addf %40, %59 : vector<8x128xf32>
    %61 = vector.extract_strided_slice %8 {offsets = [0, 16], sizes = [8, 8], strides = [1, 1]} : vector<8x128xf32> to vector<8x8xf32>
    %62 = vector.extract_strided_slice %13 {offsets = [0, 16], sizes = [8, 8], strides = [1, 1]} : vector<8x128xf32> to vector<8x8xf32>
    "tpu.trace_start"() <{level = 10 : i32, message = "qd,kd->qk"}> : () -> ()
    %cst_28 = arith.constant dense<0.000000e+00> : vector<8x8xf32>
    %63 = tpu.matmul %61, %62, %cst_28 {dimension_numbers = #tpu.dot_dimension_numbers<[1], [1], [0], [0], [0, 0, 1, 0], [], []>} : vector<8x8xf32>, vector<8x8xf32>, vector<8x8xf32> -> vector<8x8xf32>
    "tpu.trace_stop"() : () -> ()
    %cst_29 = arith.constant 0.353553385 : f32
    %64 = vector.broadcast %cst_29 : f32 to vector<8x8xf32>
    %65 = arith.mulf %63, %64 : vector<8x8xf32>
    %cst_30 = arith.constant dense<0xFF800000> : vector<8xf32>
    %66 = vector.multi_reduction <maximumf>, %65, %cst_30 [1] : vector<8x8xf32> to vector<8xf32>
    %67 = vector.shape_cast %66 : vector<8xf32> to vector<8x1xf32>
    %68 = vector.broadcast %67 : vector<8x1xf32> to vector<8x8xf32>
    %69 = arith.subf %65, %68 : vector<8x8xf32>
    %70 = math.exp %69 : vector<8x8xf32>
    %cst_31 = arith.constant dense<0.000000e+00> : vector<8xf32>
    %71 = vector.multi_reduction <add>, %70, %cst_31 [1] : vector<8x8xf32> to vector<8xf32>
    %72 = vector.shape_cast %71 : vector<8xf32> to vector<8x1xf32>
    %73 = tpu.reciprocal %72 {approx = true} : vector<8x1xf32> -> vector<8x1xf32>
    %74 = vector.broadcast %73 : vector<8x1xf32> to vector<8x8xf32>
    %75 = arith.mulf %70, %74 : vector<8x8xf32>
    %76 = vector.extract_strided_slice %18 {offsets = [0, 16], sizes = [8, 8], strides = [1, 1]} : vector<8x128xf32> to vector<8x8xf32>
    %cst_32 = arith.constant dense<0.000000e+00> : vector<8x8xf32>
    %77 = tpu.matmul %75, %76, %cst_32 {dimension_numbers = #tpu.dot_dimension_numbers<[1], [0], [0], [1], [0, 0, 1, 1], [], []>} : vector<8x8xf32>, vector<8x8xf32>, vector<8x8xf32> -> vector<8x8xf32>
    %78 = vector.extract_strided_slice %19 {offsets = [16, 0], sizes = [8, 128], strides = [1, 1]} : vector<128x128xf32> to vector<8x128xf32>
    %cst_33 = arith.constant dense<0.000000e+00> : vector<8x128xf32>
    %79 = tpu.matmul %77, %78, %cst_33 {dimension_numbers = #tpu.dot_dimension_numbers<[1], [0], [0], [1], [0, 0, 1, 1], [], []>} : vector<8x8xf32>, vector<8x128xf32>, vector<8x128xf32> -> vector<8x128xf32>
    %80 = arith.addf %60, %79 : vector<8x128xf32>
    %81 = vector.extract_strided_slice %8 {offsets = [0, 24], sizes = [8, 8], strides = [1, 1]} : vector<8x128xf32> to vector<8x8xf32>
    %82 = vector.extract_strided_slice %13 {offsets = [0, 24], sizes = [8, 8], strides = [1, 1]} : vector<8x128xf32> to vector<8x8xf32>
    "tpu.trace_start"() <{level = 10 : i32, message = "qd,kd->qk"}> : () -> ()
    %cst_34 = arith.constant dense<0.000000e+00> : vector<8x8xf32>
    %83 = tpu.matmul %81, %82, %cst_34 {dimension_numbers = #tpu.dot_dimension_numbers<[1], [1], [0], [0], [0, 0, 1, 0], [], []>} : vector<8x8xf32>, vector<8x8xf32>, vector<8x8xf32> -> vector<8x8xf32>
    "tpu.trace_stop"() : () -> ()
    %cst_35 = arith.constant 0.353553385 : f32
    %84 = vector.broadcast %cst_35 : f32 to vector<8x8xf32>
    %85 = arith.mulf %83, %84 : vector<8x8xf32>
    %cst_36 = arith.constant dense<0xFF800000> : vector<8xf32>
    %86 = vector.multi_reduction <maximumf>, %85, %cst_36 [1] : vector<8x8xf32> to vector<8xf32>
    %87 = vector.shape_cast %86 : vector<8xf32> to vector<8x1xf32>
    %88 = vector.broadcast %87 : vector<8x1xf32> to vector<8x8xf32>
    %89 = arith.subf %85, %88 : vector<8x8xf32>
    %90 = math.exp %89 : vector<8x8xf32>
    %cst_37 = arith.constant dense<0.000000e+00> : vector<8xf32>
    %91 = vector.multi_reduction <add>, %90, %cst_37 [1] : vector<8x8xf32> to vector<8xf32>
    %92 = vector.shape_cast %91 : vector<8xf32> to vector<8x1xf32>
    %93 = tpu.reciprocal %92 {approx = true} : vector<8x1xf32> -> vector<8x1xf32>
    %94 = vector.broadcast %93 : vector<8x1xf32> to vector<8x8xf32>
    %95 = arith.mulf %90, %94 : vector<8x8xf32>
    %96 = vector.extract_strided_slice %18 {offsets = [0, 24], sizes = [8, 8], strides = [1, 1]} : vector<8x128xf32> to vector<8x8xf32>
    %cst_38 = arith.constant dense<0.000000e+00> : vector<8x8xf32>
    %97 = tpu.matmul %95, %96, %cst_38 {dimension_numbers = #tpu.dot_dimension_numbers<[1], [0], [0], [1], [0, 0, 1, 1], [], []>} : vector<8x8xf32>, vector<8x8xf32>, vector<8x8xf32> -> vector<8x8xf32>
    %98 = vector.extract_strided_slice %19 {offsets = [24, 0], sizes = [8, 128], strides = [1, 1]} : vector<128x128xf32> to vector<8x128xf32>
    %cst_39 = arith.constant dense<0.000000e+00> : vector<8x128xf32>
    %99 = tpu.matmul %97, %98, %cst_39 {dimension_numbers = #tpu.dot_dimension_numbers<[1], [0], [0], [1], [0, 0, 1, 1], [], []>} : vector<8x8xf32>, vector<8x128xf32>, vector<8x128xf32> -> vector<8x128xf32>
    %100 = arith.addf %80, %99 : vector<8x128xf32>
    %c536 = arith.constant 536 : index
    %c0_40 = arith.constant 0 : index
    %101 = vector.load %arg3[%c536, %c0_40] : memref<5632x128xf32, #tpu.memory_space<vmem>>, vector<1x128xf32>
    %102 = vector.broadcast %101 : vector<1x128xf32> to vector<8x128xf32>
    %103 = arith.addf %100, %102 : vector<8x128xf32>
    %104 = arith.addf %103, %1 : vector<8x128xf32>
    %c544 = arith.constant 544 : index
    %c0_41 = arith.constant 0 : index
    %105 = vector.load %arg3[%c544, %c0_41] : memref<5632x128xf32, #tpu.memory_space<vmem>>, vector<1x128xf32>
    %c552 = arith.constant 552 : index
    %c0_42 = arith.constant 0 : index
    %106 = vector.load %arg3[%c552, %c0_42] : memref<5632x128xf32, #tpu.memory_space<vmem>>, vector<1x128xf32>
    %107 = tpu.iota {dimensions = array<i32: 1>} : vector<8x128xi32>
    %c32_i32 = arith.constant 32 : i32
    %108 = vector.broadcast %c32_i32 : i32 to vector<8x128xi32>
    %109 = arith.cmpi slt, %107, %108 : vector<8x128xi32>
    %cst_43 = arith.constant 0.000000e+00 : f32
    %110 = vector.broadcast %cst_43 : f32 to vector<8x128xf32>
    %111 = arith.select %109, %104, %110 : vector<8x128xi1>, vector<8x128xf32>
    %cst_44 = arith.constant dense<0.000000e+00> : vector<8xf32>
    %112 = vector.multi_reduction <add>, %111, %cst_44 [1] : vector<8x128xf32> to vector<8xf32>
    %113 = vector.shape_cast %112 : vector<8xf32> to vector<8x1xf32>
    %cst_45 = arith.constant 3.125000e-02 : f32
    %114 = vector.broadcast %cst_45 : f32 to vector<8x1xf32>
    %115 = arith.mulf %113, %114 : vector<8x1xf32>
    %116 = vector.broadcast %115 : vector<8x1xf32> to vector<8x128xf32>
    %117 = arith.subf %104, %116 : vector<8x128xf32>
    %cst_46 = arith.constant 0.000000e+00 : f32
    %118 = vector.broadcast %cst_46 : f32 to vector<8x128xf32>
    %119 = arith.select %109, %117, %118 : vector<8x128xi1>, vector<8x128xf32>
    %120 = arith.mulf %119, %119 : vector<8x128xf32>
    %cst_47 = arith.constant dense<0.000000e+00> : vector<8xf32>
    %121 = vector.multi_reduction <add>, %120, %cst_47 [1] : vector<8x128xf32> to vector<8xf32>
    %122 = vector.shape_cast %121 : vector<8xf32> to vector<8x1xf32>
    %cst_48 = arith.constant 3.125000e-02 : f32
    %123 = vector.broadcast %cst_48 : f32 to vector<8x1xf32>
    %124 = arith.mulf %122, %123 : vector<8x1xf32>
    %cst_49 = arith.constant 9.99999974E-6 : f32
    %125 = vector.broadcast %cst_49 : f32 to vector<8x1xf32>
    %126 = arith.addf %124, %125 : vector<8x1xf32>
    %127 = math.rsqrt %126 : vector<8x1xf32>
    %128 = vector.broadcast %127 : vector<8x1xf32> to vector<8x128xf32>
    %129 = arith.mulf %119, %128 : vector<8x128xf32>
    %130 = vector.broadcast %105 : vector<1x128xf32> to vector<8x128xf32>
    %131 = arith.mulf %129, %130 : vector<8x128xf32>
    %132 = vector.broadcast %106 : vector<1x128xf32> to vector<8x128xf32>
    %133 = arith.addf %131, %132 : vector<8x128xf32>
    %c560 = arith.constant 560 : index
    %c0_50 = arith.constant 0 : index
    %134 = vector.load %arg3[%c560, %c0_50] : memref<5632x128xf32, #tpu.memory_space<vmem>>, vector<128x128xf32>
    %cst_51 = arith.constant dense<0.000000e+00> : vector<8x128xf32>
    %135 = tpu.matmul %133, %134, %cst_51 {dimension_numbers = #tpu.dot_dimension_numbers<[1], [0], [0], [1], [0, 0, 1, 1], [], []>} : vector<8x128xf32>, vector<128x128xf32>, vector<8x128xf32> -> vector<8x128xf32>
    %c688 = arith.constant 688 : index
    %c0_52 = arith.constant 0 : index
    %136 = vector.load %arg3[%c688, %c0_52] : memref<5632x128xf32, #tpu.memory_space<vmem>>, vector<1x128xf32>
    %137 = vector.broadcast %136 : vector<1x128xf32> to vector<8x128xf32>
    %138 = arith.addf %135, %137 : vector<8x128xf32>
    %c696 = arith.constant 696 : index
    %c0_53 = arith.constant 0 : index
    %139 = vector.load %arg3[%c696, %c0_53] : memref<5632x128xf32, #tpu.memory_space<vmem>>, vector<128x128xf32>
    %cst_54 = arith.constant dense<0.000000e+00> : vector<16x128xf32>
    %140 = tpu.matmul %3, %139, %cst_54 {dimension_numbers = #tpu.dot_dimension_numbers<[1], [0], [0], [1], [0, 0, 1, 1], [], []>} : vector<16x128xf32>, vector<128x128xf32>, vector<16x128xf32> -> vector<16x128xf32>
    %c824 = arith.constant 824 : index
    %c0_55 = arith.constant 0 : index
    %141 = vector.load %arg3[%c824, %c0_55] : memref<5632x128xf32, #tpu.memory_space<vmem>>, vector<1x128xf32>
    %142 = vector.broadcast %141 : vector<1x128xf32> to vector<16x128xf32>
    %143 = arith.addf %140, %142 : vector<16x128xf32>
    %c832 = arith.constant 832 : index
    %c0_56 = arith.constant 0 : index
    %144 = vector.load %arg3[%c832, %c0_56] : memref<5632x128xf32, #tpu.memory_space<vmem>>, vector<128x128xf32>
    %cst_57 = arith.constant dense<0.000000e+00> : vector<16x128xf32>
    %145 = tpu.matmul %3, %144, %cst_57 {dimension_numbers = #tpu.dot_dimension_numbers<[1], [0], [0], [1], [0, 0, 1, 1], [], []>} : vector<16x128xf32>, vector<128x128xf32>, vector<16x128xf32> -> vector<16x128xf32>
    %c960 = arith.constant 960 : index
    %c0_58 = arith.constant 0 : index
    %146 = vector.load %arg3[%c960, %c0_58] : memref<5632x128xf32, #tpu.memory_space<vmem>>, vector<1x128xf32>
    %147 = vector.broadcast %146 : vector<1x128xf32> to vector<16x128xf32>
    %148 = arith.addf %145, %147 : vector<16x128xf32>
    %c968 = arith.constant 968 : index
    %c0_59 = arith.constant 0 : index
    %149 = vector.load %arg3[%c968, %c0_59] : memref<5632x128xf32, #tpu.memory_space<vmem>>, vector<128x128xf32>
    %cst_60 = arith.constant 0.000000e+00 : f32
    %150 = vector.broadcast %cst_60 : f32 to vector<8x128xf32>
    %cst_61 = arith.constant 0.000000e+00 : f32
    %151 = vector.broadcast %cst_61 : f32 to vector<8x16xf32>
    %152 = vector.extract_strided_slice %138 {offsets = [0, 0], sizes = [8, 8], strides = [1, 1]} : vector<8x128xf32> to vector<8x8xf32>
    %153 = vector.extract_strided_slice %143 {offsets = [0, 0], sizes = [16, 8], strides = [1, 1]} : vector<16x128xf32> to vector<16x8xf32>
    "tpu.trace_start"() <{level = 10 : i32, message = "qd,kd->qk"}> : () -> ()
    %cst_62 = arith.constant dense<0.000000e+00> : vector<8x16xf32>
    %154 = tpu.matmul %152, %153, %cst_62 {dimension_numbers = #tpu.dot_dimension_numbers<[1], [1], [0], [0], [0, 0, 1, 0], [], []>} : vector<8x8xf32>, vector<16x8xf32>, vector<8x16xf32> -> vector<8x16xf32>
    "tpu.trace_stop"() : () -> ()
    %cst_63 = arith.constant 0.353553385 : f32
    %155 = vector.broadcast %cst_63 : f32 to vector<8x16xf32>
    %156 = arith.mulf %154, %155 : vector<8x16xf32>
    %cst_64 = arith.constant dense<0xFF800000> : vector<8xf32>
    %157 = vector.multi_reduction <maximumf>, %156, %cst_64 [1] : vector<8x16xf32> to vector<8xf32>
    %158 = vector.shape_cast %157 : vector<8xf32> to vector<8x1xf32>
    %159 = vector.broadcast %158 : vector<8x1xf32> to vector<8x16xf32>
    %160 = arith.subf %156, %159 : vector<8x16xf32>
    %161 = math.exp %160 : vector<8x16xf32>
    %cst_65 = arith.constant dense<0.000000e+00> : vector<8xf32>
    %162 = vector.multi_reduction <add>, %161, %cst_65 [1] : vector<8x16xf32> to vector<8xf32>
    %163 = vector.shape_cast %162 : vector<8xf32> to vector<8x1xf32>
    %164 = tpu.reciprocal %163 {approx = true} : vector<8x1xf32> -> vector<8x1xf32>
    %165 = vector.broadcast %164 : vector<8x1xf32> to vector<8x16xf32>
    %166 = arith.mulf %161, %165 : vector<8x16xf32>
    %167 = arith.addf %151, %166 : vector<8x16xf32>
    %168 = vector.extract_strided_slice %148 {offsets = [0, 0], sizes = [16, 8], strides = [1, 1]} : vector<16x128xf32> to vector<16x8xf32>
    %cst_66 = arith.constant dense<0.000000e+00> : vector<8x8xf32>
    %169 = tpu.matmul %166, %168, %cst_66 {dimension_numbers = #tpu.dot_dimension_numbers<[1], [0], [0], [1], [0, 0, 1, 1], [], []>} : vector<8x16xf32>, vector<16x8xf32>, vector<8x8xf32> -> vector<8x8xf32>
    %170 = vector.extract_strided_slice %149 {offsets = [0, 0], sizes = [8, 128], strides = [1, 1]} : vector<128x128xf32> to vector<8x128xf32>
    %cst_67 = arith.constant dense<0.000000e+00> : vector<8x128xf32>
    %171 = tpu.matmul %169, %170, %cst_67 {dimension_numbers = #tpu.dot_dimension_numbers<[1], [0], [0], [1], [0, 0, 1, 1], [], []>} : vector<8x8xf32>, vector<8x128xf32>, vector<8x128xf32> -> vector<8x128xf32>
    %172 = arith.addf %150, %171 : vector<8x128xf32>
    %173 = vector.extract_strided_slice %138 {offsets = [0, 8], sizes = [8, 8], strides = [1, 1]} : vector<8x128xf32> to vector<8x8xf32>
    %174 = vector.extract_strided_slice %143 {offsets = [0, 8], sizes = [16, 8], strides = [1, 1]} : vector<16x128xf32> to vector<16x8xf32>
    "tpu.trace_start"() <{level = 10 : i32, message = "qd,kd->qk"}> : () -> ()
    %cst_68 = arith.constant dense<0.000000e+00> : vector<8x16xf32>
    %175 = tpu.matmul %173, %174, %cst_68 {dimension_numbers = #tpu.dot_dimension_numbers<[1], [1], [0], [0], [0, 0, 1, 0], [], []>} : vector<8x8xf32>, vector<16x8xf32>, vector<8x16xf32> -> vector<8x16xf32>
    "tpu.trace_stop"() : () -> ()
    %cst_69 = arith.constant 0.353553385 : f32
    %176 = vector.broadcast %cst_69 : f32 to vector<8x16xf32>
    %177 = arith.mulf %175, %176 : vector<8x16xf32>
    %cst_70 = arith.constant dense<0xFF800000> : vector<8xf32>
    %178 = vector.multi_reduction <maximumf>, %177, %cst_70 [1] : vector<8x16xf32> to vector<8xf32>
    %179 = vector.shape_cast %178 : vector<8xf32> to vector<8x1xf32>
    %180 = vector.broadcast %179 : vector<8x1xf32> to vector<8x16xf32>
    %181 = arith.subf %177, %180 : vector<8x16xf32>
    %182 = math.exp %181 : vector<8x16xf32>
    %cst_71 = arith.constant dense<0.000000e+00> : vector<8xf32>
    %183 = vector.multi_reduction <add>, %182, %cst_71 [1] : vector<8x16xf32> to vector<8xf32>
    %184 = vector.shape_cast %183 : vector<8xf32> to vector<8x1xf32>
    %185 = tpu.reciprocal %184 {approx = true} : vector<8x1xf32> -> vector<8x1xf32>
    %186 = vector.broadcast %185 : vector<8x1xf32> to vector<8x16xf32>
    %187 = arith.mulf %182, %186 : vector<8x16xf32>
    %188 = arith.addf %167, %187 : vector<8x16xf32>
    %189 = vector.extract_strided_slice %148 {offsets = [0, 8], sizes = [16, 8], strides = [1, 1]} : vector<16x128xf32> to vector<16x8xf32>
    %cst_72 = arith.constant dense<0.000000e+00> : vector<8x8xf32>
    %190 = tpu.matmul %187, %189, %cst_72 {dimension_numbers = #tpu.dot_dimension_numbers<[1], [0], [0], [1], [0, 0, 1, 1], [], []>} : vector<8x16xf32>, vector<16x8xf32>, vector<8x8xf32> -> vector<8x8xf32>
    %191 = vector.extract_strided_slice %149 {offsets = [8, 0], sizes = [8, 128], strides = [1, 1]} : vector<128x128xf32> to vector<8x128xf32>
    %cst_73 = arith.constant dense<0.000000e+00> : vector<8x128xf32>
    %192 = tpu.matmul %190, %191, %cst_73 {dimension_numbers = #tpu.dot_dimension_numbers<[1], [0], [0], [1], [0, 0, 1, 1], [], []>} : vector<8x8xf32>, vector<8x128xf32>, vector<8x128xf32> -> vector<8x128xf32>
    %193 = arith.addf %172, %192 : vector<8x128xf32>
    %194 = vector.extract_strided_slice %138 {offsets = [0, 16], sizes = [8, 8], strides = [1, 1]} : vector<8x128xf32> to vector<8x8xf32>
    %195 = vector.extract_strided_slice %143 {offsets = [0, 16], sizes = [16, 8], strides = [1, 1]} : vector<16x128xf32> to vector<16x8xf32>
    "tpu.trace_start"() <{level = 10 : i32, message = "qd,kd->qk"}> : () -> ()
    %cst_74 = arith.constant dense<0.000000e+00> : vector<8x16xf32>
    %196 = tpu.matmul %194, %195, %cst_74 {dimension_numbers = #tpu.dot_dimension_numbers<[1], [1], [0], [0], [0, 0, 1, 0], [], []>} : vector<8x8xf32>, vector<16x8xf32>, vector<8x16xf32> -> vector<8x16xf32>
    "tpu.trace_stop"() : () -> ()
    %cst_75 = arith.constant 0.353553385 : f32
    %197 = vector.broadcast %cst_75 : f32 to vector<8x16xf32>
    %198 = arith.mulf %196, %197 : vector<8x16xf32>
    %cst_76 = arith.constant dense<0xFF800000> : vector<8xf32>
    %199 = vector.multi_reduction <maximumf>, %198, %cst_76 [1] : vector<8x16xf32> to vector<8xf32>
    %200 = vector.shape_cast %199 : vector<8xf32> to vector<8x1xf32>
    %201 = vector.broadcast %200 : vector<8x1xf32> to vector<8x16xf32>
    %202 = arith.subf %198, %201 : vector<8x16xf32>
    %203 = math.exp %202 : vector<8x16xf32>
    %cst_77 = arith.constant dense<0.000000e+00> : vector<8xf32>
    %204 = vector.multi_reduction <add>, %203, %cst_77 [1] : vector<8x16xf32> to vector<8xf32>
    %205 = vector.shape_cast %204 : vector<8xf32> to vector<8x1xf32>
    %206 = tpu.reciprocal %205 {approx = true} : vector<8x1xf32> -> vector<8x1xf32>
    %207 = vector.broadcast %206 : vector<8x1xf32> to vector<8x16xf32>
    %208 = arith.mulf %203, %207 : vector<8x16xf32>
    %209 = arith.addf %188, %208 : vector<8x16xf32>
    %210 = vector.extract_strided_slice %148 {offsets = [0, 16], sizes = [16, 8], strides = [1, 1]} : vector<16x128xf32> to vector<16x8xf32>
    %cst_78 = arith.constant dense<0.000000e+00> : vector<8x8xf32>
    %211 = tpu.matmul %208, %210, %cst_78 {dimension_numbers = #tpu.dot_dimension_numbers<[1], [0], [0], [1], [0, 0, 1, 1], [], []>} : vector<8x16xf32>, vector<16x8xf32>, vector<8x8xf32> -> vector<8x8xf32>
    %212 = vector.extract_strided_slice %149 {offsets = [16, 0], sizes = [8, 128], strides = [1, 1]} : vector<128x128xf32> to vector<8x128xf32>
    %cst_79 = arith.constant dense<0.000000e+00> : vector<8x128xf32>
    %213 = tpu.matmul %211, %212, %cst_79 {dimension_numbers = #tpu.dot_dimension_numbers<[1], [0], [0], [1], [0, 0, 1, 1], [], []>} : vector<8x8xf32>, vector<8x128xf32>, vector<8x128xf32> -> vector<8x128xf32>
    %214 = arith.addf %193, %213 : vector<8x128xf32>
    %215 = vector.extract_strided_slice %138 {offsets = [0, 24], sizes = [8, 8], strides = [1, 1]} : vector<8x128xf32> to vector<8x8xf32>
    %216 = vector.extract_strided_slice %143 {offsets = [0, 24], sizes = [16, 8], strides = [1, 1]} : vector<16x128xf32> to vector<16x8xf32>
    "tpu.trace_start"() <{level = 10 : i32, message = "qd,kd->qk"}> : () -> ()
    %cst_80 = arith.constant dense<0.000000e+00> : vector<8x16xf32>
    %217 = tpu.matmul %215, %216, %cst_80 {dimension_numbers = #tpu.dot_dimension_numbers<[1], [1], [0], [0], [0, 0, 1, 0], [], []>} : vector<8x8xf32>, vector<16x8xf32>, vector<8x16xf32> -> vector<8x16xf32>
    "tpu.trace_stop"() : () -> ()
    %cst_81 = arith.constant 0.353553385 : f32
    %218 = vector.broadcast %cst_81 : f32 to vector<8x16xf32>
    %219 = arith.mulf %217, %218 : vector<8x16xf32>
    %cst_82 = arith.constant dense<0xFF800000> : vector<8xf32>
    %220 = vector.multi_reduction <maximumf>, %219, %cst_82 [1] : vector<8x16xf32> to vector<8xf32>
    %221 = vector.shape_cast %220 : vector<8xf32> to vector<8x1xf32>
    %222 = vector.broadcast %221 : vector<8x1xf32> to vector<8x16xf32>
    %223 = arith.subf %219, %222 : vector<8x16xf32>
    %224 = math.exp %223 : vector<8x16xf32>
    %cst_83 = arith.constant dense<0.000000e+00> : vector<8xf32>
    %225 = vector.multi_reduction <add>, %224, %cst_83 [1] : vector<8x16xf32> to vector<8xf32>
    %226 = vector.shape_cast %225 : vector<8xf32> to vector<8x1xf32>
    %227 = tpu.reciprocal %226 {approx = true} : vector<8x1xf32> -> vector<8x1xf32>
    %228 = vector.broadcast %227 : vector<8x1xf32> to vector<8x16xf32>
    %229 = arith.mulf %224, %228 : vector<8x16xf32>
    %230 = arith.addf %209, %229 : vector<8x16xf32>
    %231 = vector.extract_strided_slice %148 {offsets = [0, 24], sizes = [16, 8], strides = [1, 1]} : vector<16x128xf32> to vector<16x8xf32>
    %cst_84 = arith.constant dense<0.000000e+00> : vector<8x8xf32>
    %232 = tpu.matmul %229, %231, %cst_84 {dimension_numbers = #tpu.dot_dimension_numbers<[1], [0], [0], [1], [0, 0, 1, 1], [], []>} : vector<8x16xf32>, vector<16x8xf32>, vector<8x8xf32> -> vector<8x8xf32>
    %233 = vector.extract_strided_slice %149 {offsets = [24, 0], sizes = [8, 128], strides = [1, 1]} : vector<128x128xf32> to vector<8x128xf32>
    %cst_85 = arith.constant dense<0.000000e+00> : vector<8x128xf32>
    %234 = tpu.matmul %232, %233, %cst_85 {dimension_numbers = #tpu.dot_dimension_numbers<[1], [0], [0], [1], [0, 0, 1, 1], [], []>} : vector<8x8xf32>, vector<8x128xf32>, vector<8x128xf32> -> vector<8x128xf32>
    %235 = arith.addf %214, %234 : vector<8x128xf32>
    %c1096 = arith.constant 1096 : index
    %c0_86 = arith.constant 0 : index
    %236 = vector.load %arg3[%c1096, %c0_86] : memref<5632x128xf32, #tpu.memory_space<vmem>>, vector<1x128xf32>
    %237 = vector.broadcast %236 : vector<1x128xf32> to vector<8x128xf32>
    %238 = arith.addf %235, %237 : vector<8x128xf32>
    %cst_87 = arith.constant 2.500000e-01 : f32
    %239 = vector.broadcast %cst_87 : f32 to vector<8x16xf32>
    %240 = arith.mulf %230, %239 : vector<8x16xf32>
    %c1104 = arith.constant 1104 : index
    %c0_88 = arith.constant 0 : index
    %241 = vector.load %arg3[%c1104, %c0_88] : memref<5632x128xf32, #tpu.memory_space<vmem>>, vector<1x128xf32>
    %c1112 = arith.constant 1112 : index
    %c0_89 = arith.constant 0 : index
    %242 = vector.load %arg3[%c1112, %c0_89] : memref<5632x128xf32, #tpu.memory_space<vmem>>, vector<1x128xf32>
    %243 = tpu.iota {dimensions = array<i32: 1>} : vector<8x128xi32>
    %c32_i32_90 = arith.constant 32 : i32
    %244 = vector.broadcast %c32_i32_90 : i32 to vector<8x128xi32>
    %245 = arith.cmpi slt, %243, %244 : vector<8x128xi32>
    %cst_91 = arith.constant 0.000000e+00 : f32
    %246 = vector.broadcast %cst_91 : f32 to vector<8x128xf32>
    %247 = arith.select %245, %238, %246 : vector<8x128xi1>, vector<8x128xf32>
    %cst_92 = arith.constant dense<0.000000e+00> : vector<8xf32>
    %248 = vector.multi_reduction <add>, %247, %cst_92 [1] : vector<8x128xf32> to vector<8xf32>
    %249 = vector.shape_cast %248 : vector<8xf32> to vector<8x1xf32>
    %cst_93 = arith.constant 3.125000e-02 : f32
    %250 = vector.broadcast %cst_93 : f32 to vector<8x1xf32>
    %251 = arith.mulf %249, %250 : vector<8x1xf32>
    %252 = vector.broadcast %251 : vector<8x1xf32> to vector<8x128xf32>
    %253 = arith.subf %238, %252 : vector<8x128xf32>
    %cst_94 = arith.constant 0.000000e+00 : f32
    %254 = vector.broadcast %cst_94 : f32 to vector<8x128xf32>
    %255 = arith.select %245, %253, %254 : vector<8x128xi1>, vector<8x128xf32>
    %256 = arith.mulf %255, %255 : vector<8x128xf32>
    %cst_95 = arith.constant dense<0.000000e+00> : vector<8xf32>
    %257 = vector.multi_reduction <add>, %256, %cst_95 [1] : vector<8x128xf32> to vector<8xf32>
    %258 = vector.shape_cast %257 : vector<8xf32> to vector<8x1xf32>
    %cst_96 = arith.constant 3.125000e-02 : f32
    %259 = vector.broadcast %cst_96 : f32 to vector<8x1xf32>
    %260 = arith.mulf %258, %259 : vector<8x1xf32>
    %cst_97 = arith.constant 9.99999974E-6 : f32
    %261 = vector.broadcast %cst_97 : f32 to vector<8x1xf32>
    %262 = arith.addf %260, %261 : vector<8x1xf32>
    %263 = math.rsqrt %262 : vector<8x1xf32>
    %264 = vector.broadcast %263 : vector<8x1xf32> to vector<8x128xf32>
    %265 = arith.mulf %255, %264 : vector<8x128xf32>
    %266 = vector.broadcast %241 : vector<1x128xf32> to vector<8x128xf32>
    %267 = arith.mulf %265, %266 : vector<8x128xf32>
    %268 = vector.broadcast %242 : vector<1x128xf32> to vector<8x128xf32>
    %269 = arith.addf %267, %268 : vector<8x128xf32>
    %c1120 = arith.constant 1120 : index
    %c0_98 = arith.constant 0 : index
    %270 = vector.load %arg3[%c1120, %c0_98] : memref<5632x128xf32, #tpu.memory_space<vmem>>, vector<128x128xf32>
    %cst_99 = arith.constant dense<0.000000e+00> : vector<8x128xf32>
    %271 = tpu.matmul %269, %270, %cst_99 {dimension_numbers = #tpu.dot_dimension_numbers<[1], [0], [0], [1], [0, 0, 1, 1], [], []>} : vector<8x128xf32>, vector<128x128xf32>, vector<8x128xf32> -> vector<8x128xf32>
    %c1248 = arith.constant 1248 : index
    %c0_100 = arith.constant 0 : index
    %272 = vector.load %arg3[%c1248, %c0_100] : memref<5632x128xf32, #tpu.memory_space<vmem>>, vector<1x128xf32>
    %273 = vector.broadcast %272 : vector<1x128xf32> to vector<8x128xf32>
    %274 = arith.addf %271, %273 : vector<8x128xf32>
    %cst_101 = arith.constant 0.000000e+00 : f32
    %275 = vector.broadcast %cst_101 : f32 to vector<8x128xf32>
    %276 = arith.maximumf %274, %275 : vector<8x128xf32>
    %c1256 = arith.constant 1256 : index
    %c0_102 = arith.constant 0 : index
    %277 = vector.load %arg3[%c1256, %c0_102] : memref<5632x128xf32, #tpu.memory_space<vmem>>, vector<128x128xf32>
    %cst_103 = arith.constant dense<0.000000e+00> : vector<8x128xf32>
    %278 = tpu.matmul %276, %277, %cst_103 {dimension_numbers = #tpu.dot_dimension_numbers<[1], [0], [0], [1], [0, 0, 1, 1], [], []>} : vector<8x128xf32>, vector<128x128xf32>, vector<8x128xf32> -> vector<8x128xf32>
    %c1384 = arith.constant 1384 : index
    %c0_104 = arith.constant 0 : index
    %279 = vector.load %arg3[%c1384, %c0_104] : memref<5632x128xf32, #tpu.memory_space<vmem>>, vector<1x128xf32>
    %280 = vector.broadcast %279 : vector<1x128xf32> to vector<8x128xf32>
    %281 = arith.addf %278, %280 : vector<8x128xf32>
    %282 = arith.addf %281, %269 : vector<8x128xf32>
    %c1392 = arith.constant 1392 : index
    %c0_105 = arith.constant 0 : index
    %283 = vector.load %arg3[%c1392, %c0_105] : memref<5632x128xf32, #tpu.memory_space<vmem>>, vector<1x128xf32>
    %c1400 = arith.constant 1400 : index
    %c0_106 = arith.constant 0 : index
    %284 = vector.load %arg3[%c1400, %c0_106] : memref<5632x128xf32, #tpu.memory_space<vmem>>, vector<1x128xf32>
    %285 = tpu.iota {dimensions = array<i32: 1>} : vector<8x128xi32>
    %c32_i32_107 = arith.constant 32 : i32
    %286 = vector.broadcast %c32_i32_107 : i32 to vector<8x128xi32>
    %287 = arith.cmpi slt, %285, %286 : vector<8x128xi32>
    %cst_108 = arith.constant 0.000000e+00 : f32
    %288 = vector.broadcast %cst_108 : f32 to vector<8x128xf32>
    %289 = arith.select %287, %282, %288 : vector<8x128xi1>, vector<8x128xf32>
    %cst_109 = arith.constant dense<0.000000e+00> : vector<8xf32>
    %290 = vector.multi_reduction <add>, %289, %cst_109 [1] : vector<8x128xf32> to vector<8xf32>
    %291 = vector.shape_cast %290 : vector<8xf32> to vector<8x1xf32>
    %cst_110 = arith.constant 3.125000e-02 : f32
    %292 = vector.broadcast %cst_110 : f32 to vector<8x1xf32>
    %293 = arith.mulf %291, %292 : vector<8x1xf32>
    %294 = vector.broadcast %293 : vector<8x1xf32> to vector<8x128xf32>
    %295 = arith.subf %282, %294 : vector<8x128xf32>
    %cst_111 = arith.constant 0.000000e+00 : f32
    %296 = vector.broadcast %cst_111 : f32 to vector<8x128xf32>
    %297 = arith.select %287, %295, %296 : vector<8x128xi1>, vector<8x128xf32>
    %298 = arith.mulf %297, %297 : vector<8x128xf32>
    %cst_112 = arith.constant dense<0.000000e+00> : vector<8xf32>
    %299 = vector.multi_reduction <add>, %298, %cst_112 [1] : vector<8x128xf32> to vector<8xf32>
    %300 = vector.shape_cast %299 : vector<8xf32> to vector<8x1xf32>
    %cst_113 = arith.constant 3.125000e-02 : f32
    %301 = vector.broadcast %cst_113 : f32 to vector<8x1xf32>
    %302 = arith.mulf %300, %301 : vector<8x1xf32>
    %cst_114 = arith.constant 9.99999974E-6 : f32
    %303 = vector.broadcast %cst_114 : f32 to vector<8x1xf32>
    %304 = arith.addf %302, %303 : vector<8x1xf32>
    %305 = math.rsqrt %304 : vector<8x1xf32>
    %306 = vector.broadcast %305 : vector<8x1xf32> to vector<8x128xf32>
    %307 = arith.mulf %297, %306 : vector<8x128xf32>
    %308 = vector.broadcast %283 : vector<1x128xf32> to vector<8x128xf32>
    %309 = arith.mulf %307, %308 : vector<8x128xf32>
    %310 = vector.broadcast %284 : vector<1x128xf32> to vector<8x128xf32>
    %311 = arith.addf %309, %310 : vector<8x128xf32>
    %c2816 = arith.constant 2816 : index
    %c0_115 = arith.constant 0 : index
    %312 = vector.load %arg3[%c2816, %c0_115] : memref<5632x128xf32, #tpu.memory_space<vmem>>, vector<128x128xf32>
    %cst_116 = arith.constant dense<0.000000e+00> : vector<16x128xf32>
    %313 = tpu.matmul %3, %312, %cst_116 {dimension_numbers = #tpu.dot_dimension_numbers<[1], [0], [0], [1], [0, 0, 1, 1], [], []>} : vector<16x128xf32>, vector<128x128xf32>, vector<16x128xf32> -> vector<16x128xf32>
    %c2944 = arith.constant 2944 : index
    %c0_117 = arith.constant 0 : index
    %314 = vector.load %arg3[%c2944, %c0_117] : memref<5632x128xf32, #tpu.memory_space<vmem>>, vector<1x128xf32>
    %315 = vector.broadcast %314 : vector<1x128xf32> to vector<16x128xf32>
    %316 = arith.addf %313, %315 : vector<16x128xf32>
    %c2952 = arith.constant 2952 : index
    %c0_118 = arith.constant 0 : index
    %317 = vector.load %arg3[%c2952, %c0_118] : memref<5632x128xf32, #tpu.memory_space<vmem>>, vector<128x128xf32>
    %cst_119 = arith.constant dense<0.000000e+00> : vector<16x128xf32>
    %318 = tpu.matmul %3, %317, %cst_119 {dimension_numbers = #tpu.dot_dimension_numbers<[1], [0], [0], [1], [0, 0, 1, 1], [], []>} : vector<16x128xf32>, vector<128x128xf32>, vector<16x128xf32> -> vector<16x128xf32>
    %c3080 = arith.constant 3080 : index
    %c0_120 = arith.constant 0 : index
    %319 = vector.load %arg3[%c3080, %c0_120] : memref<5632x128xf32, #tpu.memory_space<vmem>>, vector<1x128xf32>
    %320 = vector.broadcast %319 : vector<1x128xf32> to vector<16x128xf32>
    %321 = arith.addf %318, %320 : vector<16x128xf32>
    %c3088 = arith.constant 3088 : index
    %c0_121 = arith.constant 0 : index
    %322 = vector.load %arg3[%c3088, %c0_121] : memref<5632x128xf32, #tpu.memory_space<vmem>>, vector<128x128xf32>
    %cst_122 = arith.constant dense<0.000000e+00> : vector<16x128xf32>
    %323 = tpu.matmul %3, %322, %cst_122 {dimension_numbers = #tpu.dot_dimension_numbers<[1], [0], [0], [1], [0, 0, 1, 1], [], []>} : vector<16x128xf32>, vector<128x128xf32>, vector<16x128xf32> -> vector<16x128xf32>
    %c3216 = arith.constant 3216 : index
    %c0_123 = arith.constant 0 : index
    %324 = vector.load %arg3[%c3216, %c0_123] : memref<5632x128xf32, #tpu.memory_space<vmem>>, vector<1x128xf32>
    %325 = vector.broadcast %324 : vector<1x128xf32> to vector<16x128xf32>
    %326 = arith.addf %323, %325 : vector<16x128xf32>
    %c3224 = arith.constant 3224 : index
    %c0_124 = arith.constant 0 : index
    %327 = vector.load %arg3[%c3224, %c0_124] : memref<5632x128xf32, #tpu.memory_space<vmem>>, vector<128x128xf32>
    %cst_125 = arith.constant 0.000000e+00 : f32
    %328 = vector.broadcast %cst_125 : f32 to vector<16x128xf32>
    %329 = vector.extract_strided_slice %316 {offsets = [0, 0], sizes = [16, 8], strides = [1, 1]} : vector<16x128xf32> to vector<16x8xf32>
    %330 = vector.extract_strided_slice %321 {offsets = [0, 0], sizes = [16, 8], strides = [1, 1]} : vector<16x128xf32> to vector<16x8xf32>
    "tpu.trace_start"() <{level = 10 : i32, message = "qd,kd->qk"}> : () -> ()
    %cst_126 = arith.constant dense<0.000000e+00> : vector<16x16xf32>
    %331 = tpu.matmul %329, %330, %cst_126 {dimension_numbers = #tpu.dot_dimension_numbers<[1], [1], [0], [0], [0, 0, 1, 0], [], []>} : vector<16x8xf32>, vector<16x8xf32>, vector<16x16xf32> -> vector<16x16xf32>
    "tpu.trace_stop"() : () -> ()
    %cst_127 = arith.constant 0.353553385 : f32
    %332 = vector.broadcast %cst_127 : f32 to vector<16x16xf32>
    %333 = arith.mulf %331, %332 : vector<16x16xf32>
    %cst_128 = arith.constant dense<0xFF800000> : vector<16xf32>
    %334 = vector.multi_reduction <maximumf>, %333, %cst_128 [1] : vector<16x16xf32> to vector<16xf32>
    %335 = vector.shape_cast %334 : vector<16xf32> to vector<16x1xf32>
    %336 = vector.broadcast %335 : vector<16x1xf32> to vector<16x16xf32>
    %337 = arith.subf %333, %336 : vector<16x16xf32>
    %338 = math.exp %337 : vector<16x16xf32>
    %cst_129 = arith.constant dense<0.000000e+00> : vector<16xf32>
    %339 = vector.multi_reduction <add>, %338, %cst_129 [1] : vector<16x16xf32> to vector<16xf32>
    %340 = vector.shape_cast %339 : vector<16xf32> to vector<16x1xf32>
    %341 = tpu.reciprocal %340 {approx = true} : vector<16x1xf32> -> vector<16x1xf32>
    %342 = vector.broadcast %341 : vector<16x1xf32> to vector<16x16xf32>
    %343 = arith.mulf %338, %342 : vector<16x16xf32>
    %344 = vector.extract_strided_slice %326 {offsets = [0, 0], sizes = [16, 8], strides = [1, 1]} : vector<16x128xf32> to vector<16x8xf32>
    %cst_130 = arith.constant dense<0.000000e+00> : vector<16x8xf32>
    %345 = tpu.matmul %343, %344, %cst_130 {dimension_numbers = #tpu.dot_dimension_numbers<[1], [0], [0], [1], [0, 0, 1, 1], [], []>} : vector<16x16xf32>, vector<16x8xf32>, vector<16x8xf32> -> vector<16x8xf32>
    %346 = vector.extract_strided_slice %327 {offsets = [0, 0], sizes = [8, 128], strides = [1, 1]} : vector<128x128xf32> to vector<8x128xf32>
    %cst_131 = arith.constant dense<0.000000e+00> : vector<16x128xf32>
    %347 = tpu.matmul %345, %346, %cst_131 {dimension_numbers = #tpu.dot_dimension_numbers<[1], [0], [0], [1], [0, 0, 1, 1], [], []>} : vector<16x8xf32>, vector<8x128xf32>, vector<16x128xf32> -> vector<16x128xf32>
    %348 = arith.addf %328, %347 : vector<16x128xf32>
    %349 = vector.extract_strided_slice %316 {offsets = [0, 8], sizes = [16, 8], strides = [1, 1]} : vector<16x128xf32> to vector<16x8xf32>
    %350 = vector.extract_strided_slice %321 {offsets = [0, 8], sizes = [16, 8], strides = [1, 1]} : vector<16x128xf32> to vector<16x8xf32>
    "tpu.trace_start"() <{level = 10 : i32, message = "qd,kd->qk"}> : () -> ()
    %cst_132 = arith.constant dense<0.000000e+00> : vector<16x16xf32>
    %351 = tpu.matmul %349, %350, %cst_132 {dimension_numbers = #tpu.dot_dimension_numbers<[1], [1], [0], [0], [0, 0, 1, 0], [], []>} : vector<16x8xf32>, vector<16x8xf32>, vector<16x16xf32> -> vector<16x16xf32>
    "tpu.trace_stop"() : () -> ()
    %cst_133 = arith.constant 0.353553385 : f32
    %352 = vector.broadcast %cst_133 : f32 to vector<16x16xf32>
    %353 = arith.mulf %351, %352 : vector<16x16xf32>
    %cst_134 = arith.constant dense<0xFF800000> : vector<16xf32>
    %354 = vector.multi_reduction <maximumf>, %353, %cst_134 [1] : vector<16x16xf32> to vector<16xf32>
    %355 = vector.shape_cast %354 : vector<16xf32> to vector<16x1xf32>
    %356 = vector.broadcast %355 : vector<16x1xf32> to vector<16x16xf32>
    %357 = arith.subf %353, %356 : vector<16x16xf32>
    %358 = math.exp %357 : vector<16x16xf32>
    %cst_135 = arith.constant dense<0.000000e+00> : vector<16xf32>
    %359 = vector.multi_reduction <add>, %358, %cst_135 [1] : vector<16x16xf32> to vector<16xf32>
    %360 = vector.shape_cast %359 : vector<16xf32> to vector<16x1xf32>
    %361 = tpu.reciprocal %360 {approx = true} : vector<16x1xf32> -> vector<16x1xf32>
    %362 = vector.broadcast %361 : vector<16x1xf32> to vector<16x16xf32>
    %363 = arith.mulf %358, %362 : vector<16x16xf32>
    %364 = vector.extract_strided_slice %326 {offsets = [0, 8], sizes = [16, 8], strides = [1, 1]} : vector<16x128xf32> to vector<16x8xf32>
    %cst_136 = arith.constant dense<0.000000e+00> : vector<16x8xf32>
    %365 = tpu.matmul %363, %364, %cst_136 {dimension_numbers = #tpu.dot_dimension_numbers<[1], [0], [0], [1], [0, 0, 1, 1], [], []>} : vector<16x16xf32>, vector<16x8xf32>, vector<16x8xf32> -> vector<16x8xf32>
    %366 = vector.extract_strided_slice %327 {offsets = [8, 0], sizes = [8, 128], strides = [1, 1]} : vector<128x128xf32> to vector<8x128xf32>
    %cst_137 = arith.constant dense<0.000000e+00> : vector<16x128xf32>
    %367 = tpu.matmul %365, %366, %cst_137 {dimension_numbers = #tpu.dot_dimension_numbers<[1], [0], [0], [1], [0, 0, 1, 1], [], []>} : vector<16x8xf32>, vector<8x128xf32>, vector<16x128xf32> -> vector<16x128xf32>
    %368 = arith.addf %348, %367 : vector<16x128xf32>
    %369 = vector.extract_strided_slice %316 {offsets = [0, 16], sizes = [16, 8], strides = [1, 1]} : vector<16x128xf32> to vector<16x8xf32>
    %370 = vector.extract_strided_slice %321 {offsets = [0, 16], sizes = [16, 8], strides = [1, 1]} : vector<16x128xf32> to vector<16x8xf32>
    "tpu.trace_start"() <{level = 10 : i32, message = "qd,kd->qk"}> : () -> ()
    %cst_138 = arith.constant dense<0.000000e+00> : vector<16x16xf32>
    %371 = tpu.matmul %369, %370, %cst_138 {dimension_numbers = #tpu.dot_dimension_numbers<[1], [1], [0], [0], [0, 0, 1, 0], [], []>} : vector<16x8xf32>, vector<16x8xf32>, vector<16x16xf32> -> vector<16x16xf32>
    "tpu.trace_stop"() : () -> ()
    %cst_139 = arith.constant 0.353553385 : f32
    %372 = vector.broadcast %cst_139 : f32 to vector<16x16xf32>
    %373 = arith.mulf %371, %372 : vector<16x16xf32>
    %cst_140 = arith.constant dense<0xFF800000> : vector<16xf32>
    %374 = vector.multi_reduction <maximumf>, %373, %cst_140 [1] : vector<16x16xf32> to vector<16xf32>
    %375 = vector.shape_cast %374 : vector<16xf32> to vector<16x1xf32>
    %376 = vector.broadcast %375 : vector<16x1xf32> to vector<16x16xf32>
    %377 = arith.subf %373, %376 : vector<16x16xf32>
    %378 = math.exp %377 : vector<16x16xf32>
    %cst_141 = arith.constant dense<0.000000e+00> : vector<16xf32>
    %379 = vector.multi_reduction <add>, %378, %cst_141 [1] : vector<16x16xf32> to vector<16xf32>
    %380 = vector.shape_cast %379 : vector<16xf32> to vector<16x1xf32>
    %381 = tpu.reciprocal %380 {approx = true} : vector<16x1xf32> -> vector<16x1xf32>
    %382 = vector.broadcast %381 : vector<16x1xf32> to vector<16x16xf32>
    %383 = arith.mulf %378, %382 : vector<16x16xf32>
    %384 = vector.extract_strided_slice %326 {offsets = [0, 16], sizes = [16, 8], strides = [1, 1]} : vector<16x128xf32> to vector<16x8xf32>
    %cst_142 = arith.constant dense<0.000000e+00> : vector<16x8xf32>
    %385 = tpu.matmul %383, %384, %cst_142 {dimension_numbers = #tpu.dot_dimension_numbers<[1], [0], [0], [1], [0, 0, 1, 1], [], []>} : vector<16x16xf32>, vector<16x8xf32>, vector<16x8xf32> -> vector<16x8xf32>
    %386 = vector.extract_strided_slice %327 {offsets = [16, 0], sizes = [8, 128], strides = [1, 1]} : vector<128x128xf32> to vector<8x128xf32>
    %cst_143 = arith.constant dense<0.000000e+00> : vector<16x128xf32>
    %387 = tpu.matmul %385, %386, %cst_143 {dimension_numbers = #tpu.dot_dimension_numbers<[1], [0], [0], [1], [0, 0, 1, 1], [], []>} : vector<16x8xf32>, vector<8x128xf32>, vector<16x128xf32> -> vector<16x128xf32>
    %388 = arith.addf %368, %387 : vector<16x128xf32>
    %389 = vector.extract_strided_slice %316 {offsets = [0, 24], sizes = [16, 8], strides = [1, 1]} : vector<16x128xf32> to vector<16x8xf32>
    %390 = vector.extract_strided_slice %321 {offsets = [0, 24], sizes = [16, 8], strides = [1, 1]} : vector<16x128xf32> to vector<16x8xf32>
    "tpu.trace_start"() <{level = 10 : i32, message = "qd,kd->qk"}> : () -> ()
    %cst_144 = arith.constant dense<0.000000e+00> : vector<16x16xf32>
    %391 = tpu.matmul %389, %390, %cst_144 {dimension_numbers = #tpu.dot_dimension_numbers<[1], [1], [0], [0], [0, 0, 1, 0], [], []>} : vector<16x8xf32>, vector<16x8xf32>, vector<16x16xf32> -> vector<16x16xf32>
    "tpu.trace_stop"() : () -> ()
    %cst_145 = arith.constant 0.353553385 : f32
    %392 = vector.broadcast %cst_145 : f32 to vector<16x16xf32>
    %393 = arith.mulf %391, %392 : vector<16x16xf32>
    %cst_146 = arith.constant dense<0xFF800000> : vector<16xf32>
    %394 = vector.multi_reduction <maximumf>, %393, %cst_146 [1] : vector<16x16xf32> to vector<16xf32>
    %395 = vector.shape_cast %394 : vector<16xf32> to vector<16x1xf32>
    %396 = vector.broadcast %395 : vector<16x1xf32> to vector<16x16xf32>
    %397 = arith.subf %393, %396 : vector<16x16xf32>
    %398 = math.exp %397 : vector<16x16xf32>
    %cst_147 = arith.constant dense<0.000000e+00> : vector<16xf32>
    %399 = vector.multi_reduction <add>, %398, %cst_147 [1] : vector<16x16xf32> to vector<16xf32>
    %400 = vector.shape_cast %399 : vector<16xf32> to vector<16x1xf32>
    %401 = tpu.reciprocal %400 {approx = true} : vector<16x1xf32> -> vector<16x1xf32>
    %402 = vector.broadcast %401 : vector<16x1xf32> to vector<16x16xf32>
    %403 = arith.mulf %398, %402 : vector<16x16xf32>
    %404 = vector.extract_strided_slice %326 {offsets = [0, 24], sizes = [16, 8], strides = [1, 1]} : vector<16x128xf32> to vector<16x8xf32>
    %cst_148 = arith.constant dense<0.000000e+00> : vector<16x8xf32>
    %405 = tpu.matmul %403, %404, %cst_148 {dimension_numbers = #tpu.dot_dimension_numbers<[1], [0], [0], [1], [0, 0, 1, 1], [], []>} : vector<16x16xf32>, vector<16x8xf32>, vector<16x8xf32> -> vector<16x8xf32>
    %406 = vector.extract_strided_slice %327 {offsets = [24, 0], sizes = [8, 128], strides = [1, 1]} : vector<128x128xf32> to vector<8x128xf32>
    %cst_149 = arith.constant dense<0.000000e+00> : vector<16x128xf32>
    %407 = tpu.matmul %405, %406, %cst_149 {dimension_numbers = #tpu.dot_dimension_numbers<[1], [0], [0], [1], [0, 0, 1, 1], [], []>} : vector<16x8xf32>, vector<8x128xf32>, vector<16x128xf32> -> vector<16x128xf32>
    %408 = arith.addf %388, %407 : vector<16x128xf32>
    %c3352 = arith.constant 3352 : index
    %c0_150 = arith.constant 0 : index
    %409 = vector.load %arg3[%c3352, %c0_150] : memref<5632x128xf32, #tpu.memory_space<vmem>>, vector<1x128xf32>
    %410 = vector.broadcast %409 : vector<1x128xf32> to vector<16x128xf32>
    %411 = arith.addf %408, %410 : vector<16x128xf32>
    %412 = arith.addf %411, %3 : vector<16x128xf32>
    %c3360 = arith.constant 3360 : index
    %c0_151 = arith.constant 0 : index
    %413 = vector.load %arg3[%c3360, %c0_151] : memref<5632x128xf32, #tpu.memory_space<vmem>>, vector<1x128xf32>
    %c3368 = arith.constant 3368 : index
    %c0_152 = arith.constant 0 : index
    %414 = vector.load %arg3[%c3368, %c0_152] : memref<5632x128xf32, #tpu.memory_space<vmem>>, vector<1x128xf32>
    %415 = tpu.iota {dimensions = array<i32: 1>} : vector<16x128xi32>
    %c32_i32_153 = arith.constant 32 : i32
    %416 = vector.broadcast %c32_i32_153 : i32 to vector<16x128xi32>
    %417 = arith.cmpi slt, %415, %416 : vector<16x128xi32>
    %cst_154 = arith.constant 0.000000e+00 : f32
    %418 = vector.broadcast %cst_154 : f32 to vector<16x128xf32>
    %419 = arith.select %417, %412, %418 : vector<16x128xi1>, vector<16x128xf32>
    %cst_155 = arith.constant dense<0.000000e+00> : vector<16xf32>
    %420 = vector.multi_reduction <add>, %419, %cst_155 [1] : vector<16x128xf32> to vector<16xf32>
    %421 = vector.shape_cast %420 : vector<16xf32> to vector<16x1xf32>
    %cst_156 = arith.constant 3.125000e-02 : f32
    %422 = vector.broadcast %cst_156 : f32 to vector<16x1xf32>
    %423 = arith.mulf %421, %422 : vector<16x1xf32>
    %424 = vector.broadcast %423 : vector<16x1xf32> to vector<16x128xf32>
    %425 = arith.subf %412, %424 : vector<16x128xf32>
    %cst_157 = arith.constant 0.000000e+00 : f32
    %426 = vector.broadcast %cst_157 : f32 to vector<16x128xf32>
    %427 = arith.select %417, %425, %426 : vector<16x128xi1>, vector<16x128xf32>
    %428 = arith.mulf %427, %427 : vector<16x128xf32>
    %cst_158 = arith.constant dense<0.000000e+00> : vector<16xf32>
    %429 = vector.multi_reduction <add>, %428, %cst_158 [1] : vector<16x128xf32> to vector<16xf32>
    %430 = vector.shape_cast %429 : vector<16xf32> to vector<16x1xf32>
    %cst_159 = arith.constant 3.125000e-02 : f32
    %431 = vector.broadcast %cst_159 : f32 to vector<16x1xf32>
    %432 = arith.mulf %430, %431 : vector<16x1xf32>
    %cst_160 = arith.constant 9.99999974E-6 : f32
    %433 = vector.broadcast %cst_160 : f32 to vector<16x1xf32>
    %434 = arith.addf %432, %433 : vector<16x1xf32>
    %435 = math.rsqrt %434 : vector<16x1xf32>
    %436 = vector.broadcast %435 : vector<16x1xf32> to vector<16x128xf32>
    %437 = arith.mulf %427, %436 : vector<16x128xf32>
    %438 = vector.broadcast %413 : vector<1x128xf32> to vector<16x128xf32>
    %439 = arith.mulf %437, %438 : vector<16x128xf32>
    %440 = vector.broadcast %414 : vector<1x128xf32> to vector<16x128xf32>
    %441 = arith.addf %439, %440 : vector<16x128xf32>
    %c3376 = arith.constant 3376 : index
    %c0_161 = arith.constant 0 : index
    %442 = vector.load %arg3[%c3376, %c0_161] : memref<5632x128xf32, #tpu.memory_space<vmem>>, vector<128x128xf32>
    %cst_162 = arith.constant dense<0.000000e+00> : vector<16x128xf32>
    %443 = tpu.matmul %441, %442, %cst_162 {dimension_numbers = #tpu.dot_dimension_numbers<[1], [0], [0], [1], [0, 0, 1, 1], [], []>} : vector<16x128xf32>, vector<128x128xf32>, vector<16x128xf32> -> vector<16x128xf32>
    %c3504 = arith.constant 3504 : index
    %c0_163 = arith.constant 0 : index
    %444 = vector.load %arg3[%c3504, %c0_163] : memref<5632x128xf32, #tpu.memory_space<vmem>>, vector<1x128xf32>
    %445 = vector.broadcast %444 : vector<1x128xf32> to vector<16x128xf32>
    %446 = arith.addf %443, %445 : vector<16x128xf32>
    %c3512 = arith.constant 3512 : index
    %c0_164 = arith.constant 0 : index
    %447 = vector.load %arg3[%c3512, %c0_164] : memref<5632x128xf32, #tpu.memory_space<vmem>>, vector<128x128xf32>
    %cst_165 = arith.constant dense<0.000000e+00> : vector<8x128xf32>
    %448 = tpu.matmul %311, %447, %cst_165 {dimension_numbers = #tpu.dot_dimension_numbers<[1], [0], [0], [1], [0, 0, 1, 1], [], []>} : vector<8x128xf32>, vector<128x128xf32>, vector<8x128xf32> -> vector<8x128xf32>
    %c3640 = arith.constant 3640 : index
    %c0_166 = arith.constant 0 : index
    %449 = vector.load %arg3[%c3640, %c0_166] : memref<5632x128xf32, #tpu.memory_space<vmem>>, vector<1x128xf32>
    %450 = vector.broadcast %449 : vector<1x128xf32> to vector<8x128xf32>
    %451 = arith.addf %448, %450 : vector<8x128xf32>
    %c3648 = arith.constant 3648 : index
    %c0_167 = arith.constant 0 : index
    %452 = vector.load %arg3[%c3648, %c0_167] : memref<5632x128xf32, #tpu.memory_space<vmem>>, vector<128x128xf32>
    %cst_168 = arith.constant dense<0.000000e+00> : vector<8x128xf32>
    %453 = tpu.matmul %311, %452, %cst_168 {dimension_numbers = #tpu.dot_dimension_numbers<[1], [0], [0], [1], [0, 0, 1, 1], [], []>} : vector<8x128xf32>, vector<128x128xf32>, vector<8x128xf32> -> vector<8x128xf32>
    %c3776 = arith.constant 3776 : index
    %c0_169 = arith.constant 0 : index
    %454 = vector.load %arg3[%c3776, %c0_169] : memref<5632x128xf32, #tpu.memory_space<vmem>>, vector<1x128xf32>
    %455 = vector.broadcast %454 : vector<1x128xf32> to vector<8x128xf32>
    %456 = arith.addf %453, %455 : vector<8x128xf32>
    %c3784 = arith.constant 3784 : index
    %c0_170 = arith.constant 0 : index
    %457 = vector.load %arg3[%c3784, %c0_170] : memref<5632x128xf32, #tpu.memory_space<vmem>>, vector<128x128xf32>
    %cst_171 = arith.constant 0.000000e+00 : f32
    %458 = vector.broadcast %cst_171 : f32 to vector<16x128xf32>
    %cst_172 = arith.constant 0.000000e+00 : f32
    %459 = vector.broadcast %cst_172 : f32 to vector<16x8xf32>
    %460 = vector.extract_strided_slice %446 {offsets = [0, 0], sizes = [16, 8], strides = [1, 1]} : vector<16x128xf32> to vector<16x8xf32>
    %461 = vector.extract_strided_slice %451 {offsets = [0, 0], sizes = [8, 8], strides = [1, 1]} : vector<8x128xf32> to vector<8x8xf32>
    "tpu.trace_start"() <{level = 10 : i32, message = "qd,kd->qk"}> : () -> ()
    %cst_173 = arith.constant dense<0.000000e+00> : vector<16x8xf32>
    %462 = tpu.matmul %460, %461, %cst_173 {dimension_numbers = #tpu.dot_dimension_numbers<[1], [1], [0], [0], [0, 0, 1, 0], [], []>} : vector<16x8xf32>, vector<8x8xf32>, vector<16x8xf32> -> vector<16x8xf32>
    "tpu.trace_stop"() : () -> ()
    %cst_174 = arith.constant 0.353553385 : f32
    %463 = vector.broadcast %cst_174 : f32 to vector<16x8xf32>
    %464 = arith.mulf %462, %463 : vector<16x8xf32>
    %cst_175 = arith.constant dense<0xFF800000> : vector<16xf32>
    %465 = vector.multi_reduction <maximumf>, %464, %cst_175 [1] : vector<16x8xf32> to vector<16xf32>
    %466 = vector.shape_cast %465 : vector<16xf32> to vector<16x1xf32>
    %467 = vector.broadcast %466 : vector<16x1xf32> to vector<16x8xf32>
    %468 = arith.subf %464, %467 : vector<16x8xf32>
    %469 = math.exp %468 : vector<16x8xf32>
    %cst_176 = arith.constant dense<0.000000e+00> : vector<16xf32>
    %470 = vector.multi_reduction <add>, %469, %cst_176 [1] : vector<16x8xf32> to vector<16xf32>
    %471 = vector.shape_cast %470 : vector<16xf32> to vector<16x1xf32>
    %472 = tpu.reciprocal %471 {approx = true} : vector<16x1xf32> -> vector<16x1xf32>
    %473 = vector.broadcast %472 : vector<16x1xf32> to vector<16x8xf32>
    %474 = arith.mulf %469, %473 : vector<16x8xf32>
    %475 = arith.addf %459, %474 : vector<16x8xf32>
    %476 = vector.extract_strided_slice %456 {offsets = [0, 0], sizes = [8, 8], strides = [1, 1]} : vector<8x128xf32> to vector<8x8xf32>
    %cst_177 = arith.constant dense<0.000000e+00> : vector<16x8xf32>
    %477 = tpu.matmul %474, %476, %cst_177 {dimension_numbers = #tpu.dot_dimension_numbers<[1], [0], [0], [1], [0, 0, 1, 1], [], []>} : vector<16x8xf32>, vector<8x8xf32>, vector<16x8xf32> -> vector<16x8xf32>
    %478 = vector.extract_strided_slice %457 {offsets = [0, 0], sizes = [8, 128], strides = [1, 1]} : vector<128x128xf32> to vector<8x128xf32>
    %cst_178 = arith.constant dense<0.000000e+00> : vector<16x128xf32>
    %479 = tpu.matmul %477, %478, %cst_178 {dimension_numbers = #tpu.dot_dimension_numbers<[1], [0], [0], [1], [0, 0, 1, 1], [], []>} : vector<16x8xf32>, vector<8x128xf32>, vector<16x128xf32> -> vector<16x128xf32>
    %480 = arith.addf %458, %479 : vector<16x128xf32>
    %481 = vector.extract_strided_slice %446 {offsets = [0, 8], sizes = [16, 8], strides = [1, 1]} : vector<16x128xf32> to vector<16x8xf32>
    %482 = vector.extract_strided_slice %451 {offsets = [0, 8], sizes = [8, 8], strides = [1, 1]} : vector<8x128xf32> to vector<8x8xf32>
    "tpu.trace_start"() <{level = 10 : i32, message = "qd,kd->qk"}> : () -> ()
    %cst_179 = arith.constant dense<0.000000e+00> : vector<16x8xf32>
    %483 = tpu.matmul %481, %482, %cst_179 {dimension_numbers = #tpu.dot_dimension_numbers<[1], [1], [0], [0], [0, 0, 1, 0], [], []>} : vector<16x8xf32>, vector<8x8xf32>, vector<16x8xf32> -> vector<16x8xf32>
    "tpu.trace_stop"() : () -> ()
    %cst_180 = arith.constant 0.353553385 : f32
    %484 = vector.broadcast %cst_180 : f32 to vector<16x8xf32>
    %485 = arith.mulf %483, %484 : vector<16x8xf32>
    %cst_181 = arith.constant dense<0xFF800000> : vector<16xf32>
    %486 = vector.multi_reduction <maximumf>, %485, %cst_181 [1] : vector<16x8xf32> to vector<16xf32>
    %487 = vector.shape_cast %486 : vector<16xf32> to vector<16x1xf32>
    %488 = vector.broadcast %487 : vector<16x1xf32> to vector<16x8xf32>
    %489 = arith.subf %485, %488 : vector<16x8xf32>
    %490 = math.exp %489 : vector<16x8xf32>
    %cst_182 = arith.constant dense<0.000000e+00> : vector<16xf32>
    %491 = vector.multi_reduction <add>, %490, %cst_182 [1] : vector<16x8xf32> to vector<16xf32>
    %492 = vector.shape_cast %491 : vector<16xf32> to vector<16x1xf32>
    %493 = tpu.reciprocal %492 {approx = true} : vector<16x1xf32> -> vector<16x1xf32>
    %494 = vector.broadcast %493 : vector<16x1xf32> to vector<16x8xf32>
    %495 = arith.mulf %490, %494 : vector<16x8xf32>
    %496 = arith.addf %475, %495 : vector<16x8xf32>
    %497 = vector.extract_strided_slice %456 {offsets = [0, 8], sizes = [8, 8], strides = [1, 1]} : vector<8x128xf32> to vector<8x8xf32>
    %cst_183 = arith.constant dense<0.000000e+00> : vector<16x8xf32>
    %498 = tpu.matmul %495, %497, %cst_183 {dimension_numbers = #tpu.dot_dimension_numbers<[1], [0], [0], [1], [0, 0, 1, 1], [], []>} : vector<16x8xf32>, vector<8x8xf32>, vector<16x8xf32> -> vector<16x8xf32>
    %499 = vector.extract_strided_slice %457 {offsets = [8, 0], sizes = [8, 128], strides = [1, 1]} : vector<128x128xf32> to vector<8x128xf32>
    %cst_184 = arith.constant dense<0.000000e+00> : vector<16x128xf32>
    %500 = tpu.matmul %498, %499, %cst_184 {dimension_numbers = #tpu.dot_dimension_numbers<[1], [0], [0], [1], [0, 0, 1, 1], [], []>} : vector<16x8xf32>, vector<8x128xf32>, vector<16x128xf32> -> vector<16x128xf32>
    %501 = arith.addf %480, %500 : vector<16x128xf32>
    %502 = vector.extract_strided_slice %446 {offsets = [0, 16], sizes = [16, 8], strides = [1, 1]} : vector<16x128xf32> to vector<16x8xf32>
    %503 = vector.extract_strided_slice %451 {offsets = [0, 16], sizes = [8, 8], strides = [1, 1]} : vector<8x128xf32> to vector<8x8xf32>
    "tpu.trace_start"() <{level = 10 : i32, message = "qd,kd->qk"}> : () -> ()
    %cst_185 = arith.constant dense<0.000000e+00> : vector<16x8xf32>
    %504 = tpu.matmul %502, %503, %cst_185 {dimension_numbers = #tpu.dot_dimension_numbers<[1], [1], [0], [0], [0, 0, 1, 0], [], []>} : vector<16x8xf32>, vector<8x8xf32>, vector<16x8xf32> -> vector<16x8xf32>
    "tpu.trace_stop"() : () -> ()
    %cst_186 = arith.constant 0.353553385 : f32
    %505 = vector.broadcast %cst_186 : f32 to vector<16x8xf32>
    %506 = arith.mulf %504, %505 : vector<16x8xf32>
    %cst_187 = arith.constant dense<0xFF800000> : vector<16xf32>
    %507 = vector.multi_reduction <maximumf>, %506, %cst_187 [1] : vector<16x8xf32> to vector<16xf32>
    %508 = vector.shape_cast %507 : vector<16xf32> to vector<16x1xf32>
    %509 = vector.broadcast %508 : vector<16x1xf32> to vector<16x8xf32>
    %510 = arith.subf %506, %509 : vector<16x8xf32>
    %511 = math.exp %510 : vector<16x8xf32>
    %cst_188 = arith.constant dense<0.000000e+00> : vector<16xf32>
    %512 = vector.multi_reduction <add>, %511, %cst_188 [1] : vector<16x8xf32> to vector<16xf32>
    %513 = vector.shape_cast %512 : vector<16xf32> to vector<16x1xf32>
    %514 = tpu.reciprocal %513 {approx = true} : vector<16x1xf32> -> vector<16x1xf32>
    %515 = vector.broadcast %514 : vector<16x1xf32> to vector<16x8xf32>
    %516 = arith.mulf %511, %515 : vector<16x8xf32>
    %517 = arith.addf %496, %516 : vector<16x8xf32>
    %518 = vector.extract_strided_slice %456 {offsets = [0, 16], sizes = [8, 8], strides = [1, 1]} : vector<8x128xf32> to vector<8x8xf32>
    %cst_189 = arith.constant dense<0.000000e+00> : vector<16x8xf32>
    %519 = tpu.matmul %516, %518, %cst_189 {dimension_numbers = #tpu.dot_dimension_numbers<[1], [0], [0], [1], [0, 0, 1, 1], [], []>} : vector<16x8xf32>, vector<8x8xf32>, vector<16x8xf32> -> vector<16x8xf32>
    %520 = vector.extract_strided_slice %457 {offsets = [16, 0], sizes = [8, 128], strides = [1, 1]} : vector<128x128xf32> to vector<8x128xf32>
    %cst_190 = arith.constant dense<0.000000e+00> : vector<16x128xf32>
    %521 = tpu.matmul %519, %520, %cst_190 {dimension_numbers = #tpu.dot_dimension_numbers<[1], [0], [0], [1], [0, 0, 1, 1], [], []>} : vector<16x8xf32>, vector<8x128xf32>, vector<16x128xf32> -> vector<16x128xf32>
    %522 = arith.addf %501, %521 : vector<16x128xf32>
    %523 = vector.extract_strided_slice %446 {offsets = [0, 24], sizes = [16, 8], strides = [1, 1]} : vector<16x128xf32> to vector<16x8xf32>
    %524 = vector.extract_strided_slice %451 {offsets = [0, 24], sizes = [8, 8], strides = [1, 1]} : vector<8x128xf32> to vector<8x8xf32>
    "tpu.trace_start"() <{level = 10 : i32, message = "qd,kd->qk"}> : () -> ()
    %cst_191 = arith.constant dense<0.000000e+00> : vector<16x8xf32>
    %525 = tpu.matmul %523, %524, %cst_191 {dimension_numbers = #tpu.dot_dimension_numbers<[1], [1], [0], [0], [0, 0, 1, 0], [], []>} : vector<16x8xf32>, vector<8x8xf32>, vector<16x8xf32> -> vector<16x8xf32>
    "tpu.trace_stop"() : () -> ()
    %cst_192 = arith.constant 0.353553385 : f32
    %526 = vector.broadcast %cst_192 : f32 to vector<16x8xf32>
    %527 = arith.mulf %525, %526 : vector<16x8xf32>
    %cst_193 = arith.constant dense<0xFF800000> : vector<16xf32>
    %528 = vector.multi_reduction <maximumf>, %527, %cst_193 [1] : vector<16x8xf32> to vector<16xf32>
    %529 = vector.shape_cast %528 : vector<16xf32> to vector<16x1xf32>
    %530 = vector.broadcast %529 : vector<16x1xf32> to vector<16x8xf32>
    %531 = arith.subf %527, %530 : vector<16x8xf32>
    %532 = math.exp %531 : vector<16x8xf32>
    %cst_194 = arith.constant dense<0.000000e+00> : vector<16xf32>
    %533 = vector.multi_reduction <add>, %532, %cst_194 [1] : vector<16x8xf32> to vector<16xf32>
    %534 = vector.shape_cast %533 : vector<16xf32> to vector<16x1xf32>
    %535 = tpu.reciprocal %534 {approx = true} : vector<16x1xf32> -> vector<16x1xf32>
    %536 = vector.broadcast %535 : vector<16x1xf32> to vector<16x8xf32>
    %537 = arith.mulf %532, %536 : vector<16x8xf32>
    %538 = arith.addf %517, %537 : vector<16x8xf32>
    %539 = vector.extract_strided_slice %456 {offsets = [0, 24], sizes = [8, 8], strides = [1, 1]} : vector<8x128xf32> to vector<8x8xf32>
    %cst_195 = arith.constant dense<0.000000e+00> : vector<16x8xf32>
    %540 = tpu.matmul %537, %539, %cst_195 {dimension_numbers = #tpu.dot_dimension_numbers<[1], [0], [0], [1], [0, 0, 1, 1], [], []>} : vector<16x8xf32>, vector<8x8xf32>, vector<16x8xf32> -> vector<16x8xf32>
    %541 = vector.extract_strided_slice %457 {offsets = [24, 0], sizes = [8, 128], strides = [1, 1]} : vector<128x128xf32> to vector<8x128xf32>
    %cst_196 = arith.constant dense<0.000000e+00> : vector<16x128xf32>
    %542 = tpu.matmul %540, %541, %cst_196 {dimension_numbers = #tpu.dot_dimension_numbers<[1], [0], [0], [1], [0, 0, 1, 1], [], []>} : vector<16x8xf32>, vector<8x128xf32>, vector<16x128xf32> -> vector<16x128xf32>
    %543 = arith.addf %522, %542 : vector<16x128xf32>
    %c3912 = arith.constant 3912 : index
    %c0_197 = arith.constant 0 : index
    %544 = vector.load %arg3[%c3912, %c0_197] : memref<5632x128xf32, #tpu.memory_space<vmem>>, vector<1x128xf32>
    %545 = vector.broadcast %544 : vector<1x128xf32> to vector<16x128xf32>
    %546 = arith.addf %543, %545 : vector<16x128xf32>
    %cst_198 = arith.constant 2.500000e-01 : f32
    %547 = vector.broadcast %cst_198 : f32 to vector<16x8xf32>
    %548 = arith.mulf %538, %547 : vector<16x8xf32>
    %c3920 = arith.constant 3920 : index
    %c0_199 = arith.constant 0 : index
    %549 = vector.load %arg3[%c3920, %c0_199] : memref<5632x128xf32, #tpu.memory_space<vmem>>, vector<1x128xf32>
    %c3928 = arith.constant 3928 : index
    %c0_200 = arith.constant 0 : index
    %550 = vector.load %arg3[%c3928, %c0_200] : memref<5632x128xf32, #tpu.memory_space<vmem>>, vector<1x128xf32>
    %551 = tpu.iota {dimensions = array<i32: 1>} : vector<16x128xi32>
    %c32_i32_201 = arith.constant 32 : i32
    %552 = vector.broadcast %c32_i32_201 : i32 to vector<16x128xi32>
    %553 = arith.cmpi slt, %551, %552 : vector<16x128xi32>
    %cst_202 = arith.constant 0.000000e+00 : f32
    %554 = vector.broadcast %cst_202 : f32 to vector<16x128xf32>
    %555 = arith.select %553, %546, %554 : vector<16x128xi1>, vector<16x128xf32>
    %cst_203 = arith.constant dense<0.000000e+00> : vector<16xf32>
    %556 = vector.multi_reduction <add>, %555, %cst_203 [1] : vector<16x128xf32> to vector<16xf32>
    %557 = vector.shape_cast %556 : vector<16xf32> to vector<16x1xf32>
    %cst_204 = arith.constant 3.125000e-02 : f32
    %558 = vector.broadcast %cst_204 : f32 to vector<16x1xf32>
    %559 = arith.mulf %557, %558 : vector<16x1xf32>
    %560 = vector.broadcast %559 : vector<16x1xf32> to vector<16x128xf32>
    %561 = arith.subf %546, %560 : vector<16x128xf32>
    %cst_205 = arith.constant 0.000000e+00 : f32
    %562 = vector.broadcast %cst_205 : f32 to vector<16x128xf32>
    %563 = arith.select %553, %561, %562 : vector<16x128xi1>, vector<16x128xf32>
    %564 = arith.mulf %563, %563 : vector<16x128xf32>
    %cst_206 = arith.constant dense<0.000000e+00> : vector<16xf32>
    %565 = vector.multi_reduction <add>, %564, %cst_206 [1] : vector<16x128xf32> to vector<16xf32>
    %566 = vector.shape_cast %565 : vector<16xf32> to vector<16x1xf32>
    %cst_207 = arith.constant 3.125000e-02 : f32
    %567 = vector.broadcast %cst_207 : f32 to vector<16x1xf32>
    %568 = arith.mulf %566, %567 : vector<16x1xf32>
    %cst_208 = arith.constant 9.99999974E-6 : f32
    %569 = vector.broadcast %cst_208 : f32 to vector<16x1xf32>
    %570 = arith.addf %568, %569 : vector<16x1xf32>
    %571 = math.rsqrt %570 : vector<16x1xf32>
    %572 = vector.broadcast %571 : vector<16x1xf32> to vector<16x128xf32>
    %573 = arith.mulf %563, %572 : vector<16x128xf32>
    %574 = vector.broadcast %549 : vector<1x128xf32> to vector<16x128xf32>
    %575 = arith.mulf %573, %574 : vector<16x128xf32>
    %576 = vector.broadcast %550 : vector<1x128xf32> to vector<16x128xf32>
    %577 = arith.addf %575, %576 : vector<16x128xf32>
    %c3936 = arith.constant 3936 : index
    %c0_209 = arith.constant 0 : index
    %578 = vector.load %arg3[%c3936, %c0_209] : memref<5632x128xf32, #tpu.memory_space<vmem>>, vector<128x128xf32>
    %cst_210 = arith.constant dense<0.000000e+00> : vector<16x128xf32>
    %579 = tpu.matmul %577, %578, %cst_210 {dimension_numbers = #tpu.dot_dimension_numbers<[1], [0], [0], [1], [0, 0, 1, 1], [], []>} : vector<16x128xf32>, vector<128x128xf32>, vector<16x128xf32> -> vector<16x128xf32>
    %c4064 = arith.constant 4064 : index
    %c0_211 = arith.constant 0 : index
    %580 = vector.load %arg3[%c4064, %c0_211] : memref<5632x128xf32, #tpu.memory_space<vmem>>, vector<1x128xf32>
    %581 = vector.broadcast %580 : vector<1x128xf32> to vector<16x128xf32>
    %582 = arith.addf %579, %581 : vector<16x128xf32>
    %cst_212 = arith.constant 0.000000e+00 : f32
    %583 = vector.broadcast %cst_212 : f32 to vector<16x128xf32>
    %584 = arith.maximumf %582, %583 : vector<16x128xf32>
    %c4072 = arith.constant 4072 : index
    %c0_213 = arith.constant 0 : index
    %585 = vector.load %arg3[%c4072, %c0_213] : memref<5632x128xf32, #tpu.memory_space<vmem>>, vector<128x128xf32>
    %cst_214 = arith.constant dense<0.000000e+00> : vector<16x128xf32>
    %586 = tpu.matmul %584, %585, %cst_214 {dimension_numbers = #tpu.dot_dimension_numbers<[1], [0], [0], [1], [0, 0, 1, 1], [], []>} : vector<16x128xf32>, vector<128x128xf32>, vector<16x128xf32> -> vector<16x128xf32>
    %c4200 = arith.constant 4200 : index
    %c0_215 = arith.constant 0 : index
    %587 = vector.load %arg3[%c4200, %c0_215] : memref<5632x128xf32, #tpu.memory_space<vmem>>, vector<1x128xf32>
    %588 = vector.broadcast %587 : vector<1x128xf32> to vector<16x128xf32>
    %589 = arith.addf %586, %588 : vector<16x128xf32>
    %590 = arith.addf %589, %577 : vector<16x128xf32>
    %c4208 = arith.constant 4208 : index
    %c0_216 = arith.constant 0 : index
    %591 = vector.load %arg3[%c4208, %c0_216] : memref<5632x128xf32, #tpu.memory_space<vmem>>, vector<1x128xf32>
    %c4216 = arith.constant 4216 : index
    %c0_217 = arith.constant 0 : index
    %592 = vector.load %arg3[%c4216, %c0_217] : memref<5632x128xf32, #tpu.memory_space<vmem>>, vector<1x128xf32>
    %593 = tpu.iota {dimensions = array<i32: 1>} : vector<16x128xi32>
    %c32_i32_218 = arith.constant 32 : i32
    %594 = vector.broadcast %c32_i32_218 : i32 to vector<16x128xi32>
    %595 = arith.cmpi slt, %593, %594 : vector<16x128xi32>
    %cst_219 = arith.constant 0.000000e+00 : f32
    %596 = vector.broadcast %cst_219 : f32 to vector<16x128xf32>
    %597 = arith.select %595, %590, %596 : vector<16x128xi1>, vector<16x128xf32>
    %cst_220 = arith.constant dense<0.000000e+00> : vector<16xf32>
    %598 = vector.multi_reduction <add>, %597, %cst_220 [1] : vector<16x128xf32> to vector<16xf32>
    %599 = vector.shape_cast %598 : vector<16xf32> to vector<16x1xf32>
    %cst_221 = arith.constant 3.125000e-02 : f32
    %600 = vector.broadcast %cst_221 : f32 to vector<16x1xf32>
    %601 = arith.mulf %599, %600 : vector<16x1xf32>
    %602 = vector.broadcast %601 : vector<16x1xf32> to vector<16x128xf32>
    %603 = arith.subf %590, %602 : vector<16x128xf32>
    %cst_222 = arith.constant 0.000000e+00 : f32
    %604 = vector.broadcast %cst_222 : f32 to vector<16x128xf32>
    %605 = arith.select %595, %603, %604 : vector<16x128xi1>, vector<16x128xf32>
    %606 = arith.mulf %605, %605 : vector<16x128xf32>
    %cst_223 = arith.constant dense<0.000000e+00> : vector<16xf32>
    %607 = vector.multi_reduction <add>, %606, %cst_223 [1] : vector<16x128xf32> to vector<16xf32>
    %608 = vector.shape_cast %607 : vector<16xf32> to vector<16x1xf32>
    %cst_224 = arith.constant 3.125000e-02 : f32
    %609 = vector.broadcast %cst_224 : f32 to vector<16x1xf32>
    %610 = arith.mulf %608, %609 : vector<16x1xf32>
    %cst_225 = arith.constant 9.99999974E-6 : f32
    %611 = vector.broadcast %cst_225 : f32 to vector<16x1xf32>
    %612 = arith.addf %610, %611 : vector<16x1xf32>
    %613 = math.rsqrt %612 : vector<16x1xf32>
    %614 = vector.broadcast %613 : vector<16x1xf32> to vector<16x128xf32>
    %615 = arith.mulf %605, %614 : vector<16x128xf32>
    %616 = vector.broadcast %591 : vector<1x128xf32> to vector<16x128xf32>
    %617 = arith.mulf %615, %616 : vector<16x128xf32>
    %618 = vector.broadcast %592 : vector<1x128xf32> to vector<16x128xf32>
    %619 = arith.addf %617, %618 : vector<16x128xf32>
    %cst_226 = arith.constant 0.000000e+00 : f32
    %620 = vector.broadcast %cst_226 : f32 to vector<8x112xf32>
    %621 = tpu.concatenate %240, %620 in 1 : vector<8x16xf32>, vector<8x112xf32> -> vector<8x128xf32>
    %c0_227 = arith.constant 0 : index
    %c0_228 = arith.constant 0 : index
    %c0_229 = arith.constant 0 : index
    %c0_230 = arith.constant 0 : index
    %622 = vector.load %arg6[%c0_227, %c0_228, %c0_229, %c0_230] : memref<2x1x8x128xf32, #tpu.memory_space<vmem>>, vector<1x1x8x128xf32>
    %623 = vector.shape_cast %622 : vector<1x1x8x128xf32> to vector<8x128xf32>
    %624 = vector.shape_cast %621 : vector<8x128xf32> to vector<1x1x8x128xf32>
    tpu.vector_store %arg6[%c0_227, %c0_228, %c0_229, %c0_230], %624 {strides = array<i32>} : memref<2x1x8x128xf32, #tpu.memory_space<vmem>>, vector<1x1x8x128xf32>,
    %cst_231 = arith.constant 0.000000e+00 : f32
    %625 = vector.broadcast %cst_231 : f32 to vector<16x120xf32>
    %626 = tpu.concatenate %548, %625 in 1 : vector<16x8xf32>, vector<16x120xf32> -> vector<16x128xf32>
    %c0_232 = arith.constant 0 : index
    %c0_233 = arith.constant 0 : index
    %c0_234 = arith.constant 0 : index
    %c0_235 = arith.constant 0 : index
    %627 = vector.load %arg7[%c0_232, %c0_233, %c0_234, %c0_235] : memref<2x1x16x128xf32, #tpu.memory_space<vmem>>, vector<1x1x16x128xf32>
    %628 = vector.shape_cast %627 : vector<1x1x16x128xf32> to vector<16x128xf32>
    %629 = vector.shape_cast %626 : vector<16x128xf32> to vector<1x1x16x128xf32>
    tpu.vector_store %arg7[%c0_232, %c0_233, %c0_234, %c0_235], %629 {strides = array<i32>} : memref<2x1x16x128xf32, #tpu.memory_space<vmem>>, vector<1x1x16x128xf32>,
    %c1408 = arith.constant 1408 : index
    %c0_236 = arith.constant 0 : index
    %630 = vector.load %arg3[%c1408, %c0_236] : memref<5632x128xf32, #tpu.memory_space<vmem>>, vector<128x128xf32>
    %cst_237 = arith.constant dense<0.000000e+00> : vector<8x128xf32>
    %631 = tpu.matmul %311, %630, %cst_237 {dimension_numbers = #tpu.dot_dimension_numbers<[1], [0], [0], [1], [0, 0, 1, 1], [], []>} : vector<8x128xf32>, vector<128x128xf32>, vector<8x128xf32> -> vector<8x128xf32>
    %c1536 = arith.constant 1536 : index
    %c0_238 = arith.constant 0 : index
    %632 = vector.load %arg3[%c1536, %c0_238] : memref<5632x128xf32, #tpu.memory_space<vmem>>, vector<1x128xf32>
    %633 = vector.broadcast %632 : vector<1x128xf32> to vector<8x128xf32>
    %634 = arith.addf %631, %633 : vector<8x128xf32>
    %c1544 = arith.constant 1544 : index
    %c0_239 = arith.constant 0 : index
    %635 = vector.load %arg3[%c1544, %c0_239] : memref<5632x128xf32, #tpu.memory_space<vmem>>, vector<128x128xf32>
    %cst_240 = arith.constant dense<0.000000e+00> : vector<8x128xf32>
    %636 = tpu.matmul %311, %635, %cst_240 {dimension_numbers = #tpu.dot_dimension_numbers<[1], [0], [0], [1], [0, 0, 1, 1], [], []>} : vector<8x128xf32>, vector<128x128xf32>, vector<8x128xf32> -> vector<8x128xf32>
    %c1672 = arith.constant 1672 : index
    %c0_241 = arith.constant 0 : index
    %637 = vector.load %arg3[%c1672, %c0_241] : memref<5632x128xf32, #tpu.memory_space<vmem>>, vector<1x128xf32>
    %638 = vector.broadcast %637 : vector<1x128xf32> to vector<8x128xf32>
    %639 = arith.addf %636, %638 : vector<8x128xf32>
    %c1680 = arith.constant 1680 : index
    %c0_242 = arith.constant 0 : index
    %640 = vector.load %arg3[%c1680, %c0_242] : memref<5632x128xf32, #tpu.memory_space<vmem>>, vector<128x128xf32>
    %cst_243 = arith.constant dense<0.000000e+00> : vector<8x128xf32>
    %641 = tpu.matmul %311, %640, %cst_243 {dimension_numbers = #tpu.dot_dimension_numbers<[1], [0], [0], [1], [0, 0, 1, 1], [], []>} : vector<8x128xf32>, vector<128x128xf32>, vector<8x128xf32> -> vector<8x128xf32>
    %c1808 = arith.constant 1808 : index
    %c0_244 = arith.constant 0 : index
    %642 = vector.load %arg3[%c1808, %c0_244] : memref<5632x128xf32, #tpu.memory_space<vmem>>, vector<1x128xf32>
    %643 = vector.broadcast %642 : vector<1x128xf32> to vector<8x128xf32>
    %644 = arith.addf %641, %643 : vector<8x128xf32>
    %c1816 = arith.constant 1816 : index
    %c0_245 = arith.constant 0 : index
    %645 = vector.load %arg3[%c1816, %c0_245] : memref<5632x128xf32, #tpu.memory_space<vmem>>, vector<128x128xf32>
    %cst_246 = arith.constant 0.000000e+00 : f32
    %646 = vector.broadcast %cst_246 : f32 to vector<8x128xf32>
    %647 = vector.extract_strided_slice %634 {offsets = [0, 0], sizes = [8, 8], strides = [1, 1]} : vector<8x128xf32> to vector<8x8xf32>
    %648 = vector.extract_strided_slice %639 {offsets = [0, 0], sizes = [8, 8], strides = [1, 1]} : vector<8x128xf32> to vector<8x8xf32>
    "tpu.trace_start"() <{level = 10 : i32, message = "qd,kd->qk"}> : () -> ()
    %cst_247 = arith.constant dense<0.000000e+00> : vector<8x8xf32>
    %649 = tpu.matmul %647, %648, %cst_247 {dimension_numbers = #tpu.dot_dimension_numbers<[1], [1], [0], [0], [0, 0, 1, 0], [], []>} : vector<8x8xf32>, vector<8x8xf32>, vector<8x8xf32> -> vector<8x8xf32>
    "tpu.trace_stop"() : () -> ()
    %cst_248 = arith.constant 0.353553385 : f32
    %650 = vector.broadcast %cst_248 : f32 to vector<8x8xf32>
    %651 = arith.mulf %649, %650 : vector<8x8xf32>
    %cst_249 = arith.constant dense<0xFF800000> : vector<8xf32>
    %652 = vector.multi_reduction <maximumf>, %651, %cst_249 [1] : vector<8x8xf32> to vector<8xf32>
    %653 = vector.shape_cast %652 : vector<8xf32> to vector<8x1xf32>
    %654 = vector.broadcast %653 : vector<8x1xf32> to vector<8x8xf32>
    %655 = arith.subf %651, %654 : vector<8x8xf32>
    %656 = math.exp %655 : vector<8x8xf32>
    %cst_250 = arith.constant dense<0.000000e+00> : vector<8xf32>
    %657 = vector.multi_reduction <add>, %656, %cst_250 [1] : vector<8x8xf32> to vector<8xf32>
    %658 = vector.shape_cast %657 : vector<8xf32> to vector<8x1xf32>
    %659 = tpu.reciprocal %658 {approx = true} : vector<8x1xf32> -> vector<8x1xf32>
    %660 = vector.broadcast %659 : vector<8x1xf32> to vector<8x8xf32>
    %661 = arith.mulf %656, %660 : vector<8x8xf32>
    %662 = vector.extract_strided_slice %644 {offsets = [0, 0], sizes = [8, 8], strides = [1, 1]} : vector<8x128xf32> to vector<8x8xf32>
    %cst_251 = arith.constant dense<0.000000e+00> : vector<8x8xf32>
    %663 = tpu.matmul %661, %662, %cst_251 {dimension_numbers = #tpu.dot_dimension_numbers<[1], [0], [0], [1], [0, 0, 1, 1], [], []>} : vector<8x8xf32>, vector<8x8xf32>, vector<8x8xf32> -> vector<8x8xf32>
    %664 = vector.extract_strided_slice %645 {offsets = [0, 0], sizes = [8, 128], strides = [1, 1]} : vector<128x128xf32> to vector<8x128xf32>
    %cst_252 = arith.constant dense<0.000000e+00> : vector<8x128xf32>
    %665 = tpu.matmul %663, %664, %cst_252 {dimension_numbers = #tpu.dot_dimension_numbers<[1], [0], [0], [1], [0, 0, 1, 1], [], []>} : vector<8x8xf32>, vector<8x128xf32>, vector<8x128xf32> -> vector<8x128xf32>
    %666 = arith.addf %646, %665 : vector<8x128xf32>
    %667 = vector.extract_strided_slice %634 {offsets = [0, 8], sizes = [8, 8], strides = [1, 1]} : vector<8x128xf32> to vector<8x8xf32>
    %668 = vector.extract_strided_slice %639 {offsets = [0, 8], sizes = [8, 8], strides = [1, 1]} : vector<8x128xf32> to vector<8x8xf32>
    "tpu.trace_start"() <{level = 10 : i32, message = "qd,kd->qk"}> : () -> ()
    %cst_253 = arith.constant dense<0.000000e+00> : vector<8x8xf32>
    %669 = tpu.matmul %667, %668, %cst_253 {dimension_numbers = #tpu.dot_dimension_numbers<[1], [1], [0], [0], [0, 0, 1, 0], [], []>} : vector<8x8xf32>, vector<8x8xf32>, vector<8x8xf32> -> vector<8x8xf32>
    "tpu.trace_stop"() : () -> ()
    %cst_254 = arith.constant 0.353553385 : f32
    %670 = vector.broadcast %cst_254 : f32 to vector<8x8xf32>
    %671 = arith.mulf %669, %670 : vector<8x8xf32>
    %cst_255 = arith.constant dense<0xFF800000> : vector<8xf32>
    %672 = vector.multi_reduction <maximumf>, %671, %cst_255 [1] : vector<8x8xf32> to vector<8xf32>
    %673 = vector.shape_cast %672 : vector<8xf32> to vector<8x1xf32>
    %674 = vector.broadcast %673 : vector<8x1xf32> to vector<8x8xf32>
    %675 = arith.subf %671, %674 : vector<8x8xf32>
    %676 = math.exp %675 : vector<8x8xf32>
    %cst_256 = arith.constant dense<0.000000e+00> : vector<8xf32>
    %677 = vector.multi_reduction <add>, %676, %cst_256 [1] : vector<8x8xf32> to vector<8xf32>
    %678 = vector.shape_cast %677 : vector<8xf32> to vector<8x1xf32>
    %679 = tpu.reciprocal %678 {approx = true} : vector<8x1xf32> -> vector<8x1xf32>
    %680 = vector.broadcast %679 : vector<8x1xf32> to vector<8x8xf32>
    %681 = arith.mulf %676, %680 : vector<8x8xf32>
    %682 = vector.extract_strided_slice %644 {offsets = [0, 8], sizes = [8, 8], strides = [1, 1]} : vector<8x128xf32> to vector<8x8xf32>
    %cst_257 = arith.constant dense<0.000000e+00> : vector<8x8xf32>
    %683 = tpu.matmul %681, %682, %cst_257 {dimension_numbers = #tpu.dot_dimension_numbers<[1], [0], [0], [1], [0, 0, 1, 1], [], []>} : vector<8x8xf32>, vector<8x8xf32>, vector<8x8xf32> -> vector<8x8xf32>
    %684 = vector.extract_strided_slice %645 {offsets = [8, 0], sizes = [8, 128], strides = [1, 1]} : vector<128x128xf32> to vector<8x128xf32>
    %cst_258 = arith.constant dense<0.000000e+00> : vector<8x128xf32>
    %685 = tpu.matmul %683, %684, %cst_258 {dimension_numbers = #tpu.dot_dimension_numbers<[1], [0], [0], [1], [0, 0, 1, 1], [], []>} : vector<8x8xf32>, vector<8x128xf32>, vector<8x128xf32> -> vector<8x128xf32>
    %686 = arith.addf %666, %685 : vector<8x128xf32>
    %687 = vector.extract_strided_slice %634 {offsets = [0, 16], sizes = [8, 8], strides = [1, 1]} : vector<8x128xf32> to vector<8x8xf32>
    %688 = vector.extract_strided_slice %639 {offsets = [0, 16], sizes = [8, 8], strides = [1, 1]} : vector<8x128xf32> to vector<8x8xf32>
    "tpu.trace_start"() <{level = 10 : i32, message = "qd,kd->qk"}> : () -> ()
    %cst_259 = arith.constant dense<0.000000e+00> : vector<8x8xf32>
    %689 = tpu.matmul %687, %688, %cst_259 {dimension_numbers = #tpu.dot_dimension_numbers<[1], [1], [0], [0], [0, 0, 1, 0], [], []>} : vector<8x8xf32>, vector<8x8xf32>, vector<8x8xf32> -> vector<8x8xf32>
    "tpu.trace_stop"() : () -> ()
    %cst_260 = arith.constant 0.353553385 : f32
    %690 = vector.broadcast %cst_260 : f32 to vector<8x8xf32>
    %691 = arith.mulf %689, %690 : vector<8x8xf32>
    %cst_261 = arith.constant dense<0xFF800000> : vector<8xf32>
    %692 = vector.multi_reduction <maximumf>, %691, %cst_261 [1] : vector<8x8xf32> to vector<8xf32>
    %693 = vector.shape_cast %692 : vector<8xf32> to vector<8x1xf32>
    %694 = vector.broadcast %693 : vector<8x1xf32> to vector<8x8xf32>
    %695 = arith.subf %691, %694 : vector<8x8xf32>
    %696 = math.exp %695 : vector<8x8xf32>
    %cst_262 = arith.constant dense<0.000000e+00> : vector<8xf32>
    %697 = vector.multi_reduction <add>, %696, %cst_262 [1] : vector<8x8xf32> to vector<8xf32>
    %698 = vector.shape_cast %697 : vector<8xf32> to vector<8x1xf32>
    %699 = tpu.reciprocal %698 {approx = true} : vector<8x1xf32> -> vector<8x1xf32>
    %700 = vector.broadcast %699 : vector<8x1xf32> to vector<8x8xf32>
    %701 = arith.mulf %696, %700 : vector<8x8xf32>
    %702 = vector.extract_strided_slice %644 {offsets = [0, 16], sizes = [8, 8], strides = [1, 1]} : vector<8x128xf32> to vector<8x8xf32>
    %cst_263 = arith.constant dense<0.000000e+00> : vector<8x8xf32>
    %703 = tpu.matmul %701, %702, %cst_263 {dimension_numbers = #tpu.dot_dimension_numbers<[1], [0], [0], [1], [0, 0, 1, 1], [], []>} : vector<8x8xf32>, vector<8x8xf32>, vector<8x8xf32> -> vector<8x8xf32>
    %704 = vector.extract_strided_slice %645 {offsets = [16, 0], sizes = [8, 128], strides = [1, 1]} : vector<128x128xf32> to vector<8x128xf32>
    %cst_264 = arith.constant dense<0.000000e+00> : vector<8x128xf32>
    %705 = tpu.matmul %703, %704, %cst_264 {dimension_numbers = #tpu.dot_dimension_numbers<[1], [0], [0], [1], [0, 0, 1, 1], [], []>} : vector<8x8xf32>, vector<8x128xf32>, vector<8x128xf32> -> vector<8x128xf32>
    %706 = arith.addf %686, %705 : vector<8x128xf32>
    %707 = vector.extract_strided_slice %634 {offsets = [0, 24], sizes = [8, 8], strides = [1, 1]} : vector<8x128xf32> to vector<8x8xf32>
    %708 = vector.extract_strided_slice %639 {offsets = [0, 24], sizes = [8, 8], strides = [1, 1]} : vector<8x128xf32> to vector<8x8xf32>
    "tpu.trace_start"() <{level = 10 : i32, message = "qd,kd->qk"}> : () -> ()
    %cst_265 = arith.constant dense<0.000000e+00> : vector<8x8xf32>
    %709 = tpu.matmul %707, %708, %cst_265 {dimension_numbers = #tpu.dot_dimension_numbers<[1], [1], [0], [0], [0, 0, 1, 0], [], []>} : vector<8x8xf32>, vector<8x8xf32>, vector<8x8xf32> -> vector<8x8xf32>
    "tpu.trace_stop"() : () -> ()
    %cst_266 = arith.constant 0.353553385 : f32
    %710 = vector.broadcast %cst_266 : f32 to vector<8x8xf32>
    %711 = arith.mulf %709, %710 : vector<8x8xf32>
    %cst_267 = arith.constant dense<0xFF800000> : vector<8xf32>
    %712 = vector.multi_reduction <maximumf>, %711, %cst_267 [1] : vector<8x8xf32> to vector<8xf32>
    %713 = vector.shape_cast %712 : vector<8xf32> to vector<8x1xf32>
    %714 = vector.broadcast %713 : vector<8x1xf32> to vector<8x8xf32>
    %715 = arith.subf %711, %714 : vector<8x8xf32>
    %716 = math.exp %715 : vector<8x8xf32>
    %cst_268 = arith.constant dense<0.000000e+00> : vector<8xf32>
    %717 = vector.multi_reduction <add>, %716, %cst_268 [1] : vector<8x8xf32> to vector<8xf32>
    %718 = vector.shape_cast %717 : vector<8xf32> to vector<8x1xf32>
    %719 = tpu.reciprocal %718 {approx = true} : vector<8x1xf32> -> vector<8x1xf32>
    %720 = vector.broadcast %719 : vector<8x1xf32> to vector<8x8xf32>
    %721 = arith.mulf %716, %720 : vector<8x8xf32>
    %722 = vector.extract_strided_slice %644 {offsets = [0, 24], sizes = [8, 8], strides = [1, 1]} : vector<8x128xf32> to vector<8x8xf32>
    %cst_269 = arith.constant dense<0.000000e+00> : vector<8x8xf32>
    %723 = tpu.matmul %721, %722, %cst_269 {dimension_numbers = #tpu.dot_dimension_numbers<[1], [0], [0], [1], [0, 0, 1, 1], [], []>} : vector<8x8xf32>, vector<8x8xf32>, vector<8x8xf32> -> vector<8x8xf32>
    %724 = vector.extract_strided_slice %645 {offsets = [24, 0], sizes = [8, 128], strides = [1, 1]} : vector<128x128xf32> to vector<8x128xf32>
    %cst_270 = arith.constant dense<0.000000e+00> : vector<8x128xf32>
    %725 = tpu.matmul %723, %724, %cst_270 {dimension_numbers = #tpu.dot_dimension_numbers<[1], [0], [0], [1], [0, 0, 1, 1], [], []>} : vector<8x8xf32>, vector<8x128xf32>, vector<8x128xf32> -> vector<8x128xf32>
    %726 = arith.addf %706, %725 : vector<8x128xf32>
    %c1944 = arith.constant 1944 : index
    %c0_271 = arith.constant 0 : index
    %727 = vector.load %arg3[%c1944, %c0_271] : memref<5632x128xf32, #tpu.memory_space<vmem>>, vector<1x128xf32>
    %728 = vector.broadcast %727 : vector<1x128xf32> to vector<8x128xf32>
    %729 = arith.addf %726, %728 : vector<8x128xf32>
    %730 = arith.addf %729, %311 : vector<8x128xf32>
    %c1952 = arith.constant 1952 : index
    %c0_272 = arith.constant 0 : index
    %731 = vector.load %arg3[%c1952, %c0_272] : memref<5632x128xf32, #tpu.memory_space<vmem>>, vector<1x128xf32>
    %c1960 = arith.constant 1960 : index
    %c0_273 = arith.constant 0 : index
    %732 = vector.load %arg3[%c1960, %c0_273] : memref<5632x128xf32, #tpu.memory_space<vmem>>, vector<1x128xf32>
    %733 = tpu.iota {dimensions = array<i32: 1>} : vector<8x128xi32>
    %c32_i32_274 = arith.constant 32 : i32
    %734 = vector.broadcast %c32_i32_274 : i32 to vector<8x128xi32>
    %735 = arith.cmpi slt, %733, %734 : vector<8x128xi32>
    %cst_275 = arith.constant 0.000000e+00 : f32
    %736 = vector.broadcast %cst_275 : f32 to vector<8x128xf32>
    %737 = arith.select %735, %730, %736 : vector<8x128xi1>, vector<8x128xf32>
    %cst_276 = arith.constant dense<0.000000e+00> : vector<8xf32>
    %738 = vector.multi_reduction <add>, %737, %cst_276 [1] : vector<8x128xf32> to vector<8xf32>
    %739 = vector.shape_cast %738 : vector<8xf32> to vector<8x1xf32>
    %cst_277 = arith.constant 3.125000e-02 : f32
    %740 = vector.broadcast %cst_277 : f32 to vector<8x1xf32>
    %741 = arith.mulf %739, %740 : vector<8x1xf32>
    %742 = vector.broadcast %741 : vector<8x1xf32> to vector<8x128xf32>
    %743 = arith.subf %730, %742 : vector<8x128xf32>
    %cst_278 = arith.constant 0.000000e+00 : f32
    %744 = vector.broadcast %cst_278 : f32 to vector<8x128xf32>
    %745 = arith.select %735, %743, %744 : vector<8x128xi1>, vector<8x128xf32>
    %746 = arith.mulf %745, %745 : vector<8x128xf32>
    %cst_279 = arith.constant dense<0.000000e+00> : vector<8xf32>
    %747 = vector.multi_reduction <add>, %746, %cst_279 [1] : vector<8x128xf32> to vector<8xf32>
    %748 = vector.shape_cast %747 : vector<8xf32> to vector<8x1xf32>
    %cst_280 = arith.constant 3.125000e-02 : f32
    %749 = vector.broadcast %cst_280 : f32 to vector<8x1xf32>
    %750 = arith.mulf %748, %749 : vector<8x1xf32>
    %cst_281 = arith.constant 9.99999974E-6 : f32
    %751 = vector.broadcast %cst_281 : f32 to vector<8x1xf32>
    %752 = arith.addf %750, %751 : vector<8x1xf32>
    %753 = math.rsqrt %752 : vector<8x1xf32>
    %754 = vector.broadcast %753 : vector<8x1xf32> to vector<8x128xf32>
    %755 = arith.mulf %745, %754 : vector<8x128xf32>
    %756 = vector.broadcast %731 : vector<1x128xf32> to vector<8x128xf32>
    %757 = arith.mulf %755, %756 : vector<8x128xf32>
    %758 = vector.broadcast %732 : vector<1x128xf32> to vector<8x128xf32>
    %759 = arith.addf %757, %758 : vector<8x128xf32>
    %c1968 = arith.constant 1968 : index
    %c0_282 = arith.constant 0 : index
    %760 = vector.load %arg3[%c1968, %c0_282] : memref<5632x128xf32, #tpu.memory_space<vmem>>, vector<128x128xf32>
    %cst_283 = arith.constant dense<0.000000e+00> : vector<8x128xf32>
    %761 = tpu.matmul %759, %760, %cst_283 {dimension_numbers = #tpu.dot_dimension_numbers<[1], [0], [0], [1], [0, 0, 1, 1], [], []>} : vector<8x128xf32>, vector<128x128xf32>, vector<8x128xf32> -> vector<8x128xf32>
    %c2096 = arith.constant 2096 : index
    %c0_284 = arith.constant 0 : index
    %762 = vector.load %arg3[%c2096, %c0_284] : memref<5632x128xf32, #tpu.memory_space<vmem>>, vector<1x128xf32>
    %763 = vector.broadcast %762 : vector<1x128xf32> to vector<8x128xf32>
    %764 = arith.addf %761, %763 : vector<8x128xf32>
    %c2104 = arith.constant 2104 : index
    %c0_285 = arith.constant 0 : index
    %765 = vector.load %arg3[%c2104, %c0_285] : memref<5632x128xf32, #tpu.memory_space<vmem>>, vector<128x128xf32>
    %cst_286 = arith.constant dense<0.000000e+00> : vector<16x128xf32>
    %766 = tpu.matmul %619, %765, %cst_286 {dimension_numbers = #tpu.dot_dimension_numbers<[1], [0], [0], [1], [0, 0, 1, 1], [], []>} : vector<16x128xf32>, vector<128x128xf32>, vector<16x128xf32> -> vector<16x128xf32>
    %c2232 = arith.constant 2232 : index
    %c0_287 = arith.constant 0 : index
    %767 = vector.load %arg3[%c2232, %c0_287] : memref<5632x128xf32, #tpu.memory_space<vmem>>, vector<1x128xf32>
    %768 = vector.broadcast %767 : vector<1x128xf32> to vector<16x128xf32>
    %769 = arith.addf %766, %768 : vector<16x128xf32>
    %c2240 = arith.constant 2240 : index
    %c0_288 = arith.constant 0 : index
    %770 = vector.load %arg3[%c2240, %c0_288] : memref<5632x128xf32, #tpu.memory_space<vmem>>, vector<128x128xf32>
    %cst_289 = arith.constant dense<0.000000e+00> : vector<16x128xf32>
    %771 = tpu.matmul %619, %770, %cst_289 {dimension_numbers = #tpu.dot_dimension_numbers<[1], [0], [0], [1], [0, 0, 1, 1], [], []>} : vector<16x128xf32>, vector<128x128xf32>, vector<16x128xf32> -> vector<16x128xf32>
    %c2368 = arith.constant 2368 : index
    %c0_290 = arith.constant 0 : index
    %772 = vector.load %arg3[%c2368, %c0_290] : memref<5632x128xf32, #tpu.memory_space<vmem>>, vector<1x128xf32>
    %773 = vector.broadcast %772 : vector<1x128xf32> to vector<16x128xf32>
    %774 = arith.addf %771, %773 : vector<16x128xf32>
    %c2376 = arith.constant 2376 : index
    %c0_291 = arith.constant 0 : index
    %775 = vector.load %arg3[%c2376, %c0_291] : memref<5632x128xf32, #tpu.memory_space<vmem>>, vector<128x128xf32>
    %cst_292 = arith.constant 0.000000e+00 : f32
    %776 = vector.broadcast %cst_292 : f32 to vector<8x128xf32>
    %cst_293 = arith.constant 0.000000e+00 : f32
    %777 = vector.broadcast %cst_293 : f32 to vector<8x16xf32>
    %778 = vector.extract_strided_slice %764 {offsets = [0, 0], sizes = [8, 8], strides = [1, 1]} : vector<8x128xf32> to vector<8x8xf32>
    %779 = vector.extract_strided_slice %769 {offsets = [0, 0], sizes = [16, 8], strides = [1, 1]} : vector<16x128xf32> to vector<16x8xf32>
    "tpu.trace_start"() <{level = 10 : i32, message = "qd,kd->qk"}> : () -> ()
    %cst_294 = arith.constant dense<0.000000e+00> : vector<8x16xf32>
    %780 = tpu.matmul %778, %779, %cst_294 {dimension_numbers = #tpu.dot_dimension_numbers<[1], [1], [0], [0], [0, 0, 1, 0], [], []>} : vector<8x8xf32>, vector<16x8xf32>, vector<8x16xf32> -> vector<8x16xf32>
    "tpu.trace_stop"() : () -> ()
    %cst_295 = arith.constant 0.353553385 : f32
    %781 = vector.broadcast %cst_295 : f32 to vector<8x16xf32>
    %782 = arith.mulf %780, %781 : vector<8x16xf32>
    %cst_296 = arith.constant dense<0xFF800000> : vector<8xf32>
    %783 = vector.multi_reduction <maximumf>, %782, %cst_296 [1] : vector<8x16xf32> to vector<8xf32>
    %784 = vector.shape_cast %783 : vector<8xf32> to vector<8x1xf32>
    %785 = vector.broadcast %784 : vector<8x1xf32> to vector<8x16xf32>
    %786 = arith.subf %782, %785 : vector<8x16xf32>
    %787 = math.exp %786 : vector<8x16xf32>
    %cst_297 = arith.constant dense<0.000000e+00> : vector<8xf32>
    %788 = vector.multi_reduction <add>, %787, %cst_297 [1] : vector<8x16xf32> to vector<8xf32>
    %789 = vector.shape_cast %788 : vector<8xf32> to vector<8x1xf32>
    %790 = tpu.reciprocal %789 {approx = true} : vector<8x1xf32> -> vector<8x1xf32>
    %791 = vector.broadcast %790 : vector<8x1xf32> to vector<8x16xf32>
    %792 = arith.mulf %787, %791 : vector<8x16xf32>
    %793 = arith.addf %777, %792 : vector<8x16xf32>
    %794 = vector.extract_strided_slice %774 {offsets = [0, 0], sizes = [16, 8], strides = [1, 1]} : vector<16x128xf32> to vector<16x8xf32>
    %cst_298 = arith.constant dense<0.000000e+00> : vector<8x8xf32>
    %795 = tpu.matmul %792, %794, %cst_298 {dimension_numbers = #tpu.dot_dimension_numbers<[1], [0], [0], [1], [0, 0, 1, 1], [], []>} : vector<8x16xf32>, vector<16x8xf32>, vector<8x8xf32> -> vector<8x8xf32>
    %796 = vector.extract_strided_slice %775 {offsets = [0, 0], sizes = [8, 128], strides = [1, 1]} : vector<128x128xf32> to vector<8x128xf32>
    %cst_299 = arith.constant dense<0.000000e+00> : vector<8x128xf32>
    %797 = tpu.matmul %795, %796, %cst_299 {dimension_numbers = #tpu.dot_dimension_numbers<[1], [0], [0], [1], [0, 0, 1, 1], [], []>} : vector<8x8xf32>, vector<8x128xf32>, vector<8x128xf32> -> vector<8x128xf32>
    %798 = arith.addf %776, %797 : vector<8x128xf32>
    %799 = vector.extract_strided_slice %764 {offsets = [0, 8], sizes = [8, 8], strides = [1, 1]} : vector<8x128xf32> to vector<8x8xf32>
    %800 = vector.extract_strided_slice %769 {offsets = [0, 8], sizes = [16, 8], strides = [1, 1]} : vector<16x128xf32> to vector<16x8xf32>
    "tpu.trace_start"() <{level = 10 : i32, message = "qd,kd->qk"}> : () -> ()
    %cst_300 = arith.constant dense<0.000000e+00> : vector<8x16xf32>
    %801 = tpu.matmul %799, %800, %cst_300 {dimension_numbers = #tpu.dot_dimension_numbers<[1], [1], [0], [0], [0, 0, 1, 0], [], []>} : vector<8x8xf32>, vector<16x8xf32>, vector<8x16xf32> -> vector<8x16xf32>
    "tpu.trace_stop"() : () -> ()
    %cst_301 = arith.constant 0.353553385 : f32
    %802 = vector.broadcast %cst_301 : f32 to vector<8x16xf32>
    %803 = arith.mulf %801, %802 : vector<8x16xf32>
    %cst_302 = arith.constant dense<0xFF800000> : vector<8xf32>
    %804 = vector.multi_reduction <maximumf>, %803, %cst_302 [1] : vector<8x16xf32> to vector<8xf32>
    %805 = vector.shape_cast %804 : vector<8xf32> to vector<8x1xf32>
    %806 = vector.broadcast %805 : vector<8x1xf32> to vector<8x16xf32>
    %807 = arith.subf %803, %806 : vector<8x16xf32>
    %808 = math.exp %807 : vector<8x16xf32>
    %cst_303 = arith.constant dense<0.000000e+00> : vector<8xf32>
    %809 = vector.multi_reduction <add>, %808, %cst_303 [1] : vector<8x16xf32> to vector<8xf32>
    %810 = vector.shape_cast %809 : vector<8xf32> to vector<8x1xf32>
    %811 = tpu.reciprocal %810 {approx = true} : vector<8x1xf32> -> vector<8x1xf32>
    %812 = vector.broadcast %811 : vector<8x1xf32> to vector<8x16xf32>
    %813 = arith.mulf %808, %812 : vector<8x16xf32>
    %814 = arith.addf %793, %813 : vector<8x16xf32>
    %815 = vector.extract_strided_slice %774 {offsets = [0, 8], sizes = [16, 8], strides = [1, 1]} : vector<16x128xf32> to vector<16x8xf32>
    %cst_304 = arith.constant dense<0.000000e+00> : vector<8x8xf32>
    %816 = tpu.matmul %813, %815, %cst_304 {dimension_numbers = #tpu.dot_dimension_numbers<[1], [0], [0], [1], [0, 0, 1, 1], [], []>} : vector<8x16xf32>, vector<16x8xf32>, vector<8x8xf32> -> vector<8x8xf32>
    %817 = vector.extract_strided_slice %775 {offsets = [8, 0], sizes = [8, 128], strides = [1, 1]} : vector<128x128xf32> to vector<8x128xf32>
    %cst_305 = arith.constant dense<0.000000e+00> : vector<8x128xf32>
    %818 = tpu.matmul %816, %817, %cst_305 {dimension_numbers = #tpu.dot_dimension_numbers<[1], [0], [0], [1], [0, 0, 1, 1], [], []>} : vector<8x8xf32>, vector<8x128xf32>, vector<8x128xf32> -> vector<8x128xf32>
    %819 = arith.addf %798, %818 : vector<8x128xf32>
    %820 = vector.extract_strided_slice %764 {offsets = [0, 16], sizes = [8, 8], strides = [1, 1]} : vector<8x128xf32> to vector<8x8xf32>
    %821 = vector.extract_strided_slice %769 {offsets = [0, 16], sizes = [16, 8], strides = [1, 1]} : vector<16x128xf32> to vector<16x8xf32>
    "tpu.trace_start"() <{level = 10 : i32, message = "qd,kd->qk"}> : () -> ()
    %cst_306 = arith.constant dense<0.000000e+00> : vector<8x16xf32>
    %822 = tpu.matmul %820, %821, %cst_306 {dimension_numbers = #tpu.dot_dimension_numbers<[1], [1], [0], [0], [0, 0, 1, 0], [], []>} : vector<8x8xf32>, vector<16x8xf32>, vector<8x16xf32> -> vector<8x16xf32>
    "tpu.trace_stop"() : () -> ()
    %cst_307 = arith.constant 0.353553385 : f32
    %823 = vector.broadcast %cst_307 : f32 to vector<8x16xf32>
    %824 = arith.mulf %822, %823 : vector<8x16xf32>
    %cst_308 = arith.constant dense<0xFF800000> : vector<8xf32>
    %825 = vector.multi_reduction <maximumf>, %824, %cst_308 [1] : vector<8x16xf32> to vector<8xf32>
    %826 = vector.shape_cast %825 : vector<8xf32> to vector<8x1xf32>
    %827 = vector.broadcast %826 : vector<8x1xf32> to vector<8x16xf32>
    %828 = arith.subf %824, %827 : vector<8x16xf32>
    %829 = math.exp %828 : vector<8x16xf32>
    %cst_309 = arith.constant dense<0.000000e+00> : vector<8xf32>
    %830 = vector.multi_reduction <add>, %829, %cst_309 [1] : vector<8x16xf32> to vector<8xf32>
    %831 = vector.shape_cast %830 : vector<8xf32> to vector<8x1xf32>
    %832 = tpu.reciprocal %831 {approx = true} : vector<8x1xf32> -> vector<8x1xf32>
    %833 = vector.broadcast %832 : vector<8x1xf32> to vector<8x16xf32>
    %834 = arith.mulf %829, %833 : vector<8x16xf32>
    %835 = arith.addf %814, %834 : vector<8x16xf32>
    %836 = vector.extract_strided_slice %774 {offsets = [0, 16], sizes = [16, 8], strides = [1, 1]} : vector<16x128xf32> to vector<16x8xf32>
    %cst_310 = arith.constant dense<0.000000e+00> : vector<8x8xf32>
    %837 = tpu.matmul %834, %836, %cst_310 {dimension_numbers = #tpu.dot_dimension_numbers<[1], [0], [0], [1], [0, 0, 1, 1], [], []>} : vector<8x16xf32>, vector<16x8xf32>, vector<8x8xf32> -> vector<8x8xf32>
    %838 = vector.extract_strided_slice %775 {offsets = [16, 0], sizes = [8, 128], strides = [1, 1]} : vector<128x128xf32> to vector<8x128xf32>
    %cst_311 = arith.constant dense<0.000000e+00> : vector<8x128xf32>
    %839 = tpu.matmul %837, %838, %cst_311 {dimension_numbers = #tpu.dot_dimension_numbers<[1], [0], [0], [1], [0, 0, 1, 1], [], []>} : vector<8x8xf32>, vector<8x128xf32>, vector<8x128xf32> -> vector<8x128xf32>
    %840 = arith.addf %819, %839 : vector<8x128xf32>
    %841 = vector.extract_strided_slice %764 {offsets = [0, 24], sizes = [8, 8], strides = [1, 1]} : vector<8x128xf32> to vector<8x8xf32>
    %842 = vector.extract_strided_slice %769 {offsets = [0, 24], sizes = [16, 8], strides = [1, 1]} : vector<16x128xf32> to vector<16x8xf32>
    "tpu.trace_start"() <{level = 10 : i32, message = "qd,kd->qk"}> : () -> ()
    %cst_312 = arith.constant dense<0.000000e+00> : vector<8x16xf32>
    %843 = tpu.matmul %841, %842, %cst_312 {dimension_numbers = #tpu.dot_dimension_numbers<[1], [1], [0], [0], [0, 0, 1, 0], [], []>} : vector<8x8xf32>, vector<16x8xf32>, vector<8x16xf32> -> vector<8x16xf32>
    "tpu.trace_stop"() : () -> ()
    %cst_313 = arith.constant 0.353553385 : f32
    %844 = vector.broadcast %cst_313 : f32 to vector<8x16xf32>
    %845 = arith.mulf %843, %844 : vector<8x16xf32>
    %cst_314 = arith.constant dense<0xFF800000> : vector<8xf32>
    %846 = vector.multi_reduction <maximumf>, %845, %cst_314 [1] : vector<8x16xf32> to vector<8xf32>
    %847 = vector.shape_cast %846 : vector<8xf32> to vector<8x1xf32>
    %848 = vector.broadcast %847 : vector<8x1xf32> to vector<8x16xf32>
    %849 = arith.subf %845, %848 : vector<8x16xf32>
    %850 = math.exp %849 : vector<8x16xf32>
    %cst_315 = arith.constant dense<0.000000e+00> : vector<8xf32>
    %851 = vector.multi_reduction <add>, %850, %cst_315 [1] : vector<8x16xf32> to vector<8xf32>
    %852 = vector.shape_cast %851 : vector<8xf32> to vector<8x1xf32>
    %853 = tpu.reciprocal %852 {approx = true} : vector<8x1xf32> -> vector<8x1xf32>
    %854 = vector.broadcast %853 : vector<8x1xf32> to vector<8x16xf32>
    %855 = arith.mulf %850, %854 : vector<8x16xf32>
    %856 = arith.addf %835, %855 : vector<8x16xf32>
    %857 = vector.extract_strided_slice %774 {offsets = [0, 24], sizes = [16, 8], strides = [1, 1]} : vector<16x128xf32> to vector<16x8xf32>
    %cst_316 = arith.constant dense<0.000000e+00> : vector<8x8xf32>
    %858 = tpu.matmul %855, %857, %cst_316 {dimension_numbers = #tpu.dot_dimension_numbers<[1], [0], [0], [1], [0, 0, 1, 1], [], []>} : vector<8x16xf32>, vector<16x8xf32>, vector<8x8xf32> -> vector<8x8xf32>
    %859 = vector.extract_strided_slice %775 {offsets = [24, 0], sizes = [8, 128], strides = [1, 1]} : vector<128x128xf32> to vector<8x128xf32>
    %cst_317 = arith.constant dense<0.000000e+00> : vector<8x128xf32>
    %860 = tpu.matmul %858, %859, %cst_317 {dimension_numbers = #tpu.dot_dimension_numbers<[1], [0], [0], [1], [0, 0, 1, 1], [], []>} : vector<8x8xf32>, vector<8x128xf32>, vector<8x128xf32> -> vector<8x128xf32>
    %861 = arith.addf %840, %860 : vector<8x128xf32>
    %c2504 = arith.constant 2504 : index
    %c0_318 = arith.constant 0 : index
    %862 = vector.load %arg3[%c2504, %c0_318] : memref<5632x128xf32, #tpu.memory_space<vmem>>, vector<1x128xf32>
    %863 = vector.broadcast %862 : vector<1x128xf32> to vector<8x128xf32>
    %864 = arith.addf %861, %863 : vector<8x128xf32>
    %cst_319 = arith.constant 2.500000e-01 : f32
    %865 = vector.broadcast %cst_319 : f32 to vector<8x16xf32>
    %866 = arith.mulf %856, %865 : vector<8x16xf32>
    %c2512 = arith.constant 2512 : index
    %c0_320 = arith.constant 0 : index
    %867 = vector.load %arg3[%c2512, %c0_320] : memref<5632x128xf32, #tpu.memory_space<vmem>>, vector<1x128xf32>
    %c2520 = arith.constant 2520 : index
    %c0_321 = arith.constant 0 : index
    %868 = vector.load %arg3[%c2520, %c0_321] : memref<5632x128xf32, #tpu.memory_space<vmem>>, vector<1x128xf32>
    %869 = tpu.iota {dimensions = array<i32: 1>} : vector<8x128xi32>
    %c32_i32_322 = arith.constant 32 : i32
    %870 = vector.broadcast %c32_i32_322 : i32 to vector<8x128xi32>
    %871 = arith.cmpi slt, %869, %870 : vector<8x128xi32>
    %cst_323 = arith.constant 0.000000e+00 : f32
    %872 = vector.broadcast %cst_323 : f32 to vector<8x128xf32>
    %873 = arith.select %871, %864, %872 : vector<8x128xi1>, vector<8x128xf32>
    %cst_324 = arith.constant dense<0.000000e+00> : vector<8xf32>
    %874 = vector.multi_reduction <add>, %873, %cst_324 [1] : vector<8x128xf32> to vector<8xf32>
    %875 = vector.shape_cast %874 : vector<8xf32> to vector<8x1xf32>
    %cst_325 = arith.constant 3.125000e-02 : f32
    %876 = vector.broadcast %cst_325 : f32 to vector<8x1xf32>
    %877 = arith.mulf %875, %876 : vector<8x1xf32>
    %878 = vector.broadcast %877 : vector<8x1xf32> to vector<8x128xf32>
    %879 = arith.subf %864, %878 : vector<8x128xf32>
    %cst_326 = arith.constant 0.000000e+00 : f32
    %880 = vector.broadcast %cst_326 : f32 to vector<8x128xf32>
    %881 = arith.select %871, %879, %880 : vector<8x128xi1>, vector<8x128xf32>
    %882 = arith.mulf %881, %881 : vector<8x128xf32>
    %cst_327 = arith.constant dense<0.000000e+00> : vector<8xf32>
    %883 = vector.multi_reduction <add>, %882, %cst_327 [1] : vector<8x128xf32> to vector<8xf32>
    %884 = vector.shape_cast %883 : vector<8xf32> to vector<8x1xf32>
    %cst_328 = arith.constant 3.125000e-02 : f32
    %885 = vector.broadcast %cst_328 : f32 to vector<8x1xf32>
    %886 = arith.mulf %884, %885 : vector<8x1xf32>
    %cst_329 = arith.constant 9.99999974E-6 : f32
    %887 = vector.broadcast %cst_329 : f32 to vector<8x1xf32>
    %888 = arith.addf %886, %887 : vector<8x1xf32>
    %889 = math.rsqrt %888 : vector<8x1xf32>
    %890 = vector.broadcast %889 : vector<8x1xf32> to vector<8x128xf32>
    %891 = arith.mulf %881, %890 : vector<8x128xf32>
    %892 = vector.broadcast %867 : vector<1x128xf32> to vector<8x128xf32>
    %893 = arith.mulf %891, %892 : vector<8x128xf32>
    %894 = vector.broadcast %868 : vector<1x128xf32> to vector<8x128xf32>
    %895 = arith.addf %893, %894 : vector<8x128xf32>
    %c2528 = arith.constant 2528 : index
    %c0_330 = arith.constant 0 : index
    %896 = vector.load %arg3[%c2528, %c0_330] : memref<5632x128xf32, #tpu.memory_space<vmem>>, vector<128x128xf32>
    %cst_331 = arith.constant dense<0.000000e+00> : vector<8x128xf32>
    %897 = tpu.matmul %895, %896, %cst_331 {dimension_numbers = #tpu.dot_dimension_numbers<[1], [0], [0], [1], [0, 0, 1, 1], [], []>} : vector<8x128xf32>, vector<128x128xf32>, vector<8x128xf32> -> vector<8x128xf32>
    %c2656 = arith.constant 2656 : index
    %c0_332 = arith.constant 0 : index
    %898 = vector.load %arg3[%c2656, %c0_332] : memref<5632x128xf32, #tpu.memory_space<vmem>>, vector<1x128xf32>
    %899 = vector.broadcast %898 : vector<1x128xf32> to vector<8x128xf32>
    %900 = arith.addf %897, %899 : vector<8x128xf32>
    %cst_333 = arith.constant 0.000000e+00 : f32
    %901 = vector.broadcast %cst_333 : f32 to vector<8x128xf32>
    %902 = arith.maximumf %900, %901 : vector<8x128xf32>
    %c2664 = arith.constant 2664 : index
    %c0_334 = arith.constant 0 : index
    %903 = vector.load %arg3[%c2664, %c0_334] : memref<5632x128xf32, #tpu.memory_space<vmem>>, vector<128x128xf32>
    %cst_335 = arith.constant dense<0.000000e+00> : vector<8x128xf32>
    %904 = tpu.matmul %902, %903, %cst_335 {dimension_numbers = #tpu.dot_dimension_numbers<[1], [0], [0], [1], [0, 0, 1, 1], [], []>} : vector<8x128xf32>, vector<128x128xf32>, vector<8x128xf32> -> vector<8x128xf32>
    %c2792 = arith.constant 2792 : index
    %c0_336 = arith.constant 0 : index
    %905 = vector.load %arg3[%c2792, %c0_336] : memref<5632x128xf32, #tpu.memory_space<vmem>>, vector<1x128xf32>
    %906 = vector.broadcast %905 : vector<1x128xf32> to vector<8x128xf32>
    %907 = arith.addf %904, %906 : vector<8x128xf32>
    %908 = arith.addf %907, %895 : vector<8x128xf32>
    %c2800 = arith.constant 2800 : index
    %c0_337 = arith.constant 0 : index
    %909 = vector.load %arg3[%c2800, %c0_337] : memref<5632x128xf32, #tpu.memory_space<vmem>>, vector<1x128xf32>
    %c2808 = arith.constant 2808 : index
    %c0_338 = arith.constant 0 : index
    %910 = vector.load %arg3[%c2808, %c0_338] : memref<5632x128xf32, #tpu.memory_space<vmem>>, vector<1x128xf32>
    %911 = tpu.iota {dimensions = array<i32: 1>} : vector<8x128xi32>
    %c32_i32_339 = arith.constant 32 : i32
    %912 = vector.broadcast %c32_i32_339 : i32 to vector<8x128xi32>
    %913 = arith.cmpi slt, %911, %912 : vector<8x128xi32>
    %cst_340 = arith.constant 0.000000e+00 : f32
    %914 = vector.broadcast %cst_340 : f32 to vector<8x128xf32>
    %915 = arith.select %913, %908, %914 : vector<8x128xi1>, vector<8x128xf32>
    %cst_341 = arith.constant dense<0.000000e+00> : vector<8xf32>
    %916 = vector.multi_reduction <add>, %915, %cst_341 [1] : vector<8x128xf32> to vector<8xf32>
    %917 = vector.shape_cast %916 : vector<8xf32> to vector<8x1xf32>
    %cst_342 = arith.constant 3.125000e-02 : f32
    %918 = vector.broadcast %cst_342 : f32 to vector<8x1xf32>
    %919 = arith.mulf %917, %918 : vector<8x1xf32>
    %920 = vector.broadcast %919 : vector<8x1xf32> to vector<8x128xf32>
    %921 = arith.subf %908, %920 : vector<8x128xf32>
    %cst_343 = arith.constant 0.000000e+00 : f32
    %922 = vector.broadcast %cst_343 : f32 to vector<8x128xf32>
    %923 = arith.select %913, %921, %922 : vector<8x128xi1>, vector<8x128xf32>
    %924 = arith.mulf %923, %923 : vector<8x128xf32>
    %cst_344 = arith.constant dense<0.000000e+00> : vector<8xf32>
    %925 = vector.multi_reduction <add>, %924, %cst_344 [1] : vector<8x128xf32> to vector<8xf32>
    %926 = vector.shape_cast %925 : vector<8xf32> to vector<8x1xf32>
    %cst_345 = arith.constant 3.125000e-02 : f32
    %927 = vector.broadcast %cst_345 : f32 to vector<8x1xf32>
    %928 = arith.mulf %926, %927 : vector<8x1xf32>
    %cst_346 = arith.constant 9.99999974E-6 : f32
    %929 = vector.broadcast %cst_346 : f32 to vector<8x1xf32>
    %930 = arith.addf %928, %929 : vector<8x1xf32>
    %931 = math.rsqrt %930 : vector<8x1xf32>
    %932 = vector.broadcast %931 : vector<8x1xf32> to vector<8x128xf32>
    %933 = arith.mulf %923, %932 : vector<8x128xf32>
    %934 = vector.broadcast %909 : vector<1x128xf32> to vector<8x128xf32>
    %935 = arith.mulf %933, %934 : vector<8x128xf32>
    %936 = vector.broadcast %910 : vector<1x128xf32> to vector<8x128xf32>
    %937 = arith.addf %935, %936 : vector<8x128xf32>
    %c4224 = arith.constant 4224 : index
    %c0_347 = arith.constant 0 : index
    %938 = vector.load %arg3[%c4224, %c0_347] : memref<5632x128xf32, #tpu.memory_space<vmem>>, vector<128x128xf32>
    %cst_348 = arith.constant dense<0.000000e+00> : vector<16x128xf32>
    %939 = tpu.matmul %619, %938, %cst_348 {dimension_numbers = #tpu.dot_dimension_numbers<[1], [0], [0], [1], [0, 0, 1, 1], [], []>} : vector<16x128xf32>, vector<128x128xf32>, vector<16x128xf32> -> vector<16x128xf32>
    %c4352 = arith.constant 4352 : index
    %c0_349 = arith.constant 0 : index
    %940 = vector.load %arg3[%c4352, %c0_349] : memref<5632x128xf32, #tpu.memory_space<vmem>>, vector<1x128xf32>
    %941 = vector.broadcast %940 : vector<1x128xf32> to vector<16x128xf32>
    %942 = arith.addf %939, %941 : vector<16x128xf32>
    %c4360 = arith.constant 4360 : index
    %c0_350 = arith.constant 0 : index
    %943 = vector.load %arg3[%c4360, %c0_350] : memref<5632x128xf32, #tpu.memory_space<vmem>>, vector<128x128xf32>
    %cst_351 = arith.constant dense<0.000000e+00> : vector<16x128xf32>
    %944 = tpu.matmul %619, %943, %cst_351 {dimension_numbers = #tpu.dot_dimension_numbers<[1], [0], [0], [1], [0, 0, 1, 1], [], []>} : vector<16x128xf32>, vector<128x128xf32>, vector<16x128xf32> -> vector<16x128xf32>
    %c4488 = arith.constant 4488 : index
    %c0_352 = arith.constant 0 : index
    %945 = vector.load %arg3[%c4488, %c0_352] : memref<5632x128xf32, #tpu.memory_space<vmem>>, vector<1x128xf32>
    %946 = vector.broadcast %945 : vector<1x128xf32> to vector<16x128xf32>
    %947 = arith.addf %944, %946 : vector<16x128xf32>
    %c4496 = arith.constant 4496 : index
    %c0_353 = arith.constant 0 : index
    %948 = vector.load %arg3[%c4496, %c0_353] : memref<5632x128xf32, #tpu.memory_space<vmem>>, vector<128x128xf32>
    %cst_354 = arith.constant dense<0.000000e+00> : vector<16x128xf32>
    %949 = tpu.matmul %619, %948, %cst_354 {dimension_numbers = #tpu.dot_dimension_numbers<[1], [0], [0], [1], [0, 0, 1, 1], [], []>} : vector<16x128xf32>, vector<128x128xf32>, vector<16x128xf32> -> vector<16x128xf32>
    %c4624 = arith.constant 4624 : index
    %c0_355 = arith.constant 0 : index
    %950 = vector.load %arg3[%c4624, %c0_355] : memref<5632x128xf32, #tpu.memory_space<vmem>>, vector<1x128xf32>
    %951 = vector.broadcast %950 : vector<1x128xf32> to vector<16x128xf32>
    %952 = arith.addf %949, %951 : vector<16x128xf32>
    %c4632 = arith.constant 4632 : index
    %c0_356 = arith.constant 0 : index
    %953 = vector.load %arg3[%c4632, %c0_356] : memref<5632x128xf32, #tpu.memory_space<vmem>>, vector<128x128xf32>
    %cst_357 = arith.constant 0.000000e+00 : f32
    %954 = vector.broadcast %cst_357 : f32 to vector<16x128xf32>
    %955 = vector.extract_strided_slice %942 {offsets = [0, 0], sizes = [16, 8], strides = [1, 1]} : vector<16x128xf32> to vector<16x8xf32>
    %956 = vector.extract_strided_slice %947 {offsets = [0, 0], sizes = [16, 8], strides = [1, 1]} : vector<16x128xf32> to vector<16x8xf32>
    "tpu.trace_start"() <{level = 10 : i32, message = "qd,kd->qk"}> : () -> ()
    %cst_358 = arith.constant dense<0.000000e+00> : vector<16x16xf32>
    %957 = tpu.matmul %955, %956, %cst_358 {dimension_numbers = #tpu.dot_dimension_numbers<[1], [1], [0], [0], [0, 0, 1, 0], [], []>} : vector<16x8xf32>, vector<16x8xf32>, vector<16x16xf32> -> vector<16x16xf32>
    "tpu.trace_stop"() : () -> ()
    %cst_359 = arith.constant 0.353553385 : f32
    %958 = vector.broadcast %cst_359 : f32 to vector<16x16xf32>
    %959 = arith.mulf %957, %958 : vector<16x16xf32>
    %cst_360 = arith.constant dense<0xFF800000> : vector<16xf32>
    %960 = vector.multi_reduction <maximumf>, %959, %cst_360 [1] : vector<16x16xf32> to vector<16xf32>
    %961 = vector.shape_cast %960 : vector<16xf32> to vector<16x1xf32>
    %962 = vector.broadcast %961 : vector<16x1xf32> to vector<16x16xf32>
    %963 = arith.subf %959, %962 : vector<16x16xf32>
    %964 = math.exp %963 : vector<16x16xf32>
    %cst_361 = arith.constant dense<0.000000e+00> : vector<16xf32>
    %965 = vector.multi_reduction <add>, %964, %cst_361 [1] : vector<16x16xf32> to vector<16xf32>
    %966 = vector.shape_cast %965 : vector<16xf32> to vector<16x1xf32>
    %967 = tpu.reciprocal %966 {approx = true} : vector<16x1xf32> -> vector<16x1xf32>
    %968 = vector.broadcast %967 : vector<16x1xf32> to vector<16x16xf32>
    %969 = arith.mulf %964, %968 : vector<16x16xf32>
    %970 = vector.extract_strided_slice %952 {offsets = [0, 0], sizes = [16, 8], strides = [1, 1]} : vector<16x128xf32> to vector<16x8xf32>
    %cst_362 = arith.constant dense<0.000000e+00> : vector<16x8xf32>
    %971 = tpu.matmul %969, %970, %cst_362 {dimension_numbers = #tpu.dot_dimension_numbers<[1], [0], [0], [1], [0, 0, 1, 1], [], []>} : vector<16x16xf32>, vector<16x8xf32>, vector<16x8xf32> -> vector<16x8xf32>
    %972 = vector.extract_strided_slice %953 {offsets = [0, 0], sizes = [8, 128], strides = [1, 1]} : vector<128x128xf32> to vector<8x128xf32>
    %cst_363 = arith.constant dense<0.000000e+00> : vector<16x128xf32>
    %973 = tpu.matmul %971, %972, %cst_363 {dimension_numbers = #tpu.dot_dimension_numbers<[1], [0], [0], [1], [0, 0, 1, 1], [], []>} : vector<16x8xf32>, vector<8x128xf32>, vector<16x128xf32> -> vector<16x128xf32>
    %974 = arith.addf %954, %973 : vector<16x128xf32>
    %975 = vector.extract_strided_slice %942 {offsets = [0, 8], sizes = [16, 8], strides = [1, 1]} : vector<16x128xf32> to vector<16x8xf32>
    %976 = vector.extract_strided_slice %947 {offsets = [0, 8], sizes = [16, 8], strides = [1, 1]} : vector<16x128xf32> to vector<16x8xf32>
    "tpu.trace_start"() <{level = 10 : i32, message = "qd,kd->qk"}> : () -> ()
    %cst_364 = arith.constant dense<0.000000e+00> : vector<16x16xf32>
    %977 = tpu.matmul %975, %976, %cst_364 {dimension_numbers = #tpu.dot_dimension_numbers<[1], [1], [0], [0], [0, 0, 1, 0], [], []>} : vector<16x8xf32>, vector<16x8xf32>, vector<16x16xf32> -> vector<16x16xf32>
    "tpu.trace_stop"() : () -> ()
    %cst_365 = arith.constant 0.353553385 : f32
    %978 = vector.broadcast %cst_365 : f32 to vector<16x16xf32>
    %979 = arith.mulf %977, %978 : vector<16x16xf32>
    %cst_366 = arith.constant dense<0xFF800000> : vector<16xf32>
    %980 = vector.multi_reduction <maximumf>, %979, %cst_366 [1] : vector<16x16xf32> to vector<16xf32>
    %981 = vector.shape_cast %980 : vector<16xf32> to vector<16x1xf32>
    %982 = vector.broadcast %981 : vector<16x1xf32> to vector<16x16xf32>
    %983 = arith.subf %979, %982 : vector<16x16xf32>
    %984 = math.exp %983 : vector<16x16xf32>
    %cst_367 = arith.constant dense<0.000000e+00> : vector<16xf32>
    %985 = vector.multi_reduction <add>, %984, %cst_367 [1] : vector<16x16xf32> to vector<16xf32>
    %986 = vector.shape_cast %985 : vector<16xf32> to vector<16x1xf32>
    %987 = tpu.reciprocal %986 {approx = true} : vector<16x1xf32> -> vector<16x1xf32>
    %988 = vector.broadcast %987 : vector<16x1xf32> to vector<16x16xf32>
    %989 = arith.mulf %984, %988 : vector<16x16xf32>
    %990 = vector.extract_strided_slice %952 {offsets = [0, 8], sizes = [16, 8], strides = [1, 1]} : vector<16x128xf32> to vector<16x8xf32>
    %cst_368 = arith.constant dense<0.000000e+00> : vector<16x8xf32>
    %991 = tpu.matmul %989, %990, %cst_368 {dimension_numbers = #tpu.dot_dimension_numbers<[1], [0], [0], [1], [0, 0, 1, 1], [], []>} : vector<16x16xf32>, vector<16x8xf32>, vector<16x8xf32> -> vector<16x8xf32>
    %992 = vector.extract_strided_slice %953 {offsets = [8, 0], sizes = [8, 128], strides = [1, 1]} : vector<128x128xf32> to vector<8x128xf32>
    %cst_369 = arith.constant dense<0.000000e+00> : vector<16x128xf32>
    %993 = tpu.matmul %991, %992, %cst_369 {dimension_numbers = #tpu.dot_dimension_numbers<[1], [0], [0], [1], [0, 0, 1, 1], [], []>} : vector<16x8xf32>, vector<8x128xf32>, vector<16x128xf32> -> vector<16x128xf32>
    %994 = arith.addf %974, %993 : vector<16x128xf32>
    %995 = vector.extract_strided_slice %942 {offsets = [0, 16], sizes = [16, 8], strides = [1, 1]} : vector<16x128xf32> to vector<16x8xf32>
    %996 = vector.extract_strided_slice %947 {offsets = [0, 16], sizes = [16, 8], strides = [1, 1]} : vector<16x128xf32> to vector<16x8xf32>
    "tpu.trace_start"() <{level = 10 : i32, message = "qd,kd->qk"}> : () -> ()
    %cst_370 = arith.constant dense<0.000000e+00> : vector<16x16xf32>
    %997 = tpu.matmul %995, %996, %cst_370 {dimension_numbers = #tpu.dot_dimension_numbers<[1], [1], [0], [0], [0, 0, 1, 0], [], []>} : vector<16x8xf32>, vector<16x8xf32>, vector<16x16xf32> -> vector<16x16xf32>
    "tpu.trace_stop"() : () -> ()
    %cst_371 = arith.constant 0.353553385 : f32
    %998 = vector.broadcast %cst_371 : f32 to vector<16x16xf32>
    %999 = arith.mulf %997, %998 : vector<16x16xf32>
    %cst_372 = arith.constant dense<0xFF800000> : vector<16xf32>
    %1000 = vector.multi_reduction <maximumf>, %999, %cst_372 [1] : vector<16x16xf32> to vector<16xf32>
    %1001 = vector.shape_cast %1000 : vector<16xf32> to vector<16x1xf32>
    %1002 = vector.broadcast %1001 : vector<16x1xf32> to vector<16x16xf32>
    %1003 = arith.subf %999, %1002 : vector<16x16xf32>
    %1004 = math.exp %1003 : vector<16x16xf32>
    %cst_373 = arith.constant dense<0.000000e+00> : vector<16xf32>
    %1005 = vector.multi_reduction <add>, %1004, %cst_373 [1] : vector<16x16xf32> to vector<16xf32>
    %1006 = vector.shape_cast %1005 : vector<16xf32> to vector<16x1xf32>
    %1007 = tpu.reciprocal %1006 {approx = true} : vector<16x1xf32> -> vector<16x1xf32>
    %1008 = vector.broadcast %1007 : vector<16x1xf32> to vector<16x16xf32>
    %1009 = arith.mulf %1004, %1008 : vector<16x16xf32>
    %1010 = vector.extract_strided_slice %952 {offsets = [0, 16], sizes = [16, 8], strides = [1, 1]} : vector<16x128xf32> to vector<16x8xf32>
    %cst_374 = arith.constant dense<0.000000e+00> : vector<16x8xf32>
    %1011 = tpu.matmul %1009, %1010, %cst_374 {dimension_numbers = #tpu.dot_dimension_numbers<[1], [0], [0], [1], [0, 0, 1, 1], [], []>} : vector<16x16xf32>, vector<16x8xf32>, vector<16x8xf32> -> vector<16x8xf32>
    %1012 = vector.extract_strided_slice %953 {offsets = [16, 0], sizes = [8, 128], strides = [1, 1]} : vector<128x128xf32> to vector<8x128xf32>
    %cst_375 = arith.constant dense<0.000000e+00> : vector<16x128xf32>
    %1013 = tpu.matmul %1011, %1012, %cst_375 {dimension_numbers = #tpu.dot_dimension_numbers<[1], [0], [0], [1], [0, 0, 1, 1], [], []>} : vector<16x8xf32>, vector<8x128xf32>, vector<16x128xf32> -> vector<16x128xf32>
    %1014 = arith.addf %994, %1013 : vector<16x128xf32>
    %1015 = vector.extract_strided_slice %942 {offsets = [0, 24], sizes = [16, 8], strides = [1, 1]} : vector<16x128xf32> to vector<16x8xf32>
    %1016 = vector.extract_strided_slice %947 {offsets = [0, 24], sizes = [16, 8], strides = [1, 1]} : vector<16x128xf32> to vector<16x8xf32>
    "tpu.trace_start"() <{level = 10 : i32, message = "qd,kd->qk"}> : () -> ()
    %cst_376 = arith.constant dense<0.000000e+00> : vector<16x16xf32>
    %1017 = tpu.matmul %1015, %1016, %cst_376 {dimension_numbers = #tpu.dot_dimension_numbers<[1], [1], [0], [0], [0, 0, 1, 0], [], []>} : vector<16x8xf32>, vector<16x8xf32>, vector<16x16xf32> -> vector<16x16xf32>
    "tpu.trace_stop"() : () -> ()
    %cst_377 = arith.constant 0.353553385 : f32
    %1018 = vector.broadcast %cst_377 : f32 to vector<16x16xf32>
    %1019 = arith.mulf %1017, %1018 : vector<16x16xf32>
    %cst_378 = arith.constant dense<0xFF800000> : vector<16xf32>
    %1020 = vector.multi_reduction <maximumf>, %1019, %cst_378 [1] : vector<16x16xf32> to vector<16xf32>
    %1021 = vector.shape_cast %1020 : vector<16xf32> to vector<16x1xf32>
    %1022 = vector.broadcast %1021 : vector<16x1xf32> to vector<16x16xf32>
    %1023 = arith.subf %1019, %1022 : vector<16x16xf32>
    %1024 = math.exp %1023 : vector<16x16xf32>
    %cst_379 = arith.constant dense<0.000000e+00> : vector<16xf32>
    %1025 = vector.multi_reduction <add>, %1024, %cst_379 [1] : vector<16x16xf32> to vector<16xf32>
    %1026 = vector.shape_cast %1025 : vector<16xf32> to vector<16x1xf32>
    %1027 = tpu.reciprocal %1026 {approx = true} : vector<16x1xf32> -> vector<16x1xf32>
    %1028 = vector.broadcast %1027 : vector<16x1xf32> to vector<16x16xf32>
    %1029 = arith.mulf %1024, %1028 : vector<16x16xf32>
    %1030 = vector.extract_strided_slice %952 {offsets = [0, 24], sizes = [16, 8], strides = [1, 1]} : vector<16x128xf32> to vector<16x8xf32>
    %cst_380 = arith.constant dense<0.000000e+00> : vector<16x8xf32>
    %1031 = tpu.matmul %1029, %1030, %cst_380 {dimension_numbers = #tpu.dot_dimension_numbers<[1], [0], [0], [1], [0, 0, 1, 1], [], []>} : vector<16x16xf32>, vector<16x8xf32>, vector<16x8xf32> -> vector<16x8xf32>
    %1032 = vector.extract_strided_slice %953 {offsets = [24, 0], sizes = [8, 128], strides = [1, 1]} : vector<128x128xf32> to vector<8x128xf32>
    %cst_381 = arith.constant dense<0.000000e+00> : vector<16x128xf32>
    %1033 = tpu.matmul %1031, %1032, %cst_381 {dimension_numbers = #tpu.dot_dimension_numbers<[1], [0], [0], [1], [0, 0, 1, 1], [], []>} : vector<16x8xf32>, vector<8x128xf32>, vector<16x128xf32> -> vector<16x128xf32>
    %1034 = arith.addf %1014, %1033 : vector<16x128xf32>
    %c4760 = arith.constant 4760 : index
    %c0_382 = arith.constant 0 : index
    %1035 = vector.load %arg3[%c4760, %c0_382] : memref<5632x128xf32, #tpu.memory_space<vmem>>, vector<1x128xf32>
    %1036 = vector.broadcast %1035 : vector<1x128xf32> to vector<16x128xf32>
    %1037 = arith.addf %1034, %1036 : vector<16x128xf32>
    %1038 = arith.addf %1037, %619 : vector<16x128xf32>
    %c4768 = arith.constant 4768 : index
    %c0_383 = arith.constant 0 : index
    %1039 = vector.load %arg3[%c4768, %c0_383] : memref<5632x128xf32, #tpu.memory_space<vmem>>, vector<1x128xf32>
    %c4776 = arith.constant 4776 : index
    %c0_384 = arith.constant 0 : index
    %1040 = vector.load %arg3[%c4776, %c0_384] : memref<5632x128xf32, #tpu.memory_space<vmem>>, vector<1x128xf32>
    %1041 = tpu.iota {dimensions = array<i32: 1>} : vector<16x128xi32>
    %c32_i32_385 = arith.constant 32 : i32
    %1042 = vector.broadcast %c32_i32_385 : i32 to vector<16x128xi32>
    %1043 = arith.cmpi slt, %1041, %1042 : vector<16x128xi32>
    %cst_386 = arith.constant 0.000000e+00 : f32
    %1044 = vector.broadcast %cst_386 : f32 to vector<16x128xf32>
    %1045 = arith.select %1043, %1038, %1044 : vector<16x128xi1>, vector<16x128xf32>
    %cst_387 = arith.constant dense<0.000000e+00> : vector<16xf32>
    %1046 = vector.multi_reduction <add>, %1045, %cst_387 [1] : vector<16x128xf32> to vector<16xf32>
    %1047 = vector.shape_cast %1046 : vector<16xf32> to vector<16x1xf32>
    %cst_388 = arith.constant 3.125000e-02 : f32
    %1048 = vector.broadcast %cst_388 : f32 to vector<16x1xf32>
    %1049 = arith.mulf %1047, %1048 : vector<16x1xf32>
    %1050 = vector.broadcast %1049 : vector<16x1xf32> to vector<16x128xf32>
    %1051 = arith.subf %1038, %1050 : vector<16x128xf32>
    %cst_389 = arith.constant 0.000000e+00 : f32
    %1052 = vector.broadcast %cst_389 : f32 to vector<16x128xf32>
    %1053 = arith.select %1043, %1051, %1052 : vector<16x128xi1>, vector<16x128xf32>
    %1054 = arith.mulf %1053, %1053 : vector<16x128xf32>
    %cst_390 = arith.constant dense<0.000000e+00> : vector<16xf32>
    %1055 = vector.multi_reduction <add>, %1054, %cst_390 [1] : vector<16x128xf32> to vector<16xf32>
    %1056 = vector.shape_cast %1055 : vector<16xf32> to vector<16x1xf32>
    %cst_391 = arith.constant 3.125000e-02 : f32
    %1057 = vector.broadcast %cst_391 : f32 to vector<16x1xf32>
    %1058 = arith.mulf %1056, %1057 : vector<16x1xf32>
    %cst_392 = arith.constant 9.99999974E-6 : f32
    %1059 = vector.broadcast %cst_392 : f32 to vector<16x1xf32>
    %1060 = arith.addf %1058, %1059 : vector<16x1xf32>
    %1061 = math.rsqrt %1060 : vector<16x1xf32>
    %1062 = vector.broadcast %1061 : vector<16x1xf32> to vector<16x128xf32>
    %1063 = arith.mulf %1053, %1062 : vector<16x128xf32>
    %1064 = vector.broadcast %1039 : vector<1x128xf32> to vector<16x128xf32>
    %1065 = arith.mulf %1063, %1064 : vector<16x128xf32>
    %1066 = vector.broadcast %1040 : vector<1x128xf32> to vector<16x128xf32>
    %1067 = arith.addf %1065, %1066 : vector<16x128xf32>
    %c4784 = arith.constant 4784 : index
    %c0_393 = arith.constant 0 : index
    %1068 = vector.load %arg3[%c4784, %c0_393] : memref<5632x128xf32, #tpu.memory_space<vmem>>, vector<128x128xf32>
    %cst_394 = arith.constant dense<0.000000e+00> : vector<16x128xf32>
    %1069 = tpu.matmul %1067, %1068, %cst_394 {dimension_numbers = #tpu.dot_dimension_numbers<[1], [0], [0], [1], [0, 0, 1, 1], [], []>} : vector<16x128xf32>, vector<128x128xf32>, vector<16x128xf32> -> vector<16x128xf32>
    %c4912 = arith.constant 4912 : index
    %c0_395 = arith.constant 0 : index
    %1070 = vector.load %arg3[%c4912, %c0_395] : memref<5632x128xf32, #tpu.memory_space<vmem>>, vector<1x128xf32>
    %1071 = vector.broadcast %1070 : vector<1x128xf32> to vector<16x128xf32>
    %1072 = arith.addf %1069, %1071 : vector<16x128xf32>
    %c4920 = arith.constant 4920 : index
    %c0_396 = arith.constant 0 : index
    %1073 = vector.load %arg3[%c4920, %c0_396] : memref<5632x128xf32, #tpu.memory_space<vmem>>, vector<128x128xf32>
    %cst_397 = arith.constant dense<0.000000e+00> : vector<8x128xf32>
    %1074 = tpu.matmul %937, %1073, %cst_397 {dimension_numbers = #tpu.dot_dimension_numbers<[1], [0], [0], [1], [0, 0, 1, 1], [], []>} : vector<8x128xf32>, vector<128x128xf32>, vector<8x128xf32> -> vector<8x128xf32>
    %c5048 = arith.constant 5048 : index
    %c0_398 = arith.constant 0 : index
    %1075 = vector.load %arg3[%c5048, %c0_398] : memref<5632x128xf32, #tpu.memory_space<vmem>>, vector<1x128xf32>
    %1076 = vector.broadcast %1075 : vector<1x128xf32> to vector<8x128xf32>
    %1077 = arith.addf %1074, %1076 : vector<8x128xf32>
    %c5056 = arith.constant 5056 : index
    %c0_399 = arith.constant 0 : index
    %1078 = vector.load %arg3[%c5056, %c0_399] : memref<5632x128xf32, #tpu.memory_space<vmem>>, vector<128x128xf32>
    %cst_400 = arith.constant dense<0.000000e+00> : vector<8x128xf32>
    %1079 = tpu.matmul %937, %1078, %cst_400 {dimension_numbers = #tpu.dot_dimension_numbers<[1], [0], [0], [1], [0, 0, 1, 1], [], []>} : vector<8x128xf32>, vector<128x128xf32>, vector<8x128xf32> -> vector<8x128xf32>
    %c5184 = arith.constant 5184 : index
    %c0_401 = arith.constant 0 : index
    %1080 = vector.load %arg3[%c5184, %c0_401] : memref<5632x128xf32, #tpu.memory_space<vmem>>, vector<1x128xf32>
    %1081 = vector.broadcast %1080 : vector<1x128xf32> to vector<8x128xf32>
    %1082 = arith.addf %1079, %1081 : vector<8x128xf32>
    %c5192 = arith.constant 5192 : index
    %c0_402 = arith.constant 0 : index
    %1083 = vector.load %arg3[%c5192, %c0_402] : memref<5632x128xf32, #tpu.memory_space<vmem>>, vector<128x128xf32>
    %cst_403 = arith.constant 0.000000e+00 : f32
    %1084 = vector.broadcast %cst_403 : f32 to vector<16x128xf32>
    %cst_404 = arith.constant 0.000000e+00 : f32
    %1085 = vector.broadcast %cst_404 : f32 to vector<16x8xf32>
    %1086 = vector.extract_strided_slice %1072 {offsets = [0, 0], sizes = [16, 8], strides = [1, 1]} : vector<16x128xf32> to vector<16x8xf32>
    %1087 = vector.extract_strided_slice %1077 {offsets = [0, 0], sizes = [8, 8], strides = [1, 1]} : vector<8x128xf32> to vector<8x8xf32>
    "tpu.trace_start"() <{level = 10 : i32, message = "qd,kd->qk"}> : () -> ()
    %cst_405 = arith.constant dense<0.000000e+00> : vector<16x8xf32>
    %1088 = tpu.matmul %1086, %1087, %cst_405 {dimension_numbers = #tpu.dot_dimension_numbers<[1], [1], [0], [0], [0, 0, 1, 0], [], []>} : vector<16x8xf32>, vector<8x8xf32>, vector<16x8xf32> -> vector<16x8xf32>
    "tpu.trace_stop"() : () -> ()
    %cst_406 = arith.constant 0.353553385 : f32
    %1089 = vector.broadcast %cst_406 : f32 to vector<16x8xf32>
    %1090 = arith.mulf %1088, %1089 : vector<16x8xf32>
    %cst_407 = arith.constant dense<0xFF800000> : vector<16xf32>
    %1091 = vector.multi_reduction <maximumf>, %1090, %cst_407 [1] : vector<16x8xf32> to vector<16xf32>
    %1092 = vector.shape_cast %1091 : vector<16xf32> to vector<16x1xf32>
    %1093 = vector.broadcast %1092 : vector<16x1xf32> to vector<16x8xf32>
    %1094 = arith.subf %1090, %1093 : vector<16x8xf32>
    %1095 = math.exp %1094 : vector<16x8xf32>
    %cst_408 = arith.constant dense<0.000000e+00> : vector<16xf32>
    %1096 = vector.multi_reduction <add>, %1095, %cst_408 [1] : vector<16x8xf32> to vector<16xf32>
    %1097 = vector.shape_cast %1096 : vector<16xf32> to vector<16x1xf32>
    %1098 = tpu.reciprocal %1097 {approx = true} : vector<16x1xf32> -> vector<16x1xf32>
    %1099 = vector.broadcast %1098 : vector<16x1xf32> to vector<16x8xf32>
    %1100 = arith.mulf %1095, %1099 : vector<16x8xf32>
    %1101 = arith.addf %1085, %1100 : vector<16x8xf32>
    %1102 = vector.extract_strided_slice %1082 {offsets = [0, 0], sizes = [8, 8], strides = [1, 1]} : vector<8x128xf32> to vector<8x8xf32>
    %cst_409 = arith.constant dense<0.000000e+00> : vector<16x8xf32>
    %1103 = tpu.matmul %1100, %1102, %cst_409 {dimension_numbers = #tpu.dot_dimension_numbers<[1], [0], [0], [1], [0, 0, 1, 1], [], []>} : vector<16x8xf32>, vector<8x8xf32>, vector<16x8xf32> -> vector<16x8xf32>
    %1104 = vector.extract_strided_slice %1083 {offsets = [0, 0], sizes = [8, 128], strides = [1, 1]} : vector<128x128xf32> to vector<8x128xf32>
    %cst_410 = arith.constant dense<0.000000e+00> : vector<16x128xf32>
    %1105 = tpu.matmul %1103, %1104, %cst_410 {dimension_numbers = #tpu.dot_dimension_numbers<[1], [0], [0], [1], [0, 0, 1, 1], [], []>} : vector<16x8xf32>, vector<8x128xf32>, vector<16x128xf32> -> vector<16x128xf32>
    %1106 = arith.addf %1084, %1105 : vector<16x128xf32>
    %1107 = vector.extract_strided_slice %1072 {offsets = [0, 8], sizes = [16, 8], strides = [1, 1]} : vector<16x128xf32> to vector<16x8xf32>
    %1108 = vector.extract_strided_slice %1077 {offsets = [0, 8], sizes = [8, 8], strides = [1, 1]} : vector<8x128xf32> to vector<8x8xf32>
    "tpu.trace_start"() <{level = 10 : i32, message = "qd,kd->qk"}> : () -> ()
    %cst_411 = arith.constant dense<0.000000e+00> : vector<16x8xf32>
    %1109 = tpu.matmul %1107, %1108, %cst_411 {dimension_numbers = #tpu.dot_dimension_numbers<[1], [1], [0], [0], [0, 0, 1, 0], [], []>} : vector<16x8xf32>, vector<8x8xf32>, vector<16x8xf32> -> vector<16x8xf32>
    "tpu.trace_stop"() : () -> ()
    %cst_412 = arith.constant 0.353553385 : f32
    %1110 = vector.broadcast %cst_412 : f32 to vector<16x8xf32>
    %1111 = arith.mulf %1109, %1110 : vector<16x8xf32>
    %cst_413 = arith.constant dense<0xFF800000> : vector<16xf32>
    %1112 = vector.multi_reduction <maximumf>, %1111, %cst_413 [1] : vector<16x8xf32> to vector<16xf32>
    %1113 = vector.shape_cast %1112 : vector<16xf32> to vector<16x1xf32>
    %1114 = vector.broadcast %1113 : vector<16x1xf32> to vector<16x8xf32>
    %1115 = arith.subf %1111, %1114 : vector<16x8xf32>
    %1116 = math.exp %1115 : vector<16x8xf32>
    %cst_414 = arith.constant dense<0.000000e+00> : vector<16xf32>
    %1117 = vector.multi_reduction <add>, %1116, %cst_414 [1] : vector<16x8xf32> to vector<16xf32>
    %1118 = vector.shape_cast %1117 : vector<16xf32> to vector<16x1xf32>
    %1119 = tpu.reciprocal %1118 {approx = true} : vector<16x1xf32> -> vector<16x1xf32>
    %1120 = vector.broadcast %1119 : vector<16x1xf32> to vector<16x8xf32>
    %1121 = arith.mulf %1116, %1120 : vector<16x8xf32>
    %1122 = arith.addf %1101, %1121 : vector<16x8xf32>
    %1123 = vector.extract_strided_slice %1082 {offsets = [0, 8], sizes = [8, 8], strides = [1, 1]} : vector<8x128xf32> to vector<8x8xf32>
    %cst_415 = arith.constant dense<0.000000e+00> : vector<16x8xf32>
    %1124 = tpu.matmul %1121, %1123, %cst_415 {dimension_numbers = #tpu.dot_dimension_numbers<[1], [0], [0], [1], [0, 0, 1, 1], [], []>} : vector<16x8xf32>, vector<8x8xf32>, vector<16x8xf32> -> vector<16x8xf32>
    %1125 = vector.extract_strided_slice %1083 {offsets = [8, 0], sizes = [8, 128], strides = [1, 1]} : vector<128x128xf32> to vector<8x128xf32>
    %cst_416 = arith.constant dense<0.000000e+00> : vector<16x128xf32>
    %1126 = tpu.matmul %1124, %1125, %cst_416 {dimension_numbers = #tpu.dot_dimension_numbers<[1], [0], [0], [1], [0, 0, 1, 1], [], []>} : vector<16x8xf32>, vector<8x128xf32>, vector<16x128xf32> -> vector<16x128xf32>
    %1127 = arith.addf %1106, %1126 : vector<16x128xf32>
    %1128 = vector.extract_strided_slice %1072 {offsets = [0, 16], sizes = [16, 8], strides = [1, 1]} : vector<16x128xf32> to vector<16x8xf32>
    %1129 = vector.extract_strided_slice %1077 {offsets = [0, 16], sizes = [8, 8], strides = [1, 1]} : vector<8x128xf32> to vector<8x8xf32>
    "tpu.trace_start"() <{level = 10 : i32, message = "qd,kd->qk"}> : () -> ()
    %cst_417 = arith.constant dense<0.000000e+00> : vector<16x8xf32>
    %1130 = tpu.matmul %1128, %1129, %cst_417 {dimension_numbers = #tpu.dot_dimension_numbers<[1], [1], [0], [0], [0, 0, 1, 0], [], []>} : vector<16x8xf32>, vector<8x8xf32>, vector<16x8xf32> -> vector<16x8xf32>
    "tpu.trace_stop"() : () -> ()
    %cst_418 = arith.constant 0.353553385 : f32
    %1131 = vector.broadcast %cst_418 : f32 to vector<16x8xf32>
    %1132 = arith.mulf %1130, %1131 : vector<16x8xf32>
    %cst_419 = arith.constant dense<0xFF800000> : vector<16xf32>
    %1133 = vector.multi_reduction <maximumf>, %1132, %cst_419 [1] : vector<16x8xf32> to vector<16xf32>
    %1134 = vector.shape_cast %1133 : vector<16xf32> to vector<16x1xf32>
    %1135 = vector.broadcast %1134 : vector<16x1xf32> to vector<16x8xf32>
    %1136 = arith.subf %1132, %1135 : vector<16x8xf32>
    %1137 = math.exp %1136 : vector<16x8xf32>
    %cst_420 = arith.constant dense<0.000000e+00> : vector<16xf32>
    %1138 = vector.multi_reduction <add>, %1137, %cst_420 [1] : vector<16x8xf32> to vector<16xf32>
    %1139 = vector.shape_cast %1138 : vector<16xf32> to vector<16x1xf32>
    %1140 = tpu.reciprocal %1139 {approx = true} : vector<16x1xf32> -> vector<16x1xf32>
    %1141 = vector.broadcast %1140 : vector<16x1xf32> to vector<16x8xf32>
    %1142 = arith.mulf %1137, %1141 : vector<16x8xf32>
    %1143 = arith.addf %1122, %1142 : vector<16x8xf32>
    %1144 = vector.extract_strided_slice %1082 {offsets = [0, 16], sizes = [8, 8], strides = [1, 1]} : vector<8x128xf32> to vector<8x8xf32>
    %cst_421 = arith.constant dense<0.000000e+00> : vector<16x8xf32>
    %1145 = tpu.matmul %1142, %1144, %cst_421 {dimension_numbers = #tpu.dot_dimension_numbers<[1], [0], [0], [1], [0, 0, 1, 1], [], []>} : vector<16x8xf32>, vector<8x8xf32>, vector<16x8xf32> -> vector<16x8xf32>
    %1146 = vector.extract_strided_slice %1083 {offsets = [16, 0], sizes = [8, 128], strides = [1, 1]} : vector<128x128xf32> to vector<8x128xf32>
    %cst_422 = arith.constant dense<0.000000e+00> : vector<16x128xf32>
    %1147 = tpu.matmul %1145, %1146, %cst_422 {dimension_numbers = #tpu.dot_dimension_numbers<[1], [0], [0], [1], [0, 0, 1, 1], [], []>} : vector<16x8xf32>, vector<8x128xf32>, vector<16x128xf32> -> vector<16x128xf32>
    %1148 = arith.addf %1127, %1147 : vector<16x128xf32>
    %1149 = vector.extract_strided_slice %1072 {offsets = [0, 24], sizes = [16, 8], strides = [1, 1]} : vector<16x128xf32> to vector<16x8xf32>
    %1150 = vector.extract_strided_slice %1077 {offsets = [0, 24], sizes = [8, 8], strides = [1, 1]} : vector<8x128xf32> to vector<8x8xf32>
    "tpu.trace_start"() <{level = 10 : i32, message = "qd,kd->qk"}> : () -> ()
    %cst_423 = arith.constant dense<0.000000e+00> : vector<16x8xf32>
    %1151 = tpu.matmul %1149, %1150, %cst_423 {dimension_numbers = #tpu.dot_dimension_numbers<[1], [1], [0], [0], [0, 0, 1, 0], [], []>} : vector<16x8xf32>, vector<8x8xf32>, vector<16x8xf32> -> vector<16x8xf32>
    "tpu.trace_stop"() : () -> ()
    %cst_424 = arith.constant 0.353553385 : f32
    %1152 = vector.broadcast %cst_424 : f32 to vector<16x8xf32>
    %1153 = arith.mulf %1151, %1152 : vector<16x8xf32>
    %cst_425 = arith.constant dense<0xFF800000> : vector<16xf32>
    %1154 = vector.multi_reduction <maximumf>, %1153, %cst_425 [1] : vector<16x8xf32> to vector<16xf32>
    %1155 = vector.shape_cast %1154 : vector<16xf32> to vector<16x1xf32>
    %1156 = vector.broadcast %1155 : vector<16x1xf32> to vector<16x8xf32>
    %1157 = arith.subf %1153, %1156 : vector<16x8xf32>
    %1158 = math.exp %1157 : vector<16x8xf32>
    %cst_426 = arith.constant dense<0.000000e+00> : vector<16xf32>
    %1159 = vector.multi_reduction <add>, %1158, %cst_426 [1] : vector<16x8xf32> to vector<16xf32>
    %1160 = vector.shape_cast %1159 : vector<16xf32> to vector<16x1xf32>
    %1161 = tpu.reciprocal %1160 {approx = true} : vector<16x1xf32> -> vector<16x1xf32>
    %1162 = vector.broadcast %1161 : vector<16x1xf32> to vector<16x8xf32>
    %1163 = arith.mulf %1158, %1162 : vector<16x8xf32>
    %1164 = arith.addf %1143, %1163 : vector<16x8xf32>
    %1165 = vector.extract_strided_slice %1082 {offsets = [0, 24], sizes = [8, 8], strides = [1, 1]} : vector<8x128xf32> to vector<8x8xf32>
    %cst_427 = arith.constant dense<0.000000e+00> : vector<16x8xf32>
    %1166 = tpu.matmul %1163, %1165, %cst_427 {dimension_numbers = #tpu.dot_dimension_numbers<[1], [0], [0], [1], [0, 0, 1, 1], [], []>} : vector<16x8xf32>, vector<8x8xf32>, vector<16x8xf32> -> vector<16x8xf32>
    %1167 = vector.extract_strided_slice %1083 {offsets = [24, 0], sizes = [8, 128], strides = [1, 1]} : vector<128x128xf32> to vector<8x128xf32>
    %cst_428 = arith.constant dense<0.000000e+00> : vector<16x128xf32>
    %1168 = tpu.matmul %1166, %1167, %cst_428 {dimension_numbers = #tpu.dot_dimension_numbers<[1], [0], [0], [1], [0, 0, 1, 1], [], []>} : vector<16x8xf32>, vector<8x128xf32>, vector<16x128xf32> -> vector<16x128xf32>
    %1169 = arith.addf %1148, %1168 : vector<16x128xf32>
    %c5320 = arith.constant 5320 : index
    %c0_429 = arith.constant 0 : index
    %1170 = vector.load %arg3[%c5320, %c0_429] : memref<5632x128xf32, #tpu.memory_space<vmem>>, vector<1x128xf32>
    %1171 = vector.broadcast %1170 : vector<1x128xf32> to vector<16x128xf32>
    %1172 = arith.addf %1169, %1171 : vector<16x128xf32>
    %cst_430 = arith.constant 2.500000e-01 : f32
    %1173 = vector.broadcast %cst_430 : f32 to vector<16x8xf32>
    %1174 = arith.mulf %1164, %1173 : vector<16x8xf32>
    %c5328 = arith.constant 5328 : index
    %c0_431 = arith.constant 0 : index
    %1175 = vector.load %arg3[%c5328, %c0_431] : memref<5632x128xf32, #tpu.memory_space<vmem>>, vector<1x128xf32>
    %c5336 = arith.constant 5336 : index
    %c0_432 = arith.constant 0 : index
    %1176 = vector.load %arg3[%c5336, %c0_432] : memref<5632x128xf32, #tpu.memory_space<vmem>>, vector<1x128xf32>
    %1177 = tpu.iota {dimensions = array<i32: 1>} : vector<16x128xi32>
    %c32_i32_433 = arith.constant 32 : i32
    %1178 = vector.broadcast %c32_i32_433 : i32 to vector<16x128xi32>
    %1179 = arith.cmpi slt, %1177, %1178 : vector<16x128xi32>
    %cst_434 = arith.constant 0.000000e+00 : f32
    %1180 = vector.broadcast %cst_434 : f32 to vector<16x128xf32>
    %1181 = arith.select %1179, %1172, %1180 : vector<16x128xi1>, vector<16x128xf32>
    %cst_435 = arith.constant dense<0.000000e+00> : vector<16xf32>
    %1182 = vector.multi_reduction <add>, %1181, %cst_435 [1] : vector<16x128xf32> to vector<16xf32>
    %1183 = vector.shape_cast %1182 : vector<16xf32> to vector<16x1xf32>
    %cst_436 = arith.constant 3.125000e-02 : f32
    %1184 = vector.broadcast %cst_436 : f32 to vector<16x1xf32>
    %1185 = arith.mulf %1183, %1184 : vector<16x1xf32>
    %1186 = vector.broadcast %1185 : vector<16x1xf32> to vector<16x128xf32>
    %1187 = arith.subf %1172, %1186 : vector<16x128xf32>
    %cst_437 = arith.constant 0.000000e+00 : f32
    %1188 = vector.broadcast %cst_437 : f32 to vector<16x128xf32>
    %1189 = arith.select %1179, %1187, %1188 : vector<16x128xi1>, vector<16x128xf32>
    %1190 = arith.mulf %1189, %1189 : vector<16x128xf32>
    %cst_438 = arith.constant dense<0.000000e+00> : vector<16xf32>
    %1191 = vector.multi_reduction <add>, %1190, %cst_438 [1] : vector<16x128xf32> to vector<16xf32>
    %1192 = vector.shape_cast %1191 : vector<16xf32> to vector<16x1xf32>
    %cst_439 = arith.constant 3.125000e-02 : f32
    %1193 = vector.broadcast %cst_439 : f32 to vector<16x1xf32>
    %1194 = arith.mulf %1192, %1193 : vector<16x1xf32>
    %cst_440 = arith.constant 9.99999974E-6 : f32
    %1195 = vector.broadcast %cst_440 : f32 to vector<16x1xf32>
    %1196 = arith.addf %1194, %1195 : vector<16x1xf32>
    %1197 = math.rsqrt %1196 : vector<16x1xf32>
    %1198 = vector.broadcast %1197 : vector<16x1xf32> to vector<16x128xf32>
    %1199 = arith.mulf %1189, %1198 : vector<16x128xf32>
    %1200 = vector.broadcast %1175 : vector<1x128xf32> to vector<16x128xf32>
    %1201 = arith.mulf %1199, %1200 : vector<16x128xf32>
    %1202 = vector.broadcast %1176 : vector<1x128xf32> to vector<16x128xf32>
    %1203 = arith.addf %1201, %1202 : vector<16x128xf32>
    %c5344 = arith.constant 5344 : index
    %c0_441 = arith.constant 0 : index
    %1204 = vector.load %arg3[%c5344, %c0_441] : memref<5632x128xf32, #tpu.memory_space<vmem>>, vector<128x128xf32>
    %cst_442 = arith.constant dense<0.000000e+00> : vector<16x128xf32>
    %1205 = tpu.matmul %1203, %1204, %cst_442 {dimension_numbers = #tpu.dot_dimension_numbers<[1], [0], [0], [1], [0, 0, 1, 1], [], []>} : vector<16x128xf32>, vector<128x128xf32>, vector<16x128xf32> -> vector<16x128xf32>
    %c5472 = arith.constant 5472 : index
    %c0_443 = arith.constant 0 : index
    %1206 = vector.load %arg3[%c5472, %c0_443] : memref<5632x128xf32, #tpu.memory_space<vmem>>, vector<1x128xf32>
    %1207 = vector.broadcast %1206 : vector<1x128xf32> to vector<16x128xf32>
    %1208 = arith.addf %1205, %1207 : vector<16x128xf32>
    %cst_444 = arith.constant 0.000000e+00 : f32
    %1209 = vector.broadcast %cst_444 : f32 to vector<16x128xf32>
    %1210 = arith.maximumf %1208, %1209 : vector<16x128xf32>
    %c5480 = arith.constant 5480 : index
    %c0_445 = arith.constant 0 : index
    %1211 = vector.load %arg3[%c5480, %c0_445] : memref<5632x128xf32, #tpu.memory_space<vmem>>, vector<128x128xf32>
    %cst_446 = arith.constant dense<0.000000e+00> : vector<16x128xf32>
    %1212 = tpu.matmul %1210, %1211, %cst_446 {dimension_numbers = #tpu.dot_dimension_numbers<[1], [0], [0], [1], [0, 0, 1, 1], [], []>} : vector<16x128xf32>, vector<128x128xf32>, vector<16x128xf32> -> vector<16x128xf32>
    %c5608 = arith.constant 5608 : index
    %c0_447 = arith.constant 0 : index
    %1213 = vector.load %arg3[%c5608, %c0_447] : memref<5632x128xf32, #tpu.memory_space<vmem>>, vector<1x128xf32>
    %1214 = vector.broadcast %1213 : vector<1x128xf32> to vector<16x128xf32>
    %1215 = arith.addf %1212, %1214 : vector<16x128xf32>
    %1216 = arith.addf %1215, %1203 : vector<16x128xf32>
    %c5616 = arith.constant 5616 : index
    %c0_448 = arith.constant 0 : index
    %1217 = vector.load %arg3[%c5616, %c0_448] : memref<5632x128xf32, #tpu.memory_space<vmem>>, vector<1x128xf32>
    %c5624 = arith.constant 5624 : index
    %c0_449 = arith.constant 0 : index
    %1218 = vector.load %arg3[%c5624, %c0_449] : memref<5632x128xf32, #tpu.memory_space<vmem>>, vector<1x128xf32>
    %1219 = tpu.iota {dimensions = array<i32: 1>} : vector<16x128xi32>
    %c32_i32_450 = arith.constant 32 : i32
    %1220 = vector.broadcast %c32_i32_450 : i32 to vector<16x128xi32>
    %1221 = arith.cmpi slt, %1219, %1220 : vector<16x128xi32>
    %cst_451 = arith.constant 0.000000e+00 : f32
    %1222 = vector.broadcast %cst_451 : f32 to vector<16x128xf32>
    %1223 = arith.select %1221, %1216, %1222 : vector<16x128xi1>, vector<16x128xf32>
    %cst_452 = arith.constant dense<0.000000e+00> : vector<16xf32>
    %1224 = vector.multi_reduction <add>, %1223, %cst_452 [1] : vector<16x128xf32> to vector<16xf32>
    %1225 = vector.shape_cast %1224 : vector<16xf32> to vector<16x1xf32>
    %cst_453 = arith.constant 3.125000e-02 : f32
    %1226 = vector.broadcast %cst_453 : f32 to vector<16x1xf32>
    %1227 = arith.mulf %1225, %1226 : vector<16x1xf32>
    %1228 = vector.broadcast %1227 : vector<16x1xf32> to vector<16x128xf32>
    %1229 = arith.subf %1216, %1228 : vector<16x128xf32>
    %cst_454 = arith.constant 0.000000e+00 : f32
    %1230 = vector.broadcast %cst_454 : f32 to vector<16x128xf32>
    %1231 = arith.select %1221, %1229, %1230 : vector<16x128xi1>, vector<16x128xf32>
    %1232 = arith.mulf %1231, %1231 : vector<16x128xf32>
    %cst_455 = arith.constant dense<0.000000e+00> : vector<16xf32>
    %1233 = vector.multi_reduction <add>, %1232, %cst_455 [1] : vector<16x128xf32> to vector<16xf32>
    %1234 = vector.shape_cast %1233 : vector<16xf32> to vector<16x1xf32>
    %cst_456 = arith.constant 3.125000e-02 : f32
    %1235 = vector.broadcast %cst_456 : f32 to vector<16x1xf32>
    %1236 = arith.mulf %1234, %1235 : vector<16x1xf32>
    %cst_457 = arith.constant 9.99999974E-6 : f32
    %1237 = vector.broadcast %cst_457 : f32 to vector<16x1xf32>
    %1238 = arith.addf %1236, %1237 : vector<16x1xf32>
    %1239 = math.rsqrt %1238 : vector<16x1xf32>
    %1240 = vector.broadcast %1239 : vector<16x1xf32> to vector<16x128xf32>
    %1241 = arith.mulf %1231, %1240 : vector<16x128xf32>
    %1242 = vector.broadcast %1217 : vector<1x128xf32> to vector<16x128xf32>
    %1243 = arith.mulf %1241, %1242 : vector<16x128xf32>
    %1244 = vector.broadcast %1218 : vector<1x128xf32> to vector<16x128xf32>
    %1245 = arith.addf %1243, %1244 : vector<16x128xf32>
    %cst_458 = arith.constant 0.000000e+00 : f32
    %1246 = vector.broadcast %cst_458 : f32 to vector<8x112xf32>
    %1247 = tpu.concatenate %866, %1246 in 1 : vector<8x16xf32>, vector<8x112xf32> -> vector<8x128xf32>
    %c1 = arith.constant 1 : index
    %c0_459 = arith.constant 0 : index
    %c0_460 = arith.constant 0 : index
    %c0_461 = arith.constant 0 : index
    %1248 = vector.load %arg6[%c1, %c0_459, %c0_460, %c0_461] : memref<2x1x8x128xf32, #tpu.memory_space<vmem>>, vector<1x1x8x128xf32>
    %1249 = vector.shape_cast %1248 : vector<1x1x8x128xf32> to vector<8x128xf32>
    %1250 = vector.shape_cast %1247 : vector<8x128xf32> to vector<1x1x8x128xf32>
    tpu.vector_store %arg6[%c1, %c0_459, %c0_460, %c0_461], %1250 {strides = array<i32>} : memref<2x1x8x128xf32, #tpu.memory_space<vmem>>, vector<1x1x8x128xf32>,
    %cst_462 = arith.constant 0.000000e+00 : f32
    %1251 = vector.broadcast %cst_462 : f32 to vector<16x120xf32>
    %1252 = tpu.concatenate %1174, %1251 in 1 : vector<16x8xf32>, vector<16x120xf32> -> vector<16x128xf32>
    %c1_463 = arith.constant 1 : index
    %c0_464 = arith.constant 0 : index
    %c0_465 = arith.constant 0 : index
    %c0_466 = arith.constant 0 : index
    %1253 = vector.load %arg7[%c1_463, %c0_464, %c0_465, %c0_466] : memref<2x1x16x128xf32, #tpu.memory_space<vmem>>, vector<1x1x16x128xf32>
    %1254 = vector.shape_cast %1253 : vector<1x1x16x128xf32> to vector<16x128xf32>
    %1255 = vector.shape_cast %1252 : vector<16x128xf32> to vector<1x1x16x128xf32>
    tpu.vector_store %arg7[%c1_463, %c0_464, %c0_465, %c0_466], %1255 {strides = array<i32>} : memref<2x1x16x128xf32, #tpu.memory_space<vmem>>, vector<1x1x16x128xf32>,
    %c0_467 = arith.constant 0 : index
    %c0_468 = arith.constant 0 : index
    %c0_469 = arith.constant 0 : index
    %1256 = vector.load %arg4[%c0_467, %c0_468, %c0_469] : memref<1x8x128xf32, #tpu.memory_space<vmem>>, vector<1x8x128xf32>
    %1257 = vector.shape_cast %1256 : vector<1x8x128xf32> to vector<8x128xf32>
    %1258 = vector.shape_cast %937 : vector<8x128xf32> to vector<1x8x128xf32>
    tpu.vector_store %arg4[%c0_467, %c0_468, %c0_469], %1258 {strides = array<i32>} : memref<1x8x128xf32, #tpu.memory_space<vmem>>, vector<1x8x128xf32>,
    %c0_470 = arith.constant 0 : index
    %c0_471 = arith.constant 0 : index
    %c0_472 = arith.constant 0 : index
    %1259 = vector.load %arg5[%c0_470, %c0_471, %c0_472] : memref<1x16x128xf32, #tpu.memory_space<vmem>>, vector<1x16x128xf32>
    %1260 = vector.shape_cast %1259 : vector<1x16x128xf32> to vector<16x128xf32>
    %1261 = vector.shape_cast %1245 : vector<16x128xf32> to vector<1x16x128xf32>
    tpu.vector_store %arg5[%c0_470, %c0_471, %c0_472], %1261 {strides = array<i32>} : memref<1x16x128xf32, #tpu.memory_space<vmem>>, vector<1x16x128xf32>,
    return
  }
  func.func @transform_0(%arg0: i32) -> (i32, i32, i32) {
    %c0_i32 = arith.constant 0 : i32
    %c0_i32_0 = arith.constant 0 : i32
    %c0_i32_1 = arith.constant 0 : i32
    return %arg0, %c0_i32, %c0_i32_0 : i32, i32, i32
  }
  func.func @transform_1(%arg0: i32) -> (i32, i32, i32) {
    %c0_i32 = arith.constant 0 : i32
    %c0_i32_0 = arith.constant 0 : i32
    %c0_i32_1 = arith.constant 0 : i32
    return %arg0, %c0_i32, %c0_i32_0 : i32, i32, i32
  }
  func.func @transform_2(%arg0: i32) -> (i32, i32) {
    %c0_i32 = arith.constant 0 : i32
    %c0_i32_0 = arith.constant 0 : i32
    %c0_i32_1 = arith.constant 0 : i32
    return %c0_i32, %c0_i32_0 : i32, i32
  }
  func.func @transform_3(%arg0: i32) -> (i32, i32, i32) {
    %c0_i32 = arith.constant 0 : i32
    %c0_i32_0 = arith.constant 0 : i32
    %c0_i32_1 = arith.constant 0 : i32
    return %arg0, %c0_i32, %c0_i32_0 : i32, i32, i32
  }
  func.func @transform_4(%arg0: i32) -> (i32, i32, i32) {
    %c0_i32 = arith.constant 0 : i32
    %c0_i32_0 = arith.constant 0 : i32
    %c0_i32_1 = arith.constant 0 : i32
    return %arg0, %c0_i32, %c0_i32_0 : i32, i32, i32
  }
  func.func @transform_5(%arg0: i32) -> (i32, i32, i32, i32) {
    %c0_i32 = arith.constant 0 : i32
    %c0_i32_0 = arith.constant 0 : i32
    %c0_i32_1 = arith.constant 0 : i32
    %c0_i32_2 = arith.constant 0 : i32
    return %c0_i32, %arg0, %c0_i32_0, %c0_i32_1 : i32, i32, i32, i32
  }
  func.func @transform_6(%arg0: i32) -> (i32, i32, i32, i32) {
    %c0_i32 = arith.constant 0 : i32
    %c0_i32_0 = arith.constant 0 : i32
    %c0_i32_1 = arith.constant 0 : i32
    %c0_i32_2 = arith.constant 0 : i32
    return %c0_i32, %arg0, %c0_i32_0, %c0_i32_1 : i32, i32, i32, i32
  }
}

</mosaic_0001>

<bundles_post_ra>
// kernel: mutual_attention.1
= control target key start
LH: loop header
LB: loop body
LE: loop exit
PB: predicated region body
PF: predicated region fallthrough
CT: control target
= control target key end

     0   :  { %12 = vsyncpa [#allocation3], 0  ;;  %s18278_s0 = inlined_call_operand.vmem [shape: f32[2,8,128], index: 0, kind: input, shape index: {}]   ;;  %s18279_s1 = inlined_call_operand.vmem [shape: f32[2,16,128], index: 1, kind: input, shape index: {}]   ;;  %s18280_s2 = inlined_call_operand.hbm [shape: f32[5632,128], index: 2, kind: input, shape index: {}]   ;;  %s18281_s3 = inlined_call_operand.hbm [shape: f32[2,8,128], index: 3, kind: output, shape index: {0}]   ;;  %s18282_s4 = inlined_call_operand.hbm [shape: f32[2,16,128], index: 4, kind: output, shape index: {1}]   ;;  %s18283_s5 = inlined_call_operand.vmem [shape: f32[2,2,8,128], index: 5, kind: output, shape index: {2}]   ;;  %s18284_s6 = inlined_call_operand.vmem [shape: f32[2,2,16,128], index: 6, kind: output, shape index: {3}]  }
   0x1   :  { %13 = vsyncpa [#allocation4], 0 }
   0x2   :  { %15 = vsyncpa [#allocation4 + $0x1], 0 }
   0x3   :  { %16 = vsyncpa [#allocation7], 0 }
   0x4   :  { %18 = vsyncpa [#allocation7 + $0x1], 0  ;;  %s16907_s21 = smov 0   ;;  %s16909_s22 = smov 0  }
   0x5   :  { %s16911_s23 = smov 0   ;;  %s16913_s24 = smov 0  }
   0x6 LB: > { %s16928_s25 = sadd.s32 4294967295, %s16857_s24   ;;  %s12477_s26 = sadd.s32 4294967294, %s16857_s24   ;;  %s16857_s24 = sphi %s16913_s24, %s18303_s24   ;;  %s16853_s23 = sphi %s16911_s23, %s18302_s23   ;;  %s16849_s22 = sphi %s16909_s22, %s18301_s22   ;;  %s16845_s21 = sphi %s16907_s21, %s18300_s21  }
   0x7   : > { %s16932_s27 = sadd.s32 1, %s16857_s24   ;;  %s104_s28 = sadd.s32 1, %s16853_s23 }
   0x8   : > { %s101_s29 = ssub.s32 %s16857_s24, %s16932_s27  ;;  %p114_p0 = scmp.ne.s32.totalorder %s16853_s23, %s16849_s22 }
   0x9   : > { %p102_p1 = scmp.eq.s32.totalorder %s101_s29, 0  ;;  %p115_p2 = scmp.eq.s32.totalorder %s16928_s25, 1 }
   0xa   : > { %p120_p3 = scmp.ne.s32.totalorder %s16849_s22, %s16845_s21  ;;  %p121_p4 = scmp.eq.s32.totalorder %s12477_s26, 1 }
   0xb   : > { %s16943_s30 = scalar_select %p102_p1, %s16853_s23, %s104_s28  }
   0xc   : > { %p16945_p5 = por %p115_p2, %p114_p0  ;;  %p16949_p6 = por %p121_p4, %p120_p3 }
   0xd   : > { %p12478_p7 = scmp.ge.s32.totalorder %s16857_s24, 1  ;;  %p206_p8 = scmp.lt.s32.totalorder %s16857_s24, 3 }
   0xe   : > { %s18288_s7 = scalar_select %p16945_p5, 1, 0 }
   0xf   : > { %s18289_s8 = scalar_select %p16949_p6, 1, 0 }
  0x10   : > { %p18285_p9 = scmp.eq.s32.totalorder %s16928_s25, 0  ;;  %p16956_p10 = pnand %p12478_p7, %p206_p8 }
  0x11   : > { %s16859_s10 = smov [#allocation2]   ;;  %s16731_s15 = scalar_lea.hbm %s18280_s2, 90112 }
  0x12   : > { %s18290_s9 = scalar_select %p16956_p10, 1, 0 }
  0x13   : > { %s218_s11 = sshll.u32 %s16859_s10, 4  ;;  %p16324_p11 = pneg %p16956_p10  ;;  %s219_s11 = int_to_ptr.vmem [resolvable:$true] %s218_s11 }
  0x14   : > { %p16732_p13 = scmp.ne.s32.totalorder %s18280_s2, %s16731_s15  ;;  %p16738_p3 = scmp.lt.u32.totalorder %s16731_s15, %s18280_s2 }
  0x15   : > { %p16964_p12 = pnand %p18285_p9, %p16324_p11 }
  0x17   : > { %p16733_p0 = pneg %p16964_p12 }
  0x19   : > { %p16734_p1 = pnand %p16733_p0, %p16732_p13 }
  0x1b   : > { %p16735_p2 = pneg %p16734_p1 }
  0x1d   : > { %p16740_p4 = pnand %p16738_p3, %p16735_p2 }
  0x1f   : > { %16743 = shalt.err (!%p16740_p4)
}
  0x20   : > { %s16744_s20 = scalar_lea.vmem %s219_s11, 90112  ;;  %p16752_p9 = scmp.lt.s32.totalorder %s219_s11, %s219_s11 }
  0x21   : > { %p16745_p7 = scmp.ne.s32.totalorder %s219_s11, %s16744_s20  ;;  %p16753_p6 = scmp.lt.s32.totalorder %s16744_s20, %s16744_s20 }
  0x23   : > { %p16747_p8 = pnand %p16745_p7, %p16733_p0  ;;  %p16754_p5 = por %p16753_p6, %p16752_p9 }
  0x25   : > { %p16748_p11 = pneg %p16747_p8 }
  0x27   : > { %p16755_p10 = pnand %p16754_p5, %p16748_p11 }
  0x29   : > { %16758 = shalt.err (!%p16755_p10)
}
  0x2a   : > { %s16860_s26 = smov 128   ;;  %s16861_s28 = smov 8  }
  0x2b   : > { %16327 = dma.hbm_to_vmem [thread:$0]  (!%p16964_p12), %s18280_s2, 90112, %s219_s11, [#allocation3], %s16860_s26, %s16860_s26, %s16861_s28  }
  0x2c   : > { %p18292_p13 = scmp.ne.s32.totalorder %s18290_s9, 0 }
  0x2d   : > { %p18293_p1 = scmp.eq.s32.totalorder (!%p18292_p13), %s16928_s25, 0 }
  0x2e   : > { %249 = sbr.rel (%p18292_p13) target bundleno = 24072 (0x5e08), region = 32 }
  0x35   : > { %16832 = dma.done.wait (%p18293_p1), [#allocation3], 90112   ;;  %p18294_p0 = pmov %p18293_p1 }
  0x36   : > { %v16862_v0 = vmov 0.0|0.0   ;;  %vm16863_vm0 = vmmov 0   ;;  %v16864_v1 = vmov 0.0   ;;  %v399_v2 = vld [vmem:[#allocation2 + $0x88] sm:$0xff]  ;;  %v400_v3 = vld [vmem:[#allocation2 + $0x90] sm:$0xff]  ;;  %v308_v4 = vld [vmem:[#allocation2] sm:$0xff] }
  0x37   : > { %16834 = vsyncadd (%p18294_p0), [#allocation3], 4294877184  ;;  %15284 = vmatprep.subr.bf16.mxu1 %v16862_v0  ;;  %15260 = vmatprep.subr.bf16.mxu0 %v16862_v0  ;;  %v15285_v5 = vpack.c.bf16 %v400_v3, %v399_v2  ;;  %v309_v6 = vld [vmem:[#allocation2 + $0x8] sm:$0xff]  ;;  %v401_v7 = vld [vmem:[#allocation2 + $0x98] sm:$0xff]  ;;  %p296_p5 = scmp.lt.s32.totalorder %s16928_s25, 1  ;;  %vm585_vm1 = vcmask 64512  }
  0x38   : > { %13663 = vmatprep.mubr.msk.f32.mxu1 %vm16863_vm0, %v16864_v1  ;;  %13628 = vmatprep.mubr.msk.f32.mxu0 %vm16863_vm0, %v16864_v1  ;;  %v402_v8 = vld [vmem:[#allocation2 + $0xa0] sm:$0xff]  ;;  %v15261_v9 = vpack.c.bf16 %v309_v6, %v308_v4  ;;  %v310_v10 = vld [vmem:[#allocation2 + $0x10] sm:$0xff]  ;;  %v311_v11 = vld [vmem:[#allocation2 + $0x18] sm:$0xff]  ;;  %s16865_s15 = smov 120   ;;  %s16866_s16 = smov 112   ;;  %vm1942_vm4 = vcmask 130048  }
  0x39   : > { %15286 = vmatpush3.bf16.msra.mxu1 %v15285_v5  ;;  %v15288_v12 = vpack.c.bf16 %v402_v8, %v401_v7  ;;  %v15264_v13 = vpack.c.bf16 %v311_v11, %v310_v10  ;;  %v403_v14 = vld [vmem:[#allocation2 + $0xa8] sm:$0xff]  ;;  %v404_v15 = vld [vmem:[#allocation2 + $0xb0] sm:$0xff]  ;;  %v312_v16 = vld [vmem:[#allocation2 + $0x20] sm:$0xff]  ;;  %s17008_s9 = scalar_select %p296_p5, %s16928_s25, 1 }
  0x3a   : > { %15262 = vmatpush3.bf16.msra.mxu0 %v15261_v9  ;;  %15287 = vmatprep.subr.bf16.mxu1 %v16862_v0  ;;  %v313_v17 = vld [vmem:[#allocation2 + $0x28] sm:$0xff]  ;;  %v15291_v18 = vpack.c.bf16 %v404_v15, %v403_v14  ;;  %v405_v20 = vld [vmem:[#allocation2 + $0xb8] sm:$0xff]  ;;  %v406_v21 = vld [vmem:[#allocation2 + $0xc0] sm:$0xff]  ;;  %s16867_s17 = smov 104   ;;  %s17256_s28 = sand.u32 1, %s16849_s22  }
  0x3b   : > { %15263 = vmatprep.subr.bf16.mxu0 %v16862_v0  ;;  %v15267_v19 = vpack.c.bf16 %v313_v17, %v312_v16  ;;  %v314_v22 = vld [vmem:[#allocation2 + $0x30] sm:$0xff]  ;;  %v315_v23 = vld [vmem:[#allocation2 + $0x38] sm:$0xff]  ;;  %v15294_v24 = vpack.c.bf16 %v406_v21, %v405_v20  ;;  %v407_v26 = vld [vmem:[#allocation2 + $0xc8] sm:$0xff]  ;;  %s12487_s11 = sshll.u32 %s17008_s9, 3  ;;  %s12761_s18 = sshll.u32 %s17008_s9, 4 }
  0x3c   : > { %v15270_v25 = vpack.c.bf16 %v315_v23, %v314_v22  ;;  %v408_v27 = vld [vmem:[#allocation2 + $0xd0] sm:$0xff]  ;;  %v316_v28 = vld [vmem:[#allocation2 + $0x40] sm:$0xff]  ;;  %v317_v29 = vld [vmem:[#allocation2 + $0x48] sm:$0xff]  ;;  %s299_s14 = scalar_lea.vmem %s18278_s0, %s12487_s11  ;;  %s17138_s26 = scalar_lea.vmem %s18279_s1, %s12761_s18 }
  0x3d   : > { %15289 = vmatpush3.bf16.msra.mxu1 %v15288_v12  ;;  %v15297_v30 = vpack.c.bf16 %v408_v27, %v407_v26  ;;  %v15273_v31 = vpack.c.bf16 %v317_v29, %v316_v28  ;;  %v409_v32 = vld [vmem:[#allocation2 + $0xd8] sm:$0xff]  ;;  %v410_v33 = vld [vmem:[#allocation2 + $0xe0] sm:$0xff]  ;;  %v318_v34 = vld [vmem:[#allocation2 + $0x50] sm:$0xff]  ;;  %s12484_s29 = sshll.u32 %s17256_s28, 4  ;;  %s12486_s9 = sshll.u32 %s17256_s28, 5 }
  0x3e   : > { %15265 = vmatpush3.bf16.msra.mxu0 %v15264_v13  ;;  %15290 = vmatprep.subr.bf16.mxu1 %v16862_v0  ;;  %v319_v35 = vld [vmem:[#allocation2 + $0x58] sm:$0xff]  ;;  %v15300_v36 = vpack.c.bf16 %v410_v33, %v409_v32  ;;  %v411_v38 = vld [vmem:[#allocation2 + $0xe8] sm:$0xff]  ;;  %v412_v39 = vld [vmem:[#allocation2 + $0xf0] sm:$0xff]  ;;  %s17266_s10 = scalar_lea.vmem [#allocation8], %s12484_s29  ;;  %s17561_s11 = scalar_lea.vmem [#allocation9], %s12486_s9 }
  0x3f   : > { %15266 = vmatprep.subr.bf16.mxu0 %v16862_v0  ;;  %v15276_v37 = vpack.c.bf16 %v319_v35, %v318_v34  ;;  %v320_v40 = vld [vmem:[#allocation2 + $0x60] sm:$0xff]  ;;  %v321_v41 = vld [vmem:[#allocation2 + $0x68] sm:$0xff]  ;;  %v15303_v42 = vpack.c.bf16 %v412_v39, %v411_v38  ;;  %v413_v44 = vld [vmem:[#allocation2 + $0xf8] sm:$0xff]  ;;  %s12483_s12 = sshll.u32 %s17256_s28, 3  ;;  %s12173_s19 = scalar_lea.sflag [#allocation4], %s17256_s28 }
  0x40   : > { %v15279_v43 = vpack.c.bf16 %v321_v41, %v320_v40  ;;  %v414_v45 = vld [vmem:[#allocation2 + $0x100] sm:$0xff]  ;;  %v322_v46 = vld [vmem:[#allocation2 + $0x70] sm:$0xff]  ;;  %v323_v47 = vld [vmem:[#allocation2 + $0x78] sm:$0xff]  ;;  %s18031_s13 = scalar_lea.vmem [#allocation5], %s12483_s12  ;;  %p18297_p9 = scmp.ne.s32.totalorder %s18288_s7, 0 }
  0x41   : > { %15292 = vmatpush3.bf16.msra.mxu1 %v15291_v18  ;;  %v15306_v48 = vpack.c.bf16 %v414_v45, %v413_v44  ;;  %v15282_v49 = vpack.c.bf16 %v323_v47, %v322_v46  ;;  %v17018_v50 = vld [vmem:[%s299_s14] sm:$0xff]  ;;  %v12491_v51 = vld [vmem:[#allocation2 + $0x108] ss:$0 sm:$0xff]  ;;  %v490_v59 = vld [vmem:[#allocation2 + $0x110] sm:$0xff]  ;;  %s12753_s14 = sshll.u32 %s16928_s25, 7  ;;  %s12199_s18 = sshll.u32 %s18031_s13, 4  ;;  %s12200_s18 = int_to_ptr.vmem [resolvable:$true] %s12199_s18 }
  0x42   : > { %15268 = vmatpush3.bf16.msra.mxu0 %v15267_v19  ;;  %15293 = vmatprep.subr.bf16.mxu1 %v16862_v0  ;;  %v12490_v52 = vld [vmem:[#allocation2 + $0x80] ss:$0 sm:$0xff]  ;;  %v491_v60 = vld [vmem:[#allocation2 + $0x118] sm:$0xff]  ;;  %v493_v63 = vld [vmem:[#allocation2 + $0x128] sm:$0xff]  ;;  %s16759_s20 = scalar_lea.vmem %s12200_s18, 128 }
  0x43   : > { %15269 = vmatprep.subr.bf16.mxu0 %v16862_v0  ;;  %v492_v61 = vld [vmem:[#allocation2 + $0x120] sm:$0xff]  ;;  %v15309_v62 = vpack.c.bf16 %v491_v60, %v490_v59  ;;  %v494_v3 = vld [vmem:[#allocation2 + $0x130] sm:$0xff]  ;;  %v495_v4 = vld [vmem:[#allocation2 + $0x138] sm:$0xff]  ;;  %p16760_p6 = scmp.ne.s32.totalorder %s12200_s18, %s16759_s20 }
  0x44   : > { %v15312_v2 = vpack.c.bf16 %v493_v63, %v492_v61  ;;  %v15315_v5 = vpack.c.bf16 %v495_v4, %v494_v3  ;;  %v496_v6 = vld [vmem:[#allocation2 + $0x140] sm:$0xff]  ;;  %v497_v7 = vld [vmem:[#allocation2 + $0x148] sm:$0xff]  ;;  %v498_v9 = vld [vmem:[#allocation2 + $0x150] sm:$0xff] }
  0x45   : > { %15295 = vmatpush3.bf16.msra.mxu1 %v15294_v24  ;;  %v15318_v8 = vpack.c.bf16 %v497_v7, %v496_v6  ;;  %v499_v10 = vld [vmem:[#allocation2 + $0x158] sm:$0xff]  ;;  %v500_v12 = vld [vmem:[#allocation2 + $0x160] sm:$0xff]  ;;  %v501_v13 = vld [vmem:[#allocation2 + $0x168] sm:$0xff]  ;;  %p16761_p10 = pnand %p16760_p6, %p18297_p9 }
  0x46   : > { %15271 = vmatpush3.bf16.msra.mxu0 %v15270_v25  ;;  %15296 = vmatprep.subr.bf16.mxu1 %v16862_v0  ;;  %v15321_v11 = vpack.c.bf16 %v499_v10, %v498_v9  ;;  %v15324_v14 = vpack.c.bf16 %v501_v13, %v500_v12  ;;  %v502_v15 = vld [vmem:[#allocation2 + $0x170] sm:$0xff]  ;;  %v503_v16 = vld [vmem:[#allocation2 + $0x178] sm:$0xff]  ;;  %v504_v18 = vld [vmem:[#allocation2 + $0x180] sm:$0xff] }
  0x47   : > { %15272 = vmatprep.subr.bf16.mxu0 %v16862_v0  ;;  %v15327_v17 = vpack.c.bf16 %v503_v16, %v502_v15  ;;  %v505_v19 = vld [vmem:[#allocation2 + $0x188] sm:$0xff]  ;;  %vm17158_vm3 = vmpackc.low %vm585_vm1, %vm585_vm1  ;;  %p16762_p12 = pneg %p16761_p10 }
  0x48   : > { %v15330_v20 = vpack.c.bf16 %v505_v19, %v504_v18 }
  0x49   : > { %15298 = vmatpush3.bf16.msra.mxu1 %v15297_v30  ;;  %v12492_v30 = vld [vmem:[#allocation2 + $0x190] ss:$0 sm:$0xff] }
  0x4a   : > { %15274 = vmatpush3.bf16.msra.mxu0 %v15273_v31  ;;  %15299 = vmatprep.subr.bf16.mxu1 %v16862_v0 }
  0x4b   : > { %15275 = vmatprep.subr.bf16.mxu0 %v16862_v0 }
  0x4d   : > { %15301 = vmatpush3.bf16.msra.mxu1 %v15300_v36 }
  0x4e   : > { %15277 = vmatpush3.bf16.msra.mxu0 %v15276_v37  ;;  %15302 = vmatprep.subr.bf16.mxu1 %v16862_v0 }
  0x4f   : > { %15278 = vmatprep.subr.bf16.mxu0 %v16862_v0 }
  0x51   : > { %15304 = vmatpush3.bf16.msra.mxu1 %v15303_v42 }
  0x52   : > { %15280 = vmatpush3.bf16.msra.mxu0 %v15279_v43  ;;  %15305 = vmatprep.subr.bf16.mxu1 %v16862_v0 }
  0x53   : > { %15281 = vmatprep.subr.bf16.mxu0 %v16862_v0 }
  0x55   : > { %15307 = vmatpush3.bf16.msra.mxu1 %v15306_v48 }
  0x56   : > { %15283 = vmatpush3.bf16.msra.mxu0 %v15282_v49  ;;  %13701 = vmatprep.subr.mxu1 %v16864_v1 }
  0x57   : > { %15308 = vmatprep.subr.bf16.mxu0 %v16862_v0 }
  0x58   : > { %13664 = vmatmul.mubr.f32.vlgmr.msra.gmra.mrb[0].mxu1 %v17018_v50 }
  0x59   : > { %13629 = vmatmul.mubr.f32.vlgmr.msra.gmra.mrb[0].mxu0 %v17018_v50  ;;  %13703 = vmatprep.mubr.msk.f32.mxu1 %vm16863_vm0, %v16864_v1 }
  0x5a   : > { %13698 = vmatprep.mubr.msk.f32.mxu0 %vm16863_vm0, %v16864_v1  ;;  %15310 = vmatpush3.bf16.msra.mxu0 %v15309_v62 }
  0x5b   : > { %15311 = vmatprep.subr.bf16.mxu0 %v16862_v0 }
  0x5e   : > { %15313 = vmatpush3.bf16.msra.mxu0 %v15312_v2 }
  0x5f   : > { %15314 = vmatprep.subr.bf16.mxu0 %v16862_v0 }
  0x62   : > { %15316 = vmatpush3.bf16.msra.mxu0 %v15315_v5 }
  0x63   : > { %15317 = vmatprep.subr.bf16.mxu0 %v16862_v0 }
  0x66   : > { %15319 = vmatpush3.bf16.msra.mxu0 %v15318_v8 }
  0x67   : > { %15320 = vmatprep.subr.bf16.mxu0 %v16862_v0 }
  0x6a   : > { %15322 = vmatpush3.bf16.msra.mxu0 %v15321_v11 }
  0x6b   : > { %15323 = vmatprep.subr.bf16.mxu0 %v16862_v0 }
  0x6e   : > { %15325 = vmatpush3.bf16.msra.mxu0 %v15324_v14 }
  0x6f   : > { %15326 = vmatprep.subr.bf16.mxu0 %v16862_v0 }
  0x72   : > { %15328 = vmatpush3.bf16.msra.mxu0 %v15327_v17 }
  0x73   : > { %15329 = vmatprep.subr.bf16.mxu0 %v16862_v0 }
  0x76   : > { %15331 = vmatpush3.bf16.msra.mxu0 %v15330_v20 }
  0x77   : > { %13741 = vmatprep.subr.mxu0 %v16864_v1 }
  0x79   : > { %13699 = vmatmul.mubr.f32.vlgmr.msra.gmra.mrb[2].mxu0 %v17018_v50 }
  0x7a   : > { %13743 = vmatprep.mubr.msk.f32.mxu0 %vm16863_vm0, %v16864_v1 }
 0x12b   : > { %v486_v53 = vpop.f32.mrb[0].mxu1 }
 0x12c   : > { %v17028_v54 = vadd.f32 %v12491_v51, %v486_v53  ;;  %v13665_v55 = vpop.f32.mrb[1].mxu1  ;;  %v395_v56 = vpop.f32.mrb[0].mxu0 }
 0x12d   : > { %v17030_v57 = vadd.f32 %v12490_v52, %v395_v56  ;;  %v13630_v58 = vpop.f32.mrb[1].mxu0  ;;  %v582_v56 = vld [vmem:[#allocation2 + $0x1a0] sm:$0xff] }
 0x12e   : > { %749 = vrot.lane.b32.xlu1 %v17028_v54, %s16865_s15  ;;  %13702 = vmatpush3.xpose.msk.msra.mxu1 %vm585_vm1, %v17028_v54  ;;  %v581_v58 = vld [vmem:[#allocation2 + $0x198] sm:$0xff] }
 0x12f   : > { %13706 = vmatprep.subr.mxu1 %v16864_v1 }
 0x131   : > { %13704 = vmatmul.mubr.msk.f32.vlgmr.msra.gmra.mrb[2].mxu1 %vm585_vm1, %v17030_v57 }
 0x132   : > { %747 = vrot.lane.b32.xlu1 %v17030_v57, %s16865_s15  ;;  %13708 = vmatprep.mubr.msk.f32.mxu1 %vm16863_vm0, %v16864_v1 }
 0x14c   : > { %v577_v31 = vpop.f32.mrb[2].mxu0 }
 0x14d   : > { %v17056_v32 = vadd.f32 %v12492_v30, %v577_v31  ;;  %v13700_v33 = vpop.f32.mrb[3].mxu0 }
 0x14e   : > { %v584_v33 = vld [vmem:[#allocation2 + $0x1b0] sm:$0xff] }
 0x14f   : > { %13707 = vmatpush3.msra.mxu1 %v17056_v32 }
 0x150   : > { %13711 = vmatprep.subr.mxu1 %v16864_v1 }
 0x1a0   : > { %v750_v36 = vpop.permute.xlu1 %749 }
 0x1a4   : > { %v748_v38 = vpop.permute.xlu1 %747 }
 0x204   : > { %v658_v21 = vpop.f32.mrb[2].mxu1 }
 0x205   : > { %v662_v22 = vmul.f32 0.35355338, %v658_v21  ;;  %v13705_v23 = vpop.f32.mrb[3].mxu1 }
 0x207   : > { %v663_v24 = vsel %vm585_vm1, %v662_v22, -inf }
 0x208   : > { %664 = vmax.xlane.f32.xlu0 %v663_v24 }
 0x295   : > { %v665_v25 = vpop.xlane.xlu0 %664 }
 0x296   : > { %v666_v26 = vsub.f32 %v662_v22, %v665_v25 }
 0x298   : > { %v667_v27 = vmul.f32 1.442695, %v666_v26 }
 0x29a   : > { %16501 = vpow2.f32 %v667_v27 }
 0x2a4   : > { %v16502_v28 = vpop.eup %16501 }
 0x2a5   : > { %v669_v29 = vsel %vm585_vm1, %v16502_v28, 0.0 }
 0x2a6   : > { %670 = vadd.xlane.f32.xlu0 %v669_v29 }
 0x333   : > { %v671_v34 = vpop.xlane.xlu0 %670 }
 0x334   : > { %16503 = vrcp.f32 %v671_v34 }
 0x33e   : > { %v16504_v35 = vpop.eup %16503 }
 0x33f   : > { %v673_v37 = vmul.f32 %v16504_v35, %v16502_v28 }
 0x341   : > { %13709 = vmatmul.mubr.msk.f32.vlgmr.msra.gmra.mrb[4].mxu1 %vm585_vm1, %v673_v37 }
 0x342   : > { %13712 = vmatpush3.xpose.msk.msra.mxu1 %vm585_vm1, %v750_v36  ;;  %13713 = vmatprep.mubr.msk.f32.mxu1 %vm16863_vm0, %v16864_v1 }
 0x343   : > { %13716 = vmatprep.subr.mxu1 %v16864_v1 }
 0x345   : > { %13714 = vmatmul.mubr.msk.f32.vlgmr.msra.gmra.mrb[6].mxu1 %vm585_vm1, %v748_v38 }
 0x346   : > { %13718 = vmatprep.mubr.msk.f32.mxu1 %vm16863_vm0, %v16864_v1 }
 0x414   : > { %v743_v39 = vpop.f32.mrb[4].mxu1 }
 0x415   : > { %v13710_v40 = vpop.f32.mrb[5].mxu1 }
 0x418   : > { %v821_v41 = vpop.f32.mrb[6].mxu1 }
 0x419   : > { %v825_v42 = vmul.f32 0.35355338, %v821_v41  ;;  %v13715_v43 = vpop.f32.mrb[7].mxu1  ;;  %v1549_v41 = vlaneseq }
 0x41a   : > { %v12509_v43 = vld [vmem:[#allocation2 + $0x218] ss:$0 sm:$0xff] }
 0x41b   : > { %v826_v44 = vsel %vm585_vm1, %v825_v42, -inf }
 0x41c   : > { %827 = vmax.xlane.f32.xlu0 %v826_v44  ;;  %v17123_v44 = vand.u32 127, %v1549_v41  ;;  %v1590_v41 = vld [vmem:[#allocation2 + $0x2a8] sm:$0xff] }
 0x41e   : > { %vm1551_vm2 = vcmp.lt.s32.totalorder %v17123_v44, 32 }
 0x432   : > { %838 = vrot.lane.b32.xlu0 %v17056_v32, %s16865_s15 }
 0x436   : > { %1062 = vrot.lane.b32.xlu0 %v17028_v54, %s16866_s16 }
 0x43a   : > { %1060 = vrot.lane.b32.xlu0 %v17030_v57, %s16866_s16 }
 0x4a9   : > { %v828_v45 = vpop.xlane.xlu0 %827 }
 0x4aa   : > { %v829_v46 = vsub.f32 %v825_v42, %v828_v45 }
 0x4ac   : > { %v830_v47 = vmul.f32 1.442695, %v829_v46 }
 0x4ad   : > { %v839_v48 = vpop.permute.xlu0 %838 }
 0x4ae   : > { %16505 = vpow2.f32 %v830_v47  ;;  %13717 = vmatpush3.msra.mxu1 %v839_v48 }
 0x4af   : > { %13721 = vmatprep.subr.mxu1 %v16864_v1 }
 0x4b8   : > { %v16506_v49 = vpop.eup %16505 }
 0x4b9   : > { %v832_v51 = vsel %vm585_vm1, %v16506_v49, 0.0 }
 0x4ba   : > { %833 = vadd.xlane.f32.xlu1 %v832_v51  ;;  %v1666_v51 = vld [vmem:[#allocation2 + $0x2b8] sm:$0xff] }
 0x4cb   : > { %1150 = vrot.lane.b32.xlu1 %v17056_v32, %s16866_s16 }
 0x4cf   : > { %1302 = vrot.lane.b32.xlu1 %v17028_v54, %s16867_s17  ;;  %v1063_v54 = vpop.permute.xlu0 %1062 }
 0x4d3   : > { %v1061_v61 = vpop.permute.xlu0 %1060 }
 0x547   : > { %v834_v52 = vpop.xlane.xlu1 %833 }
 0x548   : > { %16507 = vrcp.f32 %v834_v52  ;;  %v1667_v52 = vld [vmem:[#allocation2 + $0x2c0] sm:$0xff] }
 0x54b   : > { %v1151_v62 = vpop.permute.xlu1 %1150 }
 0x54f   : > { %v1303_v15 = vpop.permute.xlu1 %1302 }
 0x552   : > { %v16508_v53 = vpop.eup %16507 }
 0x553   : > { %v836_v55 = vmul.f32 %v16508_v53, %v16506_v49  ;;  %v1668_v53 = vld [vmem:[#allocation2 + $0x2c8] sm:$0xff] }
 0x555   : > { %13719 = vmatmul.mubr.msk.f32.vlgmr.msra.gmra.mrb[8].mxu1 %vm585_vm1, %v836_v55  ;;  %v15356_v55 = vpack.c.bf16 %v1667_v52, %v1666_v51  ;;  %v12511_v51 = vld [vmem:[#allocation2 + $0x228] ss:$0 sm:$0xff] }
 0x556   : > { %13722 = vmatpush3.msra.mxu1 %v582_v56  ;;  %13723 = vmatprep.mubr.msk.f32.mxu1 %vm16863_vm0, %v16864_v1  ;;  %v1669_v56 = vld [vmem:[#allocation2 + $0x2d0] sm:$0xff] }
 0x557   : > { %13726 = vmatprep.subr.mxu1 %v16864_v1 }
 0x628   : > { %v910_v59 = vpop.f32.mrb[8].mxu1 }
 0x629   : > { %v13720_v60 = vpop.f32.mrb[9].mxu1  ;;  %13724 = vmatmul.mubr.msk.f32.vlgmr.msra.gmra.mrb[10].mxu1 %vm585_vm1, %v910_v59  ;;  %v15360_v59 = vpack.c.bf16 %v1669_v56, %v1668_v53 }
 0x62a   : > { %13727 = vmatpush3.msra.mxu1 %v581_v58  ;;  %13728 = vmatprep.mubr.msk.f32.mxu1 %vm16863_vm0, %v16864_v1  ;;  %v1670_v58 = vld [vmem:[#allocation2 + $0x2d8] sm:$0xff]  ;;  %v1671_v60 = vld [vmem:[#allocation2 + $0x2e0] sm:$0xff] }
 0x62b   : > { %13731 = vmatprep.subr.mxu1 %v16864_v1 }
 0x62d   : > { %13729 = vmatmul.mubr.msk.f32.vlgmr.msra.gmra.mrb[12].mxu1 %vm585_vm1, %v743_v39 }
 0x62e   : > { %13733 = vmatprep.mubr.msk.f32.mxu1 %vm16863_vm0, %v16864_v1 }
 0x631   : > { %13732 = vmatpush3.xpose.msk.msra.mxu1 %vm585_vm1, %v1063_v54  ;;  %v1575_v54 = vld [vmem:[#allocation2 + $0x230] sm:$0xff] }
 0x632   : > { %13736 = vmatprep.subr.mxu1 %v16864_v1 }
 0x634   : > { %13734 = vmatmul.mubr.msk.f32.vlgmr.msra.gmra.mrb[14].mxu1 %vm585_vm1, %v1061_v61  ;;  %v1576_v61 = vld [vmem:[#allocation2 + $0x238] sm:$0xff] }
 0x635   : > { %13737 = vmatpush3.msra.mxu1 %v1151_v62  ;;  %13738 = vmatprep.mubr.msk.f32.mxu1 %vm16863_vm0, %v16864_v1  ;;  %v15333_v62 = vpack.c.bf16 %v1576_v61, %v1575_v54 }
 0x636   : > { %13746 = vmatprep.subr.mxu1 %v16864_v1 }
 0x6fc   : > { %v983_v63 = vpop.f32.mrb[10].mxu1 }
 0x6fd   : > { %v13725_v2 = vpop.f32.mrb[11].mxu1 }
 0x6fe   : > { %v1578_v2 = vld [vmem:[#allocation2 + $0x248] sm:$0xff] }
 0x700   : > { %v1056_v3 = vpop.f32.mrb[12].mxu1 }
 0x701   : > { %v1057_v4 = vadd.f32 %v1056_v3, %v983_v63  ;;  %v13730_v5 = vpop.f32.mrb[13].mxu1  ;;  %v1577_v63 = vld [vmem:[#allocation2 + $0x240] sm:$0xff]  ;;  %v1672_v3 = vld [vmem:[#allocation2 + $0x2e8] sm:$0xff] }
 0x702   : > { %v1673_v5 = vld [vmem:[#allocation2 + $0x2f0] sm:$0xff] }
 0x707   : > { %v1134_v6 = vpop.f32.mrb[14].mxu1 }
 0x708   : > { %v1138_v7 = vmul.f32 0.35355338, %v1134_v6  ;;  %v13735_v8 = vpop.f32.mrb[15].mxu1  ;;  %v1579_v6 = vld [vmem:[#allocation2 + $0x250] sm:$0xff] }
 0x709   : > { %v15368_v8 = vpack.c.bf16 %v1673_v5, %v1672_v3  ;;  %v1763_v5 = vld [vmem:[#allocation2 + $0x348] sm:$0xff] }
 0x70a   : > { %v1139_v9 = vsel %vm585_vm1, %v1138_v7, -inf }
 0x70b   : > { %1140 = vmax.xlane.f32.xlu0 %v1139_v9 }
 0x798   : > { %v1141_v10 = vpop.xlane.xlu0 %1140 }
 0x799   : > { %v1142_v11 = vsub.f32 %v1138_v7, %v1141_v10  ;;  %v1580_v7 = vld [vmem:[#allocation2 + $0x258] sm:$0xff] }
 0x79a   : > { %v15339_v9 = vpack.c.bf16 %v1580_v7, %v1579_v6  ;;  %v1674_v10 = vld [vmem:[#allocation2 + $0x2f8] sm:$0xff]  ;;  %v1764_v6 = vld [vmem:[#allocation2 + $0x350] sm:$0xff] }
 0x79b   : > { %v1143_v12 = vmul.f32 1.442695, %v1142_v11  ;;  %v1675_v11 = vld [vmem:[#allocation2 + $0x300] sm:$0xff] }
 0x79d   : > { %16509 = vpow2.f32 %v1143_v12  ;;  %v15372_v12 = vpack.c.bf16 %v1675_v11, %v1674_v10  ;;  %v1766_v10 = vld [vmem:[#allocation2 + $0x360] sm:$0xff]  ;;  %v1767_v11 = vld [vmem:[#allocation2 + $0x368] sm:$0xff] }
 0x7a7   : > { %v16510_v13 = vpop.eup %16509 }
 0x7a8   : > { %v1145_v14 = vsel %vm585_vm1, %v16510_v13, 0.0 }
 0x7a9   : > { %1146 = vadd.xlane.f32.xlu1 %v1145_v14  ;;  %v1677_v14 = vld [vmem:[#allocation2 + $0x310] sm:$0xff] }
 0x7ba   : > { %1300 = vrot.lane.b32.xlu1 %v17030_v57, %s16867_s17  ;;  %v583_v57 = vld [vmem:[#allocation2 + $0x1a8] sm:$0xff] }
 0x7bb   : > { %13742 = vmatpush3.msra.mxu0 %v583_v57 }
 0x7bc   : > { %13751 = vmatprep.subr.mxu0 %v16864_v1 }
 0x836   : > { %v1147_v16 = vpop.xlane.xlu1 %1146 }
 0x837   : > { %16511 = vrcp.f32 %v1147_v16 }
 0x83a   : > { %v1301_v19 = vpop.permute.xlu1 %1300 }
 0x841   : > { %v16512_v17 = vpop.eup %16511 }
 0x842   : > { %v1149_v18 = vmul.f32 %v16512_v17, %v16510_v13  ;;  %v1676_v13 = vld [vmem:[#allocation2 + $0x308] sm:$0xff] }
 0x844   : > { %13739 = vmatmul.mubr.msk.f32.vlgmr.msra.gmra.mrb[16].mxu1 %vm585_vm1, %v1149_v18 }
 0x845   : > { %13747 = vmatpush3.xpose.msk.msra.mxu1 %vm585_vm1, %v1303_v15  ;;  %13748 = vmatprep.mubr.msk.f32.mxu1 %vm16863_vm0, %v16864_v1  ;;  %v15376_v15 = vpack.c.bf16 %v1677_v14, %v1676_v13  ;;  %v1768_v13 = vld [vmem:[#allocation2 + $0x370] sm:$0xff]  ;;  %v1769_v14 = vld [vmem:[#allocation2 + $0x378] sm:$0xff] }
 0x846   : > { %13756 = vmatprep.subr.mxu1 %v16864_v1 }
 0x848   : > { %13749 = vmatmul.mubr.msk.f32.vlgmr.msra.gmra.mrb[18].mxu1 %vm585_vm1, %v1301_v19 }
 0x849   : > { %13758 = vmatprep.mubr.msk.f32.mxu1 %vm16863_vm0, %v16864_v1  ;;  %13757 = vmatpush3.msra.mxu1 %v584_v33  ;;  %v1585_v33 = vld [vmem:[#allocation2 + $0x280] sm:$0xff] }
 0x84a   : > { %15357 = vmatprep.subr.bf16.mxu1 %v15356_v55 }
 0x917   : > { %v1222_v20 = vpop.f32.mrb[16].mxu1 }
 0x918   : > { %v13740_v21 = vpop.f32.mrb[17].mxu1  ;;  %13744 = vmatmul.mubr.msk.f32.vlgmr.msra.gmra.mrb[4].mxu0 %vm585_vm1, %v1222_v20  ;;  %v1581_v20 = vld [vmem:[#allocation2 + $0x260] sm:$0xff] }
 0x919   : > { %13753 = vmatprep.mubr.msk.f32.mxu0 %vm16863_vm0, %v16864_v1  ;;  %v1582_v21 = vld [vmem:[#allocation2 + $0x268] sm:$0xff] }
 0x91b   : > { %v1374_v22 = vpop.f32.mrb[18].mxu1 }
 0x91c   : > { %v1378_v23 = vmul.f32 0.35355338, %v1374_v22  ;;  %v13750_v24 = vpop.f32.mrb[19].mxu1  ;;  %v1678_v22 = vld [vmem:[#allocation2 + $0x318] sm:$0xff] }
 0x91d   : > { %v1679_v24 = vld [vmem:[#allocation2 + $0x320] sm:$0xff] }
 0x91e   : > { %v1379_v25 = vsel %vm585_vm1, %v1378_v23, -inf }
 0x91f   : > { %1380 = vmax.xlane.f32.xlu0 %v1379_v25  ;;  %v15380_v25 = vpack.c.bf16 %v1679_v24, %v1678_v22  ;;  %v1775_v22 = vld [vmem:[#allocation2 + $0x3a8] sm:$0xff]  ;;  %v1776_v24 = vld [vmem:[#allocation2 + $0x3b0] sm:$0xff] }
 0x935   : > { %1390 = vrot.lane.b32.xlu0 %v17056_v32, %s16867_s17 }
 0x9ac   : > { %v1381_v26 = vpop.xlane.xlu0 %1380 }
 0x9ad   : > { %v1382_v27 = vsub.f32 %v1378_v23, %v1381_v26  ;;  %v15342_v23 = vpack.c.bf16 %v1582_v21, %v1581_v20  ;;  %v1583_v26 = vld [vmem:[#allocation2 + $0x270] sm:$0xff]  ;;  %v1774_v21 = vld [vmem:[#allocation2 + $0x3a0] sm:$0xff] }
 0x9af   : > { %v1383_v28 = vmul.f32 1.442695, %v1382_v27  ;;  %v1584_v27 = vld [vmem:[#allocation2 + $0x278] sm:$0xff] }
 0x9b0   : > { %v1391_v29 = vpop.permute.xlu0 %1390 }
 0x9b1   : > { %16513 = vpow2.f32 %v1383_v28  ;;  %13752 = vmatpush3.msra.mxu0 %v1391_v29  ;;  %v1680_v28 = vld [vmem:[#allocation2 + $0x328] sm:$0xff]  ;;  %v15345_v29 = vpack.c.bf16 %v1584_v27, %v1583_v26 }
 0x9b2   : > { %15332 = vmatprep.subr.bf16.mxu0 %v16862_v0 }
 0x9bb   : > { %v16514_v30 = vpop.eup %16513 }
 0x9bc   : > { %v1385_v31 = vsel %vm585_vm1, %v16514_v30, 0.0 }
 0x9bd   : > { %1386 = vadd.xlane.f32.xlu1 %v1385_v31  ;;  %v17142_v31 = vld [vmem:[%s17138_s26] sm:$0xff] }
 0x9eb   : > { %v1295_v34 = vpop.f32.mrb[4].mxu0 }
 0x9ec   : > { %v1299_v35 = vadd.f32 %v1295_v34, %v1057_v4  ;;  %v13745_v36 = vpop.f32.mrb[5].mxu0  ;;  %v15336_v4 = vpack.c.bf16 %v1578_v2, %v1577_v63  ;;  %v12512_v63 = vld [vmem:[#allocation2 + $0x2b0] ss:$0 sm:$0xff] }
 0xa4a   : > { %v1387_v37 = vpop.xlane.xlu1 %1386 }
 0xa4b   : > { %16515 = vrcp.f32 %v1387_v37  ;;  %v1587_v37 = vld [vmem:[#allocation2 + $0x290] sm:$0xff] }
 0xa55   : > { %v16516_v32 = vpop.eup %16515 }
 0xa56   : > { %v1389_v38 = vmul.f32 %v16516_v32, %v16514_v30  ;;  %v1681_v30 = vld [vmem:[#allocation2 + $0x330] sm:$0xff]  ;;  %v1588_v32 = vld [vmem:[#allocation2 + $0x298] sm:$0xff] }
 0xa57   : > { %v15384_v34 = vpack.c.bf16 %v1681_v30, %v1680_v28 }
 0xa58   : > { %13754 = vmatmul.mubr.msk.f32.vlgmr.msra.gmra.mrb[6].mxu0 %vm585_vm1, %v1389_v38  ;;  %v17147_v38 = vld [vmem:[%s17138_s26 + $0x8] sm:$0xff] }
 0xa59   : > { %13793 = vmatprep.mubr.msk.f32.mxu0 %vm16863_vm0, %v16864_v1  ;;  %15334 = vmatpush3.bf16.msra.mxu0 %v15333_v62 }
 0xa5a   : > { %15335 = vmatprep.subr.bf16.mxu0 %v16862_v0 }
 0xa5d   : > { %15337 = vmatpush3.bf16.msra.mxu0 %v15336_v4  ;;  %v1762_v4 = vld [vmem:[#allocation2 + $0x340] sm:$0xff] }
 0xa5e   : > { %15338 = vmatprep.subr.bf16.mxu0 %v16862_v0  ;;  %v15388_v7 = vpack.c.bf16 %v1763_v5, %v1762_v4 }
 0xa61   : > { %15340 = vmatpush3.bf16.msra.mxu0 %v15339_v9 }
 0xa62   : > { %15341 = vmatprep.subr.bf16.mxu0 %v16862_v0 }
 0xa65   : > { %15343 = vmatpush3.bf16.msra.mxu0 %v15342_v23  ;;  %v15412_v23 = vpack.c.bf16 %v1775_v22, %v1774_v21 }
 0xa66   : > { %15344 = vmatprep.subr.bf16.mxu0 %v16862_v0 }
 0xa69   : > { %15346 = vmatpush3.bf16.msra.mxu0 %v15345_v29 }
 0xa6a   : > { %15347 = vmatprep.subr.bf16.mxu0 %v16862_v0 }
 0xb2b   : > { %v1462_v39 = vpop.f32.mrb[6].mxu0 }
 0xb2c   : > { %v13755_v40 = vpop.f32.mrb[7].mxu0  ;;  %13759 = vmatmul.mubr.msk.f32.vlgmr.msra.gmra.mrb[20].mxu1 %vm585_vm1, %v1462_v39  ;;  %v15351_v39 = vpack.c.bf16 %v1588_v32, %v1587_v37 }
 0xb2d   : > { %15359 = vmatpush3.bf16.msra.mxu1 %v15356_v55  ;;  %13828 = vmatprep.mubr.f32.mxu1 %v17142_v31  ;;  %v1589_v40 = vld [vmem:[#allocation2 + $0x2a0] sm:$0xff]  ;;  %v12513_v55 = vld [vmem:[#allocation2 + $0x338] ss:$0 sm:$0xff] }
 0xb2e   : > { %15361 = vmatprep.subr.bf16.mxu1 %v15360_v59 }
 0xb31   : > { %15363 = vmatpush3.bf16.msra.mxu1 %v15360_v59 }
 0xbff   : > { %v1535_v42 = vpop.f32.mrb[20].mxu1 }
 0xc00   : > { %v1539_v45 = vadd.f32 %v1535_v42, %v1299_v35  ;;  %v13760_v46 = vpop.f32.mrb[21].mxu1  ;;  %v1586_v35 = vld [vmem:[#allocation2 + $0x288] sm:$0xff]  ;;  %v15354_v42 = vpack.c.bf16 %v1590_v41, %v1589_v40  ;;  %v12514_v40 = vld [vmem:[#allocation2 + $0x3c0] ss:$0 sm:$0xff] }
 0xc01   : > { %v15348_v36 = vpack.c.bf16 %v1586_v35, %v1585_v33 }
 0xc02   : > { %v1545_v47 = vadd.f32 %v12509_v43, %v1539_v45 }
 0xc03   : > { %15349 = vmatpush3.bf16.msra.mxu0 %v15348_v36 }
 0xc04   : > { %v1546_v48 = vadd.f32 %v1545_v47, %v17018_v50  ;;  %v15364_v50 = vpack.c.bf16 %v1671_v60, %v1670_v58  ;;  %15350 = vmatprep.subr.bf16.mxu0 %v16862_v0 }
 0xc06   : > { %v1552_v49 = vsel %vm1551_vm2, %v1546_v48, 0.0  ;;  %15365 = vmatprep.subr.bf16.mxu1 %v15364_v50 }
 0xc07   : > { %1553 = vadd.xlane.f32.xlu0 %v1552_v49  ;;  %15367 = vmatpush3.bf16.msra.mxu1 %v15364_v50 }
 0xc08   : > { %15369 = vmatprep.subr.bf16.mxu1 %v15368_v8  ;;  %15352 = vmatpush3.bf16.msra.mxu0 %v15351_v39 }
 0xc09   : > { %15353 = vmatprep.subr.bf16.mxu0 %v16862_v0 }
 0xc0b   : > { %15371 = vmatpush3.bf16.msra.mxu1 %v15368_v8  ;;  %v1765_v8 = vld [vmem:[#allocation2 + $0x358] sm:$0xff] }
 0xc0c   : > { %15373 = vmatprep.subr.bf16.mxu1 %v15372_v12  ;;  %15355 = vmatpush3.bf16.msra.mxu0 %v15354_v42  ;;  %v15392_v9 = vpack.c.bf16 %v1765_v8, %v1764_v6 }
 0xc0d   : > { %15389 = vmatprep.subr.bf16.mxu0 %v15388_v7 }
 0xc0f   : > { %15375 = vmatpush3.bf16.msra.mxu1 %v15372_v12  ;;  %v15396_v12 = vpack.c.bf16 %v1767_v11, %v1766_v10 }
 0xc10   : > { %15377 = vmatprep.subr.bf16.mxu1 %v15376_v15 }
 0xc13   : > { %15379 = vmatpush3.bf16.msra.mxu1 %v15376_v15  ;;  %v15400_v15 = vpack.c.bf16 %v1769_v14, %v1768_v13 }
 0xc14   : > { %15381 = vmatprep.subr.bf16.mxu1 %v15380_v25 }
 0xc17   : > { %15383 = vmatpush3.bf16.msra.mxu1 %v15380_v25  ;;  %v1777_v25 = vld [vmem:[#allocation2 + $0x3b8] sm:$0xff] }
 0xc18   : > { %15385 = vmatprep.subr.bf16.mxu1 %v15384_v34  ;;  %v15416_v26 = vpack.c.bf16 %v1777_v25, %v1776_v24 }
 0xc1b   : > { %15387 = vmatpush3.bf16.msra.mxu1 %v15384_v34 }
 0xc1c   : > { %15420 = vmatprep.subr.bf16.mxu1 %v16862_v0 }
 0xc1e   : > { %13829 = vmatmul.mubr.f32.vlgmr.msra.gmra.mrb[22].mxu1 %v17147_v38 }
 0xc1f   : > { %13870 = vmatprep.mubr.msk.f32.mxu1 %vm16863_vm0, %v16864_v1 }
 0xc94   : > { %v1554_v16 = vpop.xlane.xlu0 %1553 }
 0xc95   : > { %v1555_v17 = vmul.f32 0.03125, %v1554_v16  ;;  %v1770_v16 = vld [vmem:[#allocation2 + $0x380] sm:$0xff] }
 0xc97   : > { %v1556_v18 = vsub.f32 %v1546_v48, %v1555_v17  ;;  %v12510_v48 = vld [vmem:[#allocation2 + $0x220] ss:$0 sm:$0xff]  ;;  %v1771_v17 = vld [vmem:[#allocation2 + $0x388] sm:$0xff] }
 0xc99   : > { %v1557_v19 = vsel %vm1551_vm2, %v1556_v18, 0.0  ;;  %v15404_v18 = vpack.c.bf16 %v1771_v17, %v1770_v16 }
 0xc9a   : > { %v1558_v57 = vmul.f32 %v1557_v19, %v1557_v19 }
 0xc9c   : > { %1559 = vadd.xlane.f32.xlu1 %v1558_v57  ;;  %v1773_v57 = vld [vmem:[#allocation2 + $0x398] sm:$0xff] }
 0xcf1   : > { %v13830_v56 = vpop.f32.mrb[22].mxu1 }
 0xcf2   : > { %v1759_v58 = vadd.f32 %v13830_v56, %v12513_v55  ;;  %v1753_v59 = vpop.f32.mrb[23].mxu1 }
 0xcf3   : > { %v1754_v60 = vadd.f32 %v12513_v55, %v1753_v59 }
 0xcf5   : > { %v15421_v61 = vpack.c.bf16 %v1759_v58, %v1754_v60  ;;  %v17162_v62 = vpack.i.bf16 %v1759_v58, %v1754_v60 }
 0xcf7   : > { %15423 = vmatpush3.bf16.xpose.msk.msra.mxu1 %vm17158_vm3, %v15421_v61 }
 0xcf8   : > { %15424 = vmatprep.subr.bf16.mxu1 %v16862_v0 }
 0xd29   : > { %v1560_v43 = vpop.xlane.xlu1 %1559 }
 0xd2a   : > { %v1561_v45 = vmul.f32 0.03125, %v1560_v43 }
 0xd2c   : > { %v1562_v46 = vadd.f32 1e-05, %v1561_v45 }
 0xd2e   : > { %16517 = vrsqrt.f32 %v1562_v46 }
 0xd38   : > { %v16518_v47 = vpop.eup %16517 }
 0xd39   : > { %v1564_v49 = vmul.f32 %v16518_v47, %v1557_v19  ;;  %v1772_v19 = vld [vmem:[#allocation2 + $0x390] sm:$0xff] }
 0xd3a   : > { %v15408_v20 = vpack.c.bf16 %v1773_v57, %v1772_v19 }
 0xd3b   : > { %v1569_v52 = vmul.f32 %v12510_v48, %v1564_v49 }
 0xd3d   : > { %v1574_v53 = vadd.f32 %v12511_v51, %v1569_v52 }
 0xd3f   : > { %13794 = vmatmul.mubr.f32.vlgmr.msra.gmra.mrb[8].mxu0 %v1574_v53 }
 0xd40   : > { %13863 = vmatprep.mubr.f32.mxu0 %v17142_v31  ;;  %15391 = vmatpush3.bf16.msra.mxu0 %v15388_v7 }
 0xd41   : > { %15393 = vmatprep.subr.bf16.mxu0 %v15392_v9 }
 0xd44   : > { %15395 = vmatpush3.bf16.msra.mxu0 %v15392_v9 }
 0xd45   : > { %15397 = vmatprep.subr.bf16.mxu0 %v15396_v12 }
 0xd48   : > { %15399 = vmatpush3.bf16.msra.mxu0 %v15396_v12 }
 0xd49   : > { %15401 = vmatprep.subr.bf16.mxu0 %v15400_v15 }
 0xd4c   : > { %15403 = vmatpush3.bf16.msra.mxu0 %v15400_v15 }
 0xd4d   : > { %15405 = vmatprep.subr.bf16.mxu0 %v15404_v18 }
 0xd50   : > { %15407 = vmatpush3.bf16.msra.mxu0 %v15404_v18 }
 0xd51   : > { %15409 = vmatprep.subr.bf16.mxu0 %v15408_v20 }
 0xd54   : > { %15411 = vmatpush3.bf16.msra.mxu0 %v15408_v20 }
 0xd55   : > { %15413 = vmatprep.subr.bf16.mxu0 %v15412_v23 }
 0xd58   : > { %15415 = vmatpush3.bf16.msra.mxu0 %v15412_v23 }
 0xd59   : > { %15417 = vmatprep.subr.bf16.mxu0 %v15416_v26 }
 0xd5c   : > { %15419 = vmatpush3.bf16.msra.mxu0 %v15416_v26 }
 0xd5d   : > { %15434 = vmatprep.subr.bf16.mxu0 %v16862_v0 }
 0xd5f   : > { %13864 = vmatmul.mubr.f32.vlgmr.msra.gmra.mrb[10].mxu0 %v17147_v38 }
 0xd60   : > { %13908 = vmatprep.mubr.msk.f32.mxu0 %vm16863_vm0, %v16864_v1 }
 0xe12   : > { %v1662_v2 = vpop.f32.mrb[8].mxu0 }
 0xe13   : > { %v17167_v50 = vadd.f32 %v12512_v63, %v1662_v2  ;;  %v13795_v3 = vpop.f32.mrb[9].mxu0 }
 0xe15   : > { %2028 = vrot.lane.b32.xlu0 %v17167_v50, %s16865_s15  ;;  %13871 = vmatmul.mubr.msk.f32.vlgmr.msra.gmra.mrb[24].mxu1 %vm585_vm1, %v17167_v50 }
 0xe16   : > { %13877 = vmatprep.mubr.msk.f32.mxu1 %vm16863_vm0, %v16864_v1 }
 0xe32   : > { %v13865_v33 = vpop.f32.mrb[10].mxu0 }
 0xe33   : > { %v1849_v34 = vpop.f32.mrb[11].mxu0  ;;  %v1855_v41 = vadd.f32 %v13865_v33, %v12514_v40 }
 0xe34   : > { %v1850_v42 = vadd.f32 %v12514_v40, %v1849_v34 }
 0xe36   : > { %v15425_v43 = vpack.c.bf16 %v1855_v41, %v1850_v42  ;;  %v17181_v45 = vpack.i.bf16 %v1855_v41, %v1850_v42 }
 0xe38   : > { %15426 = vmatpush3.bf16.msra.mxu1 %v15425_v43 }
 0xe39   : > { %15427 = vmatprep.subr.bf16.mxu1 %v16862_v0 }
 0xe87   : > { %v2029_v61 = vpop.permute.xlu0 %2028 }
 0xee8   : > { %v1937_v27 = vpop.f32.mrb[24].mxu1 }
 0xee9   : > { %v1941_v28 = vmul.f32 0.35355338, %v1937_v27  ;;  %v13872_v29 = vpop.f32.mrb[25].mxu1 }
 0xeeb   : > { %v1943_v30 = vsel %vm1942_vm4, %v1941_v28, -inf }
 0xeec   : > { %1944 = vmax.xlane.f32.xlu1 %v1943_v30  ;;  %v1859_v30 = vld [vmem:[#allocation2 + $0x3d0] sm:$0xff] }
 0xf79   : > { %v1945_v35 = vpop.xlane.xlu1 %1944 }
 0xf7a   : > { %v1946_v36 = vsub.f32 %v1941_v28, %v1945_v35  ;;  %v1858_v35 = vld [vmem:[#allocation2 + $0x3c8] sm:$0xff] }
 0xf7c   : > { %v1947_v37 = vmul.f32 1.442695, %v1946_v36 }
 0xf7e   : > { %16519 = vpow2.f32 %v1947_v37 }
 0xf88   : > { %v16520_v32 = vpop.eup %16519 }
 0xf89   : > { %v1949_v39 = vsel %vm1942_vm4, %v16520_v32, 0.0 }
 0xf8a   : > { %1950 = vadd.xlane.f32.xlu1 %v1949_v39 }
 0xf9b   : > { %16382 = vrot.lane.b32.xlu1 %v17162_v62, %s16865_s15 }
 0xf9f   : > { %16387 = vrot.lane.b32.xlu1 %v17162_v62, %s16866_s16 }
 0xfa3   : > { %2350 = vrot.lane.b32.xlu1 %v17167_v50, %s16866_s16 }
0x1017   : > { %v1951_v46 = vpop.xlane.xlu1 %1950 }
0x1018   : > { %16521 = vrcp.f32 %v1951_v46 }
0x101b   : > { %v16383_v47 = vpop.permute.xlu1 %16382 }
0x101c   : > { %v16385_v49 = vunpack.i.h.bf16 %v16383_v47  ;;  %v16384_v51 = vunpack.i.l.bf16 %v16383_v47 }
0x101e   : > { %v15428_v59 = vpack.c.bf16 %v16385_v49, %v16384_v51  ;;  %v1860_v49 = vld [vmem:[#allocation2 + $0x3d8] sm:$0xff] }
0x101f   : > { %v16388_v48 = vpop.permute.xlu1 %16387 }
0x1020   : > { %v16390_v52 = vunpack.i.h.bf16 %v16388_v48  ;;  %v16389_v53 = vunpack.i.l.bf16 %v16388_v48 }
0x1022   : > { %v16522_v55 = vpop.eup %16521  ;;  %v15435_v56 = vpack.c.bf16 %v16390_v52, %v16389_v53 }
0x1023   : > { %v17190_v58 = vmul.f32 %v16522_v55, %v16520_v32  ;;  %v2351_v60 = vpop.permute.xlu1 %2350 }
0x1024   : > { %15437 = vmatpush3.bf16.xpose.msk.msra.mxu0 %vm17158_vm3, %v15435_v56 }
0x1025   : > { %13878 = vmatmul.mubr.msk.f32.vlgmr.msra.gmra.mrb[26].mxu1 %vm1942_vm4, %v17190_v58  ;;  %15441 = vmatprep.subr.bf16.mxu0 %v16862_v0 }
0x1026   : > { %15430 = vmatpush3.bf16.xpose.msk.msra.mxu1 %vm17158_vm3, %v15428_v59  ;;  %13884 = vmatprep.mubr.msk.f32.mxu1 %vm16863_vm0, %v16864_v1 }
0x1027   : > { %15431 = vmatprep.subr.bf16.mxu1 %v16862_v0 }
0x102b   : > { %13909 = vmatmul.mubr.msk.f32.vlgmr.msra.gmra.mrb[12].mxu0 %vm585_vm1, %v2351_v60 }
0x102c   : > { %13927 = vmatprep.mubr.msk.f32.mxu0 %vm16863_vm0, %v16864_v1 }
0x102d   : > { %13885 = vmatmul.mubr.msk.f32.vlgmr.msra.gmra.mrb[28].mxu1 %vm585_vm1, %v2029_v61 }
0x102e   : > { %13891 = vmatprep.mubr.msk.f32.mxu1 %vm16863_vm0, %v16864_v1 }
0x10f8   : > { %v17208_v63 = vpop.f32.mrb[26].mxu1 }
0x10f9   : > { %v13879_v2 = vpop.f32.mrb[27].mxu1 }
0x10fe   : > { %v2428_v3 = vpop.f32.mrb[12].mxu0 }
0x10ff   : > { %v13910_v4 = vpop.f32.mrb[13].mxu0  ;;  %v2432_v9 = vmul.f32 0.35355338, %v2428_v3 }
0x1100   : > { %v2106_v5 = vpop.f32.mrb[28].mxu1 }
0x1101   : > { %v2110_v6 = vmul.f32 0.35355338, %v2106_v5  ;;  %v13886_v7 = vpop.f32.mrb[29].mxu1  ;;  %v2433_v10 = vsel %vm1942_vm4, %v2432_v9, -inf }
0x1103   : > { %v2111_v8 = vsel %vm1942_vm4, %v2110_v6, -inf }
0x1104   : > { %2112 = vmax.xlane.f32.xlu1 %v2111_v8 }
0x1115   : > { %16392 = vrot.lane.b32.xlu1 %v17181_v45, %s16865_s15 }
0x1119   : > { %2598 = vrot.lane.b32.xlu1 %v17167_v50, %s16867_s17 }
0x113d   : > { %2434 = vmax.xlane.f32.xlu1 %v2433_v10 }
0x1191   : > { %v2113_v11 = vpop.xlane.xlu1 %2112 }
0x1192   : > { %v2114_v12 = vsub.f32 %v2110_v6, %v2113_v11 }
0x1194   : > { %v2115_v13 = vmul.f32 1.442695, %v2114_v12 }
0x1195   : > { %v16393_v14 = vpop.permute.xlu1 %16392 }
0x1196   : > { %16523 = vpow2.f32 %v2115_v13  ;;  %v16395_v15 = vunpack.i.h.bf16 %v16393_v14  ;;  %v16394_v16 = vunpack.i.l.bf16 %v16393_v14  ;;  %v1861_v13 = vld [vmem:[#allocation2 + $0x3e0] sm:$0xff] }
0x1198   : > { %v15432_v17 = vpack.c.bf16 %v16395_v15, %v16394_v16 }
0x1199   : > { %v2599_v50 = vpop.permute.xlu1 %2598 }
0x119a   : > { %15433 = vmatpush3.bf16.msra.mxu1 %v15432_v17 }
0x119b   : > { %13894 = vmatprep.subr.mxu1 %v16864_v1 }
0x11a0   : > { %v16524_v18 = vpop.eup %16523 }
0x11a1   : > { %v2117_v19 = vsel %vm1942_vm4, %v16524_v18, 0.0 }
0x11a2   : > { %2118 = vadd.xlane.f32.xlu0 %v2117_v19 }
0x11b8   : > { %16397 = vrot.lane.b32.xlu0 %v17162_v62, %s16867_s17 }
0x11ca   : > { %v2435_v57 = vpop.xlane.xlu1 %2434 }
0x11cb   : > { %v2436_v20 = vsub.f32 %v2432_v9, %v2435_v57 }
0x11cd   : > { %v2437_v21 = vmul.f32 1.442695, %v2436_v20  ;;  %v12535_v20 = vld [vmem:[#allocation2 + $0x448] ss:$0 sm:$0xff] }
0x11cf   : > { %16525 = vpow2.f32 %v2437_v21 }
0x11d9   : > { %v16526_v22 = vpop.eup %16525 }
0x11da   : > { %v2439_v23 = vsel %vm1942_vm4, %v16526_v22, 0.0 }
0x11db   : > { %2440 = vadd.xlane.f32.xlu0 %v2439_v23 }
0x11f1   : > { %16402 = vrot.lane.b32.xlu0 %v17181_v45, %s16866_s16 }
0x122f   : > { %v2119_v24 = vpop.xlane.xlu0 %2118 }
0x1230   : > { %16527 = vrcp.f32 %v2119_v24 }
0x1233   : > { %v16398_v25 = vpop.permute.xlu0 %16397 }
0x1234   : > { %v16400_v26 = vunpack.i.h.bf16 %v16398_v25  ;;  %v16399_v27 = vunpack.i.l.bf16 %v16398_v25  ;;  %v2878_v25 = vld [vmem:[#allocation2 + $0x460] sm:$0xff] }
0x1236   : > { %v15442_v28 = vpack.c.bf16 %v16400_v26, %v16399_v27  ;;  %v2879_v26 = vld [vmem:[#allocation2 + $0x468] sm:$0xff]  ;;  %v2880_v27 = vld [vmem:[#allocation2 + $0x470] sm:$0xff] }
0x1238   : > { %15444 = vmatpush3.bf16.xpose.msk.msra.mxu0 %vm17158_vm3, %v15442_v28  ;;  %v15449_v28 = vpack.c.bf16 %v2879_v26, %v2878_v25  ;;  %v2984_v26 = vld [vmem:[#allocation2 + $0x558] sm:$0xff] }
0x1239   : > { %15448 = vmatprep.subr.bf16.mxu0 %v16862_v0 }
0x123a   : > { %v16528_v62 = vpop.eup %16527 }
0x123b   : > { %v2121_v29 = vmul.f32 %v16528_v62, %v16524_v18  ;;  %v2881_v62 = vld [vmem:[#allocation2 + $0x478] sm:$0xff] }
0x123d   : > { %13892 = vmatmul.mubr.msk.f32.vlgmr.msra.gmra.mrb[30].mxu1 %vm1942_vm4, %v2121_v29 }
0x123e   : > { %13896 = vmatprep.mubr.msk.f32.mxu1 %vm16863_vm0, %v16864_v1  ;;  %13895 = vmatpush3.msra.mxu1 %v1859_v30  ;;  %v2882_v30 = vld [vmem:[#allocation2 + $0x480] sm:$0xff] }
0x123f   : > { %13928 = vmatmul.mubr.msk.f32.vlgmr.msra.gmra.mrb[14].mxu0 %vm585_vm1, %v2599_v50  ;;  %13899 = vmatprep.subr.mxu1 %v16864_v1 }
0x1240   : > { %13974 = vmatprep.mubr.msk.f32.mxu0 %vm16863_vm0, %v16864_v1  ;;  %15450 = vmatpush3.bf16.msra.mxu0 %v15449_v28 }
0x1241   : > { %15451 = vmatprep.subr.bf16.mxu0 %v16862_v0 }
0x1268   : > { %v2441_v33 = vpop.xlane.xlu0 %2440 }
0x1269   : > { %16529 = vrcp.f32 %v2441_v33  ;;  %v2883_v33 = vld [vmem:[#allocation2 + $0x488] sm:$0xff] }
0x126c   : > { %v16403_v34 = vpop.permute.xlu0 %16402 }
0x126d   : > { %v16405_v36 = vunpack.i.h.bf16 %v16403_v34  ;;  %v16404_v37 = vunpack.i.l.bf16 %v16403_v34  ;;  %v15455_v34 = vpack.c.bf16 %v2883_v33, %v2882_v30  ;;  %v3087_v33 = vld [vmem:[#allocation2 + $0xb00] sm:$0xff] }
0x126f   : > { %v15439_v46 = vpack.c.bf16 %v16405_v36, %v16404_v37 }
0x1273   : > { %v16530_v43 = vpop.eup %16529 }
0x1274   : > { %v2443_v48 = vmul.f32 %v16530_v43, %v16526_v22  ;;  %v2886_v43 = vld [vmem:[#allocation2 + $0x4a0] sm:$0xff] }
0x1310   : > { %v2200_v32 = vpop.f32.mrb[30].mxu1 }
0x1311   : > { %v13893_v39 = vpop.f32.mrb[31].mxu1  ;;  %13897 = vmatmul.mubr.msk.f32.vlgmr.msra.gmra.mrb[32].mxu1 %vm585_vm1, %v2200_v32 }
0x1312   : > { %v2676_v40 = vpop.f32.mrb[14].mxu0  ;;  %13900 = vmatpush3.msra.mxu1 %v1858_v35  ;;  %13901 = vmatprep.mubr.msk.f32.mxu1 %vm16863_vm0, %v16864_v1 }
0x1313   : > { %v2680_v41 = vmul.f32 0.35355338, %v2676_v40  ;;  %v13929_v42 = vpop.f32.mrb[15].mxu0  ;;  %15438 = vmatprep.subr.bf16.mxu1 %v16862_v0  ;;  %v2884_v40 = vld [vmem:[#allocation2 + $0x490] sm:$0xff] }
0x1315   : > { %13902 = vmatmul.mubr.msk.f32.vlgmr.msra.gmra.mrb[34].mxu1 %vm585_vm1, %v17208_v63  ;;  %v2681_v47 = vsel %vm1942_vm4, %v2680_v41, -inf }
0x1316   : > { %15440 = vmatpush3.bf16.msra.mxu1 %v15439_v46  ;;  %2682 = vmax.xlane.f32.xlu1 %v2681_v47  ;;  %v2887_v46 = vld [vmem:[#allocation2 + $0x4a8] sm:$0xff]  ;;  %v2888_v47 = vld [vmem:[#allocation2 + $0x4b0] sm:$0xff] }
0x1317   : > { %13915 = vmatprep.mubr.msk.f32.mxu1 %vm16863_vm0, %v16864_v1  ;;  %13918 = vmatprep.subr.mxu1 %v16864_v1 }
0x1319   : > { %13916 = vmatmul.mubr.msk.f32.vlgmr.msra.gmra.mrb[36].mxu1 %vm1942_vm4, %v2443_v48 }
0x131a   : > { %13920 = vmatprep.mubr.msk.f32.mxu1 %vm16863_vm0, %v16864_v1  ;;  %13919 = vmatpush3.msra.mxu1 %v1860_v49  ;;  %v2889_v49 = vld [vmem:[#allocation2 + $0x4b8] sm:$0xff] }
0x131b   : > { %15445 = vmatprep.subr.bf16.mxu1 %v16862_v0 }
0x13a3   : > { %v2683_v51 = vpop.xlane.xlu1 %2682 }
0x13a4   : > { %v2684_v52 = vsub.f32 %v2680_v41, %v2683_v51  ;;  %v2885_v41 = vld [vmem:[#allocation2 + $0x498] sm:$0xff]  ;;  %v15464_v51 = vpack.c.bf16 %v2889_v49, %v2888_v47  ;;  %v3095_v47 = vld [vmem:[#allocation2 + $0xb40] sm:$0xff] }
0x13a5   : > { %v15458_v42 = vpack.c.bf16 %v2885_v41, %v2884_v40  ;;  %v3092_v40 = vld [vmem:[#allocation2 + $0xb28] sm:$0xff] }
0x13a6   : > { %v2685_v53 = vmul.f32 1.442695, %v2684_v52  ;;  %v2890_v52 = vld [vmem:[#allocation2 + $0x4c0] sm:$0xff] }
0x13a8   : > { %16531 = vpow2.f32 %v2685_v53  ;;  %v2891_v53 = vld [vmem:[#allocation2 + $0x4c8] sm:$0xff] }
0x13b2   : > { %v16532_v55 = vpop.eup %16531 }
0x13b3   : > { %v2687_v56 = vsel %vm1942_vm4, %v16532_v55, 0.0 }
0x13b4   : > { %2688 = vadd.xlane.f32.xlu1 %v2687_v56  ;;  %v2892_v56 = vld [vmem:[#allocation2 + $0x4d0] sm:$0xff] }
0x13c5   : > { %16407 = vrot.lane.b32.xlu1 %v17181_v45, %s16867_s17  ;;  %v2122_v45 = vadd.f32 %v2121_v29, %v17190_v58  ;;  %v15452_v29 = vpack.c.bf16 %v2881_v62, %v2880_v27  ;;  %v2985_v27 = vld [vmem:[#allocation2 + $0x560] sm:$0xff]  ;;  %v3183_v62 = vld [vmem:[#allocation2 + $0xb88] sm:$0xff] }
0x13c6   : > { %v15494_v28 = vpack.c.bf16 %v2985_v27, %v2984_v26 }
0x13c7   : > { %v2444_v11 = vadd.f32 %v2443_v48, %v2122_v45  ;;  %15453 = vmatpush3.bf16.msra.mxu0 %v15452_v29  ;;  %v15461_v48 = vpack.c.bf16 %v2887_v46, %v2886_v43  ;;  %v2977_v45 = vld [vmem:[#allocation2 + $0x520] sm:$0xff]  ;;  %v3184_v29 = vld [vmem:[#allocation2 + $0xb90] sm:$0xff]  ;;  %v3094_v43 = vld [vmem:[#allocation2 + $0xb38] sm:$0xff] }
0x13c8   : > { %15454 = vmatprep.subr.bf16.mxu0 %v16862_v0  ;;  %v15528_v30 = vpack.c.bf16 %v3184_v29, %v3183_v62 }
0x13cb   : > { %15456 = vmatpush3.bf16.msra.mxu0 %v15455_v34  ;;  %v3088_v34 = vld [vmem:[#allocation2 + $0xb08] sm:$0xff] }
0x13cc   : > { %15457 = vmatprep.subr.bf16.mxu0 %v16862_v0 }
0x13cf   : > { %15459 = vmatpush3.bf16.msra.mxu0 %v15458_v42  ;;  %v3093_v42 = vld [vmem:[#allocation2 + $0xb30] sm:$0xff] }
0x13d0   : > { %15460 = vmatprep.subr.bf16.mxu0 %v16862_v0  ;;  %v15508_v46 = vpack.c.bf16 %v3094_v43, %v3093_v42  ;;  %v3282_v42 = vld [vmem:[#allocation2 + $0xc28] sm:$0xff] }
0x13d3   : > { %15462 = vmatpush3.bf16.msra.mxu0 %v15461_v48  ;;  %v3096_v48 = vld [vmem:[#allocation2 + $0xb48] sm:$0xff] }
0x13d4   : > { %15463 = vmatprep.subr.bf16.mxu0 %v16862_v0  ;;  %v15512_v49 = vpack.c.bf16 %v3096_v48, %v3095_v47  ;;  %v3284_v47 = vld [vmem:[#allocation2 + $0xc38] sm:$0xff] }
0x13d7   : > { %15465 = vmatpush3.bf16.msra.mxu0 %v15464_v51  ;;  %v3097_v51 = vld [vmem:[#allocation2 + $0xb50] sm:$0xff] }
0x13d8   : > { %15466 = vmatprep.subr.bf16.mxu0 %v16862_v0 }
0x13e4   : > { %v2273_v59 = vpop.f32.mrb[32].mxu1 }
0x13e5   : > { %v13898_v60 = vpop.f32.mrb[33].mxu1 }
0x13e8   : > { %v2346_v61 = vpop.f32.mrb[34].mxu1 }
0x13e9   : > { %v2347_v63 = vadd.f32 %v2346_v61, %v2273_v59  ;;  %v13903_v2 = vpop.f32.mrb[35].mxu1  ;;  %v2893_v59 = vld [vmem:[#allocation2 + $0x4d8] sm:$0xff]  ;;  %v2970_v61 = vld [vmem:[#allocation2 + $0x4e8] sm:$0xff] }
0x13ea   : > { %v15470_v60 = vpack.c.bf16 %v2893_v59, %v2892_v56  ;;  %v2972_v2 = vld [vmem:[#allocation2 + $0x4f8] sm:$0xff]  ;;  %v3100_v56 = vld [vmem:[#allocation2 + $0xb68] sm:$0xff] }
0x13ec   : > { %v2520_v3 = vpop.f32.mrb[36].mxu1 }
0x13ed   : > { %v13917_v4 = vpop.f32.mrb[37].mxu1  ;;  %13921 = vmatmul.mubr.msk.f32.vlgmr.msra.gmra.mrb[38].mxu1 %vm585_vm1, %v2520_v3 }
0x13ee   : > { %13934 = vmatprep.mubr.msk.f32.mxu1 %vm16863_vm0, %v16864_v1  ;;  %v2973_v4 = vld [vmem:[#allocation2 + $0x500] sm:$0xff] }
0x1441   : > { %v2689_v5 = vpop.xlane.xlu1 %2688 }
0x1442   : > { %16533 = vrcp.f32 %v2689_v5  ;;  %v15476_v5 = vpack.c.bf16 %v2973_v4, %v2972_v2  ;;  %v12538_v2 = vld [vmem:[#allocation2 + $0x4e0] ss:$0 sm:$0xff]  ;;  %v3185_v4 = vld [vmem:[#allocation2 + $0xb98] sm:$0xff] }
0x1445   : > { %v16408_v6 = vpop.permute.xlu1 %16407 }
0x1446   : > { %v16410_v7 = vunpack.i.h.bf16 %v16408_v6  ;;  %v16409_v8 = vunpack.i.l.bf16 %v16408_v6  ;;  %v2974_v6 = vld [vmem:[#allocation2 + $0x508] sm:$0xff] }
0x1448   : > { %v15446_v9 = vpack.c.bf16 %v16410_v7, %v16409_v8  ;;  %v2975_v7 = vld [vmem:[#allocation2 + $0x510] sm:$0xff] }
0x1449   : > { %v15479_v8 = vpack.c.bf16 %v2975_v7, %v2974_v6 }
0x144a   : > { %15447 = vmatpush3.bf16.msra.mxu1 %v15446_v9  ;;  %v2976_v9 = vld [vmem:[#allocation2 + $0x518] sm:$0xff] }
0x144b   : > { %13937 = vmatprep.subr.mxu1 %v16864_v1 }
0x144c   : > { %v16534_v10 = vpop.eup %16533 }
0x144d   : > { %v2691_v12 = vmul.f32 %v16534_v10, %v16532_v55  ;;  %v15467_v55 = vpack.c.bf16 %v2891_v53, %v2890_v52  ;;  %v15482_v10 = vpack.c.bf16 %v2977_v45, %v2976_v9  ;;  %v3098_v52 = vld [vmem:[#allocation2 + $0xb58] sm:$0xff]  ;;  %v3187_v45 = vld [vmem:[#allocation2 + $0xba8] sm:$0xff] }
0x144e   : > { %v15516_v53 = vpack.c.bf16 %v3098_v52, %v3097_v51  ;;  %v3286_v51 = vld [vmem:[#allocation2 + $0xc48] sm:$0xff] }
0x144f   : > { %v2692_v14 = vadd.f32 %v2691_v12, %v2444_v11  ;;  %13935 = vmatmul.mubr.msk.f32.vlgmr.msra.gmra.mrb[40].mxu1 %vm1942_vm4, %v2691_v12  ;;  %15468 = vmatpush3.bf16.msra.mxu0 %v15467_v55  ;;  %v2978_v11 = vld [vmem:[#allocation2 + $0x528] sm:$0xff]  ;;  %v2979_v12 = vld [vmem:[#allocation2 + $0x530] sm:$0xff]  ;;  %v3099_v55 = vld [vmem:[#allocation2 + $0xb60] sm:$0xff] }
0x1450   : > { %13938 = vmatpush3.msra.mxu1 %v1861_v13  ;;  %13939 = vmatprep.mubr.msk.f32.mxu1 %vm16863_vm0, %v16864_v1  ;;  %v15485_v13 = vpack.c.bf16 %v2979_v12, %v2978_v11  ;;  %v15520_v59 = vpack.c.bf16 %v3100_v56, %v3099_v55  ;;  %v3189_v12 = vld [vmem:[#allocation2 + $0xbb8] sm:$0xff] }
0x1451   : > { %v2852_v15 = vmul.f32 0.25, %v2692_v14  ;;  %15472 = vmatprep.subr.bf16.mxu1 %v16862_v0  ;;  %15469 = vmatprep.subr.bf16.mxu0 %v16862_v0  ;;  %v2980_v14 = vld [vmem:[#allocation2 + $0x538] sm:$0xff] }
0x1452   : > { %v3288_v55 = vld [vmem:[#allocation2 + $0xc58] sm:$0xff] }
0x1453   : > { %v6234_v58 = vsel %vm1942_vm4, %v2852_v15, 0.0  ;;  %15471 = vmatpush3.bf16.msra.mxu0 %v15470_v60  ;;  %v2981_v15 = vld [vmem:[#allocation2 + $0x540] sm:$0xff]  ;;  %v3101_v60 = vld [vmem:[#allocation2 + $0xb70] sm:$0xff] }
0x1454   : > { %6235 = vst [vmem:[%s17266_s10] sm:$0xff] %v6234_v58  ;;  %v15488_v58 = vpack.c.bf16 %v2981_v15, %v2980_v14  ;;  %v3191_v15 = vld [vmem:[#allocation2 + $0xbc8] sm:$0xff] }
0x14c0   : > { %v2593_v16 = vpop.f32.mrb[38].mxu1 }
0x14c1   : > { %v2597_v17 = vadd.f32 %v2593_v16, %v2347_v63  ;;  %v13922_v18 = vpop.f32.mrb[39].mxu1  ;;  %v2971_v63 = vld [vmem:[#allocation2 + $0x4f0] sm:$0xff]  ;;  %v2982_v16 = vld [vmem:[#allocation2 + $0x548] sm:$0xff] }
0x14c2   : > { %v15473_v3 = vpack.c.bf16 %v2971_v63, %v2970_v61  ;;  %v3102_v61 = vld [vmem:[#allocation2 + $0xb78] sm:$0xff] }
0x14c3   : > { %v15524_v63 = vpack.c.bf16 %v3102_v61, %v3101_v60  ;;  %v3290_v60 = vld [vmem:[#allocation2 + $0xc68] sm:$0xff] }
0x1522   : > { %v2768_v19 = vpop.f32.mrb[40].mxu1 }
0x1523   : > { %v13936_v50 = vpop.f32.mrb[41].mxu1  ;;  %13940 = vmatmul.mubr.msk.f32.vlgmr.msra.gmra.mrb[42].mxu1 %vm585_vm1, %v2768_v19 }
0x1524   : > { %14009 = vmatprep.mubr.msk.f32.mxu1 %vm16863_vm0, %v16864_v1  ;;  %15474 = vmatpush3.bf16.msra.mxu1 %v15473_v3 }
0x1525   : > { %15475 = vmatprep.subr.bf16.mxu1 %v16862_v0 }
0x1528   : > { %15477 = vmatpush3.bf16.msra.mxu1 %v15476_v5  ;;  %v3186_v5 = vld [vmem:[#allocation2 + $0xba0] sm:$0xff] }
0x1529   : > { %15478 = vmatprep.subr.bf16.mxu1 %v16862_v0  ;;  %v15532_v9 = vpack.c.bf16 %v3186_v5, %v3185_v4  ;;  %v3293_v4 = vld [vmem:[#allocation2 + $0xc80] sm:$0xff]  ;;  %v3294_v5 = vld [vmem:[#allocation2 + $0xc88] sm:$0xff] }
0x152c   : > { %15480 = vmatpush3.bf16.msra.mxu1 %v15479_v8 }
0x152d   : > { %15481 = vmatprep.subr.bf16.mxu1 %v16862_v0 }
0x1530   : > { %15483 = vmatpush3.bf16.msra.mxu1 %v15482_v10  ;;  %v3188_v10 = vld [vmem:[#allocation2 + $0xbb0] sm:$0xff] }
0x1531   : > { %15484 = vmatprep.subr.bf16.mxu1 %v16862_v0  ;;  %v15536_v11 = vpack.c.bf16 %v3188_v10, %v3187_v45 }
0x1534   : > { %15486 = vmatpush3.bf16.msra.mxu1 %v15485_v13  ;;  %v3190_v13 = vld [vmem:[#allocation2 + $0xbc0] sm:$0xff] }
0x1535   : > { %15487 = vmatprep.subr.bf16.mxu1 %v16862_v0  ;;  %v15540_v14 = vpack.c.bf16 %v3190_v13, %v3189_v12 }
0x1538   : > { %15489 = vmatpush3.bf16.msra.mxu1 %v15488_v58  ;;  %v3192_v58 = vld [vmem:[#allocation2 + $0xbd0] sm:$0xff] }
0x1539   : > { %15490 = vmatprep.subr.bf16.mxu1 %v16862_v0 }
0x15f6   : > { %v2841_v57 = vpop.f32.mrb[42].mxu1 }
0x15f7   : > { %v2845_v21 = vadd.f32 %v2841_v57, %v2597_v17  ;;  %v13941_v22 = vpop.f32.mrb[43].mxu1  ;;  %v2983_v17 = vld [vmem:[#allocation2 + $0x550] sm:$0xff] }
0x15f8   : > { %v15491_v18 = vpack.c.bf16 %v2983_v17, %v2982_v16  ;;  %v15544_v16 = vpack.c.bf16 %v3192_v58, %v3191_v15  ;;  %v3193_v17 = vld [vmem:[#allocation2 + $0xbd8] sm:$0xff] }
0x15f9   : > { %v2851_v23 = vadd.f32 %v12535_v20, %v2845_v21  ;;  %v12536_v21 = vld [vmem:[#allocation2 + $0x450] ss:$0 sm:$0xff] }
0x15fa   : > { %15492 = vmatpush3.bf16.msra.mxu1 %v15491_v18  ;;  %v3194_v18 = vld [vmem:[#allocation2 + $0xbe0] sm:$0xff] }
0x15fb   : > { %v2855_v24 = vsel %vm1551_vm2, %v2851_v23, 0.0  ;;  %15493 = vmatprep.subr.bf16.mxu1 %v16862_v0 }
0x15fc   : > { %2856 = vadd.xlane.f32.xlu0 %v2855_v24 }
0x15fe   : > { %15495 = vmatpush3.bf16.msra.mxu1 %v15494_v28 }
0x15ff   : > { %15529 = vmatprep.subr.bf16.mxu1 %v15528_v30 }
0x1689   : > { %v2857_v35 = vpop.xlane.xlu0 %2856 }
0x168a   : > { %v2858_v36 = vmul.f32 0.03125, %v2857_v35  ;;  %v15496_v35 = vpack.c.bf16 %v3088_v34, %v3087_v33 }
0x168c   : > { %v2859_v37 = vsub.f32 %v2851_v23, %v2858_v36  ;;  %v12537_v23 = vld [vmem:[#allocation2 + $0x458] ss:$0 sm:$0xff]  ;;  %15497 = vmatprep.subr.bf16.mxu0 %v15496_v35  ;;  %v3089_v36 = vld [vmem:[#allocation2 + $0xb10] sm:$0xff] }
0x168e   : > { %v17279_v32 = vsel %vm1551_vm2, %v2859_v37, 0.0  ;;  %v3090_v37 = vld [vmem:[#allocation2 + $0xb18] sm:$0xff] }
0x168f   : > { %v2861_v39 = vmul.f32 %v17279_v32, %v17279_v32 }
0x1691   : > { %2862 = vadd.xlane.f32.xlu1 %v2861_v39  ;;  %v3091_v39 = vld [vmem:[#allocation2 + $0xb20] sm:$0xff] }
0x1692   : > { %v15504_v41 = vpack.c.bf16 %v3092_v40, %v3091_v39  ;;  %v3280_v39 = vld [vmem:[#allocation2 + $0xc18] sm:$0xff]  ;;  %v3281_v40 = vld [vmem:[#allocation2 + $0xc20] sm:$0xff] }
0x1693   : > { %v15564_v43 = vpack.c.bf16 %v3282_v42, %v3281_v40 }
0x171e   : > { %v2863_v19 = vpop.xlane.xlu1 %2862 }
0x171f   : > { %v2864_v50 = vmul.f32 0.03125, %v2863_v19  ;;  %v15548_v19 = vpack.c.bf16 %v3194_v18, %v3193_v17 }
0x1721   : > { %v2865_v57 = vadd.f32 1e-05, %v2864_v50  ;;  %v3195_v50 = vld [vmem:[#allocation2 + $0xbe8] sm:$0xff] }
0x1723   : > { %16535 = vrsqrt.f32 %v2865_v57  ;;  %v3196_v57 = vld [vmem:[#allocation2 + $0xbf0] sm:$0xff] }
0x172d   : > { %v16536_v20 = vpop.eup %16535 }
0x172e   : > { %v2867_v22 = vmul.f32 %v16536_v20, %v17279_v32  ;;  %v15500_v32 = vpack.c.bf16 %v3090_v37, %v3089_v36  ;;  %v3197_v20 = vld [vmem:[#allocation2 + $0xbf8] sm:$0xff] }
0x1730   : > { %v2872_v24 = vmul.f32 %v12536_v21, %v2867_v22  ;;  %v3198_v21 = vld [vmem:[#allocation2 + $0xc00] sm:$0xff] }
0x1731   : > { %v15556_v22 = vpack.c.bf16 %v3198_v21, %v3197_v20  ;;  %v12544_v20 = vld [vmem:[#allocation2 + $0xc90] ss:$0 sm:$0xff] }
0x1732   : > { %v17295_v25 = vadd.f32 %v12537_v23, %v2872_v24  ;;  %v12542_v23 = vld [vmem:[#allocation2 + $0xb80] ss:$0 sm:$0xff] }
0x1734   : > { %13975 = vmatmul.mubr.f32.vlgmr.msra.gmra.mrb[16].mxu0 %v17295_v25 }
0x1735   : > { %14044 = vmatprep.mubr.f32.mxu0 %v17142_v31  ;;  %15499 = vmatpush3.bf16.msra.mxu0 %v15496_v35 }
0x1736   : > { %15501 = vmatprep.subr.bf16.mxu0 %v15500_v32 }
0x1739   : > { %15503 = vmatpush3.bf16.msra.mxu0 %v15500_v32  ;;  %v3279_v32 = vld [vmem:[#allocation2 + $0xc10] sm:$0xff] }
0x173a   : > { %15505 = vmatprep.subr.bf16.mxu0 %v15504_v41 }
0x173d   : > { %15507 = vmatpush3.bf16.msra.mxu0 %v15504_v41  ;;  %v15560_v41 = vpack.c.bf16 %v3280_v39, %v3279_v32 }
0x173e   : > { %15509 = vmatprep.subr.bf16.mxu0 %v15508_v46 }
0x1741   : > { %15511 = vmatpush3.bf16.msra.mxu0 %v15508_v46  ;;  %v3283_v46 = vld [vmem:[#allocation2 + $0xc30] sm:$0xff] }
0x1742   : > { %15513 = vmatprep.subr.bf16.mxu0 %v15512_v49  ;;  %v15568_v48 = vpack.c.bf16 %v3284_v47, %v3283_v46 }
0x1745   : > { %15515 = vmatpush3.bf16.msra.mxu0 %v15512_v49  ;;  %v3285_v49 = vld [vmem:[#allocation2 + $0xc40] sm:$0xff] }
0x1746   : > { %15517 = vmatprep.subr.bf16.mxu0 %v15516_v53  ;;  %v15572_v52 = vpack.c.bf16 %v3286_v51, %v3285_v49 }
0x1749   : > { %15519 = vmatpush3.bf16.msra.mxu0 %v15516_v53  ;;  %v3287_v53 = vld [vmem:[#allocation2 + $0xc50] sm:$0xff] }
0x174a   : > { %15521 = vmatprep.subr.bf16.mxu0 %v15520_v59  ;;  %v15576_v56 = vpack.c.bf16 %v3288_v55, %v3287_v53 }
0x174d   : > { %15523 = vmatpush3.bf16.msra.mxu0 %v15520_v59  ;;  %v3289_v59 = vld [vmem:[#allocation2 + $0xc60] sm:$0xff] }
0x174e   : > { %15525 = vmatprep.subr.bf16.mxu0 %v15524_v63  ;;  %v15580_v61 = vpack.c.bf16 %v3290_v60, %v3289_v59 }
0x1751   : > { %15527 = vmatpush3.bf16.msra.mxu0 %v15524_v63  ;;  %v3291_v63 = vld [vmem:[#allocation2 + $0xc70] sm:$0xff] }
0x1752   : > { %15561 = vmatprep.subr.bf16.mxu0 %v15560_v41 }
0x1754   : > { %14045 = vmatmul.mubr.f32.vlgmr.msra.gmra.mrb[18].mxu0 %v17147_v38 }
0x1755   : > { %14114 = vmatprep.mubr.f32.mxu0 %v17142_v31  ;;  %15563 = vmatpush3.bf16.msra.mxu0 %v15560_v41 }
0x1756   : > { %15565 = vmatprep.subr.bf16.mxu0 %v15564_v43 }
0x1759   : > { %15567 = vmatpush3.bf16.msra.mxu0 %v15564_v43 }
0x175a   : > { %15569 = vmatprep.subr.bf16.mxu0 %v15568_v48 }
0x175d   : > { %15571 = vmatpush3.bf16.msra.mxu0 %v15568_v48 }
0x175e   : > { %15573 = vmatprep.subr.bf16.mxu0 %v15572_v52 }
0x1761   : > { %15575 = vmatpush3.bf16.msra.mxu0 %v15572_v52 }
0x1762   : > { %15577 = vmatprep.subr.bf16.mxu0 %v15576_v56 }
0x1765   : > { %15579 = vmatpush3.bf16.msra.mxu0 %v15576_v56 }
0x1766   : > { %15581 = vmatprep.subr.bf16.mxu0 %v15580_v61 }
0x1769   : > { %15583 = vmatpush3.bf16.msra.mxu0 %v15580_v61 }
0x1807   : > { %v2965_v3 = vpop.f32.mrb[16].mxu0 }
0x1808   : > { %v2966_v6 = vadd.f32 %v12538_v2, %v2965_v3  ;;  %v13976_v7 = vpop.f32.mrb[17].mxu0  ;;  %v3292_v2 = vld [vmem:[#allocation2 + $0xc78] sm:$0xff] }
0x1809   : > { %v15584_v3 = vpack.c.bf16 %v3292_v2, %v3291_v63  ;;  %v17320_v7 = vld [vmem:[%s17138_s26 + $0x8] sm:$0xff] }
0x180a   : > { %v2969_v8 = vmax.f32 %v2966_v6, 0.0  ;;  %v15588_v6 = vpack.c.bf16 %v3294_v5, %v3293_v4 }
0x180b   : > { %15585 = vmatprep.subr.bf16.mxu0 %v15584_v3 }
0x180c   : > { %14010 = vmatmul.mubr.f32.vlgmr.msra.gmra.mrb[44].mxu1 %v2969_v8  ;;  %15587 = vmatpush3.bf16.msra.mxu0 %v15584_v3 }
0x180d   : > { %15531 = vmatpush3.bf16.msra.mxu1 %v15528_v30  ;;  %14079 = vmatprep.mubr.f32.mxu1 %v17142_v31  ;;  %v15552_v31 = vpack.c.bf16 %v3196_v57, %v3195_v50  ;;  %v12543_v30 = vld [vmem:[#allocation2 + $0xc08] ss:$0 sm:$0xff] }
0x180e   : > { %15533 = vmatprep.subr.bf16.mxu1 %v15532_v9  ;;  %15589 = vmatprep.subr.bf16.mxu0 %v15588_v6 }
0x1810   : > { %15591 = vmatpush3.bf16.msra.mxu0 %v15588_v6 }
0x1811   : > { %15535 = vmatpush3.bf16.msra.mxu1 %v15532_v9 }
0x1812   : > { %15537 = vmatprep.subr.bf16.mxu1 %v15536_v11 }
0x1813   : > { %14115 = vmatmul.mubr.f32.vlgmr.msra.gmra.mrb[20].mxu0 %v17320_v7 }
0x1815   : > { %15539 = vmatpush3.bf16.msra.mxu1 %v15536_v11 }
0x1816   : > { %15541 = vmatprep.subr.bf16.mxu1 %v15540_v14 }
0x1819   : > { %15543 = vmatpush3.bf16.msra.mxu1 %v15540_v14 }
0x181a   : > { %15545 = vmatprep.subr.bf16.mxu1 %v15544_v16 }
0x181d   : > { %15547 = vmatpush3.bf16.msra.mxu1 %v15544_v16 }
0x181e   : > { %15549 = vmatprep.subr.bf16.mxu1 %v15548_v19 }
0x1821   : > { %15551 = vmatpush3.bf16.msra.mxu1 %v15548_v19 }
0x1822   : > { %15553 = vmatprep.subr.bf16.mxu1 %v15552_v31 }
0x1825   : > { %15555 = vmatpush3.bf16.msra.mxu1 %v15552_v31 }
0x1826   : > { %15557 = vmatprep.subr.bf16.mxu1 %v15556_v22 }
0x1827   : > { %v14046_v24 = vpop.f32.mrb[18].mxu0 }
0x1828   : > { %v17303_v26 = vadd.f32 %v14046_v24, %v12542_v23  ;;  %v3174_v27 = vpop.f32.mrb[19].mxu0 }
0x1829   : > { %15559 = vmatpush3.bf16.msra.mxu1 %v15556_v22  ;;  %v17305_v28 = vadd.f32 %v12542_v23, %v3174_v27 }
0x182c   : > { %14080 = vmatmul.mubr.f32.vlgmr.msra.gmra.mrb[46].mxu1 %v17147_v38 }
0x182d   : > { %14121 = vmatprep.mubr.msk.f32.mxu1 %vm585_vm1, %v17305_v28 }
0x18df   : > { %v17309_v62 = vpop.f32.mrb[44].mxu1 }
0x18e0   : > { %v14011_v29 = vpop.f32.mrb[45].mxu1 }
0x18e6   : > { %v14116_v13 = vpop.f32.mrb[20].mxu0 }
0x18e7   : > { %v3372_v21 = vadd.f32 %v14116_v13, %v12544_v20  ;;  %v3366_v22 = vpop.f32.mrb[21].mxu0 }
0x18e8   : > { %v3367_v23 = vadd.f32 %v12544_v20, %v3366_v22 }
0x18ea   : > { %v15598_v24 = vpack.c.bf16 %v3372_v21, %v3367_v23  ;;  %v17327_v27 = vpack.i.bf16 %v3372_v21, %v3367_v23 }
0x18ff   : > { %v14081_v33 = vpop.f32.mrb[46].mxu1 }
0x1900   : > { %v3276_v34 = vadd.f32 %v14081_v33, %v12543_v30  ;;  %v3270_v35 = vpop.f32.mrb[47].mxu1 }
0x1901   : > { %v3271_v36 = vadd.f32 %v12543_v30, %v3270_v35 }
0x1903   : > { %v15592_v37 = vpack.c.bf16 %v3276_v34, %v3271_v36  ;;  %v17311_v38 = vpack.i.bf16 %v3276_v34, %v3271_v36 }
0x1905   : > { %15594 = vmatprep.subr.msk.bf16.mxu1 %vm17158_vm3, %v15592_v37 }
0x1906   : > { %15597 = vmatpush3.bf16.xpose.msk.msra.mxu1 %vm17158_vm3, %v15592_v37 }
0x1907   : > { %15599 = vmatprep.subr.bf16.mxu1 %v15598_v24 }
0x190d   : > { %14122 = vmatmul.mubr.msk.f32.vlgmr.msra.gmra.mrb[48].mxu1 %vm585_vm1, %v17303_v26 }
0x190e   : > { %15601 = vmatpush3.bf16.msra.mxu1 %v15598_v24 }
0x19e0   : > { %v14123_v8 = vpop.f32.mrb[48].mxu1 }
0x19e1   : > { %v3457_v9 = vpop.f32.mrb[49].mxu1  ;;  %v3467_v10 = vmul.f32 0.35355338, %v14123_v8 }
0x19e2   : > { %v3466_v45 = vmul.f32 0.35355338, %v3457_v9 }
0x19e3   : > { %v3471_v12 = vsel %vm1942_vm4, %v3467_v10, -inf }
0x19e4   : > { %v3468_v11 = vsel %vm1942_vm4, %v3466_v45, -inf }
0x19e5   : > { %3469 = vmax.xlane.f32.xlu0 %v3468_v11 }
0x19e9   : > { %3472 = vmax.xlane.f32.xlu0 %v3471_v12 }
0x1a72   : > { %v3470_v14 = vpop.xlane.xlu0 %3469 }
0x1a73   : > { %v3474_v15 = vsub.f32 %v3466_v45, %v3470_v14 }
0x1a75   : > { %v3476_v58 = vmul.f32 1.442695, %v3474_v15 }
0x1a76   : > { %v3473_v16 = vpop.xlane.xlu0 %3472 }
0x1a77   : > { %16537 = vpow2.f32 %v3476_v58  ;;  %v3475_v17 = vsub.f32 %v3467_v10, %v3473_v16 }
0x1a79   : > { %v3478_v18 = vmul.f32 1.442695, %v3475_v17 }
0x1a7b   : > { %16539 = vpow2.f32 %v3478_v18 }
0x1a81   : > { %v16538_v19 = vpop.eup %16537 }
0x1a82   : > { %v3480_v50 = vsel %vm1942_vm4, %v16538_v19, 0.0 }
0x1a83   : > { %3481 = vadd.xlane.f32.xlu0 %v3480_v50 }
0x1a85   : > { %v16540_v57 = vpop.eup %16539 }
0x1a86   : > { %v3483_v31 = vsel %vm1942_vm4, %v16540_v57, 0.0 }
0x1a87   : > { %3484 = vadd.xlane.f32.xlu1 %v3483_v31 }
0x1a98   : > { %3571 = vrot.lane.b32.xlu1 %v17305_v28, %s16865_s15 }
0x1a99   : > { %16412 = vrot.lane.b32.xlu0 %v17311_v38, %s16865_s15 }
0x1a9c   : > { %3573 = vrot.lane.b32.xlu1 %v17303_v26, %s16865_s15 }
0x1a9d   : > { %16417 = vrot.lane.b32.xlu0 %v17311_v38, %s16866_s16 }
0x1aa0   : > { %3937 = vrot.lane.b32.xlu1 %v17305_v28, %s16866_s16 }
0x1aa1   : > { %3939 = vrot.lane.b32.xlu0 %v17303_v26, %s16866_s16 }
0x1b10   : > { %v3482_v29 = vpop.xlane.xlu0 %3481 }
0x1b11   : > { %16541 = vrcp.f32 %v3482_v29 }
0x1b14   : > { %v3485_v30 = vpop.xlane.xlu1 %3484  ;;  %v16413_v33 = vpop.permute.xlu0 %16412 }
0x1b15   : > { %16543 = vrcp.f32 %v3485_v30  ;;  %v16415_v34 = vunpack.i.h.bf16 %v16413_v33  ;;  %v16414_v35 = vunpack.i.l.bf16 %v16413_v33 }
0x1b17   : > { %v15602_v36 = vpack.c.bf16 %v16415_v34, %v16414_v35 }
0x1b18   : > { %v3572_v37 = vpop.permute.xlu1 %3571  ;;  %v16418_v32 = vpop.permute.xlu0 %16417 }
0x1b19   : > { %v16420_v39 = vunpack.i.h.bf16 %v16418_v32  ;;  %v16419_v40 = vunpack.i.l.bf16 %v16418_v32  ;;  %15604 = vmatprep.subr.msk.bf16.mxu1 %vm17158_vm3, %v15602_v36 }
0x1b1b   : > { %v16542_v41 = vpop.eup %16541  ;;  %v15612_v42 = vpack.c.bf16 %v16420_v39, %v16419_v40 }
0x1b1c   : > { %v3574_v43 = vpop.permute.xlu1 %3573  ;;  %v3488_v46 = vmul.f32 %v16542_v41, %v16538_v19  ;;  %v3940_v51 = vpop.permute.xlu0 %3939 }
0x1b1d   : > { %15614 = vmatprep.subr.msk.bf16.mxu0 %vm17158_vm3, %v15612_v42 }
0x1b1e   : > { %14128 = vmatprep.mubr.msk.f32.mxu1 %vm1942_vm4, %v3488_v46  ;;  %15617 = vmatpush3.bf16.xpose.msk.msra.mxu0 %vm17158_vm3, %v15612_v42  ;;  %v3375_v46 = vld [vmem:[#allocation2 + $0xc98] sm:$0xff] }
0x1b1f   : > { %v16544_v47 = vpop.eup %16543 }
0x1b20   : > { %v3938_v48 = vpop.permute.xlu1 %3937  ;;  %v3489_v49 = vmul.f32 %v16544_v47, %v16540_v57  ;;  %v12539_v47 = vld [vmem:[#allocation2 + $0x568] ss:$0 sm:$0xff] }
0x1b21   : > { %14159 = vmatprep.mubr.msk.f32.mxu0 %vm585_vm1, %v3938_v48  ;;  %v3058_v48 = vadd.f32 %v12539_v47, %v17309_v62 }
0x1b22   : > { %14129 = vmatmul.mubr.msk.f32.vlgmr.msra.gmra.mrb[50].mxu1 %vm1942_vm4, %v3489_v49 }
0x1b23   : > { %15607 = vmatpush3.bf16.xpose.msk.msra.mxu1 %vm17158_vm3, %v15602_v36  ;;  %14135 = vmatprep.mubr.msk.f32.mxu1 %vm585_vm1, %v3572_v37  ;;  %v17387_v49 = vadd.f32 %v3058_v48, %v17295_v25 }
0x1b25   : > { %14160 = vmatmul.mubr.msk.f32.vlgmr.msra.gmra.mrb[22].mxu0 %vm585_vm1, %v3940_v51  ;;  %v3064_v51 = vsel %vm1551_vm2, %v17387_v49, 0.0 }
0x1b2a   : > { %14136 = vmatmul.mubr.msk.f32.vlgmr.msra.gmra.mrb[52].mxu1 %vm585_vm1, %v3574_v43  ;;  %v3376_v43 = vld [vmem:[#allocation2 + $0xca0] sm:$0xff] }
0x1bf5   : > { %v17355_v52 = vpop.f32.mrb[50].mxu1 }
0x1bf6   : > { %v17357_v53 = vpop.f32.mrb[51].mxu1 }
0x1bf8   : > { %v14161_v55 = vpop.f32.mrb[22].mxu0 }
0x1bf9   : > { %v4019_v56 = vpop.f32.mrb[23].mxu0  ;;  %v4029_v15 = vmul.f32 0.35355338, %v14161_v55 }
0x1bfa   : > { %v4028_v14 = vmul.f32 0.35355338, %v4019_v56 }
0x1bfb   : > { %v4033_v16 = vsel %vm1942_vm4, %v4029_v15, -inf }
0x1bfc   : > { %v4030_v58 = vsel %vm1942_vm4, %v4028_v14, -inf }
0x1bfd   : > { %v14137_v59 = vpop.f32.mrb[52].mxu1 }
0x1bfe   : > { %v3663_v60 = vmul.f32 0.35355338, %v14137_v59  ;;  %v3653_v61 = vpop.f32.mrb[53].mxu1 }
0x1bff   : > { %v3662_v63 = vmul.f32 0.35355338, %v3653_v61 }
0x1c00   : > { %v3667_v2 = vsel %vm1942_vm4, %v3663_v60, -inf }
0x1c01   : > { %3668 = vmax.xlane.f32.xlu0 %v3667_v2  ;;  %v3664_v3 = vsel %vm1942_vm4, %v3662_v63, -inf }
0x1c02   : > { %3665 = vmax.xlane.f32.xlu1 %v3664_v3 }
0x1c8e   : > { %v3669_v4 = vpop.xlane.xlu0 %3668 }
0x1c8f   : > { %v3671_v5 = vsub.f32 %v3663_v60, %v3669_v4  ;;  %v3666_v6 = vpop.xlane.xlu1 %3665 }
0x1c90   : > { %v3670_v8 = vsub.f32 %v3662_v63, %v3666_v6 }
0x1c91   : > { %v3674_v9 = vmul.f32 1.442695, %v3671_v5 }
0x1c92   : > { %v3672_v45 = vmul.f32 1.442695, %v3670_v8 }
0x1c93   : > { %16545 = vpow2.f32 %v3674_v9 }
0x1c94   : > { %16547 = vpow2.f32 %v3672_v45 }
0x1c9d   : > { %v16546_v10 = vpop.eup %16545 }
0x1c9e   : > { %v16548_v11 = vpop.eup %16547  ;;  %v3679_v12 = vsel %vm1942_vm4, %v16546_v10, 0.0 }
0x1c9f   : > { %3680 = vadd.xlane.f32.xlu1 %v3679_v12  ;;  %v3676_v13 = vsel %vm1942_vm4, %v16548_v11, 0.0 }
0x1ca0   : > { %3677 = vadd.xlane.f32.xlu0 %v3676_v13 }
0x1cb0   : > { %16427 = vrot.lane.b32.xlu1 %v17311_v38, %s16867_s17 }
0x1cb4   : > { %4222 = vrot.lane.b32.xlu1 %v17305_v28, %s16867_s17 }
0x1cb6   : > { %16422 = vrot.lane.b32.xlu0 %v17327_v27, %s16865_s15 }
0x1cba   : > { %4224 = vrot.lane.b32.xlu0 %v17303_v26, %s16867_s17 }
0x1cd8   : > { %4031 = vmax.xlane.f32.xlu1 %v4030_v58 }
0x1cd9   : > { %4034 = vmax.xlane.f32.xlu0 %v4033_v16 }
0x1d2c   : > { %v3681_v17 = vpop.xlane.xlu1 %3680 }
0x1d2d   : > { %16549 = vrcp.f32 %v3681_v17  ;;  %v3678_v38 = vpop.xlane.xlu0 %3677 }
0x1d2e   : > { %16551 = vrcp.f32 %v3678_v38 }
0x1d30   : > { %v16428_v18 = vpop.permute.xlu1 %16427 }
0x1d31   : > { %v16430_v28 = vunpack.i.h.bf16 %v16428_v18  ;;  %v16429_v19 = vunpack.i.l.bf16 %v16428_v18  ;;  %v16423_v50 = vpop.permute.xlu0 %16422 }
0x1d32   : > { %v16425_v57 = vunpack.i.h.bf16 %v16423_v50  ;;  %v16424_v31 = vunpack.i.l.bf16 %v16423_v50 }
0x1d33   : > { %v15622_v20 = vpack.c.bf16 %v16430_v28, %v16429_v19 }
0x1d34   : > { %v4223_v26 = vpop.permute.xlu1 %4222  ;;  %v15608_v21 = vpack.c.bf16 %v16425_v57, %v16424_v31 }
0x1d35   : > { %15624 = vmatprep.subr.msk.bf16.mxu0 %vm17158_vm3, %v15622_v20  ;;  %14178 = vmatprep.mubr.msk.f32.mxu0 %vm585_vm1, %v4223_v26  ;;  %v4225_v30 = vpop.permute.xlu0 %4224 }
0x1d36   : > { %15609 = vmatprep.subr.bf16.mxu1 %v15608_v21  ;;  %15627 = vmatpush3.bf16.xpose.msk.msra.mxu0 %vm17158_vm3, %v15622_v20 }
0x1d37   : > { %v16550_v22 = vpop.eup %16549  ;;  %15611 = vmatpush3.bf16.msra.mxu1 %v15608_v21 }
0x1d38   : > { %v16552_v23 = vpop.eup %16551  ;;  %v3685_v29 = vmul.f32 %v16550_v22, %v16546_v10  ;;  %14145 = vmatprep.subr.mxu1 %v3376_v43 }
0x1d39   : > { %v3684_v24 = vmul.f32 %v16552_v23, %v16548_v11 }
0x1d3b   : > { %14142 = vmatprep.mubr.msk.f32.mxu1 %vm1942_vm4, %v3684_v24  ;;  %v3378_v24 = vld [vmem:[#allocation2 + $0xcb0] sm:$0xff] }
0x1d3c   : > { %14143 = vmatmul.mubr.msk.f32.vlgmr.msra.gmra.mrb[54].mxu1 %vm1942_vm4, %v3685_v29 }
0x1d3d   : > { %14179 = vmatmul.mubr.msk.f32.vlgmr.msra.gmra.mrb[24].mxu0 %vm585_vm1, %v4225_v30  ;;  %14146 = vmatpush3.msra.mxu1 %v3376_v43 }
0x1d3e   : > { %14150 = vmatprep.subr.mxu1 %v3375_v46 }
0x1d65   : > { %v4032_v33 = vpop.xlane.xlu1 %4031 }
0x1d66   : > { %v4036_v34 = vsub.f32 %v4028_v14, %v4032_v33  ;;  %v4035_v35 = vpop.xlane.xlu0 %4034 }
0x1d67   : > { %v4037_v36 = vsub.f32 %v4029_v15, %v4035_v35  ;;  %v4653_v35 = vld [vmem:[#allocation2 + $0xdc0] sm:$0xff] }
0x1d68   : > { %v4038_v37 = vmul.f32 1.442695, %v4036_v34  ;;  %v4652_v34 = vld [vmem:[#allocation2 + $0xdb8] sm:$0xff] }
0x1d69   : > { %v4040_v32 = vmul.f32 1.442695, %v4037_v36  ;;  %v4654_v36 = vld [vmem:[#allocation2 + $0xdc8] sm:$0xff] }
0x1d6a   : > { %16553 = vpow2.f32 %v4038_v37  ;;  %v15665_v37 = vpack.c.bf16 %v4653_v35, %v4652_v34  ;;  %v12541_v35 = vld [vmem:[#allocation2 + $0x578] ss:$0 sm:$0xff] }
0x1d6b   : > { %16555 = vpow2.f32 %v4040_v32  ;;  %v4655_v32 = vld [vmem:[#allocation2 + $0xdd0] sm:$0xff] }
0x1d74   : > { %v16554_v39 = vpop.eup %16553 }
0x1d75   : > { %v16556_v40 = vpop.eup %16555  ;;  %v4042_v41 = vsel %vm1942_vm4, %v16554_v39, 0.0 }
0x1d76   : > { %4043 = vadd.xlane.f32.xlu0 %v4042_v41  ;;  %v4045_v42 = vsel %vm1942_vm4, %v16556_v40, 0.0 }
0x1d77   : > { %4046 = vadd.xlane.f32.xlu1 %v4045_v42  ;;  %v12577_v42 = vld [vmem:[#allocation2 + $0xd18] ss:$0 sm:$0xff] }
0x1d8c   : > { %16432 = vrot.lane.b32.xlu0 %v17327_v27, %s16866_s16 }
0x1dab   : > { %3065 = vadd.xlane.f32.xlu0 %v3064_v51 }
0x1e03   : > { %v4044_v55 = vpop.xlane.xlu0 %4043 }
0x1e04   : > { %16557 = vrcp.f32 %v4044_v55  ;;  %v4047_v59 = vpop.xlane.xlu1 %4046 }
0x1e05   : > { %16559 = vrcp.f32 %v4047_v59 }
0x1e07   : > { %v16433_v56 = vpop.permute.xlu0 %16432 }
0x1e08   : > { %v16435_v60 = vunpack.i.h.bf16 %v16433_v56  ;;  %v16434_v61 = vunpack.i.l.bf16 %v16433_v56  ;;  %v16730_v56 = vld [vmem:[%s17138_s26] sm:$0xff]  ;;  %s16868_s26 = smov [#allocation5]  }
0x1e09   : > { %s16763_s9 = sshll.u32 %s16868_s26, 4  ;;  %s16764_s9 = int_to_ptr.vmem [resolvable:$false] %s16763_s9 }
0x1e0a   : > { %v15618_v4 = vpack.c.bf16 %v16435_v60, %v16434_v61  ;;  %s16765_s12 = scalar_lea.vmem %s16764_s9, 256  ;;  %p16766_p2 = scmp.lt.s32.totalorder %s12200_s18, %s16764_s9 }
0x1e0b   : > { %p16767_p3 = scmp.lt.s32.totalorder %s16765_s12, %s16759_s20 }
0x1e0d   : > { %p16768_p4 = por %p16767_p3, %p16766_p2 }
0x1e0e   : > { %v16558_v8 = vpop.eup %16557 }
0x1e0f   : > { %v14144_v63 = vpop.f32.mrb[54].mxu1  ;;  %v16560_v45 = vpop.eup %16559  ;;  %v4050_v10 = vmul.f32 %v16558_v8, %v16554_v39  ;;  %v15668_v39 = vpack.c.bf16 %v4655_v32, %v4654_v36  ;;  %v4560_v36 = vld [vmem:[#allocation2 + $0xd50] sm:$0xff]  ;;  %p16769_p7 = pnand %p16768_p4, %p16762_p12 }
0x1e10   : > { %v3766_v2 = vpop.f32.mrb[55].mxu1  ;;  %v14180_v3 = vpop.f32.mrb[24].mxu0  ;;  %v4051_v11 = vmul.f32 %v16560_v45, %v16556_v40  ;;  %v4663_v45 = vld [vmem:[#allocation2 + $0xe10] sm:$0xff] }
0x1e11   : > { %14147 = vmatprep.mubr.msk.f32.mxu1 %vm585_vm1, %v3766_v2  ;;  %v4304_v62 = vpop.f32.mrb[25].mxu0  ;;  %v4314_v5 = vmul.f32 0.35355338, %v14180_v3  ;;  %v4656_v2 = vld [vmem:[#allocation2 + $0xdd8] sm:$0xff] }
0x1e12   : > { %v4313_v25 = vmul.f32 0.35355338, %v4304_v62  ;;  %14148 = vmatmul.mubr.msk.f32.vlgmr.msra.gmra.mrb[56].mxu1 %vm585_vm1, %v14144_v63  ;;  %v4658_v62 = vld [vmem:[#allocation2 + $0xde8] sm:$0xff] }
0x1e13   : > { %14151 = vmatpush3.msra.mxu1 %v3375_v46  ;;  %14152 = vmatprep.mubr.msk.f32.mxu1 %vm585_vm1, %v17357_v53  ;;  %v4318_v9 = vsel %vm1942_vm4, %v4314_v5, -inf  ;;  %v3377_v53 = vld [vmem:[#allocation2 + $0xca8] sm:$0xff] }
0x1e14   : > { %15619 = vmatprep.subr.bf16.mxu1 %v15618_v4  ;;  %v4315_v6 = vsel %vm1942_vm4, %v4313_v25, -inf }
0x1e15   : > { %4316 = vmax.xlane.f32.xlu1 %v4315_v6  ;;  %v4661_v6 = vld [vmem:[#allocation2 + $0xe00] sm:$0xff] }
0x1e19   : > { %4319 = vmax.xlane.f32.xlu1 %v4318_v9  ;;  %v4662_v9 = vld [vmem:[#allocation2 + $0xe08] sm:$0xff] }
0x1e1a   : > { %14153 = vmatmul.mubr.msk.f32.vlgmr.msra.gmra.mrb[56].mxu1 %vm585_vm1, %v17355_v52 }
0x1e1b   : > { %15621 = vmatpush3.bf16.msra.mxu1 %v15618_v4  ;;  %14166 = vmatprep.mubr.msk.f32.mxu1 %vm1942_vm4, %v4050_v10  ;;  %v15680_v10 = vpack.c.bf16 %v4663_v45, %v4662_v9  ;;  %v12579_v45 = vld [vmem:[#allocation2 + $0xd28] ss:$0 sm:$0xff] }
0x1e1c   : > { %14169 = vmatprep.subr.mxu1 %v3377_v53 }
0x1e1e   : > { %14167 = vmatmul.mubr.msk.f32.vlgmr.msra.gmra.mrb[58].mxu1 %vm1942_vm4, %v4051_v11  ;;  %v4664_v11 = vld [vmem:[#allocation2 + $0xe18] sm:$0xff] }
0x1e1f   : > { %14170 = vmatpush3.msra.mxu1 %v3377_v53  ;;  %v4665_v53 = vld [vmem:[#allocation2 + $0xe20] sm:$0xff] }
0x1e38   : > { %v3066_v40 = vpop.xlane.xlu0 %3065 }
0x1e39   : > { %v3067_v41 = vmul.f32 0.03125, %v3066_v40 }
0x1e3b   : > { %v3068_v46 = vsub.f32 %v17387_v49, %v3067_v41  ;;  %v4562_v41 = vld [vmem:[#allocation2 + $0xd60] sm:$0xff] }
0x1e3d   : > { %v17424_v61 = vsel %vm1551_vm2, %v3068_v46, 0.0  ;;  %v4564_v46 = vld [vmem:[#allocation2 + $0xd70] sm:$0xff] }
0x1e3e   : > { %v3070_v49 = vmul.f32 %v17424_v61, %v17424_v61 }
0x1ea2   : > { %v4317_v12 = vpop.xlane.xlu1 %4316 }
0x1ea3   : > { %v4321_v13 = vsub.f32 %v4313_v25, %v4317_v12  ;;  %v4659_v25 = vld [vmem:[#allocation2 + $0xdf0] sm:$0xff]  ;;  %v15683_v12 = vpack.c.bf16 %v4665_v53, %v4664_v11 }
0x1ea4   : > { %v15674_v4 = vpack.c.bf16 %v4659_v25, %v4658_v62 }
0x1ea5   : > { %v4323_v14 = vmul.f32 1.442695, %v4321_v13  ;;  %v4666_v13 = vld [vmem:[#allocation2 + $0xe28] sm:$0xff] }
0x1ea6   : > { %v4320_v15 = vpop.xlane.xlu1 %4319 }
0x1ea7   : > { %16561 = vpow2.f32 %v4323_v14  ;;  %v4322_v58 = vsub.f32 %v4314_v5, %v4320_v15  ;;  %v4660_v5 = vld [vmem:[#allocation2 + $0xdf8] sm:$0xff]  ;;  %v4667_v14 = vld [vmem:[#allocation2 + $0xe30] sm:$0xff] }
0x1ea8   : > { %v15677_v8 = vpack.c.bf16 %v4661_v6, %v4660_v5  ;;  %v15686_v15 = vpack.c.bf16 %v4667_v14, %v4666_v13  ;;  %v4743_v13 = vld [vmem:[#allocation2 + $0xe40] sm:$0xff]  ;;  %v4744_v14 = vld [vmem:[#allocation2 + $0xe48] sm:$0xff] }
0x1ea9   : > { %v4325_v16 = vmul.f32 1.442695, %v4322_v58  ;;  %v4556_v58 = vld [vmem:[#allocation2 + $0xd30] sm:$0xff] }
0x1eab   : > { %16563 = vpow2.f32 %v4325_v16  ;;  %v4557_v16 = vld [vmem:[#allocation2 + $0xd38] sm:$0xff] }
0x1eb1   : > { %v16562_v17 = vpop.eup %16561 }
0x1eb2   : > { %v4327_v52 = vsel %vm1942_vm4, %v16562_v17, 0.0 }
0x1eb3   : > { %4328 = vadd.xlane.f32.xlu1 %v4327_v52  ;;  %v15632_v52 = vpack.c.bf16 %v4557_v16, %v4556_v58  ;;  %v15689_v58 = vpack.c.bf16 %v4744_v14, %v4743_v13 }
0x1eb5   : > { %v16564_v38 = vpop.eup %16563  ;;  %15633 = vmatprep.subr.bf16.mxu0 %v15632_v52 }
0x1eb6   : > { %v4330_v18 = vsel %vm1942_vm4, %v16564_v38, 0.0  ;;  %15635 = vmatpush3.bf16.msra.mxu0 %v15632_v52  ;;  %v4746_v52 = vld [vmem:[#allocation2 + $0xe58] sm:$0xff] }
0x1eb7   : > { %4331 = vadd.xlane.f32.xlu1 %v4330_v18 }
0x1ec8   : > { %16437 = vrot.lane.b32.xlu1 %v17327_v27, %s16867_s17 }
0x1ef1   : > { %v14168_v28 = vpop.f32.mrb[58].mxu1 }
0x1ef2   : > { %v4130_v19 = vpop.f32.mrb[59].mxu1 }
0x1ef3   : > { %14171 = vmatprep.mubr.msk.f32.mxu1 %vm585_vm1, %v4130_v19 }
0x1ef4   : > { %14172 = vmatmul.mubr.msk.f32.vlgmr.msra.gmra.mrb[56].mxu1 %vm585_vm1, %v14168_v28 }
0x1f40   : > { %v4329_v50 = vpop.xlane.xlu1 %4328 }
0x1f41   : > { %16565 = vrcp.f32 %v4329_v50 }
0x1f44   : > { %v4332_v57 = vpop.xlane.xlu1 %4331 }
0x1f45   : > { %16567 = vrcp.f32 %v4332_v57 }
0x1f48   : > { %v16438_v31 = vpop.permute.xlu1 %16437 }
0x1f49   : > { %v16440_v20 = vunpack.i.h.bf16 %v16438_v31  ;;  %v16439_v26 = vunpack.i.l.bf16 %v16438_v31 }
0x1f4b   : > { %v16566_v21 = vpop.eup %16565  ;;  %v15628_v22 = vpack.c.bf16 %v16440_v20, %v16439_v26 }
0x1f4c   : > { %v4335_v23 = vmul.f32 %v16566_v21, %v16562_v17  ;;  %v4558_v17 = vld [vmem:[#allocation2 + $0xd40] sm:$0xff] }
0x1f4d   : > { %15629 = vmatprep.subr.bf16.mxu1 %v15628_v22 }
0x1f4e   : > { %15631 = vmatpush3.bf16.msra.mxu1 %v15628_v22  ;;  %14185 = vmatprep.mubr.msk.f32.mxu1 %vm1942_vm4, %v4335_v23 }
0x1f4f   : > { %v16568_v27 = vpop.eup %16567  ;;  %14188 = vmatprep.subr.mxu1 %v3378_v24 }
0x1f50   : > { %v4336_v29 = vmul.f32 %v16568_v27, %v16564_v38  ;;  %v4559_v38 = vld [vmem:[#allocation2 + $0xd48] sm:$0xff] }
0x1f51   : > { %v15636_v18 = vpack.c.bf16 %v4559_v38, %v4558_v17  ;;  %v4745_v17 = vld [vmem:[#allocation2 + $0xe50] sm:$0xff] }
0x1f52   : > { %14186 = vmatmul.mubr.msk.f32.vlgmr.msra.gmra.mrb[60].mxu1 %vm1942_vm4, %v4336_v29  ;;  %v15692_v38 = vpack.c.bf16 %v4746_v52, %v4745_v17 }
0x1f53   : > { %14189 = vmatpush3.msra.mxu1 %v3378_v24  ;;  %15637 = vmatprep.subr.bf16.mxu0 %v15636_v18 }
0x1f54   : > { %15664 = vmatprep.subr.bf16.mxu1 %v16862_v0  ;;  %15639 = vmatpush3.bf16.msra.mxu0 %v15636_v18  ;;  %v4747_v18 = vld [vmem:[#allocation2 + $0xe60] sm:$0xff] }
0x2025   : > { %v14187_v30 = vpop.f32.mrb[60].mxu1 }
0x2026   : > { %v4415_v33 = vpop.f32.mrb[61].mxu1 }
0x2027   : > { %14190 = vmatprep.mubr.msk.f32.mxu1 %vm585_vm1, %v4415_v33  ;;  %v12540_v33 = vld [vmem:[#allocation2 + $0x570] ss:$0 sm:$0xff] }
0x2028   : > { %14191 = vmatmul.mubr.msk.f32.vlgmr.msra.gmra.mrb[56].mxu1 %vm585_vm1, %v14187_v30 }
0x2029   : > { %14260 = vmatprep.mubr.msk.f32.mxu1 %vm16863_vm0, %v16864_v1  ;;  %15666 = vmatpush3.bf16.msra.mxu1 %v15665_v37  ;;  %v4561_v37 = vld [vmem:[#allocation2 + $0xd58] sm:$0xff] }
0x202a   : > { %15667 = vmatprep.subr.bf16.mxu1 %v16862_v0 }
0x202d   : > { %15669 = vmatpush3.bf16.msra.mxu1 %v15668_v39  ;;  %v15640_v39 = vpack.c.bf16 %v4561_v37, %v4560_v36  ;;  %v12581_v36 = vld [vmem:[#allocation2 + $0xe38] ss:$0 sm:$0xff] }
0x202e   : > { %15670 = vmatprep.subr.bf16.mxu1 %v16862_v0 }
0x202f   : > { %15641 = vmatprep.subr.bf16.mxu0 %v15640_v39 }
0x2030   : > { %15643 = vmatpush3.bf16.msra.mxu0 %v15640_v39 }
0x20fb   : > { %v14192_v43 = vpop.f32.mrb[56].mxu1 }
0x20fc   : > { %v4513_v47 = vadd.f32 %v14192_v43, %v12577_v42  ;;  %v4496_v48 = vpop.f32.mrb[57].mxu1 }
0x20fd   : > { %v4512_v51 = vadd.f32 %v12577_v42, %v4496_v48  ;;  %v4563_v42 = vld [vmem:[#allocation2 + $0xd68] sm:$0xff] }
0x20fe   : > { %v4515_v55 = vadd.f32 %v17320_v7, %v4513_v47  ;;  %v4657_v7 = vld [vmem:[#allocation2 + $0xde0] sm:$0xff]  ;;  %v15644_v43 = vpack.c.bf16 %v4563_v42, %v4562_v41  ;;  %v4565_v47 = vld [vmem:[#allocation2 + $0xd78] sm:$0xff]  ;;  %v12580_v41 = vld [vmem:[#allocation2 + $0xdb0] ss:$0 sm:$0xff] }
0x20ff   : > { %v4514_v59 = vadd.f32 %v16730_v56, %v4512_v51  ;;  %v15671_v3 = vpack.c.bf16 %v4657_v7, %v4656_v2  ;;  %v15648_v48 = vpack.c.bf16 %v4565_v47, %v4564_v46  ;;  %v4566_v51 = vld [vmem:[#allocation2 + $0xd80] sm:$0xff]  ;;  %v4568_v56 = vld [vmem:[#allocation2 + $0xd90] sm:$0xff] }
0x2100   : > { %v4519_v60 = vsel %vm1551_vm2, %v4515_v55, 0.0  ;;  %15645 = vmatprep.subr.bf16.mxu0 %v15644_v43 }
0x2101   : > { %4522 = vadd.xlane.f32.xlu0 %v4519_v60  ;;  %v4518_v63 = vsel %vm1551_vm2, %v4514_v59, 0.0  ;;  %15672 = vmatpush3.bf16.msra.mxu1 %v15671_v3  ;;  %v4569_v60 = vld [vmem:[#allocation2 + $0xd98] sm:$0xff] }
0x2102   : > { %4520 = vadd.xlane.f32.xlu1 %v4518_v63  ;;  %15673 = vmatprep.subr.bf16.mxu1 %v16862_v0  ;;  %v4570_v63 = vld [vmem:[#allocation2 + $0xda0] sm:$0xff] }
0x2103   : > { %15647 = vmatpush3.bf16.msra.mxu0 %v15644_v43 }
0x2104   : > { %15649 = vmatprep.subr.bf16.mxu0 %v15648_v48 }
0x2105   : > { %3071 = vadd.xlane.f32.xlu0 %v3070_v49  ;;  %15675 = vmatpush3.bf16.msra.mxu1 %v15674_v4  ;;  %v4571_v49 = vld [vmem:[#allocation2 + $0xda8] sm:$0xff] }
0x2106   : > { %15676 = vmatprep.subr.bf16.mxu1 %v16862_v0  ;;  %v15660_v2 = vpack.c.bf16 %v4571_v49, %v4570_v63 }
0x2107   : > { %15651 = vmatpush3.bf16.msra.mxu0 %v15648_v48  ;;  %v12582_v48 = vld [vmem:[#allocation2 + $0xec0] ss:$0 sm:$0xff] }
0x2109   : > { %15678 = vmatpush3.bf16.msra.mxu1 %v15677_v8  ;;  %v12578_v8 = vld [vmem:[#allocation2 + $0xd20] ss:$0 sm:$0xff] }
0x210a   : > { %15679 = vmatprep.subr.bf16.mxu1 %v16862_v0 }
0x210d   : > { %15681 = vmatpush3.bf16.msra.mxu1 %v15680_v10 }
0x210e   : > { %15682 = vmatprep.subr.bf16.mxu1 %v16862_v0 }
0x2111   : > { %15684 = vmatpush3.bf16.msra.mxu1 %v15683_v12 }
0x2112   : > { %15685 = vmatprep.subr.bf16.mxu1 %v16862_v0 }
0x2115   : > { %15687 = vmatpush3.bf16.msra.mxu1 %v15686_v15 }
0x218e   : > { %v4523_v28 = vpop.xlane.xlu0 %4522 }
0x218f   : > { %v4525_v19 = vmul.f32 0.03125, %v4523_v28  ;;  %v4521_v50 = vpop.xlane.xlu1 %4520  ;;  %v4748_v28 = vld [vmem:[#allocation2 + $0xe68] sm:$0xff] }
0x2190   : > { %v4524_v57 = vmul.f32 0.03125, %v4521_v50  ;;  %v4749_v50 = vld [vmem:[#allocation2 + $0xe70] sm:$0xff] }
0x2191   : > { %v4527_v31 = vsub.f32 %v4515_v55, %v4525_v19  ;;  %v4567_v55 = vld [vmem:[#allocation2 + $0xd88] sm:$0xff]  ;;  %v15695_v19 = vpack.c.bf16 %v4748_v28, %v4747_v18 }
0x2192   : > { %v4526_v20 = vsub.f32 %v4514_v59, %v4524_v57  ;;  %v3072_v26 = vpop.xlane.xlu0 %3071  ;;  %v15652_v59 = vpack.c.bf16 %v4567_v55, %v4566_v51  ;;  %v4750_v57 = vld [vmem:[#allocation2 + $0xe78] sm:$0xff] }
0x2193   : > { %v3073_v21 = vmul.f32 0.03125, %v3072_v26  ;;  %v4529_v27 = vsel %vm1551_vm2, %v4527_v31, 0.0  ;;  %v15698_v31 = vpack.c.bf16 %v4750_v57, %v4749_v50  ;;  %v4752_v26 = vld [vmem:[#allocation2 + $0xe88] sm:$0xff] }
0x2194   : > { %v4528_v22 = vsel %vm1551_vm2, %v4526_v20, 0.0  ;;  %v4531_v29 = vmul.f32 %v4529_v27, %v4529_v27  ;;  %15653 = vmatprep.subr.bf16.mxu0 %v15652_v59  ;;  %v4751_v20 = vld [vmem:[#allocation2 + $0xe80] sm:$0xff] }
0x2195   : > { %v3074_v23 = vadd.f32 1e-05, %v3073_v21  ;;  %v4530_v24 = vmul.f32 %v4528_v22, %v4528_v22  ;;  %15655 = vmatpush3.bf16.msra.mxu0 %v15652_v59  ;;  %v15701_v21 = vpack.c.bf16 %v4752_v26, %v4751_v20 }
0x2197   : > { %16569 = vrsqrt.f32 %v3074_v23  ;;  %4532 = vadd.xlane.f32.xlu0 %v4530_v24  ;;  %v4754_v23 = vld [vmem:[#allocation2 + $0xe98] sm:$0xff] }
0x219b   : > { %4534 = vadd.xlane.f32.xlu0 %v4531_v29  ;;  %v4756_v29 = vld [vmem:[#allocation2 + $0xea8] sm:$0xff] }
0x21a1   : > { %v16570_v30 = vpop.eup %16569 }
0x21a2   : > { %v3076_v34 = vmul.f32 %v16570_v30, %v17424_v61  ;;  %v15656_v61 = vpack.c.bf16 %v4569_v60, %v4568_v56 }
0x21a4   : > { %v3081_v32 = vmul.f32 %v12540_v33, %v3076_v34  ;;  %15657 = vmatprep.subr.bf16.mxu0 %v15656_v61  ;;  %v4757_v33 = vld [vmem:[#allocation2 + $0xeb0] sm:$0xff]  ;;  %v4758_v34 = vld [vmem:[#allocation2 + $0xeb8] sm:$0xff] }
0x21a5   : > { %15659 = vmatpush3.bf16.msra.mxu0 %v15656_v61 }
0x21a6   : > { %v17440_v40 = vadd.f32 %v12541_v35, %v3081_v32  ;;  %15661 = vmatprep.subr.bf16.mxu0 %v15660_v2  ;;  %v15710_v35 = vpack.c.bf16 %v4758_v34, %v4757_v33 }
0x21a8   : > { %14261 = vmatmul.mubr.f32.vlgmr.msra.gmra.mrb[62].mxu1 %v17440_v40 }
0x21a9   : > { %15663 = vmatpush3.bf16.msra.mxu0 %v15660_v2 }
0x21aa   : > { %15688 = vmatprep.subr.bf16.mxu0 %v16862_v0 }
0x2224   : > { %v4533_v7 = vpop.xlane.xlu0 %4532 }
0x2225   : > { %v4536_v3 = vmul.f32 0.03125, %v4533_v7 }
0x2227   : > { %v4538_v62 = vadd.f32 1e-05, %v4536_v3 }
0x2228   : > { %v4535_v25 = vpop.xlane.xlu0 %4534 }
0x2229   : > { %16571 = vrsqrt.f32 %v4538_v62  ;;  %v4537_v4 = vmul.f32 0.03125, %v4535_v25 }
0x222b   : > { %v4539_v5 = vadd.f32 1e-05, %v4537_v4 }
0x222d   : > { %16573 = vrsqrt.f32 %v4539_v5 }
0x2233   : > { %v16572_v6 = vpop.eup %16571 }
0x2234   : > { %v4542_v9 = vmul.f32 %v16572_v6, %v4528_v22  ;;  %v4753_v22 = vld [vmem:[#allocation2 + $0xe90] sm:$0xff] }
0x2235   : > { %v15704_v24 = vpack.c.bf16 %v4754_v23, %v4753_v22 }
0x2236   : > { %v4548_v10 = vmul.f32 %v12578_v8, %v4542_v9 }
0x2237   : > { %v16574_v11 = vpop.eup %16573 }
0x2238   : > { %v4543_v53 = vmul.f32 %v16574_v11, %v4529_v27  ;;  %v4554_v12 = vadd.f32 %v12579_v45, %v4548_v10  ;;  %v4755_v27 = vld [vmem:[#allocation2 + $0xea0] sm:$0xff] }
0x2239   : > { %v15707_v30 = vpack.c.bf16 %v4756_v29, %v4755_v27 }
0x223a   : > { %v4549_v15 = vmul.f32 %v12578_v8, %v4543_v53  ;;  %14225 = vmatprep.mubr.f32.mxu0 %v4554_v12 }
0x223c   : > { %v4555_v16 = vadd.f32 %v12579_v45, %v4549_v15 }
0x223e   : > { %14226 = vmatmul.mubr.f32.vlgmr.msra.gmra.mrb[26].mxu0 %v4555_v16 }
0x223f   : > { %15690 = vmatpush3.bf16.msra.mxu0 %v15689_v58  ;;  %14295 = vmatprep.mubr.msk.f32.mxu0 %vm16863_vm0, %v16864_v1 }
0x2240   : > { %15691 = vmatprep.subr.bf16.mxu0 %v16862_v0 }
0x2243   : > { %15693 = vmatpush3.bf16.msra.mxu0 %v15692_v38 }
0x2244   : > { %15694 = vmatprep.subr.bf16.mxu0 %v16862_v0 }
0x2247   : > { %15696 = vmatpush3.bf16.msra.mxu0 %v15695_v19 }
0x2248   : > { %15697 = vmatprep.subr.bf16.mxu0 %v16862_v0 }
0x224b   : > { %15699 = vmatpush3.bf16.msra.mxu0 %v15698_v31 }
0x224c   : > { %15700 = vmatprep.subr.bf16.mxu0 %v16862_v0 }
0x224f   : > { %15702 = vmatpush3.bf16.msra.mxu0 %v15701_v21 }
0x2250   : > { %15703 = vmatprep.subr.bf16.mxu0 %v16862_v0 }
0x2253   : > { %15705 = vmatpush3.bf16.msra.mxu0 %v15704_v24 }
0x2254   : > { %15706 = vmatprep.subr.bf16.mxu0 %v16862_v0 }
0x2257   : > { %15708 = vmatpush3.bf16.msra.mxu0 %v15707_v30 }
0x2258   : > { %15709 = vmatprep.subr.bf16.mxu0 %v16862_v0 }
0x225b   : > { %15711 = vmatpush3.bf16.msra.mxu0 %v15710_v35 }
0x225e   : > { %14296 = vmatmul.mubr.f32.vlgmr.msra.gmra.mrb[28].mxu0 %v17440_v40 }
0x227b   : > { %v4739_v37 = vpop.f32.mrb[62].mxu1 }
0x227c   : > { %v17454_v32 = vadd.f32 %v12581_v36, %v4739_v37  ;;  %v14262_v39 = vpop.f32.mrb[63].mxu1  ;;  %v4835_v37 = vld [vmem:[#allocation2 + $0xed0] sm:$0xff] }
0x227e   : > { %14298 = vmatprep.subr.msk.mxu1 %vm585_vm1, %v17454_v32 }
0x227f   : > { %14299 = vmatpush3.xpose.msk.msra.mxu1 %vm585_vm1, %v17454_v32 }
0x2311   : > { %v14227_v42 = vpop.f32.mrb[26].mxu0 }
0x2312   : > { %v4643_v43 = vpop.f32.mrb[27].mxu0  ;;  %v17462_v47 = vadd.f32 %v14227_v42, %v12580_v41 }
0x2313   : > { %v17460_v46 = vadd.f32 %v12580_v41, %v4643_v43 }
0x2315   : > { %14300 = vmatprep.mubr.msk.f32.mxu1 %vm585_vm1, %v17460_v46 }
0x2316   : > { %14301 = vmatmul.mubr.msk.f32.vlgmr.msra.gmra.mrb[64].mxu1 %vm585_vm1, %v17462_v47 }
0x2331   : > { %v4830_v51 = vpop.f32.mrb[28].mxu0 }
0x2332   : > { %v17468_v55 = vadd.f32 %v12582_v48, %v4830_v51  ;;  %v14297_v56 = vpop.f32.mrb[29].mxu0 }
0x2334   : > { %14303 = vmatprep.subr.mxu1 %v17468_v55 }
0x2335   : > { %14304 = vmatpush3.msra.mxu1 %v17468_v55 }
0x23e9   : > { %v14302_v59 = vpop.f32.mrb[64].mxu1 }
0x23ea   : > { %v4923_v60 = vmul.f32 0.35355338, %v14302_v59  ;;  %v4913_v61 = vpop.f32.mrb[65].mxu1 }
0x23eb   : > { %v4922_v63 = vmul.f32 0.35355338, %v4913_v61 }
0x23ec   : > { %v4927_v49 = vsel %vm585_vm1, %v4923_v60, -inf }
0x23ed   : > { %4928 = vmax.xlane.f32.xlu1 %v4927_v49  ;;  %v4924_v2 = vsel %vm585_vm1, %v4922_v63, -inf }
0x23ee   : > { %4925 = vmax.xlane.f32.xlu0 %v4924_v2 }
0x247a   : > { %v4929_v7 = vpop.xlane.xlu1 %4928 }
0x247b   : > { %v4931_v3 = vsub.f32 %v4923_v60, %v4929_v7  ;;  %v4926_v62 = vpop.xlane.xlu0 %4925 }
0x247c   : > { %v4930_v25 = vsub.f32 %v4922_v63, %v4926_v62 }
0x247d   : > { %v4934_v4 = vmul.f32 1.442695, %v4931_v3 }
0x247e   : > { %v4932_v5 = vmul.f32 1.442695, %v4930_v25 }
0x247f   : > { %16575 = vpow2.f32 %v4934_v4 }
0x2480   : > { %16577 = vpow2.f32 %v4932_v5 }
0x2489   : > { %v16576_v6 = vpop.eup %16575 }
0x248a   : > { %v16578_v8 = vpop.eup %16577  ;;  %v4939_v9 = vsel %vm585_vm1, %v16576_v6, 0.0 }
0x248b   : > { %4940 = vadd.xlane.f32.xlu1 %v4939_v9  ;;  %v4936_v45 = vsel %vm585_vm1, %v16578_v8, 0.0 }
0x248c   : > { %4937 = vadd.xlane.f32.xlu0 %v4936_v45 }
0x249c   : > { %5029 = vrot.lane.b32.xlu1 %v17460_v46, %s16865_s15 }
0x24a0   : > { %5031 = vrot.lane.b32.xlu1 %v17462_v47, %s16865_s15 }
0x24a2   : > { %5033 = vrot.lane.b32.xlu0 %v17454_v32, %s16865_s15 }
0x2518   : > { %v4941_v10 = vpop.xlane.xlu1 %4940 }
0x2519   : > { %16579 = vrcp.f32 %v4941_v10  ;;  %v4938_v11 = vpop.xlane.xlu0 %4937 }
0x251a   : > { %16581 = vrcp.f32 %v4938_v11 }
0x251c   : > { %v5030_v14 = vpop.permute.xlu1 %5029 }
0x251d   : > { %v5034_v53 = vpop.permute.xlu0 %5033 }
0x251e   : > { %14308 = vmatprep.subr.msk.mxu1 %vm585_vm1, %v5034_v53 }
0x2520   : > { %v5032_v16 = vpop.permute.xlu1 %5031 }
0x2523   : > { %v16580_v12 = vpop.eup %16579 }
0x2524   : > { %v16582_v13 = vpop.eup %16581  ;;  %v17485_v58 = vmul.f32 %v16580_v12, %v16576_v6 }
0x2525   : > { %v17483_v15 = vmul.f32 %v16582_v13, %v16578_v8 }
0x2527   : > { %14305 = vmatprep.mubr.msk.f32.mxu1 %vm585_vm1, %v17483_v15 }
0x2528   : > { %14306 = vmatmul.mubr.msk.f32.vlgmr.msra.gmra.mrb[66].mxu1 %vm585_vm1, %v17485_v58 }
0x2529   : > { %14309 = vmatpush3.xpose.msk.msra.mxu1 %vm585_vm1, %v5034_v53  ;;  %14310 = vmatprep.mubr.msk.f32.mxu1 %vm585_vm1, %v5030_v14 }
0x252c   : > { %14311 = vmatmul.mubr.msk.f32.vlgmr.msra.gmra.mrb[68].mxu1 %vm585_vm1, %v5032_v16 }
0x25fb   : > { %v17494_v17 = vpop.f32.mrb[66].mxu1 }
0x25fc   : > { %v17496_v52 = vpop.f32.mrb[67].mxu1 }
0x25ff   : > { %v14312_v38 = vpop.f32.mrb[68].mxu1 }
0x2600   : > { %v5117_v18 = vmul.f32 0.35355338, %v14312_v38  ;;  %v5107_v28 = vpop.f32.mrb[69].mxu1 }
0x2601   : > { %v5116_v19 = vmul.f32 0.35355338, %v5107_v28 }
0x2602   : > { %v5121_v50 = vsel %vm585_vm1, %v5117_v18, -inf }
0x2603   : > { %5122 = vmax.xlane.f32.xlu1 %v5121_v50  ;;  %v5118_v57 = vsel %vm585_vm1, %v5116_v19, -inf }
0x2604   : > { %5119 = vmax.xlane.f32.xlu0 %v5118_v57 }
0x2614   : > { %5143 = vrot.lane.b32.xlu1 %v17468_v55, %s16865_s15 }
0x2618   : > { %5389 = vrot.lane.b32.xlu1 %v17460_v46, %s16866_s16 }
0x261c   : > { %5391 = vrot.lane.b32.xlu1 %v17462_v47, %s16866_s16 }
0x2620   : > { %5669 = vrot.lane.b32.xlu1 %v17460_v46, %s16867_s17 }
0x2690   : > { %v5123_v31 = vpop.xlane.xlu1 %5122 }
0x2691   : > { %v5125_v20 = vsub.f32 %v5117_v18, %v5123_v31  ;;  %v5120_v26 = vpop.xlane.xlu0 %5119 }
0x2692   : > { %v5124_v21 = vsub.f32 %v5116_v19, %v5120_v26 }
0x2693   : > { %v5128_v22 = vmul.f32 1.442695, %v5125_v20 }
0x2694   : > { %v5126_v23 = vmul.f32 1.442695, %v5124_v21  ;;  %v5144_v24 = vpop.permute.xlu1 %5143 }
0x2695   : > { %14313 = vmatprep.subr.mxu1 %v5144_v24 }
0x2696   : > { %16583 = vpow2.f32 %v5126_v23  ;;  %14314 = vmatpush3.msra.mxu1 %v5144_v24 }
0x2697   : > { %16585 = vpow2.f32 %v5128_v22  ;;  %14318 = vmatprep.subr.mxu1 %v4835_v37 }
0x2698   : > { %v5390_v27 = vpop.permute.xlu1 %5389 }
0x269c   : > { %v5392_v29 = vpop.permute.xlu1 %5391 }
0x26a0   : > { %v16584_v30 = vpop.eup %16583  ;;  %v5670_v33 = vpop.permute.xlu1 %5669 }
0x26a1   : > { %14345 = vmatprep.mubr.msk.f32.mxu0 %vm585_vm1, %v5670_v33  ;;  %v5130_v34 = vsel %vm585_vm1, %v16584_v30, 0.0  ;;  %v16586_v35 = vpop.eup %16585 }
0x26a2   : > { %5131 = vadd.xlane.f32.xlu0 %v5130_v34  ;;  %v5133_v36 = vsel %vm585_vm1, %v16586_v35, 0.0 }
0x26a6   : > { %5134 = vadd.xlane.f32.xlu0 %v5133_v36 }
0x26bc   : > { %5393 = vrot.lane.b32.xlu0 %v17454_v32, %s16866_s16 }
0x26c0   : > { %5673 = vrot.lane.b32.xlu0 %v17454_v32, %s16867_s17 }
0x26c4   : > { %5671 = vrot.lane.b32.xlu0 %v17462_v47, %s16867_s17  ;;  %v4834_v47 = vld [vmem:[#allocation2 + $0xec8] sm:$0xff] }
0x272f   : > { %v5132_v39 = vpop.xlane.xlu0 %5131 }
0x2730   : > { %16587 = vrcp.f32 %v5132_v39 }
0x2733   : > { %v5135_v41 = vpop.xlane.xlu0 %5134 }
0x2734   : > { %16589 = vrcp.f32 %v5135_v41 }
0x2737   : > { %v5394_v42 = vpop.permute.xlu0 %5393 }
0x273a   : > { %v16588_v43 = vpop.eup %16587 }
0x273b   : > { %v5674_v46 = vpop.permute.xlu0 %5673  ;;  %v17517_v48 = vmul.f32 %v16588_v43, %v16584_v30 }
0x273c   : > { %14343 = vmatprep.subr.msk.mxu0 %vm585_vm1, %v5674_v46 }
0x273d   : > { %14315 = vmatprep.mubr.msk.f32.mxu1 %vm585_vm1, %v17517_v48  ;;  %14344 = vmatpush3.xpose.msk.msra.mxu0 %vm585_vm1, %v5674_v46 }
0x273e   : > { %v16590_v32 = vpop.eup %16589 }
0x273f   : > { %v5672_v51 = vpop.permute.xlu0 %5671  ;;  %v17523_v56 = vmul.f32 %v16590_v32, %v16586_v35 }
0x2740   : > { %14346 = vmatmul.mubr.msk.f32.vlgmr.msra.gmra.mrb[30].mxu0 %vm585_vm1, %v5672_v51 }
0x2741   : > { %14316 = vmatmul.mubr.msk.f32.vlgmr.msra.gmra.mrb[70].mxu1 %vm585_vm1, %v17523_v56  ;;  %v5141_v41 = vadd.f32 %v17523_v56, %v17485_v58  ;;  %v4836_v58 = vld [vmem:[#allocation2 + $0xed8] sm:$0xff] }
0x2742   : > { %14319 = vmatpush3.msra.mxu1 %v4835_v37  ;;  %v5140_v37 = vadd.f32 %v17517_v48, %v17483_v15  ;;  %v4837_v48 = vld [vmem:[#allocation2 + $0xee0] sm:$0xff] }
0x2743   : > { %14323 = vmatprep.subr.mxu1 %v4834_v47 }
0x2813   : > { %v14347_v59 = vpop.f32.mrb[30].mxu0 }
0x2814   : > { %v14317_v60 = vpop.f32.mrb[70].mxu1  ;;  %v5747_v61 = vpop.f32.mrb[31].mxu0  ;;  %v5757_v4 = vmul.f32 0.35355338, %v14347_v59 }
0x2815   : > { %v5218_v63 = vpop.f32.mrb[71].mxu1  ;;  %v5756_v62 = vmul.f32 0.35355338, %v5747_v61 }
0x2816   : > { %14320 = vmatprep.mubr.msk.f32.mxu1 %vm585_vm1, %v5218_v63  ;;  %v5761_v8 = vsel %vm585_vm1, %v5757_v4, -inf }
0x2817   : > { %14321 = vmatmul.mubr.msk.f32.vlgmr.msra.gmra.mrb[72].mxu1 %vm585_vm1, %v14317_v60  ;;  %v5758_v6 = vsel %vm585_vm1, %v5756_v62, -inf }
0x2818   : > { %14324 = vmatpush3.msra.mxu1 %v4834_v47  ;;  %14325 = vmatprep.mubr.msk.f32.mxu1 %vm585_vm1, %v17496_v52 }
0x2819   : > { %14328 = vmatprep.subr.msk.mxu1 %vm585_vm1, %v5394_v42 }
0x281f   : > { %14326 = vmatmul.mubr.msk.f32.vlgmr.msra.gmra.mrb[72].mxu1 %vm585_vm1, %v17494_v17 }
0x2820   : > { %14329 = vmatpush3.xpose.msk.msra.mxu1 %vm585_vm1, %v5394_v42  ;;  %14330 = vmatprep.mubr.msk.f32.mxu1 %vm585_vm1, %v5390_v27 }
0x2823   : > { %14331 = vmatmul.mubr.msk.f32.vlgmr.msra.gmra.mrb[74].mxu1 %vm585_vm1, %v5392_v29 }
0x28f6   : > { %v14332_v49 = vpop.f32.mrb[74].mxu1 }
0x28f7   : > { %v5477_v2 = vmul.f32 0.35355338, %v14332_v49  ;;  %v5467_v7 = vpop.f32.mrb[75].mxu1 }
0x28f8   : > { %v5476_v3 = vmul.f32 0.35355338, %v5467_v7 }
0x28f9   : > { %v5481_v25 = vsel %vm585_vm1, %v5477_v2, -inf }
0x28fa   : > { %5482 = vmax.xlane.f32.xlu0 %v5481_v25  ;;  %v5478_v5 = vsel %vm585_vm1, %v5476_v3, -inf }
0x28fb   : > { %5479 = vmax.xlane.f32.xlu1 %v5478_v5 }
0x28fe   : > { %5759 = vmax.xlane.f32.xlu0 %v5758_v6  ;;  %v5998_v6 = vld [vmem:[#allocation2 + $0xf60] sm:$0xff] }
0x28ff   : > { %5762 = vmax.xlane.f32.xlu1 %v5761_v8  ;;  %v5999_v8 = vld [vmem:[#allocation2 + $0xf68] sm:$0xff] }
0x2987   : > { %v5483_v9 = vpop.xlane.xlu0 %5482 }
0x2988   : > { %v5480_v45 = vpop.xlane.xlu1 %5479  ;;  %v5485_v11 = vsub.f32 %v5477_v2, %v5483_v9  ;;  %v12611_v2 = vld [vmem:[#allocation2 + $0xf48] ss:$0 sm:$0xff]  ;;  %v6000_v9 = vld [vmem:[#allocation2 + $0xf70] sm:$0xff] }
0x2989   : > { %v5484_v10 = vsub.f32 %v5476_v3, %v5480_v45  ;;  %v15712_v45 = vpack.c.bf16 %v5999_v8, %v5998_v6 }
0x298a   : > { %v5488_v52 = vmul.f32 1.442695, %v5485_v11 }
0x298b   : > { %v5760_v53 = vpop.xlane.xlu0 %5759  ;;  %v5486_v16 = vmul.f32 1.442695, %v5484_v10  ;;  %v6001_v10 = vld [vmem:[#allocation2 + $0xf78] sm:$0xff] }
0x298c   : > { %v5764_v12 = vsub.f32 %v5756_v62, %v5760_v53  ;;  %v5763_v13 = vpop.xlane.xlu1 %5762  ;;  %v15716_v11 = vpack.c.bf16 %v6001_v10, %v6000_v9  ;;  %v6002_v53 = vld [vmem:[#allocation2 + $0xf80] sm:$0xff] }
0x298d   : > { %v5765_v14 = vsub.f32 %v5757_v4, %v5763_v13 }
0x298e   : > { %v5766_v17 = vmul.f32 1.442695, %v5764_v12  ;;  %v6003_v12 = vld [vmem:[#allocation2 + $0xf88] sm:$0xff] }
0x298f   : > { %v5768_v38 = vmul.f32 1.442695, %v5765_v14  ;;  %v15720_v13 = vpack.c.bf16 %v6003_v12, %v6002_v53  ;;  %v12613_v12 = vld [vmem:[#allocation2 + $0xf58] ss:$0 sm:$0xff] }
0x2990   : > { %16591 = vpow2.f32 %v5766_v17 }
0x2991   : > { %16593 = vpow2.f32 %v5768_v38 }
0x2992   : > { %16595 = vpow2.f32 %v5486_v16 }
0x2993   : > { %16597 = vpow2.f32 %v5488_v52 }
0x299a   : > { %v16592_v18 = vpop.eup %16591 }
0x299b   : > { %v16594_v28 = vpop.eup %16593  ;;  %v5770_v19 = vsel %vm585_vm1, %v16592_v18, 0.0 }
0x299c   : > { %v16596_v50 = vpop.eup %16595  ;;  %5771 = vadd.xlane.f32.xlu0 %v5770_v19  ;;  %v5773_v57 = vsel %vm585_vm1, %v16594_v28, 0.0 }
0x299d   : > { %v16598_v31 = vpop.eup %16597  ;;  %5774 = vadd.xlane.f32.xlu1 %v5773_v57  ;;  %v5490_v20 = vsel %vm585_vm1, %v16596_v50, 0.0 }
0x299e   : > { %v5493_v26 = vsel %vm585_vm1, %v16598_v31, 0.0 }
0x29a0   : > { %5491 = vadd.xlane.f32.xlu0 %v5490_v20  ;;  %v6005_v20 = vld [vmem:[#allocation2 + $0xf98] sm:$0xff] }
0x29a1   : > { %5494 = vadd.xlane.f32.xlu1 %v5493_v26 }
0x29b2   : > { %5782 = vrot.lane.b32.xlu1 %v17468_v55, %s16867_s17 }
0x29b6   : > { %5502 = vrot.lane.b32.xlu0 %v17468_v55, %s16866_s16 }
0x2a29   : > { %v5772_v21 = vpop.xlane.xlu0 %5771 }
0x2a2a   : > { %16599 = vrcp.f32 %v5772_v21  ;;  %v5775_v22 = vpop.xlane.xlu1 %5774  ;;  %v6006_v21 = vld [vmem:[#allocation2 + $0xfa0] sm:$0xff] }
0x2a2b   : > { %16601 = vrcp.f32 %v5775_v22  ;;  %v6007_v22 = vld [vmem:[#allocation2 + $0xfa8] sm:$0xff] }
0x2a2d   : > { %v5492_v23 = vpop.xlane.xlu0 %5491 }
0x2a2e   : > { %16603 = vrcp.f32 %v5492_v23  ;;  %v5495_v24 = vpop.xlane.xlu1 %5494  ;;  %v15728_v23 = vpack.c.bf16 %v6007_v22, %v6006_v21  ;;  %v6247_v21 = vld [vmem:[#allocation2 + $0x5b8] sm:$0xff] }
0x2a2f   : > { %16605 = vrcp.f32 %v5495_v24  ;;  %v6008_v24 = vld [vmem:[#allocation2 + $0xfb0] sm:$0xff] }
0x2a31   : > { %v5503_v27 = vpop.permute.xlu0 %5502 }
0x2a32   : > { %v5783_v29 = vpop.permute.xlu1 %5782  ;;  %14333 = vmatprep.subr.mxu1 %v5503_v27 }
0x2a33   : > { %14334 = vmatpush3.msra.mxu1 %v5503_v27  ;;  %14348 = vmatprep.subr.mxu0 %v5783_v29  ;;  %v6009_v27 = vld [vmem:[#allocation2 + $0xfb8] sm:$0xff] }
0x2a34   : > { %v16600_v30 = vpop.eup %16599  ;;  %14349 = vmatpush3.msra.mxu0 %v5783_v29  ;;  %14338 = vmatprep.subr.mxu1 %v4836_v58  ;;  %v15732_v29 = vpack.c.bf16 %v6009_v27, %v6008_v24  ;;  %v6249_v24 = vld [vmem:[#allocation2 + $0x5c8] sm:$0xff] }
0x2a35   : > { %v16602_v33 = vpop.eup %16601  ;;  %v5778_v34 = vmul.f32 %v16600_v30, %v16592_v18  ;;  %15713 = vmatprep.subr.bf16.mxu0 %v15712_v45  ;;  %v6010_v30 = vld [vmem:[#allocation2 + $0xfc0] sm:$0xff] }
0x2a36   : > { %v5779_v35 = vmul.f32 %v16602_v33, %v16594_v28  ;;  %v6011_v33 = vld [vmem:[#allocation2 + $0xfc8] sm:$0xff] }
0x2a37   : > { %14350 = vmatprep.mubr.msk.f32.mxu0 %vm585_vm1, %v5778_v34 }
0x2a38   : > { %v16604_v55 = vpop.eup %16603  ;;  %14351 = vmatmul.mubr.msk.f32.vlgmr.msra.gmra.mrb[32].mxu0 %vm585_vm1, %v5779_v35 }
0x2a39   : > { %v16606_v36 = vpop.eup %16605  ;;  %v5498_v39 = vmul.f32 %v16604_v55, %v16596_v50  ;;  %15715 = vmatpush3.bf16.msra.mxu0 %v15712_v45  ;;  %v6013_v55 = vld [vmem:[#allocation2 + $0xfd8] sm:$0xff]  ;;  %v12612_v45 = vld [vmem:[#allocation2 + $0xf50] ss:$0 sm:$0xff] }
0x2a3a   : > { %v5499_v42 = vmul.f32 %v16606_v36, %v16598_v31  ;;  %15717 = vmatprep.subr.bf16.mxu0 %v15716_v11  ;;  %v6004_v31 = vld [vmem:[#allocation2 + $0xf90] sm:$0xff] }
0x2a3b   : > { %v5500_v43 = vadd.f32 %v5498_v39, %v5140_v37  ;;  %14335 = vmatprep.mubr.msk.f32.mxu1 %vm585_vm1, %v5498_v39  ;;  %v15724_v26 = vpack.c.bf16 %v6005_v20, %v6004_v31  ;;  %v6096_v37 = vld [vmem:[#allocation2 + $0xfe8] sm:$0xff]  ;;  %v6097_v39 = vld [vmem:[#allocation2 + $0xff0] sm:$0xff] }
0x2a3c   : > { %v5501_v46 = vadd.f32 %v5499_v42, %v5141_v41  ;;  %14336 = vmatmul.mubr.msk.f32.vlgmr.msra.gmra.mrb[76].mxu1 %vm585_vm1, %v5499_v42  ;;  %v6098_v41 = vld [vmem:[#allocation2 + $0xff8] sm:$0xff]  ;;  %v15744_v42 = vpack.c.bf16 %v6097_v39, %v6096_v37  ;;  %v6245_v31 = vld [vmem:[#allocation2 + $0x5a8] sm:$0xff] }
0x2a3d   : > { %v5780_v32 = vadd.f32 %v5778_v34, %v5500_v43  ;;  %14339 = vmatpush3.msra.mxu1 %v4836_v58  ;;  %15719 = vmatpush3.bf16.msra.mxu0 %v15716_v11  ;;  %v15736_v34 = vpack.c.bf16 %v6011_v33, %v6010_v30  ;;  %v6099_v43 = vld [vmem:[#allocation2 + $0x1000] sm:$0xff]  ;;  %v6104_v58 = vld [vmem:[#allocation2 + $0x1028] sm:$0xff]  ;;  %v6251_v30 = vld [vmem:[#allocation2 + $0x5d8] sm:$0xff] }
0x2a3e   : > { %v5781_v51 = vadd.f32 %v5779_v35, %v5501_v46  ;;  %14353 = vmatprep.subr.mxu1 %v4837_v48  ;;  %15721 = vmatprep.subr.bf16.mxu0 %v15720_v13  ;;  %v6012_v35 = vld [vmem:[#allocation2 + $0xfd0] sm:$0xff]  ;;  %v15748_v46 = vpack.c.bf16 %v6099_v43, %v6098_v41  ;;  %v6255_v37 = vld [vmem:[#allocation2 + $0x5f8] sm:$0xff] }
0x2a3f   : > { %v5956_v47 = vmul.f32 0.25, %v5780_v32  ;;  %v15740_v36 = vpack.c.bf16 %v6013_v55, %v6012_v35  ;;  %v6100_v32 = vld [vmem:[#allocation2 + $0x1008] sm:$0xff]  ;;  %v6422_v41 = vld [vmem:[#allocation2 + $0x690] sm:$0xff] }
0x2a40   : > { %v5957_v59 = vmul.f32 0.25, %v5781_v51  ;;  %v6101_v51 = vld [vmem:[#allocation2 + $0x1010] sm:$0xff]  ;;  %v6253_v35 = vld [vmem:[#allocation2 + $0x5e8] sm:$0xff] }
0x2a41   : > { %v6236_v60 = vsel %vm585_vm1, %v5956_v47, 0.0  ;;  %15723 = vmatpush3.bf16.msra.mxu0 %v15720_v13  ;;  %v15752_v47 = vpack.c.bf16 %v6101_v51, %v6100_v32  ;;  %v6425_v32 = vld [vmem:[#allocation2 + $0x6a8] sm:$0xff] }
0x2a42   : > { %v6237_v15 = vsel %vm585_vm1, %v5957_v59, 0.0  ;;  %6238 = vst [vmem:[%s17561_s11] sm:$0xff] %v6236_v60  ;;  %15725 = vmatprep.subr.bf16.mxu0 %v15724_v26  ;;  %v6102_v59 = vld [vmem:[#allocation2 + $0x1018] sm:$0xff]  ;;  %v6103_v60 = vld [vmem:[#allocation2 + $0x1020] sm:$0xff] }
0x2a43   : > { %6239 = vst [vmem:[%s17561_s11 + $0x8] sm:$0xff] %v6237_v15  ;;  %v15756_v15 = vpack.c.bf16 %v6103_v60, %v6102_v59  ;;  %v6427_v59 = vld [vmem:[#allocation2 + $0x6b8] sm:$0xff] }
0x2a45   : > { %15727 = vmatpush3.bf16.msra.mxu0 %v15724_v26  ;;  %v6246_v26 = vld [vmem:[#allocation2 + $0x5b0] sm:$0xff] }
0x2a46   : > { %15729 = vmatprep.subr.bf16.mxu0 %v15728_v23  ;;  %v15786_v22 = vpack.c.bf16 %v6247_v21, %v6246_v26  ;;  %v6337_v21 = vld [vmem:[#allocation2 + $0x638] sm:$0xff] }
0x2a49   : > { %15731 = vmatpush3.bf16.msra.mxu0 %v15728_v23  ;;  %v6248_v23 = vld [vmem:[#allocation2 + $0x5c0] sm:$0xff] }
0x2a4a   : > { %15733 = vmatprep.subr.bf16.mxu0 %v15732_v29  ;;  %v15789_v27 = vpack.c.bf16 %v6249_v24, %v6248_v23  ;;  %v6339_v24 = vld [vmem:[#allocation2 + $0x648] sm:$0xff] }
0x2a4d   : > { %15735 = vmatpush3.bf16.msra.mxu0 %v15732_v29  ;;  %v6250_v29 = vld [vmem:[#allocation2 + $0x5d0] sm:$0xff] }
0x2a4e   : > { %15737 = vmatprep.subr.bf16.mxu0 %v15736_v34  ;;  %v15792_v33 = vpack.c.bf16 %v6251_v30, %v6250_v29  ;;  %v6341_v30 = vld [vmem:[#allocation2 + $0x658] sm:$0xff] }
0x2a51   : > { %15739 = vmatpush3.bf16.msra.mxu0 %v15736_v34  ;;  %v6252_v34 = vld [vmem:[#allocation2 + $0x5e0] sm:$0xff] }
0x2a52   : > { %15741 = vmatprep.subr.bf16.mxu0 %v15740_v36  ;;  %v15795_v55 = vpack.c.bf16 %v6253_v35, %v6252_v34  ;;  %v6343_v35 = vld [vmem:[#allocation2 + $0x668] sm:$0xff] }
0x2a55   : > { %15743 = vmatpush3.bf16.msra.mxu0 %v15740_v36  ;;  %v6254_v36 = vld [vmem:[#allocation2 + $0x5f0] sm:$0xff] }
0x2a56   : > { %15776 = vmatprep.subr.bf16.mxu0 %v16862_v0  ;;  %v15798_v39 = vpack.c.bf16 %v6255_v37, %v6254_v36  ;;  %v6345_v37 = vld [vmem:[#allocation2 + $0x678] sm:$0xff] }
0x2b0b   : > { %v14352_v56 = vpop.f32.mrb[32].mxu0 }
0x2b0c   : > { %v5857_v61 = vpop.f32.mrb[33].mxu0 }
0x2b0f   : > { %v14337_v63 = vpop.f32.mrb[76].mxu1 }
0x2b10   : > { %v5577_v49 = vpop.f32.mrb[77].mxu1 }
0x2b11   : > { %14340 = vmatprep.mubr.msk.f32.mxu1 %vm585_vm1, %v5577_v49 }
0x2b12   : > { %14341 = vmatmul.mubr.msk.f32.vlgmr.msra.gmra.mrb[72].mxu1 %vm585_vm1, %v14337_v63  ;;  %v6107_v63 = vld [vmem:[#allocation2 + $0x1040] sm:$0xff] }
0x2b13   : > { %14354 = vmatpush3.msra.mxu1 %v4837_v48  ;;  %14355 = vmatprep.mubr.msk.f32.mxu1 %vm585_vm1, %v5857_v61  ;;  %v6105_v48 = vld [vmem:[#allocation2 + $0x1030] sm:$0xff]  ;;  %v6106_v61 = vld [vmem:[#allocation2 + $0x1038] sm:$0xff] }
0x2b14   : > { %15745 = vmatprep.subr.bf16.mxu1 %v15744_v42  ;;  %v15764_v49 = vpack.c.bf16 %v6107_v63, %v6106_v61  ;;  %v6431_v61 = vld [vmem:[#allocation2 + $0x6d8] sm:$0xff] }
0x2b1a   : > { %14356 = vmatmul.mubr.msk.f32.vlgmr.msra.gmra.mrb[72].mxu1 %vm585_vm1, %v14352_v56  ;;  %v15760_v56 = vpack.c.bf16 %v6105_v48, %v6104_v58  ;;  %v6429_v58 = vld [vmem:[#allocation2 + $0x6c8] sm:$0xff] }
0x2b1b   : > { %15747 = vmatpush3.bf16.msra.mxu1 %v15744_v42  ;;  %v6423_v42 = vld [vmem:[#allocation2 + $0x698] sm:$0xff] }
0x2b1c   : > { %15749 = vmatprep.subr.bf16.mxu1 %v15748_v46  ;;  %v15825_v43 = vpack.c.bf16 %v6423_v42, %v6422_v41 }
0x2b1f   : > { %15751 = vmatpush3.bf16.msra.mxu1 %v15748_v46  ;;  %v6424_v46 = vld [vmem:[#allocation2 + $0x6a0] sm:$0xff] }
0x2b20   : > { %15753 = vmatprep.subr.bf16.mxu1 %v15752_v47  ;;  %v15828_v51 = vpack.c.bf16 %v6425_v32, %v6424_v46 }
0x2b23   : > { %15755 = vmatpush3.bf16.msra.mxu1 %v15752_v47  ;;  %v6426_v47 = vld [vmem:[#allocation2 + $0x6b0] sm:$0xff] }
0x2b24   : > { %15757 = vmatprep.subr.bf16.mxu1 %v15756_v15  ;;  %v15831_v60 = vpack.c.bf16 %v6427_v59, %v6426_v47  ;;  %v12619_v59 = vld [vmem:[#allocation2 + $0x688] ss:$0 sm:$0xff] }
0x2b27   : > { %15759 = vmatpush3.bf16.msra.mxu1 %v15756_v15  ;;  %v6428_v15 = vld [vmem:[#allocation2 + $0x6c0] sm:$0xff] }
0x2b28   : > { %15761 = vmatprep.subr.bf16.mxu1 %v15760_v56  ;;  %v15834_v48 = vpack.c.bf16 %v6429_v58, %v6428_v15  ;;  %v12618_v15 = vld [vmem:[#allocation2 + $0x600] ss:$0 sm:$0xff] }
0x2b2b   : > { %15763 = vmatpush3.bf16.msra.mxu1 %v15760_v56  ;;  %v6430_v56 = vld [vmem:[#allocation2 + $0x6d0] sm:$0xff] }
0x2b2c   : > { %15765 = vmatprep.subr.bf16.mxu1 %v15764_v49  ;;  %v15837_v63 = vpack.c.bf16 %v6431_v61, %v6430_v56  ;;  %v12620_v56 = vld [vmem:[#allocation2 + $0x710] ss:$0 sm:$0xff] }
0x2b2f   : > { %15767 = vmatpush3.bf16.msra.mxu1 %v15764_v49  ;;  %v6432_v49 = vld [vmem:[#allocation2 + $0x6e0] sm:$0xff] }
0x2bed   : > { %v14357_v7 = vpop.f32.mrb[72].mxu1 }
0x2bee   : > { %v5955_v3 = vadd.f32 %v14357_v7, %v12611_v2  ;;  %v5938_v62 = vpop.f32.mrb[73].mxu1  ;;  %v6109_v7 = vld [vmem:[#allocation2 + $0x1050] sm:$0xff] }
0x2bef   : > { %v5954_v25 = vadd.f32 %v12611_v2, %v5938_v62  ;;  %v6108_v2 = vld [vmem:[#allocation2 + $0x1048] sm:$0xff] }
0x2bf0   : > { %v5961_v4 = vsel %vm1551_vm2, %v5955_v3, 0.0 }
0x2bf1   : > { %5964 = vadd.xlane.f32.xlu0 %v5961_v4  ;;  %v5960_v5 = vsel %vm1551_vm2, %v5954_v25, 0.0 }
0x2bf2   : > { %5962 = vadd.xlane.f32.xlu1 %v5960_v5 }
0x2c7e   : > { %v5965_v14 = vpop.xlane.xlu0 %5964 }
0x2c7f   : > { %v5967_v16 = vmul.f32 0.03125, %v5965_v14  ;;  %v5963_v17 = vpop.xlane.xlu1 %5962  ;;  %v6240_v14 = vld [vmem:[#allocation2 + $0x580] sm:$0xff] }
0x2c80   : > { %v5966_v52 = vmul.f32 0.03125, %v5963_v17 }
0x2c81   : > { %v5969_v38 = vsub.f32 %v5955_v3, %v5967_v16  ;;  %v15768_v3 = vpack.c.bf16 %v6109_v7, %v6108_v2  ;;  %v6241_v16 = vld [vmem:[#allocation2 + $0x588] sm:$0xff] }
0x2c82   : > { %v5968_v18 = vsub.f32 %v5954_v25, %v5966_v52  ;;  %v6433_v2 = vld [vmem:[#allocation2 + $0x6e8] sm:$0xff] }
0x2c83   : > { %v17575_v28 = vsel %vm1551_vm2, %v5969_v38, 0.0  ;;  %15769 = vmatprep.subr.bf16.mxu1 %v15768_v3  ;;  %v15777_v38 = vpack.c.bf16 %v6241_v16, %v6240_v14  ;;  %v15840_v7 = vpack.c.bf16 %v6433_v2, %v6432_v49  ;;  %v6332_v14 = vld [vmem:[#allocation2 + $0x610] sm:$0xff] }
0x2c84   : > { %v5973_v19 = vmul.f32 %v17575_v28, %v17575_v28  ;;  %v17581_v50 = vsel %vm1551_vm2, %v5968_v18, 0.0  ;;  %15771 = vmatpush3.bf16.msra.mxu1 %v15768_v3  ;;  %v6434_v3 = vld [vmem:[#allocation2 + $0x6f0] sm:$0xff] }
0x2c85   : > { %v5972_v57 = vmul.f32 %v17581_v50, %v17581_v50 }
0x2c86   : > { %5976 = vadd.xlane.f32.xlu1 %v5973_v19  ;;  %v6242_v19 = vld [vmem:[#allocation2 + $0x590] sm:$0xff] }
0x2c87   : > { %5974 = vadd.xlane.f32.xlu0 %v5972_v57  ;;  %v6243_v57 = vld [vmem:[#allocation2 + $0x598] sm:$0xff] }
0x2d13   : > { %v5977_v62 = vpop.xlane.xlu1 %5976 }
0x2d14   : > { %v5979_v25 = vmul.f32 0.03125, %v5977_v62  ;;  %v5975_v4 = vpop.xlane.xlu0 %5974  ;;  %v6435_v62 = vld [vmem:[#allocation2 + $0x6f8] sm:$0xff] }
0x2d15   : > { %v5978_v5 = vmul.f32 0.03125, %v5975_v4  ;;  %v6436_v4 = vld [vmem:[#allocation2 + $0x700] sm:$0xff] }
0x2d16   : > { %v5981_v6 = vadd.f32 1e-05, %v5979_v25  ;;  %v15843_v25 = vpack.c.bf16 %v6435_v62, %v6434_v3 }
0x2d17   : > { %v5980_v8 = vadd.f32 1e-05, %v5978_v5  ;;  %v6437_v5 = vld [vmem:[#allocation2 + $0x708] sm:$0xff] }
0x2d18   : > { %16607 = vrsqrt.f32 %v5981_v6  ;;  %v15846_v6 = vpack.c.bf16 %v6437_v5, %v6436_v4 }
0x2d19   : > { %16609 = vrsqrt.f32 %v5980_v8  ;;  %v6110_v8 = vld [vmem:[#allocation2 + $0x1058] sm:$0xff] }
0x2d22   : > { %v16608_v9 = vpop.eup %16607 }
0x2d23   : > { %v16610_v10 = vpop.eup %16609  ;;  %v5985_v11 = vmul.f32 %v16608_v9, %v17575_v28  ;;  %v15780_v28 = vpack.c.bf16 %v6243_v57, %v6242_v19  ;;  %v6111_v9 = vld [vmem:[#allocation2 + $0x1060] sm:$0xff]  ;;  %v6333_v57 = vld [vmem:[#allocation2 + $0x618] sm:$0xff] }
0x2d24   : > { %v5984_v53 = vmul.f32 %v16610_v10, %v17581_v50  ;;  %v6244_v50 = vld [vmem:[#allocation2 + $0x5a0] sm:$0xff] }
0x2d25   : > { %v5991_v13 = vmul.f32 %v12612_v45, %v5985_v11  ;;  %v15783_v20 = vpack.c.bf16 %v6245_v31, %v6244_v50  ;;  %v12614_v10 = vld [vmem:[#allocation2 + $0xfe0] ss:$0 sm:$0xff]  ;;  %v6335_v31 = vld [vmem:[#allocation2 + $0x628] sm:$0xff] }
0x2d26   : > { %v5990_v17 = vmul.f32 %v12612_v45, %v5984_v53  ;;  %v15772_v45 = vpack.c.bf16 %v6111_v9, %v6110_v8 }
0x2d27   : > { %v17590_v18 = vadd.f32 %v12613_v12, %v5991_v13  ;;  %v6331_v13 = vld [vmem:[#allocation2 + $0x608] sm:$0xff] }
0x2d28   : > { %v17588_v52 = vadd.f32 %v12613_v12, %v5990_v17  ;;  %15773 = vmatprep.subr.bf16.mxu1 %v15772_v45 }
0x2d29   : > { %15775 = vmatpush3.bf16.msra.mxu1 %v15772_v45 }
0x2d2a   : > { %14390 = vmatprep.mubr.f32.mxu0 %v17588_v52  ;;  %15800 = vmatprep.subr.bf16.mxu1 %v16862_v0 }
0x2d2b   : > { %14391 = vmatmul.mubr.f32.vlgmr.msra.gmra.mrb[34].mxu0 %v17590_v18 }
0x2d2c   : > { %15778 = vmatpush3.bf16.msra.mxu0 %v15777_v38  ;;  %14460 = vmatprep.mubr.msk.f32.mxu0 %vm16863_vm0, %v16864_v1  ;;  %v15801_v38 = vpack.c.bf16 %v6332_v14, %v6331_v13 }
0x2d2d   : > { %15779 = vmatprep.subr.bf16.mxu0 %v16862_v0 }
0x2d30   : > { %15781 = vmatpush3.bf16.msra.mxu0 %v15780_v28  ;;  %v6334_v28 = vld [vmem:[#allocation2 + $0x620] sm:$0xff] }
0x2d31   : > { %15782 = vmatprep.subr.bf16.mxu0 %v16862_v0  ;;  %v15804_v50 = vpack.c.bf16 %v6334_v28, %v6333_v57 }
0x2d34   : > { %15784 = vmatpush3.bf16.msra.mxu0 %v15783_v20  ;;  %v6336_v20 = vld [vmem:[#allocation2 + $0x630] sm:$0xff] }
0x2d35   : > { %15785 = vmatprep.subr.bf16.mxu0 %v16862_v0  ;;  %v15807_v26 = vpack.c.bf16 %v6336_v20, %v6335_v31 }
0x2d38   : > { %15787 = vmatpush3.bf16.msra.mxu0 %v15786_v22  ;;  %v6338_v22 = vld [vmem:[#allocation2 + $0x640] sm:$0xff] }
0x2d39   : > { %15788 = vmatprep.subr.bf16.mxu0 %v16862_v0  ;;  %v15810_v23 = vpack.c.bf16 %v6338_v22, %v6337_v21  ;;  %v6514_v22 = vld [vmem:[#allocation2 + $0x720] sm:$0xff] }
0x2d3c   : > { %15790 = vmatpush3.bf16.msra.mxu0 %v15789_v27  ;;  %v6340_v27 = vld [vmem:[#allocation2 + $0x650] sm:$0xff] }
0x2d3d   : > { %15791 = vmatprep.subr.bf16.mxu0 %v16862_v0  ;;  %v15813_v29 = vpack.c.bf16 %v6340_v27, %v6339_v24 }
0x2d40   : > { %15793 = vmatpush3.bf16.msra.mxu0 %v15792_v33  ;;  %v6342_v33 = vld [vmem:[#allocation2 + $0x660] sm:$0xff] }
0x2d41   : > { %15794 = vmatprep.subr.bf16.mxu0 %v16862_v0  ;;  %v15816_v34 = vpack.c.bf16 %v6342_v33, %v6341_v30 }
0x2d44   : > { %15796 = vmatpush3.bf16.msra.mxu0 %v15795_v55  ;;  %v6344_v55 = vld [vmem:[#allocation2 + $0x670] sm:$0xff] }
0x2d45   : > { %15797 = vmatprep.subr.bf16.mxu0 %v16862_v0  ;;  %v15819_v36 = vpack.c.bf16 %v6344_v55, %v6343_v35 }
0x2d48   : > { %15799 = vmatpush3.bf16.msra.mxu0 %v15798_v39  ;;  %v6346_v39 = vld [vmem:[#allocation2 + $0x680] sm:$0xff] }
0x2d49   : > { %15824 = vmatprep.subr.bf16.mxu0 %v16862_v0  ;;  %v15822_v42 = vpack.c.bf16 %v6346_v39, %v6345_v37 }
0x2d4b   : > { %14461 = vmatmul.mubr.f32.vlgmr.msra.gmra.mrb[36].mxu0 %v17440_v40 }
0x2d4c   : > { %15826 = vmatpush3.bf16.msra.mxu0 %v15825_v43  ;;  %14530 = vmatprep.mubr.msk.f32.mxu0 %vm16863_vm0, %v16864_v1 }
0x2d4d   : > { %15827 = vmatprep.subr.bf16.mxu0 %v16862_v0 }
0x2d50   : > { %15829 = vmatpush3.bf16.msra.mxu0 %v15828_v51 }
0x2d51   : > { %15830 = vmatprep.subr.bf16.mxu0 %v16862_v0 }
0x2d54   : > { %15832 = vmatpush3.bf16.msra.mxu0 %v15831_v60 }
0x2d55   : > { %15833 = vmatprep.subr.bf16.mxu0 %v16862_v0 }
0x2d58   : > { %15835 = vmatpush3.bf16.msra.mxu0 %v15834_v48 }
0x2d59   : > { %15836 = vmatprep.subr.bf16.mxu0 %v16862_v0 }
0x2d5c   : > { %15838 = vmatpush3.bf16.msra.mxu0 %v15837_v63 }
0x2d5d   : > { %15839 = vmatprep.subr.bf16.mxu0 %v16862_v0 }
0x2d60   : > { %15841 = vmatpush3.bf16.msra.mxu0 %v15840_v7 }
0x2d61   : > { %15842 = vmatprep.subr.bf16.mxu0 %v16862_v0 }
0x2d64   : > { %15844 = vmatpush3.bf16.msra.mxu0 %v15843_v25 }
0x2d65   : > { %15845 = vmatprep.subr.bf16.mxu0 %v16862_v0 }
0x2d68   : > { %15847 = vmatpush3.bf16.msra.mxu0 %v15846_v6 }
0x2d69   : > { %14573 = vmatprep.subr.mxu0 %v16864_v1 }
0x2d6b   : > { %14531 = vmatmul.mubr.f32.vlgmr.msra.gmra.mrb[38].mxu0 %v17440_v40 }
0x2d6c   : > { %14575 = vmatprep.mubr.msk.f32.mxu0 %vm16863_vm0, %v16864_v1 }
0x2dfe   : > { %v14392_v11 = vpop.f32.mrb[34].mxu0 }
0x2dff   : > { %v6091_v53 = vadd.f32 %v14392_v11, %v12614_v10  ;;  %v6085_v12 = vpop.f32.mrb[35].mxu0 }
0x2e00   : > { %v6086_v16 = vadd.f32 %v12614_v10, %v6085_v12 }
0x2e01   : > { %v6095_v19 = vmax.f32 %v6091_v53, 0.0 }
0x2e02   : > { %v6094_v17 = vmax.f32 %v6086_v16, 0.0 }
0x2e04   : > { %14425 = vmatprep.mubr.f32.mxu1 %v6094_v17 }
0x2e05   : > { %14426 = vmatmul.mubr.f32.vlgmr.msra.gmra.mrb[78].mxu1 %v6095_v19 }
0x2e06   : > { %15802 = vmatpush3.bf16.msra.mxu1 %v15801_v38  ;;  %14495 = vmatprep.mubr.msk.f32.mxu1 %vm16863_vm0, %v16864_v1 }
0x2e07   : > { %15803 = vmatprep.subr.bf16.mxu1 %v16862_v0 }
0x2e0a   : > { %15805 = vmatpush3.bf16.msra.mxu1 %v15804_v50 }
0x2e0b   : > { %15806 = vmatprep.subr.bf16.mxu1 %v16862_v0 }
0x2e0e   : > { %15808 = vmatpush3.bf16.msra.mxu1 %v15807_v26 }
0x2e0f   : > { %15809 = vmatprep.subr.bf16.mxu1 %v16862_v0 }
0x2e12   : > { %15811 = vmatpush3.bf16.msra.mxu1 %v15810_v23  ;;  %v6513_v23 = vld [vmem:[#allocation2 + $0x718] sm:$0xff] }
0x2e13   : > { %15812 = vmatprep.subr.bf16.mxu1 %v16862_v0 }
0x2e16   : > { %15814 = vmatpush3.bf16.msra.mxu1 %v15813_v29 }
0x2e17   : > { %15815 = vmatprep.subr.bf16.mxu1 %v16862_v0 }
0x2e1a   : > { %15817 = vmatpush3.bf16.msra.mxu1 %v15816_v34 }
0x2e1b   : > { %15818 = vmatprep.subr.bf16.mxu1 %v16862_v0 }
0x2e1e   : > { %v6327_v41 = vpop.f32.mrb[36].mxu0  ;;  %15820 = vmatpush3.bf16.msra.mxu1 %v15819_v36 }
0x2e1f   : > { %v14462_v43 = vpop.f32.mrb[37].mxu0  ;;  %15821 = vmatprep.subr.bf16.mxu1 %v16862_v0  ;;  %v17640_v61 = vadd.f32 %v12618_v15, %v6327_v41 }
0x2e22   : > { %15823 = vmatpush3.bf16.msra.mxu1 %v15822_v42 }
0x2e23   : > { %14533 = vmatprep.subr.mxu1 %v16864_v1 }
0x2e25   : > { %14496 = vmatmul.mubr.f32.vlgmr.msra.gmra.mrb[80].mxu1 %v17440_v40 }
0x2e26   : > { %14535 = vmatprep.mubr.msk.f32.mxu1 %vm16863_vm0, %v16864_v1 }
0x2e3e   : > { %v6509_v46 = vpop.f32.mrb[38].mxu0 }
0x2e3f   : > { %v14532_v32 = vpop.f32.mrb[39].mxu0  ;;  %v17643_v63 = vadd.f32 %v12620_v56, %v6509_v46 }
0x2ed8   : > { %v17632_v51 = vpop.f32.mrb[78].mxu1 }
0x2ed9   : > { %v17634_v47 = vpop.f32.mrb[79].mxu1 }
0x2ef8   : > { %v6418_v60 = vpop.f32.mrb[80].mxu1 }
0x2ef9   : > { %v17636_v58 = vadd.f32 %v12619_v59, %v6418_v60  ;;  %v14497_v48 = vpop.f32.mrb[81].mxu1 }
0x2efb   : > { %14534 = vmatpush3.xpose.msk.msra.mxu1 %vm585_vm1, %v17636_v58 }
0x2efc   : > { %14538 = vmatprep.subr.mxu1 %v16864_v1 }
0x2efe   : > { %14536 = vmatmul.mubr.msk.f32.vlgmr.msra.gmra.mrb[82].mxu1 %vm585_vm1, %v17640_v61 }
0x2eff   : > { %14539 = vmatpush3.msra.mxu1 %v17643_v63  ;;  %14540 = vmatprep.mubr.msk.f32.mxu1 %vm16863_vm0, %v16864_v1 }
0x2f00   : > { %14543 = vmatprep.subr.mxu1 %v16864_v1 }
0x2fd1   : > { %v6589_v49 = vpop.f32.mrb[82].mxu1 }
0x2fd2   : > { %v6593_v2 = vmul.f32 0.35355338, %v6589_v49  ;;  %v14537_v7 = vpop.f32.mrb[83].mxu1 }
0x2fd3   : > { %v12615_v7 = vld [vmem:[#allocation2 + $0x1068] ss:$0 sm:$0xff] }
0x2fd4   : > { %v6594_v3 = vsel %vm585_vm1, %v6593_v2, -inf }
0x2fd5   : > { %6595 = vmax.xlane.f32.xlu0 %v6594_v3 }
0x2feb   : > { %6680 = vrot.lane.b32.xlu0 %v17636_v58, %s16865_s15 }
0x3062   : > { %v6596_v62 = vpop.xlane.xlu0 %6595 }
0x3063   : > { %v6597_v25 = vsub.f32 %v6593_v2, %v6596_v62 }
0x3065   : > { %v6598_v4 = vmul.f32 1.442695, %v6597_v25  ;;  %v6184_v25 = vadd.f32 %v12615_v7, %v17634_v47 }
0x3066   : > { %v6681_v10 = vpop.permute.xlu0 %6680 }
0x3067   : > { %16611 = vpow2.f32 %v6598_v4 }
0x3071   : > { %v16612_v5 = vpop.eup %16611 }
0x3072   : > { %v6600_v6 = vsel %vm585_vm1, %v16612_v5, 0.0 }
0x3073   : > { %6601 = vadd.xlane.f32.xlu1 %v6600_v6 }
0x3084   : > { %6678 = vrot.lane.b32.xlu1 %v17640_v61, %s16865_s15 }
0x3100   : > { %v6602_v8 = vpop.xlane.xlu1 %6601 }
0x3101   : > { %16613 = vrcp.f32 %v6602_v8  ;;  %v6189_v8 = vadd.f32 %v17632_v51, %v12615_v7  ;;  %v7604_v7 = vld [vmem:[#allocation2 + $0x888] sm:$0xff] }
0x3104   : > { %v6679_v11 = vpop.permute.xlu1 %6678 }
0x310b   : > { %v16614_v9 = vpop.eup %16613 }
0x310c   : > { %v6604_v45 = vmul.f32 %v16614_v9, %v16612_v5  ;;  %v6192_v9 = vadd.f32 %v6184_v25, %v17588_v52  ;;  %v7606_v25 = vld [vmem:[#allocation2 + $0x898] sm:$0xff] }
0x310e   : > { %14541 = vmatmul.mubr.msk.f32.vlgmr.msra.gmra.mrb[84].mxu1 %vm585_vm1, %v6604_v45 }
0x310f   : > { %14544 = vmatpush3.xpose.msk.msra.mxu1 %vm585_vm1, %v6681_v10  ;;  %14545 = vmatprep.mubr.msk.f32.mxu1 %vm16863_vm0, %v16864_v1  ;;  %v6193_v10 = vadd.f32 %v6189_v8, %v17590_v18  ;;  %v6516_v18 = vld [vmem:[#allocation2 + $0x730] sm:$0xff] }
0x3110   : > { %14548 = vmatprep.subr.mxu1 %v16864_v1  ;;  %v7609_v8 = vld [vmem:[#allocation2 + $0x8b0] sm:$0xff] }
0x3112   : > { %14546 = vmatmul.mubr.msk.f32.vlgmr.msra.gmra.mrb[86].mxu1 %vm585_vm1, %v6679_v11  ;;  %v6196_v11 = vsel %vm1551_vm2, %v6192_v9, 0.0 }
0x3113   : > { %14550 = vmatprep.mubr.msk.f32.mxu1 %vm16863_vm0, %v16864_v1 }
0x31e1   : > { %v6674_v53 = vpop.f32.mrb[84].mxu1 }
0x31e2   : > { %v14542_v12 = vpop.f32.mrb[85].mxu1 }
0x31e5   : > { %v6752_v13 = vpop.f32.mrb[86].mxu1 }
0x31e6   : > { %v6756_v14 = vmul.f32 0.35355338, %v6752_v13  ;;  %v14547_v16 = vpop.f32.mrb[87].mxu1 }
0x31e8   : > { %v6757_v17 = vsel %vm585_vm1, %v6756_v14, -inf }
0x31e9   : > { %6758 = vmax.xlane.f32.xlu1 %v6757_v17 }
0x31fa   : > { %6993 = vrot.lane.b32.xlu1 %v17636_v58, %s16866_s16 }
0x31fe   : > { %6991 = vrot.lane.b32.xlu1 %v17640_v61, %s16866_s16 }
0x3276   : > { %v6759_v38 = vpop.xlane.xlu1 %6758 }
0x3277   : > { %v6760_v19 = vsub.f32 %v6756_v14, %v6759_v38 }
0x3279   : > { %v6761_v57 = vmul.f32 1.442695, %v6760_v19 }
0x327a   : > { %v6994_v29 = vpop.permute.xlu1 %6993 }
0x327b   : > { %16615 = vpow2.f32 %v6761_v57 }
0x327e   : > { %v6992_v30 = vpop.permute.xlu1 %6991 }
0x3285   : > { %v16616_v28 = vpop.eup %16615 }
0x3286   : > { %v6763_v50 = vsel %vm585_vm1, %v16616_v28, 0.0 }
0x3287   : > { %6764 = vadd.xlane.f32.xlu0 %v6763_v50 }
0x329d   : > { %6769 = vrot.lane.b32.xlu0 %v17643_v63, %s16865_s15 }
0x3314   : > { %v6765_v31 = vpop.xlane.xlu0 %6764 }
0x3315   : > { %16617 = vrcp.f32 %v6765_v31  ;;  %v7594_v31 = vld [vmem:[#allocation2 + $0x838] sm:$0xff] }
0x3318   : > { %v6770_v20 = vpop.permute.xlu0 %6769 }
0x3319   : > { %14549 = vmatpush3.msra.mxu1 %v6770_v20  ;;  %v7595_v20 = vld [vmem:[#allocation2 + $0x840] sm:$0xff] }
0x331a   : > { %14553 = vmatprep.subr.mxu1 %v16864_v1 }
0x331f   : > { %v16618_v26 = vpop.eup %16617 }
0x3320   : > { %v6767_v21 = vmul.f32 %v16618_v26, %v16616_v28  ;;  %v15872_v26 = vpack.c.bf16 %v7595_v20, %v7594_v31 }
0x3322   : > { %14551 = vmatmul.mubr.msk.f32.vlgmr.msra.gmra.mrb[88].mxu1 %vm585_vm1, %v6767_v21 }
0x3323   : > { %14554 = vmatpush3.msra.mxu1 %v6514_v22  ;;  %14555 = vmatprep.mubr.msk.f32.mxu1 %vm16863_vm0, %v16864_v1 }
0x3324   : > { %14558 = vmatprep.subr.mxu1 %v16864_v1 }
0x33f5   : > { %v6841_v24 = vpop.f32.mrb[88].mxu1 }
0x33f6   : > { %v14552_v27 = vpop.f32.mrb[89].mxu1  ;;  %14556 = vmatmul.mubr.msk.f32.vlgmr.msra.gmra.mrb[90].mxu1 %vm585_vm1, %v6841_v24 }
0x33f7   : > { %14559 = vmatpush3.msra.mxu1 %v6513_v23  ;;  %14560 = vmatprep.mubr.msk.f32.mxu1 %vm16863_vm0, %v16864_v1  ;;  %v12637_v27 = vld [vmem:[#allocation2 + $0x798] ss:$0 sm:$0xff] }
0x33f8   : > { %14563 = vmatprep.subr.mxu1 %v16864_v1 }
0x33fa   : > { %14561 = vmatmul.mubr.msk.f32.vlgmr.msra.gmra.mrb[92].mxu1 %vm585_vm1, %v6674_v53  ;;  %v6197_v53 = vsel %vm1551_vm2, %v6193_v10, 0.0 }
0x33fb   : > { %14565 = vmatprep.mubr.msk.f32.mxu1 %vm16863_vm0, %v16864_v1 }
0x33fe   : > { %14564 = vmatpush3.xpose.msk.msra.mxu1 %vm585_vm1, %v6994_v29 }
0x33ff   : > { %14568 = vmatprep.subr.mxu1 %v16864_v1 }
0x3401   : > { %14566 = vmatmul.mubr.msk.f32.vlgmr.msra.gmra.mrb[94].mxu1 %vm585_vm1, %v6992_v30 }
0x3402   : > { %14570 = vmatprep.mubr.msk.f32.mxu1 %vm16863_vm0, %v16864_v1 }
0x34c9   : > { %v6914_v33 = vpop.f32.mrb[90].mxu1 }
0x34ca   : > { %v14557_v34 = vpop.f32.mrb[91].mxu1 }
0x34cd   : > { %v6987_v35 = vpop.f32.mrb[92].mxu1 }
0x34ce   : > { %v17690_v55 = vadd.f32 %v6987_v35, %v6914_v33  ;;  %v14562_v36 = vpop.f32.mrb[93].mxu1 }
0x34d4   : > { %v7065_v37 = vpop.f32.mrb[94].mxu1 }
0x34d5   : > { %v7069_v39 = vmul.f32 0.35355338, %v7065_v37  ;;  %v14567_v41 = vpop.f32.mrb[95].mxu1 }
0x34d7   : > { %v7070_v42 = vsel %vm585_vm1, %v7069_v39, -inf }
0x34d8   : > { %7071 = vmax.xlane.f32.xlu0 %v7070_v42 }
0x34ee   : > { %7081 = vrot.lane.b32.xlu0 %v17643_v63, %s16866_s16 }
0x34f2   : > { %7231 = vrot.lane.b32.xlu0 %v17640_v61, %s16867_s17 }
0x3565   : > { %v7072_v43 = vpop.xlane.xlu0 %7071 }
0x3566   : > { %v7073_v46 = vsub.f32 %v7069_v39, %v7072_v43  ;;  %v7596_v43 = vld [vmem:[#allocation2 + $0x848] sm:$0xff] }
0x3568   : > { %v7074_v32 = vmul.f32 1.442695, %v7073_v46  ;;  %v7597_v46 = vld [vmem:[#allocation2 + $0x850] sm:$0xff] }
0x3569   : > { %v7082_v59 = vpop.permute.xlu0 %7081 }
0x356a   : > { %16619 = vpow2.f32 %v7074_v32  ;;  %14569 = vmatpush3.msra.mxu1 %v7082_v59  ;;  %v15876_v32 = vpack.c.bf16 %v7597_v46, %v7596_v43  ;;  %v7598_v59 = vld [vmem:[#allocation2 + $0x858] sm:$0xff]  ;;  %v7515_v46 = vld [vmem:[#allocation2 + $0x810] sm:$0xff] }
0x356b   : > { %14578 = vmatprep.subr.mxu1 %v16864_v1 }
0x356d   : > { %v7232_v2 = vpop.permute.xlu0 %7231 }
0x3574   : > { %v16620_v60 = vpop.eup %16619 }
0x3575   : > { %v7076_v15 = vsel %vm585_vm1, %v16620_v60, 0.0 }
0x3576   : > { %7077 = vadd.xlane.f32.xlu1 %v7076_v15 }
0x3587   : > { %7233 = vrot.lane.b32.xlu1 %v17636_v58, %s16867_s17  ;;  %v6515_v58 = vld [vmem:[#allocation2 + $0x728] sm:$0xff] }
0x3588   : > { %14574 = vmatpush3.msra.mxu0 %v6515_v58 }
0x3589   : > { %14583 = vmatprep.subr.mxu0 %v16864_v1 }
0x3603   : > { %v7078_v48 = vpop.xlane.xlu1 %7077 }
0x3604   : > { %16621 = vrcp.f32 %v7078_v48  ;;  %v7600_v48 = vld [vmem:[#allocation2 + $0x868] sm:$0xff] }
0x3607   : > { %v7234_v61 = vpop.permute.xlu1 %7233 }
0x360e   : > { %v16622_v56 = vpop.eup %16621 }
0x360f   : > { %v7080_v49 = vmul.f32 %v16622_v56, %v16620_v60  ;;  %v7599_v60 = vld [vmem:[#allocation2 + $0x860] sm:$0xff]  ;;  %v7601_v56 = vld [vmem:[#allocation2 + $0x870] sm:$0xff] }
0x3610   : > { %v15880_v15 = vpack.c.bf16 %v7599_v60, %v7598_v59  ;;  %v7517_v59 = vld [vmem:[#allocation2 + $0x820] sm:$0xff]  ;;  %v7518_v60 = vld [vmem:[#allocation2 + $0x828] sm:$0xff] }
0x3611   : > { %14571 = vmatmul.mubr.msk.f32.vlgmr.msra.gmra.mrb[96].mxu1 %vm585_vm1, %v7080_v49  ;;  %v15884_v49 = vpack.c.bf16 %v7601_v56, %v7600_v48  ;;  %v7691_v48 = vld [vmem:[#allocation2 + $0x8c8] sm:$0xff]  ;;  %v15870_v56 = vpack.c.bf16 %v7518_v60, %v7517_v59 }
0x3612   : > { %14579 = vmatpush3.xpose.msk.msra.mxu1 %vm585_vm1, %v7234_v61  ;;  %14580 = vmatprep.mubr.msk.f32.mxu1 %vm16863_vm0, %v16864_v1  ;;  %v7602_v61 = vld [vmem:[#allocation2 + $0x878] sm:$0xff] }
0x3613   : > { %14588 = vmatprep.subr.mxu1 %v16864_v1 }
0x3615   : > { %14581 = vmatmul.mubr.msk.f32.vlgmr.msra.gmra.mrb[98].mxu1 %vm585_vm1, %v7232_v2  ;;  %v7603_v2 = vld [vmem:[#allocation2 + $0x880] sm:$0xff] }
0x3616   : > { %14590 = vmatprep.mubr.msk.f32.mxu1 %vm16863_vm0, %v16864_v1  ;;  %14589 = vmatpush3.msra.mxu1 %v6516_v18  ;;  %v15888_v58 = vpack.c.bf16 %v7603_v2, %v7602_v61 }
0x3617   : > { %15873 = vmatprep.subr.bf16.mxu1 %v15872_v26 }
0x36e4   : > { %v7153_v3 = vpop.f32.mrb[96].mxu1 }
0x36e5   : > { %v14572_v62 = vpop.f32.mrb[97].mxu1  ;;  %14576 = vmatmul.mubr.msk.f32.vlgmr.msra.gmra.mrb[40].mxu0 %vm585_vm1, %v7153_v3  ;;  %v7605_v3 = vld [vmem:[#allocation2 + $0x890] sm:$0xff] }
0x36e6   : > { %14585 = vmatprep.mubr.msk.f32.mxu0 %vm16863_vm0, %v16864_v1  ;;  %v15892_v62 = vpack.c.bf16 %v7605_v3, %v7604_v7  ;;  %v12638_v3 = vld [vmem:[#allocation2 + $0x7a0] ss:$0 sm:$0xff] }
0x36e8   : > { %v7305_v4 = vpop.f32.mrb[98].mxu1 }
0x36e9   : > { %v7309_v5 = vmul.f32 0.35355338, %v7305_v4  ;;  %v14582_v6 = vpop.f32.mrb[99].mxu1  ;;  %v7607_v4 = vld [vmem:[#allocation2 + $0x8a0] sm:$0xff] }
0x36ea   : > { %v7608_v6 = vld [vmem:[#allocation2 + $0x8a8] sm:$0xff] }
0x36eb   : > { %v7310_v45 = vsel %vm585_vm1, %v7309_v5, -inf }
0x36ec   : > { %7311 = vmax.xlane.f32.xlu1 %v7310_v45  ;;  %v7503_v45 = vld [vmem:[#allocation2 + $0x7b0] sm:$0xff] }
0x36f0   : > { %6198 = vadd.xlane.f32.xlu1 %v6196_v11  ;;  %v7505_v11 = vld [vmem:[#allocation2 + $0x7c0] sm:$0xff] }
0x36f4   : > { %6200 = vadd.xlane.f32.xlu1 %v6197_v53 }
0x3779   : > { %v7312_v47 = vpop.xlane.xlu1 %7311 }
0x377a   : > { %v7313_v12 = vsub.f32 %v7309_v5, %v7312_v47  ;;  %v15896_v5 = vpack.c.bf16 %v7607_v4, %v7606_v25  ;;  %v7506_v47 = vld [vmem:[#allocation2 + $0x7c8] sm:$0xff]  ;;  %v7692_v4 = vld [vmem:[#allocation2 + $0x8d0] sm:$0xff] }
0x377b   : > { %v12639_v25 = vld [vmem:[#allocation2 + $0x7a8] ss:$0 sm:$0xff] }
0x377c   : > { %v7314_v13 = vmul.f32 1.442695, %v7313_v12  ;;  %v15852_v12 = vpack.c.bf16 %v7506_v47, %v7505_v11  ;;  %v7697_v47 = vld [vmem:[#allocation2 + $0x8f8] sm:$0xff] }
0x377d   : > { %v6199_v21 = vpop.xlane.xlu1 %6198 }
0x377e   : > { %16623 = vpow2.f32 %v7314_v13  ;;  %v6202_v22 = vmul.f32 0.03125, %v6199_v21  ;;  %v7507_v13 = vld [vmem:[#allocation2 + $0x7d0] sm:$0xff] }
0x3780   : > { %v6204_v33 = vsub.f32 %v6192_v9, %v6202_v22  ;;  %v15900_v9 = vpack.c.bf16 %v7609_v8, %v7608_v6  ;;  %v12617_v22 = vld [vmem:[#allocation2 + $0x1078] ss:$0 sm:$0xff] }
0x3781   : > { %v6201_v23 = vpop.xlane.xlu1 %6200 }
0x3782   : > { %v6203_v34 = vmul.f32 0.03125, %v6201_v23  ;;  %v17736_v36 = vsel %vm1551_vm2, %v6204_v33, 0.0  ;;  %v7509_v23 = vld [vmem:[#allocation2 + $0x7e0] sm:$0xff] }
0x3783   : > { %v6208_v41 = vmul.f32 %v17736_v36, %v17736_v36 }
0x3784   : > { %v6205_v37 = vsub.f32 %v6193_v10, %v6203_v34  ;;  %v7504_v10 = vld [vmem:[#allocation2 + $0x7b8] sm:$0xff] }
0x3785   : > { %v15849_v53 = vpack.c.bf16 %v7504_v10, %v7503_v45  ;;  %v7694_v45 = vld [vmem:[#allocation2 + $0x8e0] sm:$0xff]  ;;  %v7695_v10 = vld [vmem:[#allocation2 + $0x8e8] sm:$0xff] }
0x3786   : > { %v17745_v42 = vsel %vm1551_vm2, %v6205_v37, 0.0  ;;  %v15912_v11 = vpack.c.bf16 %v7695_v10, %v7694_v45 }
0x3788   : > { %v16624_v51 = vpop.eup %16623 }
0x3789   : > { %v7316_v52 = vsel %vm585_vm1, %v16624_v51, 0.0 }
0x378a   : > { %7317 = vadd.xlane.f32.xlu0 %v7316_v52 }
0x37a0   : > { %7321 = vrot.lane.b32.xlu0 %v17643_v63, %s16867_s17 }
0x37b8   : > { %v7226_v14 = vpop.f32.mrb[40].mxu0 }
0x37b9   : > { %v7230_v16 = vadd.f32 %v7226_v14, %v17690_v55  ;;  %v14577_v17 = vpop.f32.mrb[41].mxu0 }
0x3817   : > { %v7318_v38 = vpop.xlane.xlu0 %7317 }
0x3818   : > { %16625 = vrcp.f32 %v7318_v38 }
0x381b   : > { %v7322_v19 = vpop.permute.xlu0 %7321 }
0x381c   : > { %14584 = vmatpush3.msra.mxu0 %v7322_v19 }
0x381d   : > { %15848 = vmatprep.subr.bf16.mxu0 %v16862_v0 }
0x3822   : > { %v16626_v57 = vpop.eup %16625 }
0x3823   : > { %v7320_v28 = vmul.f32 %v16626_v57, %v16624_v51  ;;  %v7508_v51 = vld [vmem:[#allocation2 + $0x7d8] sm:$0xff] }
0x3824   : > { %v15855_v52 = vpack.c.bf16 %v7508_v51, %v7507_v13  ;;  %v7698_v13 = vld [vmem:[#allocation2 + $0x900] sm:$0xff]  ;;  %v7699_v51 = vld [vmem:[#allocation2 + $0x908] sm:$0xff] }
0x3825   : > { %14586 = vmatmul.mubr.msk.f32.vlgmr.msra.gmra.mrb[42].mxu0 %vm585_vm1, %v7320_v28 }
0x3826   : > { %14625 = vmatprep.mubr.msk.f32.mxu0 %vm16863_vm0, %v16864_v1  ;;  %15850 = vmatpush3.bf16.msra.mxu0 %v15849_v53  ;;  %v7696_v53 = vld [vmem:[#allocation2 + $0x8f0] sm:$0xff] }
0x3827   : > { %15851 = vmatprep.subr.bf16.mxu0 %v16862_v0 }
0x382a   : > { %15853 = vmatpush3.bf16.msra.mxu0 %v15852_v12  ;;  %v15916_v12 = vpack.c.bf16 %v7697_v47, %v7696_v53 }
0x382b   : > { %15854 = vmatprep.subr.bf16.mxu0 %v16862_v0 }
0x382e   : > { %15856 = vmatpush3.bf16.msra.mxu0 %v15855_v52  ;;  %v15920_v52 = vpack.c.bf16 %v7699_v51, %v7698_v13 }
0x382f   : > { %15857 = vmatprep.subr.bf16.mxu0 %v16862_v0 }
0x38f8   : > { %v7393_v63 = vpop.f32.mrb[42].mxu0 }
0x38f9   : > { %v14587_v50 = vpop.f32.mrb[43].mxu0  ;;  %14591 = vmatmul.mubr.msk.f32.vlgmr.msra.gmra.mrb[100].mxu1 %vm585_vm1, %v7393_v63 }
0x38fa   : > { %15875 = vmatpush3.bf16.msra.mxu1 %v15872_v26  ;;  %v12616_v26 = vld [vmem:[#allocation2 + $0x1070] ss:$0 sm:$0xff] }
0x38fb   : > { %15877 = vmatprep.subr.bf16.mxu1 %v15876_v32 }
0x38fe   : > { %15879 = vmatpush3.bf16.msra.mxu1 %v15876_v32  ;;  %v7516_v32 = vld [vmem:[#allocation2 + $0x818] sm:$0xff] }
0x38ff   : > { %15881 = vmatprep.subr.bf16.mxu1 %v15880_v15 }
0x3902   : > { %15883 = vmatpush3.bf16.msra.mxu1 %v15880_v15  ;;  %v7690_v15 = vld [vmem:[#allocation2 + $0x8c0] sm:$0xff] }
0x3903   : > { %15885 = vmatprep.subr.bf16.mxu1 %v15884_v49 }
0x3906   : > { %15887 = vmatpush3.bf16.msra.mxu1 %v15884_v49  ;;  %v15904_v49 = vpack.c.bf16 %v7691_v48, %v7690_v15 }
0x3907   : > { %15889 = vmatprep.subr.bf16.mxu1 %v15888_v58 }
0x390a   : > { %15891 = vmatpush3.bf16.msra.mxu1 %v15888_v58 }
0x390b   : > { %15893 = vmatprep.subr.bf16.mxu1 %v15892_v62 }
0x390e   : > { %15895 = vmatpush3.bf16.msra.mxu1 %v15892_v62 }
0x390f   : > { %15897 = vmatprep.subr.bf16.mxu1 %v15896_v5 }
0x3912   : > { %15899 = vmatpush3.bf16.msra.mxu1 %v15896_v5  ;;  %v7693_v5 = vld [vmem:[#allocation2 + $0x8d8] sm:$0xff] }
0x3913   : > { %15901 = vmatprep.subr.bf16.mxu1 %v15900_v9 }
0x3916   : > { %15903 = vmatpush3.bf16.msra.mxu1 %v15900_v9  ;;  %v15908_v9 = vpack.c.bf16 %v7693_v5, %v7692_v4 }
0x3917   : > { %15936 = vmatprep.subr.bf16.mxu1 %v16862_v0 }
0x39cc   : > { %v7466_v24 = vpop.f32.mrb[100].mxu1 }
0x39cd   : > { %v7470_v29 = vadd.f32 %v7466_v24, %v7230_v16  ;;  %v14592_v30 = vpop.f32.mrb[101].mxu1  ;;  %v7510_v24 = vld [vmem:[#allocation2 + $0x7e8] sm:$0xff] }
0x39cf   : > { %v7476_v35 = vadd.f32 %v12637_v27, %v7470_v29  ;;  %v15858_v29 = vpack.c.bf16 %v7510_v24, %v7509_v23  ;;  %v12640_v24 = vld [vmem:[#allocation2 + $0x830] ss:$0 sm:$0xff] }
0x39d1   : > { %v17732_v55 = vadd.f32 %v7476_v35, %v17440_v40  ;;  %v6209_v40 = vmul.f32 %v17745_v42, %v17745_v42  ;;  %15859 = vmatpush3.bf16.msra.mxu0 %v15858_v29  ;;  %v7511_v35 = vld [vmem:[#allocation2 + $0x7f0] sm:$0xff] }
0x39d2   : > { %15860 = vmatprep.subr.bf16.mxu0 %v16862_v0 }
0x39d3   : > { %v7480_v39 = vsel %vm1551_vm2, %v17732_v55, 0.0 }
0x39d4   : > { %7481 = vadd.xlane.f32.xlu1 %v7480_v39 }
0x39d8   : > { %6210 = vadd.xlane.f32.xlu1 %v6208_v41  ;;  %v7514_v41 = vld [vmem:[#allocation2 + $0x808] sm:$0xff] }
0x39dc   : > { %6212 = vadd.xlane.f32.xlu1 %v6209_v40 }
0x3a61   : > { %v7482_v18 = vpop.xlane.xlu1 %7481 }
0x3a62   : > { %v7483_v14 = vmul.f32 0.03125, %v7482_v18  ;;  %v7700_v18 = vld [vmem:[#allocation2 + $0x910] sm:$0xff] }
0x3a64   : > { %v7484_v16 = vsub.f32 %v17732_v55, %v7483_v14  ;;  %v7512_v55 = vld [vmem:[#allocation2 + $0x7f8] sm:$0xff] }
0x3a65   : > { %v6211_v17 = vpop.xlane.xlu1 %6210  ;;  %v15861_v39 = vpack.c.bf16 %v7512_v55, %v7511_v35  ;;  %v7701_v14 = vld [vmem:[#allocation2 + $0x918] sm:$0xff] }
0x3a66   : > { %v7485_v38 = vsel %vm1551_vm2, %v7484_v16, 0.0  ;;  %v6214_v19 = vmul.f32 0.03125, %v6211_v17  ;;  %v15924_v16 = vpack.c.bf16 %v7701_v14, %v7700_v18  ;;  %v7702_v17 = vld [vmem:[#allocation2 + $0x920] sm:$0xff] }
0x3a67   : > { %v7486_v57 = vmul.f32 %v7485_v38, %v7485_v38  ;;  %15862 = vmatpush3.bf16.msra.mxu0 %v15861_v39 }
0x3a68   : > { %v6216_v28 = vadd.f32 1e-05, %v6214_v19  ;;  %15863 = vmatprep.subr.bf16.mxu0 %v16862_v0 }
0x3a69   : > { %7487 = vadd.xlane.f32.xlu0 %v7486_v57  ;;  %v6213_v63 = vpop.xlane.xlu1 %6212  ;;  %v7704_v57 = vld [vmem:[#allocation2 + $0x930] sm:$0xff] }
0x3a6a   : > { %16627 = vrsqrt.f32 %v6216_v28  ;;  %v6215_v50 = vmul.f32 0.03125, %v6213_v63  ;;  %v7705_v28 = vld [vmem:[#allocation2 + $0x938] sm:$0xff] }
0x3a6b   : > { %v15932_v63 = vpack.c.bf16 %v7705_v28, %v7704_v57 }
0x3a6c   : > { %v6217_v31 = vadd.f32 1e-05, %v6215_v50  ;;  %v12641_v50 = vld [vmem:[#allocation2 + $0x8b8] ss:$0 sm:$0xff] }
0x3a6e   : > { %16629 = vrsqrt.f32 %v6217_v31 }
0x3a74   : > { %v16628_v20 = vpop.eup %16627 }
0x3a75   : > { %v6220_v21 = vmul.f32 %v16628_v20, %v17736_v36  ;;  %v7513_v36 = vld [vmem:[#allocation2 + $0x800] sm:$0xff] }
0x3a76   : > { %v15864_v43 = vpack.c.bf16 %v7514_v41, %v7513_v36 }
0x3a77   : > { %v6226_v27 = vmul.f32 %v12616_v26, %v6220_v21 }
0x3a78   : > { %v16630_v30 = vpop.eup %16629  ;;  %15865 = vmatpush3.bf16.msra.mxu0 %v15864_v43 }
0x3a79   : > { %v17757_v33 = vadd.f32 %v12617_v22, %v6226_v27  ;;  %v6221_v34 = vmul.f32 %v16630_v30, %v17745_v42  ;;  %v15867_v42 = vpack.c.bf16 %v7516_v32, %v7515_v46  ;;  %15866 = vmatprep.subr.bf16.mxu0 %v16862_v0 }
0x3a7b   : > { %v6227_v37 = vmul.f32 %v12616_v26, %v6221_v34  ;;  %14660 = vmatprep.mubr.f32.mxu1 %v17757_v33  ;;  %v12642_v34 = vld [vmem:[#allocation2 + $0x940] ss:$0 sm:$0xff] }
0x3a7c   : > { %15868 = vmatpush3.bf16.msra.mxu0 %v15867_v42 }
0x3a7d   : > { %v17762_v40 = vadd.f32 %v12617_v22, %v6227_v37  ;;  %15869 = vmatprep.subr.bf16.mxu0 %v16862_v0 }
0x3a7f   : > { %14661 = vmatmul.mubr.f32.vlgmr.msra.gmra.mrb[102].mxu1 %v17762_v40 }
0x3a80   : > { %14702 = vmatprep.mubr.msk.f32.mxu1 %vm16863_vm0, %v16864_v1  ;;  %15871 = vmatpush3.bf16.msra.mxu0 %v15870_v56 }
0x3a81   : > { %15905 = vmatprep.subr.bf16.mxu0 %v15904_v49 }
0x3af6   : > { %v7488_v61 = vpop.xlane.xlu0 %7487 }
0x3af7   : > { %v7489_v2 = vmul.f32 0.03125, %v7488_v61 }
0x3af9   : > { %v7490_v58 = vadd.f32 1e-05, %v7489_v2 }
0x3afb   : > { %16631 = vrsqrt.f32 %v7490_v58 }
0x3b05   : > { %v16632_v7 = vpop.eup %16631 }
0x3b06   : > { %v7492_v62 = vmul.f32 %v16632_v7, %v7485_v38  ;;  %v7703_v38 = vld [vmem:[#allocation2 + $0x928] sm:$0xff] }
0x3b07   : > { %v15928_v19 = vpack.c.bf16 %v7703_v38, %v7702_v17 }
0x3b08   : > { %v7497_v6 = vmul.f32 %v12638_v3, %v7492_v62 }
0x3b0a   : > { %v7502_v8 = vadd.f32 %v12639_v25, %v7497_v6 }
0x3b0c   : > { %14626 = vmatmul.mubr.f32.vlgmr.msra.gmra.mrb[44].mxu0 %v7502_v8 }
0x3b0d   : > { %15907 = vmatpush3.bf16.msra.mxu0 %v15904_v49  ;;  %14695 = vmatprep.mubr.f32.mxu0 %v17757_v33 }
0x3b0e   : > { %15909 = vmatprep.subr.bf16.mxu0 %v15908_v9 }
0x3b11   : > { %15911 = vmatpush3.bf16.msra.mxu0 %v15908_v9 }
0x3b12   : > { %15913 = vmatprep.subr.bf16.mxu0 %v15912_v11 }
0x3b15   : > { %15915 = vmatpush3.bf16.msra.mxu0 %v15912_v11 }
0x3b16   : > { %15917 = vmatprep.subr.bf16.mxu0 %v15916_v12 }
0x3b19   : > { %15919 = vmatpush3.bf16.msra.mxu0 %v15916_v12 }
0x3b1a   : > { %15921 = vmatprep.subr.bf16.mxu0 %v15920_v52 }
0x3b1d   : > { %15923 = vmatpush3.bf16.msra.mxu0 %v15920_v52 }
0x3b1e   : > { %15925 = vmatprep.subr.bf16.mxu0 %v15924_v16 }
0x3b21   : > { %15927 = vmatpush3.bf16.msra.mxu0 %v15924_v16 }
0x3b22   : > { %15929 = vmatprep.subr.bf16.mxu0 %v15928_v19 }
0x3b25   : > { %15931 = vmatpush3.bf16.msra.mxu0 %v15928_v19 }
0x3b26   : > { %15933 = vmatprep.subr.bf16.mxu0 %v15932_v63 }
0x3b29   : > { %15935 = vmatpush3.bf16.msra.mxu0 %v15932_v63 }
0x3b2a   : > { %15950 = vmatprep.subr.bf16.mxu0 %v16862_v0 }
0x3b2c   : > { %14696 = vmatmul.mubr.f32.vlgmr.msra.gmra.mrb[46].mxu0 %v17762_v40 }
0x3b2d   : > { %14740 = vmatprep.mubr.msk.f32.mxu0 %vm16863_vm0, %v16864_v1 }
0x3b52   : > { %v14662_v31 = vpop.f32.mrb[102].mxu1 }
0x3b53   : > { %v7687_v20 = vadd.f32 %v14662_v31, %v12641_v50  ;;  %v7681_v26 = vpop.f32.mrb[103].mxu1 }
0x3b54   : > { %v7682_v21 = vadd.f32 %v12641_v50, %v7681_v26 }
0x3b56   : > { %v15937_v22 = vpack.c.bf16 %v7687_v20, %v7682_v21  ;;  %v17775_v23 = vpack.i.bf16 %v7687_v20, %v7682_v21 }
0x3b58   : > { %15939 = vmatpush3.bf16.xpose.msk.msra.mxu1 %vm17158_vm3, %v15937_v22 }
0x3b59   : > { %15940 = vmatprep.subr.bf16.mxu1 %v16862_v0 }
0x3bdf   : > { %v7590_v27 = vpop.f32.mrb[44].mxu0 }
0x3be0   : > { %v7591_v29 = vadd.f32 %v12640_v24, %v7590_v27  ;;  %v14627_v30 = vpop.f32.mrb[45].mxu0 }
0x3be2   : > { %8277 = vrot.lane.b32.xlu0 %v7591_v29, %s16866_s16  ;;  %14703 = vmatmul.mubr.msk.f32.vlgmr.msra.gmra.mrb[104].mxu1 %vm585_vm1, %v7591_v29 }
0x3be3   : > { %14709 = vmatprep.mubr.msk.f32.mxu1 %vm16863_vm0, %v16864_v1 }
0x3bff   : > { %v14697_v35 = vpop.f32.mrb[46].mxu0 }
0x3c00   : > { %v7783_v55 = vadd.f32 %v14697_v35, %v12642_v34  ;;  %v7777_v37 = vpop.f32.mrb[47].mxu0 }
0x3c01   : > { %v7778_v39 = vadd.f32 %v12642_v34, %v7777_v37  ;;  %v7787_v37 = vld [vmem:[#allocation2 + $0x950] sm:$0xff] }
0x3c03   : > { %v15941_v36 = vpack.c.bf16 %v7783_v55, %v7778_v39  ;;  %v16451_v41 = vpack.i.bf16 %v7783_v55, %v7778_v39 }
0x3c05   : > { %15942 = vmatpush3.bf16.msra.mxu1 %v15941_v36 }
0x3c06   : > { %15943 = vmatprep.subr.bf16.mxu1 %v16862_v0 }
0x3c54   : > { %v8278_v9 = vpop.permute.xlu0 %8277 }
0x3cb5   : > { %v7865_v43 = vpop.f32.mrb[104].mxu1 }
0x3cb6   : > { %v7869_v46 = vmul.f32 0.35355338, %v7865_v43  ;;  %v14704_v32 = vpop.f32.mrb[105].mxu1 }
0x3cb8   : > { %v7870_v42 = vsel %vm1942_vm4, %v7869_v46, -inf }
0x3cb9   : > { %7871 = vmax.xlane.f32.xlu1 %v7870_v42 }
0x3cca   : > { %16442 = vrot.lane.b32.xlu1 %v17775_v23, %s16865_s15 }
0x3d46   : > { %v7872_v59 = vpop.xlane.xlu1 %7871 }
0x3d47   : > { %v7873_v60 = vsub.f32 %v7869_v46, %v7872_v59 }
0x3d49   : > { %v7874_v15 = vmul.f32 1.442695, %v7873_v60 }
0x3d4a   : > { %v16443_v49 = vpop.permute.xlu1 %16442 }
0x3d4b   : > { %16633 = vpow2.f32 %v7874_v15  ;;  %v16445_v7 = vunpack.i.h.bf16 %v16443_v49  ;;  %v16444_v3 = vunpack.i.l.bf16 %v16443_v49 }
0x3d4d   : > { %v15944_v8 = vpack.c.bf16 %v16445_v7, %v16444_v3 }
0x3d55   : > { %v16634_v48 = vpop.eup %16633 }
0x3d56   : > { %v7876_v56 = vsel %vm1942_vm4, %v16634_v48, 0.0 }
0x3d57   : > { %7877 = vadd.xlane.f32.xlu1 %v7876_v56 }
0x3d68   : > { %7955 = vrot.lane.b32.xlu1 %v7591_v29, %s16865_s15 }
0x3d6c   : > { %16447 = vrot.lane.b32.xlu1 %v17775_v23, %s16866_s16 }
0x3de4   : > { %v7878_v61 = vpop.xlane.xlu1 %7877 }
0x3de5   : > { %16635 = vrcp.f32 %v7878_v61 }
0x3de8   : > { %v7956_v2 = vpop.permute.xlu1 %7955 }
0x3dec   : > { %v16448_v58 = vpop.permute.xlu1 %16447 }
0x3ded   : > { %v16450_v62 = vunpack.i.h.bf16 %v16448_v58  ;;  %v16449_v25 = vunpack.i.l.bf16 %v16448_v58 }
0x3def   : > { %v16636_v4 = vpop.eup %16635  ;;  %v15951_v5 = vpack.c.bf16 %v16450_v62, %v16449_v25 }
0x3df0   : > { %v17792_v6 = vmul.f32 %v16636_v4, %v16634_v48 }
0x3df1   : > { %15953 = vmatpush3.bf16.xpose.msk.msra.mxu0 %vm17158_vm3, %v15951_v5 }
0x3df2   : > { %14710 = vmatmul.mubr.msk.f32.vlgmr.msra.gmra.mrb[106].mxu1 %vm1942_vm4, %v17792_v6  ;;  %15957 = vmatprep.subr.bf16.mxu0 %v16862_v0 }
0x3df3   : > { %15946 = vmatpush3.bf16.xpose.msk.msra.mxu1 %vm17158_vm3, %v15944_v8  ;;  %14716 = vmatprep.mubr.msk.f32.mxu1 %vm16863_vm0, %v16864_v1 }
0x3df4   : > { %15947 = vmatprep.subr.bf16.mxu1 %v16862_v0 }
0x3df8   : > { %14741 = vmatmul.mubr.msk.f32.vlgmr.msra.gmra.mrb[48].mxu0 %vm585_vm1, %v8278_v9 }
0x3df9   : > { %14759 = vmatprep.mubr.msk.f32.mxu0 %vm16863_vm0, %v16864_v1 }
0x3dfa   : > { %14717 = vmatmul.mubr.msk.f32.vlgmr.msra.gmra.mrb[108].mxu1 %vm585_vm1, %v7956_v2  ;;  %v7788_v2 = vld [vmem:[#allocation2 + $0x958] sm:$0xff] }
0x3dfb   : > { %14723 = vmatprep.mubr.msk.f32.mxu1 %vm16863_vm0, %v16864_v1 }
0x3ec5   : > { %v17810_v45 = vpop.f32.mrb[106].mxu1 }
0x3ec6   : > { %v14711_v10 = vpop.f32.mrb[107].mxu1 }
0x3ecb   : > { %v8355_v11 = vpop.f32.mrb[48].mxu0 }
0x3ecc   : > { %v14742_v53 = vpop.f32.mrb[49].mxu0  ;;  %v8359_v52 = vmul.f32 0.35355338, %v8355_v11 }
0x3ecd   : > { %v8033_v47 = vpop.f32.mrb[108].mxu1 }
0x3ece   : > { %v8037_v12 = vmul.f32 0.35355338, %v8033_v47  ;;  %v14718_v13 = vpop.f32.mrb[109].mxu1  ;;  %v8360_v18 = vsel %vm1942_vm4, %v8359_v52, -inf }
0x3ed0   : > { %v8038_v51 = vsel %vm1942_vm4, %v8037_v12, -inf }
0x3ed1   : > { %8039 = vmax.xlane.f32.xlu1 %v8038_v51 }
0x3ee2   : > { %16452 = vrot.lane.b32.xlu1 %v16451_v41, %s16865_s15 }
0x3ee6   : > { %8525 = vrot.lane.b32.xlu1 %v7591_v29, %s16867_s17 }
0x3f0a   : > { %8361 = vmax.xlane.f32.xlu1 %v8360_v18 }
0x3f1b   : > { %16462 = vrot.lane.b32.xlu1 %v16451_v41, %s16866_s16 }
0x3f1f   : > { %16467 = vrot.lane.b32.xlu1 %v16451_v41, %s16867_s17  ;;  %v7786_v41 = vld [vmem:[#allocation2 + $0x948] sm:$0xff] }
0x3f5e   : > { %v8040_v14 = vpop.xlane.xlu1 %8039 }
0x3f5f   : > { %v8041_v16 = vsub.f32 %v8037_v12, %v8040_v14 }
0x3f61   : > { %v8042_v17 = vmul.f32 1.442695, %v8041_v16 }
0x3f62   : > { %v16453_v38 = vpop.permute.xlu1 %16452 }
0x3f63   : > { %16637 = vpow2.f32 %v8042_v17  ;;  %v16455_v19 = vunpack.i.h.bf16 %v16453_v38  ;;  %v16454_v57 = vunpack.i.l.bf16 %v16453_v38  ;;  %v7789_v17 = vld [vmem:[#allocation2 + $0x960] sm:$0xff] }
0x3f65   : > { %v15948_v28 = vpack.c.bf16 %v16455_v19, %v16454_v57 }
0x3f66   : > { %v8526_v31 = vpop.permute.xlu1 %8525 }
0x3f67   : > { %15949 = vmatpush3.bf16.msra.mxu1 %v15948_v28 }
0x3f68   : > { %14726 = vmatprep.subr.mxu1 %v16864_v1 }
0x3f6d   : > { %v16638_v63 = vpop.eup %16637 }
0x3f6e   : > { %v8044_v50 = vsel %vm1942_vm4, %v16638_v63, 0.0 }
0x3f6f   : > { %8045 = vadd.xlane.f32.xlu0 %v8044_v50 }
0x3f85   : > { %16457 = vrot.lane.b32.xlu0 %v17775_v23, %s16867_s17 }
0x3f97   : > { %v8362_v20 = vpop.xlane.xlu1 %8361 }
0x3f98   : > { %v8363_v26 = vsub.f32 %v8359_v52, %v8362_v20 }
0x3f9a   : > { %v8364_v21 = vmul.f32 1.442695, %v8363_v26  ;;  %v12663_v26 = vld [vmem:[#allocation2 + $0x9c8] ss:$0 sm:$0xff] }
0x3f9b   : > { %v16463_v36 = vpop.permute.xlu1 %16462 }
0x3f9c   : > { %16639 = vpow2.f32 %v8364_v21  ;;  %v16465_v43 = vunpack.i.h.bf16 %v16463_v36  ;;  %v16464_v46 = vunpack.i.l.bf16 %v16463_v36 }
0x3f9e   : > { %v15955_v56 = vpack.c.bf16 %v16465_v43, %v16464_v46 }
0x3f9f   : > { %v16468_v5 = vpop.permute.xlu1 %16467 }
0x3fa0   : > { %v16470_v9 = vunpack.i.h.bf16 %v16468_v5 }
0x3fa6   : > { %v16640_v22 = vpop.eup %16639 }
0x3fa7   : > { %v8366_v24 = vsel %vm1942_vm4, %v16640_v22, 0.0 }
0x3fa8   : > { %8367 = vadd.xlane.f32.xlu0 %v8366_v24 }
0x3ffc   : > { %v8046_v27 = vpop.xlane.xlu0 %8045 }
0x3ffd   : > { %16641 = vrcp.f32 %v8046_v27 }
0x4000   : > { %v16458_v29 = vpop.permute.xlu0 %16457 }
0x4001   : > { %v16460_v30 = vunpack.i.h.bf16 %v16458_v29  ;;  %v16459_v34 = vunpack.i.l.bf16 %v16458_v29  ;;  %v8805_v29 = vld [vmem:[#allocation2 + $0x9e0] sm:$0xff] }
0x4003   : > { %v15958_v35 = vpack.c.bf16 %v16460_v30, %v16459_v34  ;;  %v8806_v30 = vld [vmem:[#allocation2 + $0x9e8] sm:$0xff]  ;;  %v8807_v34 = vld [vmem:[#allocation2 + $0x9f0] sm:$0xff] }
0x4005   : > { %15960 = vmatpush3.bf16.xpose.msk.msra.mxu0 %vm17158_vm3, %v15958_v35  ;;  %v15965_v35 = vpack.c.bf16 %v8806_v30, %v8805_v29  ;;  %v12665_v30 = vld [vmem:[#allocation2 + $0x9d8] ss:$0 sm:$0xff] }
0x4006   : > { %15964 = vmatprep.subr.bf16.mxu0 %v16862_v0 }
0x4007   : > { %v16642_v23 = vpop.eup %16641 }
0x4008   : > { %v8048_v55 = vmul.f32 %v16642_v23, %v16638_v63  ;;  %v8808_v23 = vld [vmem:[#allocation2 + $0x9f8] sm:$0xff] }
0x400a   : > { %14724 = vmatmul.mubr.msk.f32.vlgmr.msra.gmra.mrb[110].mxu1 %vm1942_vm4, %v8048_v55  ;;  %v8049_v52 = vadd.f32 %v8048_v55, %v17792_v6  ;;  %v15968_v55 = vpack.c.bf16 %v8808_v23, %v8807_v34  ;;  %v9016_v34 = vld [vmem:[#allocation2 + $0x1090] sm:$0xff] }
0x400b   : > { %14728 = vmatprep.mubr.msk.f32.mxu1 %vm16863_vm0, %v16864_v1  ;;  %14727 = vmatpush3.msra.mxu1 %v7787_v37  ;;  %v8809_v37 = vld [vmem:[#allocation2 + $0xa00] sm:$0xff] }
0x400c   : > { %14760 = vmatmul.mubr.msk.f32.vlgmr.msra.gmra.mrb[50].mxu0 %vm585_vm1, %v8526_v31  ;;  %14731 = vmatprep.subr.mxu1 %v16864_v1 }
0x400d   : > { %14806 = vmatprep.mubr.msk.f32.mxu0 %vm16863_vm0, %v16864_v1  ;;  %15966 = vmatpush3.bf16.msra.mxu0 %v15965_v35  ;;  %v9017_v35 = vld [vmem:[#allocation2 + $0x1098] sm:$0xff] }
0x400e   : > { %15967 = vmatprep.subr.bf16.mxu0 %v16862_v0 }
0x4011   : > { %15969 = vmatpush3.bf16.msra.mxu0 %v15968_v55 }
0x4012   : > { %15970 = vmatprep.subr.bf16.mxu0 %v16862_v0 }
0x4035   : > { %v8368_v39 = vpop.xlane.xlu0 %8367 }
0x4036   : > { %16643 = vrcp.f32 %v8368_v39  ;;  %v8810_v39 = vld [vmem:[#allocation2 + $0xa08] sm:$0xff] }
0x4037   : > { %v15971_v36 = vpack.c.bf16 %v8810_v39, %v8809_v37  ;;  %v16016_v37 = vpack.c.bf16 %v9017_v35, %v9016_v34  ;;  %v9018_v39 = vld [vmem:[#allocation2 + $0x10a0] sm:$0xff] }
0x4039   : > { %15972 = vmatpush3.bf16.msra.mxu0 %v15971_v36  ;;  %v9019_v36 = vld [vmem:[#allocation2 + $0x10a8] sm:$0xff] }
0x403a   : > { %15973 = vmatprep.subr.bf16.mxu0 %v16862_v0 }
0x4040   : > { %v16644_v48 = vpop.eup %16643 }
0x4041   : > { %v8370_v61 = vmul.f32 %v16644_v48, %v16640_v22  ;;  %v8813_v48 = vld [vmem:[#allocation2 + $0xa20] sm:$0xff] }
0x4043   : > { %v8371_v14 = vadd.f32 %v8370_v61, %v8049_v52  ;;  %v8902_v52 = vld [vmem:[#allocation2 + $0xa90] sm:$0xff] }
0x40dd   : > { %v8127_v32 = vpop.f32.mrb[110].mxu1 }
0x40de   : > { %v14725_v42 = vpop.f32.mrb[111].mxu1  ;;  %14729 = vmatmul.mubr.msk.f32.vlgmr.msra.gmra.mrb[112].mxu1 %vm585_vm1, %v8127_v32 }
0x40df   : > { %v8603_v59 = vpop.f32.mrb[50].mxu0  ;;  %14732 = vmatpush3.msra.mxu1 %v7786_v41  ;;  %14733 = vmatprep.mubr.msk.f32.mxu1 %vm16863_vm0, %v16864_v1 }
0x40e0   : > { %v8607_v60 = vmul.f32 0.35355338, %v8603_v59  ;;  %v14761_v15 = vpop.f32.mrb[51].mxu0  ;;  %15954 = vmatprep.subr.bf16.mxu1 %v16862_v0  ;;  %v8811_v59 = vld [vmem:[#allocation2 + $0xa10] sm:$0xff] }
0x40e2   : > { %14734 = vmatmul.mubr.msk.f32.vlgmr.msra.gmra.mrb[114].mxu1 %vm585_vm1, %v17810_v45  ;;  %v8608_v49 = vsel %vm1942_vm4, %v8607_v60, -inf  ;;  %v16469_v45 = vunpack.i.l.bf16 %v16468_v5  ;;  %v9014_v5 = vld [vmem:[#allocation2 + $0x1080] sm:$0xff] }
0x40e3   : > { %15956 = vmatpush3.bf16.msra.mxu1 %v15955_v56  ;;  %8609 = vmax.xlane.f32.xlu0 %v8608_v49  ;;  %v8814_v56 = vld [vmem:[#allocation2 + $0xa28] sm:$0xff] }
0x40e4   : > { %14747 = vmatprep.mubr.msk.f32.mxu1 %vm16863_vm0, %v16864_v1  ;;  %14750 = vmatprep.subr.mxu1 %v16864_v1  ;;  %v15962_v47 = vpack.c.bf16 %v16470_v9, %v16469_v45  ;;  %v15977_v49 = vpack.c.bf16 %v8814_v56, %v8813_v48  ;;  %v9025_v48 = vld [vmem:[#allocation2 + $0x10d8] sm:$0xff] }
0x40e6   : > { %14748 = vmatmul.mubr.msk.f32.vlgmr.msra.gmra.mrb[116].mxu1 %vm1942_vm4, %v8370_v61  ;;  %v8815_v61 = vld [vmem:[#allocation2 + $0xa30] sm:$0xff] }
0x40e7   : > { %14752 = vmatprep.mubr.msk.f32.mxu1 %vm16863_vm0, %v16864_v1  ;;  %14751 = vmatpush3.msra.mxu1 %v7788_v2  ;;  %v8816_v2 = vld [vmem:[#allocation2 + $0xa38] sm:$0xff] }
0x40e8   : > { %15961 = vmatprep.subr.bf16.mxu1 %v16862_v0 }
0x4170   : > { %v8610_v58 = vpop.xlane.xlu0 %8609 }
0x4171   : > { %v8611_v7 = vsub.f32 %v8607_v60, %v8610_v58  ;;  %v8812_v60 = vld [vmem:[#allocation2 + $0xa18] sm:$0xff]  ;;  %v15980_v58 = vpack.c.bf16 %v8816_v2, %v8815_v61  ;;  %v9027_v61 = vld [vmem:[#allocation2 + $0x10e8] sm:$0xff] }
0x4172   : > { %v15974_v15 = vpack.c.bf16 %v8812_v60, %v8811_v59  ;;  %v9023_v59 = vld [vmem:[#allocation2 + $0x10c8] sm:$0xff] }
0x4173   : > { %v8612_v3 = vmul.f32 1.442695, %v8611_v7  ;;  %v8817_v7 = vld [vmem:[#allocation2 + $0xa40] sm:$0xff] }
0x4174   : > { %15975 = vmatpush3.bf16.msra.mxu0 %v15974_v15  ;;  %v9024_v15 = vld [vmem:[#allocation2 + $0x10d0] sm:$0xff] }
0x4175   : > { %16645 = vpow2.f32 %v8612_v3  ;;  %15976 = vmatprep.subr.bf16.mxu0 %v16862_v0  ;;  %v8818_v3 = vld [vmem:[#allocation2 + $0xa48] sm:$0xff]  ;;  %v16032_v56 = vpack.c.bf16 %v9025_v48, %v9024_v15  ;;  %v9121_v15 = vld [vmem:[#allocation2 + $0x1160] sm:$0xff] }
0x4178   : > { %15978 = vmatpush3.bf16.msra.mxu0 %v15977_v49  ;;  %v9026_v49 = vld [vmem:[#allocation2 + $0x10e0] sm:$0xff] }
0x4179   : > { %15979 = vmatprep.subr.bf16.mxu0 %v16862_v0  ;;  %v16036_v2 = vpack.c.bf16 %v9027_v61, %v9026_v49  ;;  %v9123_v49 = vld [vmem:[#allocation2 + $0x1170] sm:$0xff] }
0x417c   : > { %15981 = vmatpush3.bf16.msra.mxu0 %v15980_v58  ;;  %v9028_v58 = vld [vmem:[#allocation2 + $0x10f0] sm:$0xff] }
0x417d   : > { %15982 = vmatprep.subr.bf16.mxu0 %v16862_v0 }
0x417f   : > { %v16646_v62 = vpop.eup %16645 }
0x4180   : > { %v8614_v25 = vsel %vm1942_vm4, %v16646_v62, 0.0 }
0x4181   : > { %8615 = vadd.xlane.f32.xlu0 %v8614_v25  ;;  %v8819_v25 = vld [vmem:[#allocation2 + $0xa50] sm:$0xff] }
0x41b1   : > { %v8200_v4 = vpop.f32.mrb[112].mxu1 }
0x41b2   : > { %v14730_v8 = vpop.f32.mrb[113].mxu1 }
0x41b3   : > { %v9015_v8 = vld [vmem:[#allocation2 + $0x1088] sm:$0xff] }
0x41b4   : > { %v16012_v45 = vpack.c.bf16 %v9015_v8, %v9014_v5  ;;  %v9208_v5 = vld [vmem:[#allocation2 + $0x11a0] sm:$0xff]  ;;  %v9209_v8 = vld [vmem:[#allocation2 + $0x11a8] sm:$0xff] }
0x41b5   : > { %v8273_v10 = vpop.f32.mrb[114].mxu1 }
0x41b6   : > { %v8274_v11 = vadd.f32 %v8273_v10, %v8200_v4  ;;  %v14735_v53 = vpop.f32.mrb[115].mxu1  ;;  %v8820_v4 = vld [vmem:[#allocation2 + $0xa58] sm:$0xff]  ;;  %v8897_v10 = vld [vmem:[#allocation2 + $0xa68] sm:$0xff] }
0x41b7   : > { %v15986_v9 = vpack.c.bf16 %v8820_v4, %v8819_v25  ;;  %v8899_v53 = vld [vmem:[#allocation2 + $0xa78] sm:$0xff] }
0x41b8   : > { %v9207_v25 = vld [vmem:[#allocation2 + $0x1198] sm:$0xff] }
0x41b9   : > { %v8447_v12 = vpop.f32.mrb[116].mxu1 }
0x41ba   : > { %v14749_v13 = vpop.f32.mrb[117].mxu1  ;;  %14753 = vmatmul.mubr.msk.f32.vlgmr.msra.gmra.mrb[118].mxu1 %vm585_vm1, %v8447_v12  ;;  %v8900_v12 = vld [vmem:[#allocation2 + $0xa80] sm:$0xff] }
0x41bb   : > { %15963 = vmatpush3.bf16.msra.mxu1 %v15962_v47  ;;  %14766 = vmatprep.mubr.msk.f32.mxu1 %vm16863_vm0, %v16864_v1  ;;  %v15992_v13 = vpack.c.bf16 %v8900_v12, %v8899_v53  ;;  %v9212_v53 = vld [vmem:[#allocation2 + $0x11c0] sm:$0xff] }
0x41bc   : > { %14769 = vmatprep.subr.mxu1 %v16864_v1 }
0x420e   : > { %v8616_v51 = vpop.xlane.xlu0 %8615 }
0x420f   : > { %16647 = vrcp.f32 %v8616_v51  ;;  %v8901_v51 = vld [vmem:[#allocation2 + $0xa88] sm:$0xff] }
0x4219   : > { %v16648_v18 = vpop.eup %16647 }
0x421a   : > { %v8618_v16 = vmul.f32 %v16648_v18, %v16646_v62  ;;  %v15983_v62 = vpack.c.bf16 %v8818_v3, %v8817_v7  ;;  %v15995_v18 = vpack.c.bf16 %v8902_v52, %v8901_v51  ;;  %v9029_v7 = vld [vmem:[#allocation2 + $0x10f8] sm:$0xff] }
0x421b   : > { %v16040_v3 = vpack.c.bf16 %v9029_v7, %v9028_v58  ;;  %v9215_v51 = vld [vmem:[#allocation2 + $0x11d8] sm:$0xff]  ;;  %v9125_v58 = vld [vmem:[#allocation2 + $0x1180] sm:$0xff] }
0x421c   : > { %v8619_v38 = vadd.f32 %v8618_v16, %v8371_v14  ;;  %14767 = vmatmul.mubr.msk.f32.vlgmr.msra.gmra.mrb[120].mxu1 %vm1942_vm4, %v8618_v16  ;;  %15984 = vmatpush3.bf16.msra.mxu0 %v15983_v62  ;;  %v8903_v14 = vld [vmem:[#allocation2 + $0xa98] sm:$0xff]  ;;  %v8904_v16 = vld [vmem:[#allocation2 + $0xaa0] sm:$0xff]  ;;  %v9206_v62 = vld [vmem:[#allocation2 + $0x1190] sm:$0xff] }
0x421d   : > { %14770 = vmatpush3.msra.mxu1 %v7789_v17  ;;  %14771 = vmatprep.mubr.msk.f32.mxu1 %vm16863_vm0, %v16864_v1  ;;  %v15998_v17 = vpack.c.bf16 %v8904_v16, %v8903_v14  ;;  %v16076_v4 = vpack.c.bf16 %v9207_v25, %v9206_v62  ;;  %v9217_v14 = vld [vmem:[#allocation2 + $0x11e8] sm:$0xff] }
0x421e   : > { %v8779_v19 = vmul.f32 0.25, %v8619_v38  ;;  %15988 = vmatprep.subr.bf16.mxu1 %v16862_v0  ;;  %15985 = vmatprep.subr.bf16.mxu0 %v16862_v0  ;;  %v8905_v38 = vld [vmem:[#allocation2 + $0xaa8] sm:$0xff] }
0x4220   : > { %v12161_v57 = vsel %vm1942_vm4, %v8779_v19, 0.0  ;;  %15987 = vmatpush3.bf16.msra.mxu0 %v15986_v9  ;;  %v8906_v19 = vld [vmem:[#allocation2 + $0xab0] sm:$0xff]  ;;  %v16080_v9 = vpack.c.bf16 %v9209_v8, %v9208_v5 }
0x4221   : > { %12746 = vst [vmem:[%s17266_s10 + $0x8] sm:$0xff] %v12161_v57  ;;  %16013 = vmatprep.subr.bf16.mxu0 %v16012_v45  ;;  %v16001_v57 = vpack.c.bf16 %v8906_v19, %v8905_v38  ;;  %v9219_v38 = vld [vmem:[#allocation2 + $0x11f8] sm:$0xff]  ;;  %v12672_v8 = vld [vmem:[#allocation2 + $0x1210] ss:$0 sm:$0xff] }
0x428d   : > { %v8520_v28 = vpop.f32.mrb[118].mxu1 }
0x428e   : > { %v8524_v63 = vadd.f32 %v8520_v28, %v8274_v11  ;;  %v14754_v6 = vpop.f32.mrb[119].mxu1  ;;  %v8898_v11 = vld [vmem:[#allocation2 + $0xa70] sm:$0xff]  ;;  %v8907_v28 = vld [vmem:[#allocation2 + $0xab8] sm:$0xff] }
0x428f   : > { %v15989_v47 = vpack.c.bf16 %v8898_v11, %v8897_v10  ;;  %v9211_v10 = vld [vmem:[#allocation2 + $0x11b8] sm:$0xff] }
0x42ef   : > { %v8695_v50 = vpop.f32.mrb[120].mxu1 }
0x42f0   : > { %v14768_v31 = vpop.f32.mrb[121].mxu1  ;;  %14772 = vmatmul.mubr.msk.f32.vlgmr.msra.gmra.mrb[122].mxu1 %vm585_vm1, %v8695_v50  ;;  %v8909_v50 = vld [vmem:[#allocation2 + $0xac8] sm:$0xff] }
0x42f1   : > { %14841 = vmatprep.mubr.msk.f32.mxu1 %vm16863_vm0, %v16864_v1  ;;  %15990 = vmatpush3.bf16.msra.mxu1 %v15989_v47  ;;  %v8910_v31 = vld [vmem:[#allocation2 + $0xad0] sm:$0xff]  ;;  %v9213_v47 = vld [vmem:[#allocation2 + $0x11c8] sm:$0xff] }
0x42f2   : > { %15991 = vmatprep.subr.bf16.mxu1 %v16862_v0  ;;  %v16088_v12 = vpack.c.bf16 %v9213_v47, %v9212_v53 }
0x42f5   : > { %15993 = vmatpush3.bf16.msra.mxu1 %v15992_v13  ;;  %v9214_v13 = vld [vmem:[#allocation2 + $0x11d0] sm:$0xff] }
0x42f6   : > { %15994 = vmatprep.subr.bf16.mxu1 %v16862_v0  ;;  %v16092_v52 = vpack.c.bf16 %v9215_v51, %v9214_v13  ;;  %v12671_v51 = vld [vmem:[#allocation2 + $0x1188] ss:$0 sm:$0xff] }
0x42f9   : > { %15996 = vmatpush3.bf16.msra.mxu1 %v15995_v18  ;;  %v9216_v18 = vld [vmem:[#allocation2 + $0x11e0] sm:$0xff] }
0x42fa   : > { %15997 = vmatprep.subr.bf16.mxu1 %v16862_v0  ;;  %v16096_v16 = vpack.c.bf16 %v9217_v14, %v9216_v18 }
0x42fd   : > { %15999 = vmatpush3.bf16.msra.mxu1 %v15998_v17  ;;  %v9218_v17 = vld [vmem:[#allocation2 + $0x11f0] sm:$0xff] }
0x42fe   : > { %16000 = vmatprep.subr.bf16.mxu1 %v16862_v0  ;;  %v16100_v19 = vpack.c.bf16 %v9219_v38, %v9218_v17 }
0x4301   : > { %16002 = vmatpush3.bf16.msra.mxu1 %v16001_v57  ;;  %v9220_v57 = vld [vmem:[#allocation2 + $0x1200] sm:$0xff] }
0x4302   : > { %16003 = vmatprep.subr.bf16.mxu1 %v16862_v0 }
0x43c3   : > { %v8768_v20 = vpop.f32.mrb[122].mxu1 }
0x43c4   : > { %v8772_v21 = vadd.f32 %v8768_v20, %v8524_v63  ;;  %v14773_v22 = vpop.f32.mrb[123].mxu1  ;;  %v8908_v63 = vld [vmem:[#allocation2 + $0xac0] sm:$0xff]  ;;  %v16007_v20 = vpack.c.bf16 %v8910_v31, %v8909_v50 }
0x43c5   : > { %v16004_v6 = vpack.c.bf16 %v8908_v63, %v8907_v28  ;;  %v9221_v28 = vld [vmem:[#allocation2 + $0x1208] sm:$0xff]  ;;  %v8912_v50 = vld [vmem:[#allocation2 + $0xae0] sm:$0xff] }
0x43c6   : > { %v8778_v24 = vadd.f32 %v12663_v26, %v8772_v21  ;;  %v16104_v63 = vpack.c.bf16 %v9221_v28, %v9220_v57 }
0x43c7   : > { %16005 = vmatpush3.bf16.msra.mxu1 %v16004_v6  ;;  %v8911_v6 = vld [vmem:[#allocation2 + $0xad8] sm:$0xff] }
0x43c8   : > { %v8782_v27 = vsel %vm1551_vm2, %v8778_v24, 0.0  ;;  %16006 = vmatprep.subr.bf16.mxu1 %v16862_v0  ;;  %v16010_v31 = vpack.c.bf16 %v8912_v50, %v8911_v6 }
0x43c9   : > { %8783 = vadd.xlane.f32.xlu0 %v8782_v27  ;;  %v12664_v27 = vld [vmem:[#allocation2 + $0x9d0] ss:$0 sm:$0xff] }
0x43cb   : > { %16008 = vmatpush3.bf16.msra.mxu1 %v16007_v20  ;;  %v9110_v20 = vld [vmem:[#allocation2 + $0x1108] sm:$0xff] }
0x43cc   : > { %16009 = vmatprep.subr.bf16.mxu1 %v16862_v0 }
0x43cf   : > { %16011 = vmatpush3.bf16.msra.mxu1 %v16010_v31 }
0x4456   : > { %v8784_v41 = vpop.xlane.xlu0 %8783 }
0x4457   : > { %v8785_v43 = vmul.f32 0.03125, %v8784_v41  ;;  %v16020_v41 = vpack.c.bf16 %v9019_v36, %v9018_v39  ;;  %v9115_v39 = vld [vmem:[#allocation2 + $0x1130] sm:$0xff] }
0x4459   : > { %v8786_v46 = vsub.f32 %v8778_v24, %v8785_v43  ;;  %v9020_v43 = vld [vmem:[#allocation2 + $0x10b0] sm:$0xff] }
0x445b   : > { %v17869_v32 = vsel %vm1551_vm2, %v8786_v46, 0.0  ;;  %v9021_v46 = vld [vmem:[#allocation2 + $0x10b8] sm:$0xff] }
0x445c   : > { %v8788_v42 = vmul.f32 %v17869_v32, %v17869_v32 }
0x445e   : > { %8789 = vadd.xlane.f32.xlu1 %v8788_v42  ;;  %v9022_v42 = vld [vmem:[#allocation2 + $0x10c0] sm:$0xff] }
0x445f   : > { %v16028_v60 = vpack.c.bf16 %v9023_v59, %v9022_v42  ;;  %v9119_v42 = vld [vmem:[#allocation2 + $0x1150] sm:$0xff] }
0x44eb   : > { %v8790_v26 = vpop.xlane.xlu1 %8789 }
0x44ec   : > { %v8791_v21 = vmul.f32 0.03125, %v8790_v26  ;;  %v9111_v26 = vld [vmem:[#allocation2 + $0x1110] sm:$0xff] }
0x44ee   : > { %v8792_v22 = vadd.f32 1e-05, %v8791_v21  ;;  %v16044_v21 = vpack.c.bf16 %v9111_v26, %v9110_v20 }
0x44f0   : > { %16649 = vrsqrt.f32 %v8792_v22  ;;  %16045 = vmatprep.subr.bf16.mxu1 %v16044_v21  ;;  %v12666_v22 = vld [vmem:[#allocation2 + $0xa60] ss:$0 sm:$0xff] }
0x44fa   : > { %v16650_v24 = vpop.eup %16649 }
0x44fb   : > { %v8794_v29 = vmul.f32 %v16650_v24, %v17869_v32  ;;  %v16024_v32 = vpack.c.bf16 %v9021_v46, %v9020_v43  ;;  %v9117_v43 = vld [vmem:[#allocation2 + $0x1140] sm:$0xff] }
0x44fd   : > { %v8799_v23 = vmul.f32 %v12664_v27, %v8794_v29  ;;  %v9112_v27 = vld [vmem:[#allocation2 + $0x1118] sm:$0xff]  ;;  %v9113_v29 = vld [vmem:[#allocation2 + $0x1120] sm:$0xff] }
0x44ff   : > { %v17885_v55 = vadd.f32 %v12665_v30, %v8799_v23  ;;  %v16048_v23 = vpack.c.bf16 %v9113_v29, %v9112_v27 }
0x4501   : > { %14807 = vmatmul.mubr.f32.vlgmr.msra.gmra.mrb[52].mxu0 %v17885_v55 }
0x4502   : > { %16015 = vmatpush3.bf16.msra.mxu0 %v16012_v45  ;;  %14876 = vmatprep.mubr.f32.mxu0 %v17757_v33  ;;  %v9210_v45 = vld [vmem:[#allocation2 + $0x11b0] sm:$0xff] }
0x4503   : > { %16017 = vmatprep.subr.bf16.mxu0 %v16016_v37  ;;  %v16084_v11 = vpack.c.bf16 %v9211_v10, %v9210_v45 }
0x4506   : > { %16019 = vmatpush3.bf16.msra.mxu0 %v16016_v37  ;;  %v9114_v37 = vld [vmem:[#allocation2 + $0x1128] sm:$0xff] }
0x4507   : > { %16021 = vmatprep.subr.bf16.mxu0 %v16020_v41  ;;  %v16052_v36 = vpack.c.bf16 %v9115_v39, %v9114_v37 }
0x450a   : > { %16023 = vmatpush3.bf16.msra.mxu0 %v16020_v41  ;;  %v9116_v41 = vld [vmem:[#allocation2 + $0x1138] sm:$0xff] }
0x450b   : > { %16025 = vmatprep.subr.bf16.mxu0 %v16024_v32  ;;  %v16056_v46 = vpack.c.bf16 %v9117_v43, %v9116_v41 }
0x450e   : > { %16027 = vmatpush3.bf16.msra.mxu0 %v16024_v32  ;;  %v9118_v32 = vld [vmem:[#allocation2 + $0x1148] sm:$0xff] }
0x450f   : > { %16029 = vmatprep.subr.bf16.mxu0 %v16028_v60  ;;  %v16060_v59 = vpack.c.bf16 %v9119_v42, %v9118_v32 }
0x4512   : > { %16031 = vmatpush3.bf16.msra.mxu0 %v16028_v60  ;;  %v9120_v60 = vld [vmem:[#allocation2 + $0x1158] sm:$0xff] }
0x4513   : > { %16033 = vmatprep.subr.bf16.mxu0 %v16032_v56  ;;  %v16064_v48 = vpack.c.bf16 %v9121_v15, %v9120_v60 }
0x4516   : > { %16035 = vmatpush3.bf16.msra.mxu0 %v16032_v56  ;;  %v9122_v56 = vld [vmem:[#allocation2 + $0x1168] sm:$0xff] }
0x4517   : > { %16037 = vmatprep.subr.bf16.mxu0 %v16036_v2  ;;  %v16068_v61 = vpack.c.bf16 %v9123_v49, %v9122_v56 }
0x451a   : > { %16039 = vmatpush3.bf16.msra.mxu0 %v16036_v2  ;;  %v9124_v2 = vld [vmem:[#allocation2 + $0x1178] sm:$0xff] }
0x451b   : > { %16041 = vmatprep.subr.bf16.mxu0 %v16040_v3  ;;  %v16072_v7 = vpack.c.bf16 %v9125_v58, %v9124_v2 }
0x451e   : > { %16043 = vmatpush3.bf16.msra.mxu0 %v16040_v3  ;;  %v12670_v3 = vld [vmem:[#allocation2 + $0x1100] ss:$0 sm:$0xff] }
0x451f   : > { %16077 = vmatprep.subr.bf16.mxu0 %v16076_v4 }
0x4521   : > { %14877 = vmatmul.mubr.f32.vlgmr.msra.gmra.mrb[54].mxu0 %v17762_v40 }
0x4522   : > { %16079 = vmatpush3.bf16.msra.mxu0 %v16076_v4  ;;  %14946 = vmatprep.mubr.f32.mxu0 %v17757_v33 }
0x4523   : > { %16081 = vmatprep.subr.bf16.mxu0 %v16080_v9 }
0x4526   : > { %16083 = vmatpush3.bf16.msra.mxu0 %v16080_v9 }
0x4527   : > { %16085 = vmatprep.subr.bf16.mxu0 %v16084_v11 }
0x452a   : > { %16087 = vmatpush3.bf16.msra.mxu0 %v16084_v11 }
0x452b   : > { %16089 = vmatprep.subr.bf16.mxu0 %v16088_v12 }
0x452e   : > { %16091 = vmatpush3.bf16.msra.mxu0 %v16088_v12 }
0x452f   : > { %16093 = vmatprep.subr.bf16.mxu0 %v16092_v52 }
0x4532   : > { %16095 = vmatpush3.bf16.msra.mxu0 %v16092_v52 }
0x4533   : > { %16097 = vmatprep.subr.bf16.mxu0 %v16096_v16 }
0x4536   : > { %16099 = vmatpush3.bf16.msra.mxu0 %v16096_v16 }
0x4537   : > { %16101 = vmatprep.subr.bf16.mxu0 %v16100_v19 }
0x453a   : > { %16103 = vmatpush3.bf16.msra.mxu0 %v16100_v19 }
0x453b   : > { %16105 = vmatprep.subr.bf16.mxu0 %v16104_v63 }
0x453e   : > { %16107 = vmatpush3.bf16.msra.mxu0 %v16104_v63 }
0x4541   : > { %14947 = vmatmul.mubr.f32.vlgmr.msra.gmra.mrb[56].mxu0 %v17762_v40 }
0x45d4   : > { %v8892_v24 = vpop.f32.mrb[52].mxu0 }
0x45d5   : > { %v8893_v30 = vadd.f32 %v12666_v22, %v8892_v24  ;;  %v14808_v34 = vpop.f32.mrb[53].mxu0 }
0x45d7   : > { %v8896_v35 = vmax.f32 %v8893_v30, 0.0 }
0x45d9   : > { %14842 = vmatmul.mubr.f32.vlgmr.msra.gmra.mrb[124].mxu1 %v8896_v35 }
0x45da   : > { %16047 = vmatpush3.bf16.msra.mxu1 %v16044_v21  ;;  %14911 = vmatprep.mubr.f32.mxu1 %v17757_v33 }
0x45db   : > { %16049 = vmatprep.subr.bf16.mxu1 %v16048_v23 }
0x45de   : > { %16051 = vmatpush3.bf16.msra.mxu1 %v16048_v23 }
0x45df   : > { %16053 = vmatprep.subr.bf16.mxu1 %v16052_v36 }
0x45e2   : > { %16055 = vmatpush3.bf16.msra.mxu1 %v16052_v36 }
0x45e3   : > { %16057 = vmatprep.subr.bf16.mxu1 %v16056_v46 }
0x45e6   : > { %16059 = vmatpush3.bf16.msra.mxu1 %v16056_v46 }
0x45e7   : > { %16061 = vmatprep.subr.bf16.mxu1 %v16060_v59 }
0x45ea   : > { %16063 = vmatpush3.bf16.msra.mxu1 %v16060_v59 }
0x45eb   : > { %16065 = vmatprep.subr.bf16.mxu1 %v16064_v48 }
0x45ee   : > { %16067 = vmatpush3.bf16.msra.mxu1 %v16064_v48 }
0x45ef   : > { %16069 = vmatprep.subr.bf16.mxu1 %v16068_v61 }
0x45f2   : > { %16071 = vmatpush3.bf16.msra.mxu1 %v16068_v61 }
0x45f3   : > { %16073 = vmatprep.subr.bf16.mxu1 %v16072_v7 }
0x45f4   : > { %v14878_v62 = vpop.f32.mrb[54].mxu0 }
0x45f5   : > { %v17893_v25 = vadd.f32 %v14878_v62, %v12670_v3  ;;  %v9101_v4 = vpop.f32.mrb[55].mxu0 }
0x45f6   : > { %v17895_v5 = vadd.f32 %v12670_v3, %v9101_v4  ;;  %16075 = vmatpush3.bf16.msra.mxu1 %v16072_v7 }
0x45f8   : > { %9498 = vrot.lane.b32.xlu1 %v17895_v5, %s16865_s15 }
0x45f9   : > { %14912 = vmatmul.mubr.f32.vlgmr.msra.gmra.mrb[126].mxu1 %v17762_v40 }
0x45fa   : > { %14953 = vmatprep.mubr.msk.f32.mxu1 %vm585_vm1, %v17895_v5 }
0x4614   : > { %v14948_v9 = vpop.f32.mrb[56].mxu0 }
0x4615   : > { %v9299_v45 = vadd.f32 %v14948_v9, %v12672_v8  ;;  %v9293_v10 = vpop.f32.mrb[57].mxu0 }
0x4616   : > { %v9294_v11 = vadd.f32 %v12672_v8, %v9293_v10 }
0x4618   : > { %v16114_v53 = vpack.c.bf16 %v9299_v45, %v9294_v11  ;;  %v17902_v47 = vpack.i.bf16 %v9299_v45, %v9294_v11 }
0x466a   : > { %v9499_v56 = vpop.permute.xlu1 %9498 }
0x46ac   : > { %v17904_v12 = vpop.f32.mrb[124].mxu1 }
0x46ad   : > { %v14843_v13 = vpop.f32.mrb[125].mxu1 }
0x46cc   : > { %v14913_v52 = vpop.f32.mrb[126].mxu1 }
0x46cd   : > { %v9203_v18 = vadd.f32 %v14913_v52, %v12671_v51  ;;  %v9197_v14 = vpop.f32.mrb[127].mxu1 }
0x46ce   : > { %v9198_v16 = vadd.f32 %v12671_v51, %v9197_v14 }
0x46d0   : > { %v16108_v17 = vpack.c.bf16 %v9203_v18, %v9198_v16  ;;  %v17906_v38 = vpack.i.bf16 %v9203_v18, %v9198_v16 }
0x46d2   : > { %16110 = vmatprep.subr.msk.bf16.mxu1 %vm17158_vm3, %v16108_v17 }
0x46d3   : > { %16113 = vmatpush3.bf16.xpose.msk.msra.mxu1 %vm17158_vm3, %v16108_v17 }
0x46d4   : > { %16115 = vmatprep.subr.bf16.mxu1 %v16114_v53 }
0x46da   : > { %14954 = vmatmul.mubr.msk.f32.vlgmr.msra.gmra.mrb[128].mxu1 %vm585_vm1, %v17893_v25 }
0x46db   : > { %16117 = vmatpush3.bf16.msra.mxu1 %v16114_v53 }
0x47ad   : > { %v14955_v19 = vpop.f32.mrb[128].mxu1 }
0x47ae   : > { %v9384_v57 = vpop.f32.mrb[129].mxu1  ;;  %v9394_v63 = vmul.f32 0.35355338, %v14955_v19 }
0x47af   : > { %v9393_v28 = vmul.f32 0.35355338, %v9384_v57 }
0x47b0   : > { %v9398_v50 = vsel %vm1942_vm4, %v9394_v63, -inf }
0x47b1   : > { %v9395_v6 = vsel %vm1942_vm4, %v9393_v28, -inf }
0x47b2   : > { %9396 = vmax.xlane.f32.xlu0 %v9395_v6 }
0x47b6   : > { %9399 = vmax.xlane.f32.xlu0 %v9398_v50 }
0x483f   : > { %v9397_v31 = vpop.xlane.xlu0 %9396 }
0x4840   : > { %v9401_v20 = vsub.f32 %v9393_v28, %v9397_v31 }
0x4842   : > { %v9403_v22 = vmul.f32 1.442695, %v9401_v20 }
0x4843   : > { %v9400_v26 = vpop.xlane.xlu0 %9399 }
0x4844   : > { %v9402_v21 = vsub.f32 %v9394_v63, %v9400_v26 }
0x4846   : > { %v9405_v24 = vmul.f32 1.442695, %v9402_v21 }
0x4848   : > { %16651 = vpow2.f32 %v9405_v24 }
0x4849   : > { %16653 = vpow2.f32 %v9403_v22 }
0x4852   : > { %v16652_v27 = vpop.eup %16651 }
0x4853   : > { %v9410_v29 = vsel %vm1942_vm4, %v16652_v27, 0.0  ;;  %v16654_v30 = vpop.eup %16653 }
0x4854   : > { %9411 = vadd.xlane.f32.xlu0 %v9410_v29  ;;  %v9407_v34 = vsel %vm1942_vm4, %v16654_v30, 0.0 }
0x4858   : > { %9408 = vadd.xlane.f32.xlu0 %v9407_v34 }
0x486e   : > { %16472 = vrot.lane.b32.xlu0 %v17906_v38, %s16865_s15 }
0x4872   : > { %9500 = vrot.lane.b32.xlu0 %v17893_v25, %s16865_s15 }
0x4876   : > { %16477 = vrot.lane.b32.xlu0 %v17906_v38, %s16866_s16 }
0x487a   : > { %9864 = vrot.lane.b32.xlu0 %v17895_v5, %s16866_s16 }
0x487e   : > { %9866 = vrot.lane.b32.xlu0 %v17893_v25, %s16866_s16 }
0x48e1   : > { %v9412_v35 = vpop.xlane.xlu0 %9411 }
0x48e2   : > { %16655 = vrcp.f32 %v9412_v35 }
0x48e5   : > { %v9409_v23 = vpop.xlane.xlu0 %9408 }
0x48e6   : > { %16657 = vrcp.f32 %v9409_v23 }
0x48e9   : > { %v16473_v37 = vpop.permute.xlu0 %16472 }
0x48ea   : > { %v16475_v39 = vunpack.i.h.bf16 %v16473_v37  ;;  %v16474_v36 = vunpack.i.l.bf16 %v16473_v37 }
0x48ec   : > { %v16118_v41 = vpack.c.bf16 %v16475_v39, %v16474_v36  ;;  %v16656_v46 = vpop.eup %16655 }
0x48ed   : > { %v9501_v43 = vpop.permute.xlu0 %9500  ;;  %v9416_v60 = vmul.f32 %v16656_v46, %v16652_v27 }
0x48ee   : > { %16120 = vmatprep.subr.msk.bf16.mxu1 %vm17158_vm3, %v16118_v41 }
0x48f0   : > { %v16658_v32 = vpop.eup %16657 }
0x48f1   : > { %v16478_v42 = vpop.permute.xlu0 %16477  ;;  %v9415_v59 = vmul.f32 %v16658_v32, %v16654_v30 }
0x48f2   : > { %v16480_v15 = vunpack.i.h.bf16 %v16478_v42  ;;  %v16479_v48 = vunpack.i.l.bf16 %v16478_v42 }
0x48f3   : > { %14960 = vmatprep.mubr.msk.f32.mxu1 %vm1942_vm4, %v9415_v59 }
0x48f4   : > { %v16128_v49 = vpack.c.bf16 %v16480_v15, %v16479_v48  ;;  %14961 = vmatmul.mubr.msk.f32.vlgmr.msra.gmra.mrb[130].mxu1 %vm1942_vm4, %v9416_v60  ;;  %v9303_v15 = vld [vmem:[#allocation2 + $0x1220] sm:$0xff]  ;;  %v9302_v48 = vld [vmem:[#allocation2 + $0x1218] sm:$0xff] }
0x48f5   : > { %16123 = vmatpush3.bf16.xpose.msk.msra.mxu1 %vm17158_vm3, %v16118_v41  ;;  %14967 = vmatprep.mubr.msk.f32.mxu1 %vm585_vm1, %v9499_v56  ;;  %v9865_v61 = vpop.permute.xlu0 %9864  ;;  %v12667_v56 = vld [vmem:[#allocation2 + $0xae8] ss:$0 sm:$0xff] }
0x48f6   : > { %16130 = vmatprep.subr.msk.bf16.mxu0 %vm17158_vm3, %v16128_v49  ;;  %14991 = vmatprep.mubr.msk.f32.mxu0 %vm585_vm1, %v9865_v61 }
0x48f7   : > { %16133 = vmatpush3.bf16.xpose.msk.msra.mxu0 %vm17158_vm3, %v16128_v49  ;;  %v8985_v49 = vadd.f32 %v12667_v56, %v17904_v12 }
0x48f9   : > { %v9867_v2 = vpop.permute.xlu0 %9866  ;;  %v17974_v61 = vadd.f32 %v8985_v49, %v17885_v55 }
0x48fc   : > { %14968 = vmatmul.mubr.msk.f32.vlgmr.msra.gmra.mrb[132].mxu1 %vm585_vm1, %v9501_v43 }
0x48fe   : > { %14992 = vmatmul.mubr.msk.f32.vlgmr.msra.gmra.mrb[58].mxu0 %vm585_vm1, %v9867_v2  ;;  %v8991_v2 = vsel %vm1551_vm2, %v17974_v61, 0.0 }
0x49c7   : > { %v17942_v58 = vpop.f32.mrb[130].mxu1 }
0x49c8   : > { %v17944_v7 = vpop.f32.mrb[131].mxu1 }
0x49cf   : > { %v14969_v3 = vpop.f32.mrb[132].mxu1 }
0x49d0   : > { %v9590_v62 = vmul.f32 0.35355338, %v14969_v3  ;;  %v9580_v4 = vpop.f32.mrb[133].mxu1 }
0x49d1   : > { %v9589_v8 = vmul.f32 0.35355338, %v9580_v4  ;;  %v14993_v9 = vpop.f32.mrb[58].mxu0 }
0x49d2   : > { %v9946_v45 = vpop.f32.mrb[59].mxu0  ;;  %v9594_v10 = vsel %vm1942_vm4, %v9590_v62, -inf  ;;  %v9956_v63 = vmul.f32 0.35355338, %v14993_v9 }
0x49d3   : > { %9595 = vmax.xlane.f32.xlu0 %v9594_v10  ;;  %v9591_v11 = vsel %vm1942_vm4, %v9589_v8, -inf  ;;  %v9955_v28 = vmul.f32 0.35355338, %v9946_v45 }
0x49d4   : > { %9592 = vmax.xlane.f32.xlu1 %v9591_v11  ;;  %v9960_v50 = vsel %vm1942_vm4, %v9956_v63, -inf }
0x49d5   : > { %v9957_v6 = vsel %vm1942_vm4, %v9955_v28, -inf }
0x4a60   : > { %v9596_v53 = vpop.xlane.xlu0 %9595 }
0x4a61   : > { %v9598_v13 = vsub.f32 %v9590_v62, %v9596_v53  ;;  %v9593_v51 = vpop.xlane.xlu1 %9592 }
0x4a62   : > { %v9597_v52 = vsub.f32 %v9589_v8, %v9593_v51 }
0x4a63   : > { %v9601_v18 = vmul.f32 1.442695, %v9598_v13 }
0x4a64   : > { %v9599_v14 = vmul.f32 1.442695, %v9597_v52 }
0x4a65   : > { %16659 = vpow2.f32 %v9601_v18 }
0x4a66   : > { %16661 = vpow2.f32 %v9599_v14 }
0x4a6f   : > { %v16660_v16 = vpop.eup %16659 }
0x4a70   : > { %v16662_v17 = vpop.eup %16661  ;;  %v9606_v19 = vsel %vm1942_vm4, %v16660_v16, 0.0 }
0x4a71   : > { %9607 = vadd.xlane.f32.xlu1 %v9606_v19  ;;  %v9603_v57 = vsel %vm1942_vm4, %v16662_v17, 0.0 }
0x4a72   : > { %9604 = vadd.xlane.f32.xlu0 %v9603_v57 }
0x4a82   : > { %16487 = vrot.lane.b32.xlu1 %v17906_v38, %s16867_s17 }
0x4a86   : > { %10149 = vrot.lane.b32.xlu1 %v17895_v5, %s16867_s17 }
0x4a88   : > { %16482 = vrot.lane.b32.xlu0 %v17902_v47, %s16865_s15 }
0x4a8c   : > { %10151 = vrot.lane.b32.xlu0 %v17893_v25, %s16867_s17 }
0x4aaa   : > { %9958 = vmax.xlane.f32.xlu1 %v9957_v6 }
0x4aab   : > { %9961 = vmax.xlane.f32.xlu0 %v9960_v50 }
0x4afe   : > { %v9608_v31 = vpop.xlane.xlu1 %9607 }
0x4aff   : > { %16663 = vrcp.f32 %v9608_v31  ;;  %v9605_v38 = vpop.xlane.xlu0 %9604 }
0x4b00   : > { %16665 = vrcp.f32 %v9605_v38 }
0x4b02   : > { %v16488_v20 = vpop.permute.xlu1 %16487 }
0x4b03   : > { %v16490_v5 = vunpack.i.h.bf16 %v16488_v20  ;;  %v16489_v26 = vunpack.i.l.bf16 %v16488_v20  ;;  %v16483_v21 = vpop.permute.xlu0 %16482 }
0x4b04   : > { %v16485_v22 = vunpack.i.h.bf16 %v16483_v21  ;;  %v16484_v24 = vunpack.i.l.bf16 %v16483_v21 }
0x4b05   : > { %v16138_v27 = vpack.c.bf16 %v16490_v5, %v16489_v26 }
0x4b06   : > { %v16124_v25 = vpack.c.bf16 %v16485_v22, %v16484_v24  ;;  %v10150_v29 = vpop.permute.xlu1 %10149 }
0x4b07   : > { %16140 = vmatprep.subr.msk.bf16.mxu0 %vm17158_vm3, %v16138_v27  ;;  %15010 = vmatprep.mubr.msk.f32.mxu0 %vm585_vm1, %v10150_v29  ;;  %v10152_v37 = vpop.permute.xlu0 %10151 }
0x4b08   : > { %16125 = vmatprep.subr.bf16.mxu1 %v16124_v25  ;;  %16143 = vmatpush3.bf16.xpose.msk.msra.mxu0 %vm17158_vm3, %v16138_v27 }
0x4b09   : > { %v16664_v30 = vpop.eup %16663  ;;  %16127 = vmatpush3.bf16.msra.mxu1 %v16124_v25 }
0x4b0a   : > { %v16666_v34 = vpop.eup %16665  ;;  %v9612_v23 = vmul.f32 %v16664_v30, %v16660_v16  ;;  %14977 = vmatprep.subr.mxu1 %v9303_v15 }
0x4b0b   : > { %v9611_v35 = vmul.f32 %v16666_v34, %v16662_v17 }
0x4b0d   : > { %14974 = vmatprep.mubr.msk.f32.mxu1 %vm1942_vm4, %v9611_v35  ;;  %v9305_v35 = vld [vmem:[#allocation2 + $0x1230] sm:$0xff] }
0x4b0e   : > { %14975 = vmatmul.mubr.msk.f32.vlgmr.msra.gmra.mrb[134].mxu1 %vm1942_vm4, %v9612_v23 }
0x4b0f   : > { %15011 = vmatmul.mubr.msk.f32.vlgmr.msra.gmra.mrb[60].mxu0 %vm585_vm1, %v10152_v37  ;;  %14978 = vmatpush3.msra.mxu1 %v9303_v15 }
0x4b10   : > { %14982 = vmatprep.subr.mxu1 %v9302_v48 }
0x4b37   : > { %v9959_v39 = vpop.xlane.xlu1 %9958 }
0x4b38   : > { %v9963_v36 = vsub.f32 %v9955_v28, %v9959_v39  ;;  %v9962_v41 = vpop.xlane.xlu0 %9961 }
0x4b39   : > { %v9964_v43 = vsub.f32 %v9956_v63, %v9962_v41  ;;  %v10580_v41 = vld [vmem:[#allocation2 + $0x1340] sm:$0xff] }
0x4b3a   : > { %v9965_v46 = vmul.f32 1.442695, %v9963_v36  ;;  %v10579_v36 = vld [vmem:[#allocation2 + $0x1338] sm:$0xff] }
0x4b3b   : > { %v9967_v32 = vmul.f32 1.442695, %v9964_v43  ;;  %v10581_v43 = vld [vmem:[#allocation2 + $0x1348] sm:$0xff] }
0x4b3c   : > { %16667 = vpow2.f32 %v9965_v46  ;;  %v16181_v46 = vpack.c.bf16 %v10580_v41, %v10579_v36  ;;  %v10487_v36 = vld [vmem:[#allocation2 + $0x12d0] sm:$0xff]  ;;  %v10488_v41 = vld [vmem:[#allocation2 + $0x12d8] sm:$0xff] }
0x4b3d   : > { %16669 = vpow2.f32 %v9967_v32  ;;  %v10582_v32 = vld [vmem:[#allocation2 + $0x1350] sm:$0xff] }
0x4b46   : > { %v16668_v54 = vpop.eup %16667 }
0x4b47   : > { %v16670_v42 = vpop.eup %16669  ;;  %v9969_v59 = vsel %vm1942_vm4, %v16668_v54, 0.0 }
0x4b48   : > { %9970 = vadd.xlane.f32.xlu0 %v9969_v59  ;;  %v9972_v60 = vsel %vm1942_vm4, %v16670_v42, 0.0 }
0x4b49   : > { %9973 = vadd.xlane.f32.xlu1 %v9972_v60  ;;  %v12705_v60 = vld [vmem:[#allocation2 + $0x1298] ss:$0 sm:$0xff] }
0x4b5e   : > { %16492 = vrot.lane.b32.xlu0 %v17902_v47, %s16866_s16 }
0x4b7d   : > { %8992 = vadd.xlane.f32.xlu0 %v8991_v2 }
0x4bd5   : > { %v9971_v3 = vpop.xlane.xlu0 %9970 }
0x4bd6   : > { %16671 = vrcp.f32 %v9971_v3  ;;  %v9974_v4 = vpop.xlane.xlu1 %9973 }
0x4bd7   : > { %16673 = vrcp.f32 %v9974_v4 }
0x4bd9   : > { %v16493_v62 = vpop.permute.xlu0 %16492 }
0x4bda   : > { %v16495_v8 = vunpack.i.h.bf16 %v16493_v62  ;;  %v16494_v9 = vunpack.i.l.bf16 %v16493_v62 }
0x4bdc   : > { %v16134_v55 = vpack.c.bf16 %v16495_v8, %v16494_v9 }
0x4be0   : > { %v16672_v52 = vpop.eup %16671 }
0x4be1   : > { %v14976_v45 = vpop.f32.mrb[134].mxu1  ;;  %v16674_v14 = vpop.eup %16673  ;;  %v9977_v16 = vmul.f32 %v16672_v52, %v16668_v54  ;;  %v16184_v54 = vpack.c.bf16 %v10582_v32, %v10581_v43  ;;  %v10590_v52 = vld [vmem:[#allocation2 + $0x1390] sm:$0xff] }
0x4be2   : > { %v9693_v10 = vpop.f32.mrb[135].mxu1  ;;  %v15012_v11 = vpop.f32.mrb[60].mxu0  ;;  %v9978_v17 = vmul.f32 %v16674_v14, %v16670_v42 }
0x4be3   : > { %14979 = vmatprep.mubr.msk.f32.mxu1 %vm585_vm1, %v9693_v10  ;;  %v10231_v12 = vpop.f32.mrb[61].mxu0  ;;  %v10241_v13 = vmul.f32 0.35355338, %v15012_v11  ;;  %v10586_v11 = vld [vmem:[#allocation2 + $0x1370] sm:$0xff] }
0x4be4   : > { %v10240_v53 = vmul.f32 0.35355338, %v10231_v12  ;;  %14980 = vmatmul.mubr.msk.f32.vlgmr.msra.gmra.mrb[136].mxu1 %vm585_vm1, %v14976_v45  ;;  %v10583_v45 = vld [vmem:[#allocation2 + $0x1358] sm:$0xff] }
0x4be5   : > { %14983 = vmatpush3.msra.mxu1 %v9302_v48  ;;  %14984 = vmatprep.mubr.msk.f32.mxu1 %vm585_vm1, %v17944_v7  ;;  %v10245_v18 = vsel %vm1942_vm4, %v10241_v13, -inf  ;;  %v9304_v7 = vld [vmem:[#allocation2 + $0x1228] sm:$0xff] }
0x4be6   : > { %16135 = vmatprep.subr.bf16.mxu1 %v16134_v55  ;;  %v10242_v51 = vsel %vm1942_vm4, %v10240_v53, -inf }
0x4be7   : > { %10243 = vmax.xlane.f32.xlu1 %v10242_v51  ;;  %v10589_v51 = vld [vmem:[#allocation2 + $0x1388] sm:$0xff] }
0x4be8   : > { %v16196_v14 = vpack.c.bf16 %v10590_v52, %v10589_v51  ;;  %v12707_v51 = vld [vmem:[#allocation2 + $0x12a8] ss:$0 sm:$0xff] }
0x4beb   : > { %10246 = vmax.xlane.f32.xlu1 %v10245_v18  ;;  %v10591_v18 = vld [vmem:[#allocation2 + $0x1398] sm:$0xff] }
0x4bec   : > { %14985 = vmatmul.mubr.msk.f32.vlgmr.msra.gmra.mrb[136].mxu1 %vm585_vm1, %v17942_v58 }
0x4bed   : > { %16137 = vmatpush3.bf16.msra.mxu1 %v16134_v55  ;;  %14998 = vmatprep.mubr.msk.f32.mxu1 %vm1942_vm4, %v9977_v16  ;;  %v10587_v55 = vld [vmem:[#allocation2 + $0x1378] sm:$0xff]  ;;  %v10592_v16 = vld [vmem:[#allocation2 + $0x13a0] sm:$0xff] }
0x4bee   : > { %15001 = vmatprep.subr.mxu1 %v9304_v7 }
0x4bf0   : > { %14999 = vmatmul.mubr.msk.f32.vlgmr.msra.gmra.mrb[138].mxu1 %vm1942_vm4, %v9978_v17  ;;  %v16199_v17 = vpack.c.bf16 %v10592_v16, %v10591_v18 }
0x4bf1   : > { %15002 = vmatpush3.msra.mxu1 %v9304_v7  ;;  %v10593_v7 = vld [vmem:[#allocation2 + $0x13a8] sm:$0xff] }
0x4c0a   : > { %v8993_v42 = vpop.xlane.xlu0 %8992 }
0x4c0b   : > { %v8994_v59 = vmul.f32 0.03125, %v8993_v42  ;;  %v10490_v42 = vld [vmem:[#allocation2 + $0x12e8] sm:$0xff] }
0x4c0d   : > { %v8995_v48 = vsub.f32 %v17974_v61, %v8994_v59 }
0x4c0f   : > { %v18009_v4 = vsel %vm1551_vm2, %v8995_v48, 0.0 }
0x4c10   : > { %v8997_v61 = vmul.f32 %v18009_v4, %v18009_v4 }
0x4c74   : > { %v10244_v19 = vpop.xlane.xlu1 %10243 }
0x4c75   : > { %v10248_v57 = vsub.f32 %v10240_v53, %v10244_v19  ;;  %v10588_v53 = vld [vmem:[#allocation2 + $0x1380] sm:$0xff]  ;;  %v10594_v19 = vld [vmem:[#allocation2 + $0x13b0] sm:$0xff] }
0x4c77   : > { %v10250_v28 = vmul.f32 1.442695, %v10248_v57  ;;  %v16202_v57 = vpack.c.bf16 %v10594_v19, %v10593_v7  ;;  %v10671_v7 = vld [vmem:[#allocation2 + $0x13c8] sm:$0xff] }
0x4c78   : > { %v10247_v63 = vpop.xlane.xlu1 %10246 }
0x4c79   : > { %16675 = vpow2.f32 %v10250_v28  ;;  %v10249_v6 = vsub.f32 %v10241_v13, %v10247_v63  ;;  %v16193_v13 = vpack.c.bf16 %v10588_v53, %v10587_v55  ;;  %v10483_v28 = vld [vmem:[#allocation2 + $0x12b0] sm:$0xff]  ;;  %v10484_v63 = vld [vmem:[#allocation2 + $0x12b8] sm:$0xff]  ;;  %v12706_v53 = vld [vmem:[#allocation2 + $0x12a0] ss:$0 sm:$0xff] }
0x4c7b   : > { %v10252_v50 = vmul.f32 1.442695, %v10249_v6  ;;  %v10485_v6 = vld [vmem:[#allocation2 + $0x12c0] sm:$0xff] }
0x4c7d   : > { %16677 = vpow2.f32 %v10252_v50  ;;  %v16148_v50 = vpack.c.bf16 %v10484_v63, %v10483_v28  ;;  %v10672_v63 = vld [vmem:[#allocation2 + $0x13d0] sm:$0xff] }
0x4c7f   : > { %16149 = vmatprep.subr.bf16.mxu0 %v16148_v50 }
0x4c80   : > { %16151 = vmatpush3.bf16.msra.mxu0 %v16148_v50 }
0x4c83   : > { %v16676_v31 = vpop.eup %16675 }
0x4c84   : > { %v10254_v58 = vsel %vm1942_vm4, %v16676_v31, 0.0 }
0x4c85   : > { %10255 = vadd.xlane.f32.xlu1 %v10254_v58 }
0x4c87   : > { %v16678_v38 = vpop.eup %16677 }
0x4c88   : > { %v10257_v20 = vsel %vm1942_vm4, %v16678_v38, 0.0 }
0x4c89   : > { %10258 = vadd.xlane.f32.xlu1 %v10257_v20 }
0x4c9a   : > { %16497 = vrot.lane.b32.xlu1 %v17902_v47, %s16867_s17 }
0x4cc3   : > { %v15000_v5 = vpop.f32.mrb[138].mxu1 }
0x4cc4   : > { %v10057_v26 = vpop.f32.mrb[139].mxu1 }
0x4cc5   : > { %15003 = vmatprep.mubr.msk.f32.mxu1 %vm585_vm1, %v10057_v26 }
0x4cc6   : > { %15004 = vmatmul.mubr.msk.f32.vlgmr.msra.gmra.mrb[136].mxu1 %vm585_vm1, %v15000_v5 }
0x4d12   : > { %v10256_v21 = vpop.xlane.xlu1 %10255 }
0x4d13   : > { %16679 = vrcp.f32 %v10256_v21 }
0x4d16   : > { %v10259_v22 = vpop.xlane.xlu1 %10258 }
0x4d17   : > { %16681 = vrcp.f32 %v10259_v22 }
0x4d1a   : > { %v16498_v24 = vpop.permute.xlu1 %16497 }
0x4d1b   : > { %v16500_v27 = vunpack.i.h.bf16 %v16498_v24  ;;  %v16499_v25 = vunpack.i.l.bf16 %v16498_v24 }
0x4d1d   : > { %v16680_v29 = vpop.eup %16679  ;;  %v16144_v30 = vpack.c.bf16 %v16500_v27, %v16499_v25 }
0x4d1e   : > { %v10262_v34 = vmul.f32 %v16680_v29, %v16676_v31  ;;  %v10486_v31 = vld [vmem:[#allocation2 + $0x12c8] sm:$0xff] }
0x4d1f   : > { %16145 = vmatprep.subr.bf16.mxu1 %v16144_v30  ;;  %v16152_v58 = vpack.c.bf16 %v10486_v31, %v10485_v6  ;;  %v10673_v6 = vld [vmem:[#allocation2 + $0x13d8] sm:$0xff]  ;;  %v10674_v31 = vld [vmem:[#allocation2 + $0x13e0] sm:$0xff] }
0x4d20   : > { %16147 = vmatpush3.bf16.msra.mxu1 %v16144_v30  ;;  %15017 = vmatprep.mubr.msk.f32.mxu1 %vm1942_vm4, %v10262_v34  ;;  %v16208_v50 = vpack.c.bf16 %v10673_v6, %v10672_v63 }
0x4d21   : > { %v16682_v47 = vpop.eup %16681  ;;  %15020 = vmatprep.subr.mxu1 %v9305_v35  ;;  %16153 = vmatprep.subr.bf16.mxu0 %v16152_v58 }
0x4d22   : > { %v10263_v23 = vmul.f32 %v16682_v47, %v16678_v38  ;;  %16155 = vmatpush3.bf16.msra.mxu0 %v16152_v58  ;;  %v10675_v58 = vld [vmem:[#allocation2 + $0x13e8] sm:$0xff] }
0x4d24   : > { %15018 = vmatmul.mubr.msk.f32.vlgmr.msra.gmra.mrb[140].mxu1 %vm1942_vm4, %v10263_v23  ;;  %v12668_v23 = vld [vmem:[#allocation2 + $0xaf0] ss:$0 sm:$0xff] }
0x4d25   : > { %15021 = vmatpush3.msra.mxu1 %v9305_v35 }
0x4d26   : > { %16180 = vmatprep.subr.bf16.mxu1 %v16862_v0 }
0x4df7   : > { %v15019_v37 = vpop.f32.mrb[140].mxu1 }
0x4df8   : > { %v10342_v39 = vpop.f32.mrb[141].mxu1 }
0x4df9   : > { %15022 = vmatprep.mubr.msk.f32.mxu1 %vm585_vm1, %v10342_v39  ;;  %v12669_v39 = vld [vmem:[#allocation2 + $0xaf8] ss:$0 sm:$0xff] }
0x4dfa   : > { %15023 = vmatmul.mubr.msk.f32.vlgmr.msra.gmra.mrb[136].mxu1 %vm585_vm1, %v15019_v37 }
0x4dfb   : > { %15092 = vmatprep.mubr.msk.f32.mxu1 %vm16863_vm0, %v16864_v1  ;;  %16182 = vmatpush3.bf16.msra.mxu1 %v16181_v46  ;;  %v16156_v46 = vpack.c.bf16 %v10488_v41, %v10487_v36 }
0x4dfc   : > { %16183 = vmatprep.subr.bf16.mxu1 %v16862_v0 }
0x4dfd   : > { %16157 = vmatprep.subr.bf16.mxu0 %v16156_v46 }
0x4dfe   : > { %16159 = vmatpush3.bf16.msra.mxu0 %v16156_v46 }
0x4dff   : > { %16185 = vmatpush3.bf16.msra.mxu1 %v16184_v54  ;;  %v10489_v54 = vld [vmem:[#allocation2 + $0x12e0] sm:$0xff] }
0x4e00   : > { %16186 = vmatprep.subr.bf16.mxu1 %v16862_v0  ;;  %v16160_v59 = vpack.c.bf16 %v10490_v42, %v10489_v54 }
0x4e02   : > { %16161 = vmatprep.subr.bf16.mxu0 %v16160_v59 }
0x4e03   : > { %16163 = vmatpush3.bf16.msra.mxu0 %v16160_v59 }
0x4ecd   : > { %v15024_v15 = vpop.f32.mrb[136].mxu1 }
0x4ece   : > { %v10440_v56 = vadd.f32 %v15024_v15, %v12705_v60  ;;  %v10423_v49 = vpop.f32.mrb[137].mxu1  ;;  %v10492_v15 = vld [vmem:[#allocation2 + $0x12f8] sm:$0xff] }
0x4ecf   : > { %v10439_v2 = vadd.f32 %v12705_v60, %v10423_v49  ;;  %v10491_v60 = vld [vmem:[#allocation2 + $0x12f0] sm:$0xff]  ;;  %v10494_v49 = vld [vmem:[#allocation2 + $0x1308] sm:$0xff] }
0x4ed0   : > { %v10442_v3 = vadd.f32 %v10440_v56, %v17762_v40  ;;  %v10584_v40 = vld [vmem:[#allocation2 + $0x1360] sm:$0xff]  ;;  %v16164_v48 = vpack.c.bf16 %v10492_v15, %v10491_v60 }
0x4ed1   : > { %v10441_v62 = vadd.f32 %v10439_v2, %v17757_v33  ;;  %v16187_v10 = vpack.c.bf16 %v10584_v40, %v10583_v45  ;;  %v10585_v33 = vld [vmem:[#allocation2 + $0x1368] sm:$0xff]  ;;  %v10493_v56 = vld [vmem:[#allocation2 + $0x1300] sm:$0xff]  ;;  %v10495_v2 = vld [vmem:[#allocation2 + $0x1310] sm:$0xff] }
0x4ed2   : > { %v10446_v8 = vsel %vm1551_vm2, %v10442_v3, 0.0  ;;  %v16190_v12 = vpack.c.bf16 %v10586_v11, %v10585_v33  ;;  %16165 = vmatprep.subr.bf16.mxu0 %v16164_v48 }
0x4ed3   : > { %10449 = vadd.xlane.f32.xlu0 %v10446_v8  ;;  %v10445_v9 = vsel %vm1551_vm2, %v10441_v62, 0.0  ;;  %16188 = vmatpush3.bf16.msra.mxu1 %v16187_v10  ;;  %v10497_v8 = vld [vmem:[#allocation2 + $0x1320] sm:$0xff] }
0x4ed4   : > { %10447 = vadd.xlane.f32.xlu1 %v10445_v9  ;;  %16189 = vmatprep.subr.bf16.mxu1 %v16862_v0  ;;  %v10498_v9 = vld [vmem:[#allocation2 + $0x1328] sm:$0xff] }
0x4ed5   : > { %16167 = vmatpush3.bf16.msra.mxu0 %v16164_v48 }
0x4ed7   : > { %8998 = vadd.xlane.f32.xlu0 %v8997_v61  ;;  %16191 = vmatpush3.bf16.msra.mxu1 %v16190_v12  ;;  %v16176_v61 = vpack.c.bf16 %v10498_v9, %v10497_v8 }
0x4ed8   : > { %16192 = vmatprep.subr.bf16.mxu1 %v16862_v0 }
0x4edb   : > { %16194 = vmatpush3.bf16.msra.mxu1 %v16193_v13 }
0x4edc   : > { %16195 = vmatprep.subr.bf16.mxu1 %v16862_v0 }
0x4edf   : > { %16197 = vmatpush3.bf16.msra.mxu1 %v16196_v14 }
0x4ee0   : > { %16198 = vmatprep.subr.bf16.mxu1 %v16862_v0 }
0x4ee3   : > { %16200 = vmatpush3.bf16.msra.mxu1 %v16199_v17  ;;  %v10670_v17 = vld [vmem:[#allocation2 + $0x13c0] sm:$0xff] }
0x4ee4   : > { %16201 = vmatprep.subr.bf16.mxu1 %v16862_v0 }
0x4ee7   : > { %16203 = vmatpush3.bf16.msra.mxu1 %v16202_v57  ;;  %v16205_v57 = vpack.c.bf16 %v10671_v7, %v10670_v17 }
0x4f60   : > { %v10450_v38 = vpop.xlane.xlu0 %10449 }
0x4f61   : > { %v10452_v20 = vmul.f32 0.03125, %v10450_v38  ;;  %v10448_v5 = vpop.xlane.xlu1 %10447  ;;  %v16211_v38 = vpack.c.bf16 %v10675_v58, %v10674_v31 }
0x4f62   : > { %v10451_v26 = vmul.f32 0.03125, %v10448_v5  ;;  %v10677_v5 = vld [vmem:[#allocation2 + $0x13f8] sm:$0xff] }
0x4f63   : > { %v10454_v21 = vsub.f32 %v10442_v3, %v10452_v20  ;;  %v16168_v3 = vpack.c.bf16 %v10494_v49, %v10493_v56  ;;  %v10676_v20 = vld [vmem:[#allocation2 + $0x13f0] sm:$0xff] }
0x4f64   : > { %v10453_v22 = vsub.f32 %v10441_v62, %v10451_v26  ;;  %v8999_v24 = vpop.xlane.xlu0 %8998  ;;  %v10496_v62 = vld [vmem:[#allocation2 + $0x1318] sm:$0xff]  ;;  %v16214_v26 = vpack.c.bf16 %v10677_v5, %v10676_v20 }
0x4f65   : > { %v9000_v27 = vmul.f32 0.03125, %v8999_v24  ;;  %v10456_v34 = vsel %vm1551_vm2, %v10454_v21, 0.0  ;;  %16169 = vmatprep.subr.bf16.mxu0 %v16168_v3  ;;  %v10678_v21 = vld [vmem:[#allocation2 + $0x1400] sm:$0xff] }
0x4f66   : > { %v10455_v25 = vsel %vm1551_vm2, %v10453_v22, 0.0  ;;  %v10458_v35 = vmul.f32 %v10456_v34, %v10456_v34  ;;  %16171 = vmatpush3.bf16.msra.mxu0 %v16168_v3  ;;  %v10679_v22 = vld [vmem:[#allocation2 + $0x1408] sm:$0xff] }
0x4f67   : > { %v9001_v29 = vadd.f32 1e-05, %v9000_v27  ;;  %v10457_v30 = vmul.f32 %v10455_v25, %v10455_v25  ;;  %v16217_v24 = vpack.c.bf16 %v10679_v22, %v10678_v21  ;;  %v10681_v27 = vld [vmem:[#allocation2 + $0x1418] sm:$0xff] }
0x4f69   : > { %16683 = vrsqrt.f32 %v9001_v29  ;;  %10459 = vadd.xlane.f32.xlu0 %v10457_v30  ;;  %v10682_v29 = vld [vmem:[#allocation2 + $0x1420] sm:$0xff]  ;;  %v10683_v30 = vld [vmem:[#allocation2 + $0x1428] sm:$0xff] }
0x4f6d   : > { %10461 = vadd.xlane.f32.xlu0 %v10458_v35  ;;  %v10684_v35 = vld [vmem:[#allocation2 + $0x1430] sm:$0xff] }
0x4f73   : > { %v16684_v47 = vpop.eup %16683 }
0x4f74   : > { %v9003_v37 = vmul.f32 %v16684_v47, %v18009_v4  ;;  %v16172_v4 = vpack.c.bf16 %v10496_v62, %v10495_v2  ;;  %v10685_v47 = vld [vmem:[#allocation2 + $0x1438] sm:$0xff] }
0x4f76   : > { %v9008_v43 = vmul.f32 %v12668_v23, %v9003_v37  ;;  %16173 = vmatprep.subr.bf16.mxu0 %v16172_v4  ;;  %v16226_v23 = vpack.c.bf16 %v10685_v47, %v10684_v35  ;;  %v12709_v37 = vld [vmem:[#allocation2 + $0x13b8] ss:$0 sm:$0xff]  ;;  %v10762_v35 = vld [vmem:[#allocation2 + $0x1450] sm:$0xff] }
0x4f77   : > { %16175 = vmatpush3.bf16.msra.mxu0 %v16172_v4 }
0x4f78   : > { %v18028_v32 = vadd.f32 %v12669_v39, %v9008_v43  ;;  %16177 = vmatprep.subr.bf16.mxu0 %v16176_v61  ;;  %v12708_v43 = vld [vmem:[#allocation2 + $0x1330] ss:$0 sm:$0xff] }
0x4f7a   : > { %15093 = vmatmul.mubr.f32.vlgmr.msra.gmra.mrb[142].mxu1 %v18028_v32  ;;  %12169 = vst [vmem:[%s18031_s13] sm:$0xff] %v18028_v32 }
0x4f7b   : > { %16179 = vmatpush3.bf16.msra.mxu0 %v16176_v61 }
0x4f7c   : > { %16204 = vmatprep.subr.bf16.mxu0 %v16862_v0 }
0x4ff6   : > { %v10460_v45 = vpop.xlane.xlu0 %10459 }
0x4ff7   : > { %v10463_v40 = vmul.f32 0.03125, %v10460_v45 }
0x4ff9   : > { %v10465_v10 = vadd.f32 1e-05, %v10463_v40 }
0x4ffa   : > { %v10462_v33 = vpop.xlane.xlu0 %10461 }
0x4ffb   : > { %16685 = vrsqrt.f32 %v10465_v10  ;;  %v10464_v11 = vmul.f32 0.03125, %v10462_v33 }
0x4ffd   : > { %v10466_v12 = vadd.f32 1e-05, %v10464_v11 }
0x4fff   : > { %16687 = vrsqrt.f32 %v10466_v12 }
0x5005   : > { %v16686_v55 = vpop.eup %16685 }
0x5006   : > { %v10469_v13 = vmul.f32 %v16686_v55, %v10455_v25 }
0x5008   : > { %v10475_v52 = vmul.f32 %v12706_v53, %v10469_v13 }
0x5009   : > { %v16688_v18 = vpop.eup %16687 }
0x500a   : > { %v10470_v14 = vmul.f32 %v16688_v18, %v10456_v34  ;;  %v10481_v16 = vadd.f32 %v12707_v51, %v10475_v52  ;;  %v16223_v34 = vpack.c.bf16 %v10683_v30, %v10682_v29 }
0x500c   : > { %v10476_v19 = vmul.f32 %v12706_v53, %v10470_v14  ;;  %15057 = vmatprep.mubr.f32.mxu0 %v10481_v16 }
0x500e   : > { %v10482_v28 = vadd.f32 %v12707_v51, %v10476_v19 }
0x5010   : > { %15058 = vmatmul.mubr.f32.vlgmr.msra.gmra.mrb[62].mxu0 %v10482_v28 }
0x5011   : > { %16206 = vmatpush3.bf16.msra.mxu0 %v16205_v57  ;;  %15127 = vmatprep.mubr.msk.f32.mxu0 %vm16863_vm0, %v16864_v1  ;;  %v10680_v1 = vld [vmem:[#allocation2 + $0x1410] sm:$0xff] }
0x5012   : > { %16207 = vmatprep.subr.bf16.mxu0 %v16862_v0  ;;  %v16220_v25 = vpack.c.bf16 %v10681_v27, %v10680_v1 }
0x5015   : > { %16209 = vmatpush3.bf16.msra.mxu0 %v16208_v50 }
0x5016   : > { %16210 = vmatprep.subr.bf16.mxu0 %v16862_v0 }
0x5019   : > { %16212 = vmatpush3.bf16.msra.mxu0 %v16211_v38 }
0x501a   : > { %16213 = vmatprep.subr.bf16.mxu0 %v16862_v0 }
0x501d   : > { %16215 = vmatpush3.bf16.msra.mxu0 %v16214_v26 }
0x501e   : > { %16216 = vmatprep.subr.bf16.mxu0 %v16862_v0 }
0x5021   : > { %16218 = vmatpush3.bf16.msra.mxu0 %v16217_v24 }
0x5022   : > { %16219 = vmatprep.subr.bf16.mxu0 %v16862_v0 }
0x5025   : > { %16221 = vmatpush3.bf16.msra.mxu0 %v16220_v25 }
0x5026   : > { %16222 = vmatprep.subr.bf16.mxu0 %v16862_v0 }
0x5029   : > { %16224 = vmatpush3.bf16.msra.mxu0 %v16223_v34 }
0x502a   : > { %16225 = vmatprep.subr.bf16.mxu0 %v16862_v0 }
0x502d   : > { %16227 = vmatpush3.bf16.msra.mxu0 %v16226_v23 }
0x5030   : > { %15128 = vmatmul.mubr.f32.vlgmr.msra.gmra.mrb[64].mxu0 %v18028_v32  ;;  %v12710_v32 = vld [vmem:[#allocation2 + $0x1440] ss:$0 sm:$0xff] }
0x504d   : > { %v10666_v39 = vpop.f32.mrb[142].mxu1 }
0x504e   : > { %v18046_v36 = vadd.f32 %v12709_v37, %v10666_v39  ;;  %v15094_v41 = vpop.f32.mrb[143].mxu1 }
0x5050   : > { %15130 = vmatprep.subr.msk.mxu1 %vm585_vm1, %v18046_v36 }
0x5051   : > { %15131 = vmatpush3.xpose.msk.msra.mxu1 %vm585_vm1, %v18046_v36 }
0x50e3   : > { %v15059_v46 = vpop.f32.mrb[62].mxu0 }
0x50e4   : > { %v10570_v54 = vpop.f32.mrb[63].mxu0  ;;  %v18054_v0 = vadd.f32 %v15059_v46, %v12708_v43 }
0x50e5   : > { %v18052_v42 = vadd.f32 %v12708_v43, %v10570_v54 }
0x50e7   : > { %15132 = vmatprep.mubr.msk.f32.mxu1 %vm585_vm1, %v18052_v42 }
0x50e8   : > { %15133 = vmatmul.mubr.msk.f32.vlgmr.msra.gmra.mrb[144].mxu1 %vm585_vm1, %v18054_v0 }
0x5103   : > { %v10757_v59 = vpop.f32.mrb[64].mxu0 }
0x5104   : > { %v18060_v60 = vadd.f32 %v12710_v32, %v10757_v59  ;;  %v15129_v15 = vpop.f32.mrb[65].mxu0 }
0x5106   : > { %15135 = vmatprep.subr.mxu1 %v18060_v60 }
0x5107   : > { %15136 = vmatpush3.msra.mxu1 %v18060_v60 }
0x51bb   : > { %v15134_v48 = vpop.f32.mrb[144].mxu1 }
0x51bc   : > { %v10850_v56 = vmul.f32 0.35355338, %v15134_v48  ;;  %v10840_v49 = vpop.f32.mrb[145].mxu1 }
0x51bd   : > { %v10849_v2 = vmul.f32 0.35355338, %v10840_v49 }
0x51be   : > { %v10854_v3 = vsel %vm585_vm1, %v10850_v56, -inf }
0x51bf   : > { %10855 = vmax.xlane.f32.xlu1 %v10854_v3  ;;  %v10851_v62 = vsel %vm585_vm1, %v10849_v2, -inf }
0x51c0   : > { %10852 = vmax.xlane.f32.xlu0 %v10851_v62 }
0x524c   : > { %v10856_v4 = vpop.xlane.xlu1 %10855 }
0x524d   : > { %v10858_v8 = vsub.f32 %v10850_v56, %v10856_v4  ;;  %v10853_v9 = vpop.xlane.xlu0 %10852 }
0x524e   : > { %v10857_v61 = vsub.f32 %v10849_v2, %v10853_v9 }
0x524f   : > { %v10861_v45 = vmul.f32 1.442695, %v10858_v8 }
0x5250   : > { %v10859_v40 = vmul.f32 1.442695, %v10857_v61 }
0x5251   : > { %16689 = vpow2.f32 %v10861_v45 }
0x5252   : > { %16691 = vpow2.f32 %v10859_v40 }
0x525b   : > { %v16690_v10 = vpop.eup %16689 }
0x525c   : > { %v16692_v33 = vpop.eup %16691  ;;  %v10866_v11 = vsel %vm585_vm1, %v16690_v10, 0.0 }
0x525d   : > { %10867 = vadd.xlane.f32.xlu1 %v10866_v11  ;;  %v10863_v12 = vsel %vm585_vm1, %v16692_v33, 0.0 }
0x525e   : > { %10864 = vadd.xlane.f32.xlu0 %v10863_v12 }
0x526e   : > { %10956 = vrot.lane.b32.xlu1 %v18052_v42, %s16865_s15 }
0x5272   : > { %10958 = vrot.lane.b32.xlu1 %v18054_v0, %s16865_s15 }
0x5274   : > { %10960 = vrot.lane.b32.xlu0 %v18046_v36, %s16865_s15 }
0x52ea   : > { %v10868_v55 = vpop.xlane.xlu1 %10867 }
0x52eb   : > { %16693 = vrcp.f32 %v10868_v55  ;;  %v10865_v53 = vpop.xlane.xlu0 %10864 }
0x52ec   : > { %16695 = vrcp.f32 %v10865_v53 }
0x52ee   : > { %v10957_v18 = vpop.permute.xlu1 %10956 }
0x52ef   : > { %v10961_v13 = vpop.permute.xlu0 %10960 }
0x52f0   : > { %15140 = vmatprep.subr.msk.mxu1 %vm585_vm1, %v10961_v13 }
0x52f2   : > { %v10959_v17 = vpop.permute.xlu1 %10958 }
0x52f5   : > { %v16694_v51 = vpop.eup %16693 }
0x52f6   : > { %v16696_v52 = vpop.eup %16695  ;;  %v18077_v16 = vmul.f32 %v16694_v51, %v16690_v10 }
0x52f7   : > { %v18075_v14 = vmul.f32 %v16696_v52, %v16692_v33 }
0x52f9   : > { %15137 = vmatprep.mubr.msk.f32.mxu1 %vm585_vm1, %v18075_v14 }
0x52fa   : > { %15138 = vmatmul.mubr.msk.f32.vlgmr.msra.gmra.mrb[146].mxu1 %vm585_vm1, %v18077_v16 }
0x52fb   : > { %15141 = vmatpush3.xpose.msk.msra.mxu1 %vm585_vm1, %v10961_v13  ;;  %15142 = vmatprep.mubr.msk.f32.mxu1 %vm585_vm1, %v10957_v18 }
0x52fe   : > { %15143 = vmatmul.mubr.msk.f32.vlgmr.msra.gmra.mrb[148].mxu1 %vm585_vm1, %v10959_v17 }
0x53cd   : > { %v18086_v7 = vpop.f32.mrb[146].mxu1 }
0x53ce   : > { %v18088_v19 = vpop.f32.mrb[147].mxu1 }
0x53d1   : > { %v15144_v57 = vpop.f32.mrb[148].mxu1 }
0x53d2   : > { %v11044_v28 = vmul.f32 0.35355338, %v15144_v57  ;;  %v11034_v63 = vpop.f32.mrb[149].mxu1 }
0x53d3   : > { %v11043_v6 = vmul.f32 0.35355338, %v11034_v63 }
0x53d4   : > { %v11048_v50 = vsel %vm585_vm1, %v11044_v28, -inf }
0x53d5   : > { %11049 = vmax.xlane.f32.xlu1 %v11048_v50  ;;  %v11045_v31 = vsel %vm585_vm1, %v11043_v6, -inf }
0x53d6   : > { %11046 = vmax.xlane.f32.xlu0 %v11045_v31 }
0x53e6   : > { %11070 = vrot.lane.b32.xlu1 %v18060_v60, %s16865_s15 }
0x53ea   : > { %11316 = vrot.lane.b32.xlu1 %v18052_v42, %s16866_s16 }
0x53ee   : > { %11318 = vrot.lane.b32.xlu1 %v18054_v0, %s16866_s16 }
0x53f2   : > { %11596 = vrot.lane.b32.xlu1 %v18052_v42, %s16867_s17  ;;  %v10761_v42 = vld [vmem:[#allocation2 + $0x1448] sm:$0xff] }
0x5462   : > { %v11050_v58 = vpop.xlane.xlu1 %11049 }
0x5463   : > { %v11052_v38 = vsub.f32 %v11044_v28, %v11050_v58  ;;  %v11047_v20 = vpop.xlane.xlu0 %11046 }
0x5464   : > { %v11051_v5 = vsub.f32 %v11043_v6, %v11047_v20 }
0x5465   : > { %v11055_v26 = vmul.f32 1.442695, %v11052_v38 }
0x5466   : > { %v11053_v21 = vmul.f32 1.442695, %v11051_v5  ;;  %v11071_v22 = vpop.permute.xlu1 %11070 }
0x5467   : > { %15145 = vmatprep.subr.mxu1 %v11071_v22 }
0x5468   : > { %16697 = vpow2.f32 %v11053_v21  ;;  %15146 = vmatpush3.msra.mxu1 %v11071_v22 }
0x5469   : > { %16699 = vpow2.f32 %v11055_v26  ;;  %15150 = vmatprep.subr.mxu1 %v10762_v35 }
0x546a   : > { %v11317_v24 = vpop.permute.xlu1 %11316 }
0x546e   : > { %v11319_v1 = vpop.permute.xlu1 %11318 }
0x5472   : > { %v16698_v27 = vpop.eup %16697  ;;  %v11597_v25 = vpop.permute.xlu1 %11596 }
0x5473   : > { %15177 = vmatprep.mubr.msk.f32.mxu0 %vm585_vm1, %v11597_v25  ;;  %v11057_v29 = vsel %vm585_vm1, %v16698_v27, 0.0  ;;  %v16700_v30 = vpop.eup %16699 }
0x5474   : > { %11058 = vadd.xlane.f32.xlu0 %v11057_v29  ;;  %v11060_v34 = vsel %vm585_vm1, %v16700_v30, 0.0 }
0x5478   : > { %11061 = vadd.xlane.f32.xlu0 %v11060_v34 }
0x548e   : > { %11320 = vrot.lane.b32.xlu0 %v18046_v36, %s16866_s16 }
0x5492   : > { %11600 = vrot.lane.b32.xlu0 %v18046_v36, %s16867_s17 }
0x5496   : > { %11598 = vrot.lane.b32.xlu0 %v18054_v0, %s16867_s17 }
0x5501   : > { %v11059_v47 = vpop.xlane.xlu0 %11058 }
0x5502   : > { %16701 = vrcp.f32 %v11059_v47 }
0x5505   : > { %v11062_v23 = vpop.xlane.xlu0 %11061 }
0x5506   : > { %16703 = vrcp.f32 %v11062_v23 }
0x5509   : > { %v11321_v37 = vpop.permute.xlu0 %11320 }
0x550c   : > { %v16702_v39 = vpop.eup %16701 }
0x550d   : > { %v11601_v41 = vpop.permute.xlu0 %11600  ;;  %v18109_v43 = vmul.f32 %v16702_v39, %v16698_v27 }
0x550e   : > { %15175 = vmatprep.subr.msk.mxu0 %vm585_vm1, %v11601_v41 }
0x550f   : > { %15147 = vmatprep.mubr.msk.f32.mxu1 %vm585_vm1, %v18109_v43  ;;  %15176 = vmatpush3.xpose.msk.msra.mxu0 %vm585_vm1, %v11601_v41  ;;  %v11067_v25 = vadd.f32 %v18109_v43, %v18075_v14  ;;  %v10763_v14 = vld [vmem:[#allocation2 + $0x1458] sm:$0xff] }
0x5510   : > { %v16704_v36 = vpop.eup %16703 }
0x5511   : > { %v18115_v46 = vmul.f32 %v16704_v36, %v16700_v30  ;;  %v11599_v54 = vpop.permute.xlu0 %11598 }
0x5512   : > { %15178 = vmatmul.mubr.msk.f32.vlgmr.msra.gmra.mrb[66].mxu0 %vm585_vm1, %v11599_v54 }
0x5513   : > { %15148 = vmatmul.mubr.msk.f32.vlgmr.msra.gmra.mrb[150].mxu1 %vm585_vm1, %v18115_v46  ;;  %v11068_v30 = vadd.f32 %v18115_v46, %v18077_v16  ;;  %v10764_v16 = vld [vmem:[#allocation2 + $0x1460] sm:$0xff] }
0x5514   : > { %15151 = vmatpush3.msra.mxu1 %v10762_v35 }
0x5515   : > { %15155 = vmatprep.subr.mxu1 %v10761_v42 }
0x55e5   : > { %v15179_v0 = vpop.f32.mrb[66].mxu0 }
0x55e6   : > { %v15149_v32 = vpop.f32.mrb[150].mxu1  ;;  %v11674_v59 = vpop.f32.mrb[67].mxu0  ;;  %v11684_v4 = vmul.f32 0.35355338, %v15179_v0 }
0x55e7   : > { %v11145_v15 = vpop.f32.mrb[151].mxu1  ;;  %v11683_v3 = vmul.f32 0.35355338, %v11674_v59 }
0x55e8   : > { %15152 = vmatprep.mubr.msk.f32.mxu1 %vm585_vm1, %v11145_v15  ;;  %v11688_v61 = vsel %vm585_vm1, %v11684_v4, -inf }
0x55e9   : > { %15153 = vmatmul.mubr.msk.f32.vlgmr.msra.gmra.mrb[152].mxu1 %vm585_vm1, %v15149_v32  ;;  %v11685_v9 = vsel %vm585_vm1, %v11683_v3, -inf  ;;  %v12739_v32 = vld [vmem:[#allocation2 + $0x14c8] ss:$0 sm:$0xff] }
0x55ea   : > { %15156 = vmatpush3.msra.mxu1 %v10761_v42  ;;  %15157 = vmatprep.mubr.msk.f32.mxu1 %vm585_vm1, %v18088_v19 }
0x55eb   : > { %15160 = vmatprep.subr.msk.mxu1 %vm585_vm1, %v11321_v37 }
0x55f1   : > { %15158 = vmatmul.mubr.msk.f32.vlgmr.msra.gmra.mrb[152].mxu1 %vm585_vm1, %v18086_v7 }
0x55f2   : > { %15161 = vmatpush3.xpose.msk.msra.mxu1 %vm585_vm1, %v11321_v37  ;;  %15162 = vmatprep.mubr.msk.f32.mxu1 %vm585_vm1, %v11317_v24 }
0x55f5   : > { %15163 = vmatmul.mubr.msk.f32.vlgmr.msra.gmra.mrb[154].mxu1 %vm585_vm1, %v11319_v1 }
0x56c8   : > { %v15164_v48 = vpop.f32.mrb[154].mxu1 }
0x56c9   : > { %v11404_v56 = vmul.f32 0.35355338, %v15164_v48  ;;  %v11394_v49 = vpop.f32.mrb[155].mxu1 }
0x56ca   : > { %v11403_v2 = vmul.f32 0.35355338, %v11394_v49 }
0x56cb   : > { %v11408_v62 = vsel %vm585_vm1, %v11404_v56, -inf }
0x56cc   : > { %11409 = vmax.xlane.f32.xlu0 %v11408_v62  ;;  %v11405_v8 = vsel %vm585_vm1, %v11403_v2, -inf  ;;  %v11926_v62 = vld [vmem:[#allocation2 + $0x14e8] sm:$0xff] }
0x56cd   : > { %11406 = vmax.xlane.f32.xlu1 %v11405_v8 }
0x56d0   : > { %11686 = vmax.xlane.f32.xlu0 %v11685_v9  ;;  %v11928_v9 = vld [vmem:[#allocation2 + $0x14f8] sm:$0xff] }
0x56d1   : > { %11689 = vmax.xlane.f32.xlu1 %v11688_v61 }
0x5759   : > { %v11410_v45 = vpop.xlane.xlu0 %11409 }
0x575a   : > { %v11407_v40 = vpop.xlane.xlu1 %11406  ;;  %v11412_v33 = vsub.f32 %v11404_v56, %v11410_v45  ;;  %v11929_v45 = vld [vmem:[#allocation2 + $0x1500] sm:$0xff] }
0x575b   : > { %v11411_v10 = vsub.f32 %v11403_v2, %v11407_v40  ;;  %v11930_v40 = vld [vmem:[#allocation2 + $0x1508] sm:$0xff] }
0x575c   : > { %v11415_v52 = vmul.f32 1.442695, %v11412_v33 }
0x575d   : > { %v11687_v11 = vpop.xlane.xlu0 %11686  ;;  %v11413_v13 = vmul.f32 1.442695, %v11411_v10  ;;  %v16236_v10 = vpack.c.bf16 %v11930_v40, %v11929_v45 }
0x575e   : > { %v11691_v12 = vsub.f32 %v11683_v3, %v11687_v11  ;;  %v11690_v55 = vpop.xlane.xlu1 %11689  ;;  %v11925_v3 = vld [vmem:[#allocation2 + $0x14e0] sm:$0xff] }
0x575f   : > { %v11692_v53 = vsub.f32 %v11684_v4, %v11690_v55  ;;  %v11927_v4 = vld [vmem:[#allocation2 + $0x14f0] sm:$0xff]  ;;  %v16228_v8 = vpack.c.bf16 %v11926_v62, %v11925_v3 }
0x5760   : > { %v11693_v51 = vmul.f32 1.442695, %v11691_v12  ;;  %v16232_v61 = vpack.c.bf16 %v11928_v9, %v11927_v4 }
0x5761   : > { %v11695_v18 = vmul.f32 1.442695, %v11692_v53 }
0x5762   : > { %16705 = vpow2.f32 %v11693_v51 }
0x5763   : > { %16707 = vpow2.f32 %v11695_v18 }
0x5764   : > { %16709 = vpow2.f32 %v11413_v13 }
0x5765   : > { %16711 = vpow2.f32 %v11415_v52 }
0x576c   : > { %v16706_v17 = vpop.eup %16705 }
0x576d   : > { %v16708_v7 = vpop.eup %16707  ;;  %v11697_v19 = vsel %vm585_vm1, %v16706_v17, 0.0 }
0x576e   : > { %v16710_v57 = vpop.eup %16709  ;;  %11698 = vadd.xlane.f32.xlu0 %v11697_v19  ;;  %v11700_v28 = vsel %vm585_vm1, %v16708_v7, 0.0  ;;  %v11932_v19 = vld [vmem:[#allocation2 + $0x1518] sm:$0xff] }
0x576f   : > { %v16712_v63 = vpop.eup %16711  ;;  %11701 = vadd.xlane.f32.xlu1 %v11700_v28  ;;  %v11417_v6 = vsel %vm585_vm1, %v16710_v57, 0.0  ;;  %v11933_v28 = vld [vmem:[#allocation2 + $0x1520] sm:$0xff] }
0x5770   : > { %v11420_v50 = vsel %vm585_vm1, %v16712_v63, 0.0 }
0x5772   : > { %11418 = vadd.xlane.f32.xlu0 %v11417_v6  ;;  %v11935_v6 = vld [vmem:[#allocation2 + $0x1530] sm:$0xff] }
0x5773   : > { %11421 = vadd.xlane.f32.xlu1 %v11420_v50 }
0x5784   : > { %11709 = vrot.lane.b32.xlu1 %v18060_v60, %s16867_s17  ;;  %s18188_s17 = scalar_lea.hbm %s18281_s3, %s12753_s14 }
0x5788   : > { %11429 = vrot.lane.b32.xlu0 %v18060_v60, %s16866_s16 }
0x57fb   : > { %v11699_v31 = vpop.xlane.xlu0 %11698 }
0x57fc   : > { %16713 = vrcp.f32 %v11699_v31  ;;  %v11702_v58 = vpop.xlane.xlu1 %11701  ;;  %v11936_v31 = vld [vmem:[#allocation2 + $0x1538] sm:$0xff] }
0x57fd   : > { %16715 = vrcp.f32 %v11702_v58  ;;  %v16248_v58 = vpack.c.bf16 %v11936_v31, %v11935_v6 }
0x57ff   : > { %v11419_v38 = vpop.xlane.xlu0 %11418 }
0x5800   : > { %16717 = vrcp.f32 %v11419_v38  ;;  %v11422_v20 = vpop.xlane.xlu1 %11421  ;;  %v11937_v38 = vld [vmem:[#allocation2 + $0x1540] sm:$0xff] }
0x5801   : > { %16719 = vrcp.f32 %v11422_v20  ;;  %v11938_v20 = vld [vmem:[#allocation2 + $0x1548] sm:$0xff] }
0x5803   : > { %v11430_v5 = vpop.permute.xlu0 %11429 }
0x5804   : > { %v11710_v26 = vpop.permute.xlu1 %11709  ;;  %15165 = vmatprep.subr.mxu1 %v11430_v5 }
0x5805   : > { %15166 = vmatpush3.msra.mxu1 %v11430_v5  ;;  %15180 = vmatprep.subr.mxu0 %v11710_v26  ;;  %v16252_v5 = vpack.c.bf16 %v11938_v20, %v11937_v38 }
0x5806   : > { %v16714_v21 = vpop.eup %16713  ;;  %15181 = vmatpush3.msra.mxu0 %v11710_v26  ;;  %15170 = vmatprep.subr.mxu1 %v10763_v14  ;;  %v11939_v26 = vld [vmem:[#allocation2 + $0x1550] sm:$0xff] }
0x5807   : > { %v16716_v22 = vpop.eup %16715  ;;  %v11705_v24 = vmul.f32 %v16714_v21, %v16706_v17  ;;  %16229 = vmatprep.subr.bf16.mxu0 %v16228_v8  ;;  %v11940_v21 = vld [vmem:[#allocation2 + $0x1558] sm:$0xff] }
0x5808   : > { %v11706_v1 = vmul.f32 %v16716_v22, %v16708_v7  ;;  %v11931_v7 = vld [vmem:[#allocation2 + $0x1510] sm:$0xff]  ;;  %v16256_v22 = vpack.c.bf16 %v11940_v21, %v11939_v26 }
0x5809   : > { %15182 = vmatprep.mubr.msk.f32.mxu0 %vm585_vm1, %v11705_v24 }
0x580a   : > { %v16718_v60 = vpop.eup %16717  ;;  %15183 = vmatmul.mubr.msk.f32.vlgmr.msra.gmra.mrb[68].mxu0 %vm585_vm1, %v11706_v1 }
0x580b   : > { %v16720_v27 = vpop.eup %16719  ;;  %v11425_v29 = vmul.f32 %v16718_v60, %v16710_v57  ;;  %16231 = vmatpush3.bf16.msra.mxu0 %v16228_v8  ;;  %v16240_v57 = vpack.c.bf16 %v11932_v19, %v11931_v7  ;;  %v12025_v60 = vld [vmem:[#allocation2 + $0x1578] sm:$0xff] }
0x580c   : > { %v11426_v34 = vmul.f32 %v16720_v27, %v16712_v63  ;;  %16233 = vmatprep.subr.bf16.mxu0 %v16232_v61  ;;  %v11934_v63 = vld [vmem:[#allocation2 + $0x1528] sm:$0xff]  ;;  %v12741_v8 = vld [vmem:[#allocation2 + $0x14d8] ss:$0 sm:$0xff] }
0x580d   : > { %v11427_v35 = vadd.f32 %v11425_v29, %v11067_v25  ;;  %15167 = vmatprep.mubr.msk.f32.mxu1 %vm585_vm1, %v11425_v29  ;;  %v16244_v50 = vpack.c.bf16 %v11934_v63, %v11933_v28  ;;  %v12026_v25 = vld [vmem:[#allocation2 + $0x1580] sm:$0xff] }
0x580e   : > { %v11428_v47 = vadd.f32 %v11426_v34, %v11068_v30  ;;  %15168 = vmatmul.mubr.msk.f32.vlgmr.msra.gmra.mrb[156].mxu1 %vm585_vm1, %v11426_v34  ;;  %v16264_v29 = vpack.c.bf16 %v12026_v25, %v12025_v60  ;;  %v12027_v30 = vld [vmem:[#allocation2 + $0x1588] sm:$0xff]  ;;  %v12028_v34 = vld [vmem:[#allocation2 + $0x1590] sm:$0xff] }
0x580f   : > { %v11707_v23 = vadd.f32 %v11705_v24, %v11427_v35  ;;  %15171 = vmatpush3.msra.mxu1 %v10763_v14  ;;  %16235 = vmatpush3.bf16.msra.mxu0 %v16232_v61  ;;  %v12023_v24 = vld [vmem:[#allocation2 + $0x1568] sm:$0xff]  ;;  %v16268_v35 = vpack.c.bf16 %v12028_v34, %v12027_v30  ;;  %v12034_v14 = vld [vmem:[#allocation2 + $0x15c0] sm:$0xff] }
0x5810   : > { %v11708_v37 = vadd.f32 %v11706_v1, %v11428_v47  ;;  %15185 = vmatprep.subr.mxu1 %v10764_v16  ;;  %16237 = vmatprep.subr.bf16.mxu0 %v16236_v10  ;;  %v12024_v1 = vld [vmem:[#allocation2 + $0x1570] sm:$0xff]  ;;  %v12029_v47 = vld [vmem:[#allocation2 + $0x1598] sm:$0xff] }
0x5811   : > { %v11883_v39 = vmul.f32 0.25, %v11707_v23  ;;  %v16260_v27 = vpack.c.bf16 %v12024_v1, %v12023_v24  ;;  %v12030_v23 = vld [vmem:[#allocation2 + $0x15a0] sm:$0xff] }
0x5812   : > { %v11884_v41 = vmul.f32 0.25, %v11708_v37  ;;  %v16272_v37 = vpack.c.bf16 %v12030_v23, %v12029_v47 }
0x5813   : > { %v12164_v36 = vsel %vm585_vm1, %v11883_v39, 0.0  ;;  %16239 = vmatpush3.bf16.msra.mxu0 %v16236_v10  ;;  %v12031_v39 = vld [vmem:[#allocation2 + $0x15a8] sm:$0xff]  ;;  %v12037_v10 = vld [vmem:[#allocation2 + $0x15d8] sm:$0xff] }
0x5814   : > { %v12165_v54 = vsel %vm585_vm1, %v11884_v41, 0.0  ;;  %12747 = vst [vmem:[%s17561_s11 + $0x10] sm:$0xff] %v12164_v36  ;;  %16241 = vmatprep.subr.bf16.mxu0 %v16240_v57  ;;  %v12032_v41 = vld [vmem:[#allocation2 + $0x15b0] sm:$0xff] }
0x5815   : > { %12748 = vst [vmem:[%s17561_s11 + $0x18] sm:$0xff] %v12165_v54  ;;  %v16276_v36 = vpack.c.bf16 %v12032_v41, %v12031_v39  ;;  %v12033_v54 = vld [vmem:[#allocation2 + $0x15b8] sm:$0xff] }
0x5817   : > { %16243 = vmatpush3.bf16.msra.mxu0 %v16240_v57 }
0x5818   : > { %16245 = vmatprep.subr.bf16.mxu0 %v16244_v50 }
0x581b   : > { %16247 = vmatpush3.bf16.msra.mxu0 %v16244_v50 }
0x581c   : > { %16249 = vmatprep.subr.bf16.mxu0 %v16248_v58 }
0x581f   : > { %16251 = vmatpush3.bf16.msra.mxu0 %v16248_v58 }
0x5820   : > { %16253 = vmatprep.subr.bf16.mxu0 %v16252_v5 }
0x5823   : > { %16255 = vmatpush3.bf16.msra.mxu0 %v16252_v5 }
0x5824   : > { %16257 = vmatprep.subr.bf16.mxu0 %v16256_v22 }
0x5827   : > { %16259 = vmatpush3.bf16.msra.mxu0 %v16256_v22 }
0x58dd   : > { %v15184_v43 = vpop.f32.mrb[68].mxu0 }
0x58de   : > { %v11784_v46 = vpop.f32.mrb[69].mxu0 }
0x58e1   : > { %v15169_v42 = vpop.f32.mrb[156].mxu1 }
0x58e2   : > { %v11504_v0 = vpop.f32.mrb[157].mxu1 }
0x58e3   : > { %15172 = vmatprep.mubr.msk.f32.mxu1 %vm585_vm1, %v11504_v0 }
0x58e4   : > { %15173 = vmatmul.mubr.msk.f32.vlgmr.msra.gmra.mrb[152].mxu1 %vm585_vm1, %v15169_v42 }
0x58e5   : > { %15186 = vmatpush3.msra.mxu1 %v10764_v16  ;;  %15187 = vmatprep.mubr.msk.f32.mxu1 %vm585_vm1, %v11784_v46  ;;  %v16280_v16 = vpack.c.bf16 %v12034_v14, %v12033_v54  ;;  %v12036_v46 = vld [vmem:[#allocation2 + $0x15d0] sm:$0xff] }
0x58e6   : > { %16261 = vmatprep.subr.bf16.mxu1 %v16260_v27 }
0x58ec   : > { %15188 = vmatmul.mubr.msk.f32.vlgmr.msra.gmra.mrb[152].mxu1 %vm585_vm1, %v15184_v43  ;;  %v12035_v43 = vld [vmem:[#allocation2 + $0x15c8] sm:$0xff] }
0x58ed   : > { %16263 = vmatpush3.bf16.msra.mxu1 %v16260_v27  ;;  %v16284_v42 = vpack.c.bf16 %v12036_v46, %v12035_v43 }
0x58ee   : > { %16265 = vmatprep.subr.bf16.mxu1 %v16264_v29 }
0x58f1   : > { %16267 = vmatpush3.bf16.msra.mxu1 %v16264_v29 }
0x58f2   : > { %16269 = vmatprep.subr.bf16.mxu1 %v16268_v35 }
0x58f5   : > { %16271 = vmatpush3.bf16.msra.mxu1 %v16268_v35 }
0x58f6   : > { %16273 = vmatprep.subr.bf16.mxu1 %v16272_v37 }
0x58f9   : > { %16275 = vmatpush3.bf16.msra.mxu1 %v16272_v37 }
0x58fa   : > { %16277 = vmatprep.subr.bf16.mxu1 %v16276_v36 }
0x58fd   : > { %16279 = vmatpush3.bf16.msra.mxu1 %v16276_v36 }
0x58fe   : > { %16281 = vmatprep.subr.bf16.mxu1 %v16280_v16 }
0x5901   : > { %16283 = vmatpush3.bf16.msra.mxu1 %v16280_v16 }
0x5902   : > { %16285 = vmatprep.subr.bf16.mxu1 %v16284_v42 }
0x5905   : > { %16287 = vmatpush3.bf16.msra.mxu1 %v16284_v42 }
0x59bf   : > { %v15189_v59 = vpop.f32.mrb[152].mxu1 }
0x59c0   : > { %v11882_v15 = vadd.f32 %v15189_v59, %v12739_v32  ;;  %v11865_v48 = vpop.f32.mrb[153].mxu1 }
0x59c1   : > { %v11881_v56 = vadd.f32 %v12739_v32, %v11865_v48 }
0x59c2   : > { %v11888_v49 = vsel %vm1551_vm2, %v11882_v15, 0.0 }
0x59c3   : > { %11891 = vadd.xlane.f32.xlu0 %v11888_v49  ;;  %v11887_v2 = vsel %vm1551_vm2, %v11881_v56, 0.0 }
0x59c4   : > { %11889 = vadd.xlane.f32.xlu1 %v11887_v2  ;;  %v12740_v2 = vld [vmem:[#allocation2 + $0x14d0] ss:$0 sm:$0xff] }
0x5a50   : > { %v11892_v33 = vpop.xlane.xlu0 %11891 }
0x5a51   : > { %v11894_v11 = vmul.f32 0.03125, %v11892_v33  ;;  %v11890_v12 = vpop.xlane.xlu1 %11889  ;;  %v12038_v33 = vld [vmem:[#allocation2 + $0x15e0] sm:$0xff] }
0x5a52   : > { %v11893_v55 = vmul.f32 0.03125, %v11890_v12  ;;  %v12742_v12 = vld [vmem:[#allocation2 + $0x1560] ss:$0 sm:$0xff] }
0x5a53   : > { %v11896_v53 = vsub.f32 %v11882_v15, %v11894_v11  ;;  %v16288_v11 = vpack.c.bf16 %v12038_v33, %v12037_v10 }
0x5a54   : > { %v11895_v13 = vsub.f32 %v11881_v56, %v11893_v55 }
0x5a55   : > { %v18164_v51 = vsel %vm1551_vm2, %v11896_v53, 0.0  ;;  %16289 = vmatprep.subr.bf16.mxu1 %v16288_v11 }
0x5a56   : > { %v18168_v52 = vsel %vm1551_vm2, %v11895_v13, 0.0  ;;  %v11900_v18 = vmul.f32 %v18164_v51, %v18164_v51  ;;  %16291 = vmatpush3.bf16.msra.mxu1 %v16288_v11 }
0x5a57   : > { %v11899_v17 = vmul.f32 %v18168_v52, %v18168_v52 }
0x5a58   : > { %11903 = vadd.xlane.f32.xlu1 %v11900_v18 }
0x5a59   : > { %11901 = vadd.xlane.f32.xlu0 %v11899_v17 }
0x5ae5   : > { %v11904_v0 = vpop.xlane.xlu1 %11903 }
0x5ae6   : > { %v11906_v32 = vmul.f32 0.03125, %v11904_v0  ;;  %v11902_v59 = vpop.xlane.xlu0 %11901 }
0x5ae7   : > { %v11905_v15 = vmul.f32 0.03125, %v11902_v59 }
0x5ae8   : > { %v11908_v48 = vadd.f32 1e-05, %v11906_v32 }
0x5ae9   : > { %v11907_v56 = vadd.f32 1e-05, %v11905_v15 }
0x5aea   : > { %16721 = vrsqrt.f32 %v11908_v48 }
0x5aeb   : > { %16723 = vrsqrt.f32 %v11907_v56 }
0x5af4   : > { %v16722_v49 = vpop.eup %16721 }
0x5af5   : > { %v16724_v3 = vpop.eup %16723  ;;  %v11912_v62 = vmul.f32 %v16722_v49, %v18164_v51 }
0x5af6   : > { %v11911_v4 = vmul.f32 %v16724_v3, %v18168_v52  ;;  %v12743_v52 = vld [vmem:[#allocation2 + $0x15e8] ss:$0 sm:$0xff] }
0x5af7   : > { %v11918_v9 = vmul.f32 %v12740_v2, %v11912_v62 }
0x5af8   : > { %v11917_v61 = vmul.f32 %v12740_v2, %v11911_v4 }
0x5af9   : > { %v11924_v40 = vadd.f32 %v12741_v8, %v11918_v9 }
0x5afa   : > { %v11923_v45 = vadd.f32 %v12741_v8, %v11917_v61 }
0x5afc   : > { %15222 = vmatprep.mubr.f32.mxu0 %v11923_v45 }
0x5afd   : > { %15223 = vmatmul.mubr.f32.vlgmr.msra.gmra.mrb[70].mxu0 %v11924_v40 }
0x5bd0   : > { %v15224_v55 = vpop.f32.mrb[70].mxu0 }
0x5bd1   : > { %v12018_v53 = vadd.f32 %v15224_v55, %v12742_v12  ;;  %v12012_v13 = vpop.f32.mrb[71].mxu0 }
0x5bd2   : > { %v12013_v18 = vadd.f32 %v12742_v12, %v12012_v13 }
0x5bd3   : > { %v12022_v17 = vmax.f32 %v12018_v53, 0.0 }
0x5bd4   : > { %v12021_v51 = vmax.f32 %v12013_v18, 0.0 }
0x5bd6   : > { %15257 = vmatprep.mubr.f32.mxu1 %v12021_v51 }
0x5bd7   : > { %15258 = vmatmul.mubr.f32.vlgmr.msra.gmra.mrb[158].mxu1 %v12022_v17 }
0x5caa   : > { %v15259_v7 = vpop.f32.mrb[158].mxu1 }
0x5cab   : > { %v12116_v19 = vadd.f32 %v15259_v7, %v12743_v52  ;;  %v12110_v57 = vpop.f32.mrb[159].mxu1 }
0x5cac   : > { %v12111_v28 = vadd.f32 %v12743_v52, %v12110_v57 }
0x5cad   : > { %v12120_v63 = vadd.f32 %v12116_v19, %v11924_v40 }
0x5cae   : > { %v12119_v6 = vadd.f32 %v12111_v28, %v11923_v45 }
0x5caf   : > { %v12124_v50 = vsel %vm1551_vm2, %v12120_v63, 0.0 }
0x5cb0   : > { %12127 = vadd.xlane.f32.xlu1 %v12124_v50  ;;  %v12123_v31 = vsel %vm1551_vm2, %v12119_v6, 0.0 }
0x5cb1   : > { %12125 = vadd.xlane.f32.xlu0 %v12123_v31 }
0x5d3d   : > { %v12128_v58 = vpop.xlane.xlu1 %12127 }
0x5d3e   : > { %v12130_v38 = vmul.f32 0.03125, %v12128_v58  ;;  %v12126_v20 = vpop.xlane.xlu0 %12125 }
0x5d3f   : > { %v12129_v5 = vmul.f32 0.03125, %v12126_v20 }
0x5d40   : > { %v12132_v26 = vsub.f32 %v12120_v63, %v12130_v38 }
0x5d41   : > { %v12131_v21 = vsub.f32 %v12119_v6, %v12129_v5 }
0x5d42   : > { %v12134_v22 = vsel %vm1551_vm2, %v12132_v26, 0.0 }
0x5d43   : > { %v12133_v24 = vsel %vm1551_vm2, %v12131_v21, 0.0  ;;  %v12136_v1 = vmul.f32 %v12134_v22, %v12134_v22 }
0x5d44   : > { %v12135_v60 = vmul.f32 %v12133_v24, %v12133_v24 }
0x5d45   : > { %12139 = vadd.xlane.f32.xlu1 %v12136_v1 }
0x5d46   : > { %12137 = vadd.xlane.f32.xlu0 %v12135_v60 }
0x5d47   : > { %16772 = shalt.err (!%p16769_p7)
}
0x5d48   : > { %s16773_s13 = scalar_lea.hbm %s18188_s17, 128  ;;  %s16777_s16 = scalar_lea.hbm %s18281_s3, 256 }
0x5d49   : > { %p16774_p8 = scmp.ne.s32.totalorder %s18188_s17, %s16773_s13  ;;  %p16778_p1 = scmp.lt.u32.totalorder %s18188_s17, %s18281_s3 }
0x5d4a   : > { %p16779_p0 = scmp.lt.u32.totalorder %s16777_s16, %s16773_s13  ;;  %p16781_p6 = scmp.lt.u32.totalorder %s16773_s13, %s18188_s17 }
0x5d4b   : > { %p16775_p11 = pnand %p16774_p8, %p18297_p9 }
0x5d4c   : > { %p16780_p5 = por %p16779_p0, %p16778_p1 }
0x5d4d   : > { %p16776_p13 = pneg %p16775_p11 }
0x5d4e   : > { %p16782_p10 = por %p16781_p6, %p16780_p5 }
0x5d50   : > { %p16783_p12 = pnand %p16782_p10, %p16776_p13 }
0x5d52   : > { %16786 = shalt.err (!%p16783_p12)
}
0x5d53   : > { %16320 = dma.vmem_to_hbm [thread:$0]  (%p18297_p9), %s12200_s18, 128, %s18188_s17, %s12173_s19   ;;  %v12744_v47 = vld [vmem:[#allocation2 + $0x15f0] ss:$0 sm:$0xff]  ;;  %v12745_v39 = vld [vmem:[#allocation2 + $0x15f8] ss:$0 sm:$0xff] }
0x5d54   : > { %s12762_s20 = sshll.u32 %s16928_s25, 8  ;;  %s283_s17 = scalar_lea.vmem [#allocation6], %s12484_s29 }
0x5d55   : > { %s12212_s18 = sshll.u32 %s283_s17, 4  ;;  %s18215_s13 = scalar_lea.hbm %s18282_s4, %s12762_s20  ;;  %s18217_s18 = int_to_ptr.vmem [resolvable:$true] %s12212_s18 }
0x5d56   : > { %s12178_s14 = scalar_lea.sflag [#allocation7], %s17256_s28  ;;  %s16787_s15 = scalar_lea.vmem %s18217_s18, 256 }
0x5d57   : > { %p16788_p2 = scmp.ne.s32.totalorder %s18217_s18, %s16787_s15  ;;  %s16869_s29 = smov [#allocation6]  }
0x5d58   : > { %s16791_s16 = sshll.u32 %s16869_s29, 4  ;;  %s16792_s16 = int_to_ptr.vmem [resolvable:$false] %s16791_s16 }
0x5d59   : > { %p16789_p3 = pnand %p16788_p2, %p18297_p9  ;;  %s16793_s26 = scalar_lea.vmem %s16792_s16, 512 }
0x5d5a   : > { %p16794_p7 = scmp.lt.s32.totalorder %s18217_s18, %s16792_s16  ;;  %p16795_p8 = scmp.lt.s32.totalorder %s16793_s26, %s16787_s15 }
0x5d5b   : > { %p16790_p4 = pneg %p16789_p3 }
0x5d5c   : > { %p16796_p11 = por %p16795_p8, %p16794_p7 }
0x5d5e   : > { %p16797_p13 = pnand %p16796_p11, %p16790_p4 }
0x5dd2   : > { %v12140_v44 = vpop.xlane.xlu1 %12139 }
0x5dd3   : > { %v12142_v27 = vmul.f32 0.03125, %v12140_v44  ;;  %v12138_v25 = vpop.xlane.xlu0 %12137 }
0x5dd4   : > { %v12141_v29 = vmul.f32 0.03125, %v12138_v25 }
0x5dd5   : > { %v12144_v30 = vadd.f32 1e-05, %v12142_v27 }
0x5dd6   : > { %v12143_v34 = vadd.f32 1e-05, %v12141_v29 }
0x5dd7   : > { %16725 = vrsqrt.f32 %v12144_v30 }
0x5dd8   : > { %16727 = vrsqrt.f32 %v12143_v34 }
0x5de1   : > { %v16726_v35 = vpop.eup %16725 }
0x5de2   : > { %v16728_v23 = vpop.eup %16727  ;;  %v12148_v37 = vmul.f32 %v16726_v35, %v12134_v22 }
0x5de3   : > { %v12147_v41 = vmul.f32 %v16728_v23, %v12133_v24 }
0x5de4   : > { %v12154_v36 = vmul.f32 %v12744_v47, %v12148_v37 }
0x5de5   : > { %v12153_v54 = vmul.f32 %v12744_v47, %v12147_v41 }
0x5de6   : > { %v12160_v14 = vadd.f32 %v12745_v39, %v12154_v36 }
0x5de7   : > { %v12159_v16 = vadd.f32 %v12745_v39, %v12153_v54 }
0x5de8   : > { %12171 = vst [vmem:[%s283_s17 + $0x8] sm:$0xff] %v12160_v14 }
0x5de9   : > { %12170 = vst [vmem:[%s283_s17] sm:$0xff] %v12159_v16 }
0x5dea   : > { %16800 = shalt.err (!%p16797_p13)
}
0x5deb   : > { %s16801_s9 = scalar_lea.hbm %s18215_s13, 256  ;;  %s16805_s19 = scalar_lea.hbm %s18282_s4, 512 }
0x5dec   : > { %p16802_p1 = scmp.ne.s32.totalorder %s18215_s13, %s16801_s9  ;;  %p16806_p6 = scmp.lt.u32.totalorder %s18215_s13, %s18282_s4 }
0x5ded   : > { %p16807_p10 = scmp.lt.u32.totalorder %s16805_s19, %s16801_s9  ;;  %p16809_p2 = scmp.lt.u32.totalorder %s16801_s9, %s18215_s13 }
0x5dee   : > { %p16803_p0 = pnand %p16802_p1, %p18297_p9 }
0x5def   : > { %p16808_p12 = por %p16807_p10, %p16806_p6 }
0x5df0   : > { %p16804_p5 = pneg %p16803_p0 }
0x5df1   : > { %p16810_p3 = por %p16809_p2, %p16808_p12 }
0x5df3   : > { %p16811_p4 = pnand %p16810_p3, %p16804_p5 }
0x5df5   : > { %16814 = shalt.err (!%p16811_p4)
}
0x5df6   : > { %s16870_s15 = smov 128   ;;  %s16871_s16 = smov 8   ;;  %v12253_v43 = vld [vmem:[%s17266_s10] sm:$0xff] (%p18297_p9)  ;;  %v12255_v46 = vld [vmem:[%s17266_s10 + $0x8] sm:$0xff] (%p18297_p9) }
0x5df7   : > { %16321 = dma.vmem_to_hbm [thread:$0]  (%p18297_p9), %s18217_s18, 256, %s18215_s13, %s12178_s14, %s16870_s15, %s16870_s15, %s16871_s16  }
0x5df8   : > { %12221 = sbr.rel (!%p18297_p9) target bundleno = 24063 (0x5dff), region = 48  ;;  %s12756_s26 = sshll.u32 (%p18297_p9), %s16928_s25, 3 }
0x5df9   : > { %s12223_s17 = scalar_lea.vmem (%p18297_p9), %s18283_s5, %s12756_s26 }
0x5dfa   : > { %12254 = vst [vmem:[%s12223_s17] sm:$0xff] (%p18297_p9), %v12253_v43  ;;  %12256 = vst [vmem:[%s12223_s17 + $0x10] sm:$0xff] (%p18297_p9), %v12255_v46 }
0x5dff PF: > { %p18298_p7 = scmp.ne.s32.totalorder %s18288_s7, 0 }
0x5e00   : > { %s12763_s28 = sshll.u32 (%p18298_p7), %s16928_s25, 4  ;;  %v12299_v42 = vld [vmem:[%s17561_s11] sm:$0xff] (%p18298_p7)  ;;  %v12301_v0 = vld [vmem:[%s17561_s11 + $0x8] sm:$0xff] (%p18298_p7)  ;;  %v12303_v32 = vld [vmem:[%s17561_s11 + $0x10] sm:$0xff] (%p18298_p7) }
0x5e01   : > { %12262 = sbr.rel (!%p18298_p7) target bundleno = 24072 (0x5e08), region = 86  ;;  %s12265_s13 = scalar_lea.vmem (%p18298_p7), %s18284_s6, %s12763_s28  ;;  %v12305_v59 = vld [vmem:[%s17561_s11 + $0x18] sm:$0xff] (%p18298_p7) }
0x5e02   : > { %12300 = vst [vmem:[%s12265_s13] sm:$0xff] (%p18298_p7), %v12299_v42  ;;  %12302 = vst [vmem:[%s12265_s13 + $0x8] sm:$0xff] (%p18298_p7), %v12301_v0 }
0x5e03   : > { %12304 = vst [vmem:[%s12265_s13 + $0x20] sm:$0xff] (%p18298_p7), %v12303_v32  ;;  %12306 = vst [vmem:[%s12265_s13 + $0x28] sm:$0xff] (%p18298_p7), %v12305_v59 }
0x5e08 PF: > { %p16337_p9 = scmp.ge.s32.totalorder %s16857_s24, 2  ;;  %s12318_s7 = sand.u32 1, %s16845_s21  }
0x5e09   : > { %p18299_p8 = scmp.ne.s32.totalorder %s18289_s8, 0  ;;  %s12319_s25 = scalar_lea.sflag [#allocation4], %s12318_s7 }
0x5e0b   : > { %p16329_p11 = pnand %p16337_p9, %p18299_p8 }
0x5e0d   : > { %16836 = dma.done.wait (!%p16329_p11), %s12319_s25, 128  }
0x5e0e   : > { %16838 = vsyncadd (!%p16329_p11), %s12319_s25, 4294967168  ;;  %s12328_s14 = scalar_lea.sflag [#allocation7], %s12318_s7 }
0x5e0f   : > { %16840 = dma.done.wait (!%p16329_p11), %s12328_s14, 256  }
0x5e10   : > { %16842 = vsyncadd (!%p16329_p11), %s12328_s14, 4294967040  ;;  %p21_p13 = scmp.ge.s32.totalorder %s16932_s27, 4   ;;  %s18300_s21 = smov %s16849_s22 }
0x5e11   : > { %s18301_s22 = smov %s16853_s23  ;;  %s18302_s23 = smov %s16943_s30 }
0x5e12   : > { %s18303_s24 = smov %s16932_s27  ;;  %23 = sbr.rel (!%p21_p13) target bundleno = 6 (0x6), region = 194 }
0x5e19   :  { %12347 = vsyncpa [#allocation3], 1 }
0x5e1a   :  { %12349 = vsyncpa [#allocation3 + $0x1], 1 }
0x5e1b   :  { %12350 = vsyncpa [#allocation4], 1 }
0x5e1c   :  { %12352 = vsyncpa [#allocation4 + $0x1], 1 }
0x5e1d   :  { %12353 = vsyncpa [#allocation7], 1 }
0x5e1e   :  { %12355 = vsyncpa [#allocation7 + $0x1], 1 }

</bundles_post_ra>
